<compile_context>
chip_gen: v5e
topology: v5e:2x2
jax: 0.10.0
libtpu: 0.0.40
codegen_flags: <defaults>
</compile_context>

<pallas_src>
import jax
import jax.numpy as jnp
from jax import lax
from jax.experimental import pallas as pl
from jax.experimental.pallas import tpu as pltpu


def _round_up(x, m):
    return (x + m - 1) // m * m


# ----------------------------- Pallas kernels --------------------------------

def _make_conv_relu_pool_kernel(Hp, Wp, Hq):
    """Fused 3x3/s2 conv (no bias) + ReLU + 2x2 maxpool for ONE batch element.

    x_ref: (16*Hq, Wq, Cin) bf16  4x4 space-to-depth groups; group g=4*a+b
                                  (a=row%4, b=col%4) occupies rows [g*Hq,(g+1)*Hq)
    w_ref: (9*Cin, Cout)    bf16  rows ordered (kh, kw, cin)
    o_ref: (Hp, Wp, Cout)   bf16  pooled output
    """

    def kernel(x_ref, w_ref, o_ref):
        def body(po, carry):
            # The 4 conv outputs feeding pooled row `po` are conv rows
            # 2*po+s (s in {0,1}) at col parities p in {0,1}.  After the 4x4
            # space-to-depth, tap (kh,kw) of that conv output is the
            # contiguous slice group[(2s+kh)%4, (2p+kw)%4] rows po+(2s+kh)//4,
            # cols [(2p+kw)//4, +Wp) — no strided loads needed.
            rows = []
            for s in range(2):                 # conv-row parity in pool window
                for p in range(2):             # conv-col parity in pool window
                    taps = []
                    for kh in range(3):
                        for kw in range(3):
                            gh, oi = (2 * s + kh) % 4, (2 * s + kh) // 4
                            gw, oj = (2 * p + kw) % 4, (2 * p + kw) // 4
                            base = (gh * 4 + gw) * Hq + oi
                            taps.append(x_ref[base + po, pl.ds(oj, Wp), :])
                    rows.append(jnp.concatenate(taps, axis=-1))   # (Wp, 9*Cin)
            im2col = jnp.concatenate(rows, axis=0)                # (4*Wp, 9*Cin)
            z = jnp.dot(im2col, w_ref[...],
                        preferred_element_type=jnp.float32)       # (4*Wp, Cout) f32
            z = jnp.maximum(z, 0.0)                               # fused ReLU
            pooled = jnp.maximum(                                 # fused 2x2 maxpool
                jnp.maximum(z[0:Wp], z[Wp:2 * Wp]),
                jnp.maximum(z[2 * Wp:3 * Wp], z[3 * Wp:4 * Wp]))
            o_ref[po] = pooled.astype(o_ref.dtype)
            return carry

        lax.fori_loop(0, Hp, body, 0)

    return kernel


def _fc_kernel(a_ref, w_ref, b_ref, o_ref):
    o_ref[...] = (jnp.dot(a_ref[...], w_ref[...],
                          preferred_element_type=jnp.float32)
                  + b_ref[...]).astype(o_ref.dtype)


# ----------------------------- Layer wrappers ---------------------------------

def conv_relu_pool_stage(x_nhwc, w9):
    """maxpool2(relu(conv 3x3, stride 2, VALID, no bias)) as one pallas_call."""
    B, H, W, Cin = x_nhwc.shape
    Cout = w9.shape[1]
    Ho, Wo = (H - 3) // 2 + 1, (W - 3) // 2 + 1
    Hp, Wp = Ho // 2, Wo // 2

    # One-shot 4x4 space-to-depth (input read/written once, vs 9 tap copies).
    H4, W4 = _round_up(H, 4), _round_up(W, 4)
    Hq, Wq = H4 // 4, W4 // 4
    xp = jnp.pad(x_nhwc, ((0, 0), (0, H4 - H), (0, W4 - W), (0, 0)))
    x4 = xp.reshape(B, Hq, 4, Wq, 4, Cin).transpose(0, 2, 4, 1, 3, 5)
    x4 = x4.reshape(B, 16 * Hq, Wq, Cin)

    kernel = _make_conv_relu_pool_kernel(Hp, Wp, Hq)
    return pl.pallas_call(
        kernel,
        out_shape=jax.ShapeDtypeStruct((B, Hp, Wp, Cout), jnp.bfloat16),
        grid_spec=pltpu.PrefetchScalarGridSpec(
            num_scalar_prefetch=0,
            grid=(B,),
            in_specs=[
                pl.BlockSpec((None, 16 * Hq, Wq, Cin), lambda b: (b, 0, 0, 0)),
                pl.BlockSpec((9 * Cin, Cout), lambda b: (0, 0)),  # fetched once
            ],
            out_specs=pl.BlockSpec((None, Hp, Wp, Cout), lambda b: (b, 0, 0, 0)),
        ),
        compiler_params=pltpu.CompilerParams(
            dimension_semantics=("parallel",),
            vmem_limit_bytes=32 * 1024 * 1024),
    )(x4, w9)


def pallas_fc(x, w_kn, b_1n):
    """out = x @ w_kn + b.  x:(B,K), w_kn:(K,N) bf16 (N NOT padded), b:(1,N) f32."""
    Bm, K = x.shape
    N = w_kn.shape[1]
    Mp = _round_up(max(Bm, 8), 8)
    a = jnp.pad(x.astype(jnp.bfloat16), ((0, Mp - Bm), (0, 0)))
    out = pl.pallas_call(
        _fc_kernel,
        out_shape=jax.ShapeDtypeStruct((Mp, N), jnp.float32),
        grid_spec=pltpu.PrefetchScalarGridSpec(
            num_scalar_prefetch=0,
            grid=(1,),
            in_specs=[pl.BlockSpec((Mp, K), lambda i: (0, 0)),
                      pl.BlockSpec((K, N), lambda i: (0, 0)),
                      pl.BlockSpec((1, N), lambda i: (0, 0))],
            out_specs=pl.BlockSpec((Mp, N), lambda i: (0, 0)),
        ),
        compiler_params=pltpu.CompilerParams(
            dimension_semantics=("arbitrary",)),
    )(a, w_kn, b_1n)
    return out[:Bm]


# ----------------------------- Weight packing ---------------------------------

def pack_params(w1, w2, fc_w, fc_b, feat_hw=(7, 7)):
    """One-time weight packing kept OFF the per-call critical path."""
    def pack_conv(w):              # (Cout, Cin, 3, 3) -> (9*Cin, Cout) bf16
        cout, cin = w.shape[0], w.shape[1]
        return (jnp.transpose(w, (2, 3, 1, 0))
                .reshape(9 * cin, cout).astype(jnp.bfloat16))

    n, k = fc_w.shape
    hp, wp = feat_hw
    c = k // (hp * wp)
    # torch flattens features in (C,H,W) order; our activations are NHWC, so
    # permute fc columns once here instead of transposing activations per call.
    fc_w_nhwc = fc_w.reshape(n, c, hp, wp).transpose(0, 2, 3, 1).reshape(n, k)
    return dict(w1=pack_conv(w1),
                w2=pack_conv(w2),
                fc_w=jnp.asarray(fc_w_nhwc.T, jnp.bfloat16),   # (K, 10), no N-pad
                fc_b=fc_b.astype(jnp.float32).reshape(1, n))


# ----------------------------- Model forward ----------------------------------

def env_classifier_forward(x_nchw, params):
    x = jnp.transpose(x_nchw.astype(jnp.bfloat16), (0, 2, 3, 1))   # NCHW -> NHWC
    x = conv_relu_pool_stage(x, params["w1"])     # (B, 29, 29, 128)
    x = conv_relu_pool_stage(x, params["w2"])     # (B, 7, 7, 256)
    feat = x.reshape(x.shape[0], -1)              # NHWC flatten; fc cols pre-permuted
    return pallas_fc(feat, params["fc_w"], params["fc_b"])


# ----------------------------- Pure-JAX reference ------------------------------

def ref_forward(x, w1, w2, fc_w, fc_b):
    dn = ('NCHW', 'OIHW', 'NCHW')
    y = lax.conv_general_dilated(x, w1, (2, 2), 'VALID', dimension_numbers=dn)
    y = jnp.maximum(y, 0.0)
    y = lax.reduce_window(y, -jnp.inf, lax.max, (1, 1, 2, 2), (1, 1, 2, 2), 'VALID')
    y = lax.conv_general_dilated(y, w2, (2, 2), 'VALID', dimension_numbers=dn)
    y = jnp.maximum(y, 0.0)
    y = lax.reduce_window(y, -jnp.inf, lax.max, (1, 1, 2, 2), (1, 1, 2, 2), 'VALID')
    y = y.reshape(y.shape[0], -1)
    return y @ fc_w.T + fc_b


# --------------------------------- Main ----------------------------------------

if __name__ == "__main__":
    # The module's fc expects 256*7*7 features => in_channels = 64 and the
    # smallest consistent spatial size 119 (conv s2 ->59 -> pool 29 -> conv 14 -> pool 7).
    B, in_channels, H, W = 2, 64, 119, 119
    num_class = 10

    key = jax.random.PRNGKey(0)
    kx, k1, k2, k3, k4 = jax.random.split(key, 5)

    x = jax.random.normal(kx, (B, in_channels, H, W), jnp.float32)
    w1 = jax.random.normal(k1, (2 * in_channels, in_channels, 3, 3),
                           jnp.float32) * (1.0 / (9 * in_channels) ** 0.5)
    w2 = jax.random.normal(k2, (4 * in_channels, 2 * in_channels, 3, 3),
                           jnp.float32) * (1.0 / (9 * 2 * in_channels) ** 0.5)
    fc_w = jax.random.normal(k3, (num_class, 256 * 7 * 7),
                             jnp.float32) * (1.0 / (256 * 7 * 7) ** 0.5)
    fc_b = jax.random.normal(k4, (num_class,), jnp.float32) * 0.01

    params = pack_params(w1, w2, fc_w, fc_b)          # one-time pre-pack
    fwd = jax.jit(env_classifier_forward)

    out = jax.block_until_ready(fwd(x, params))
    assert out.shape == (B, num_class), out.shape

    ref = jax.block_until_ready(ref_forward(x, w1, w2, fc_w, fc_b))
    # bf16 operands with f32 accumulation (ReLU/pool done in f32) -> loose tol.
    err = float(jnp.max(jnp.abs(out - ref)))
    assert jnp.allclose(out, ref, atol=1e-1, rtol=1e-1), err

    print("KERNEL_OK")
</pallas_src>

<mosaic_0001>
module attributes {stable_mosaic.version = 11 : i64} {
  func.func @kernel(%arg0: i32, %arg1: memref<1x480x30x64xbf16, #tpu.memory_space<vmem>>, %arg2: memref<576x128xbf16, #tpu.memory_space<vmem>>, %arg3: memref<1x29x29x128xbf16, #tpu.memory_space<vmem>>) attributes {dimension_semantics = [#tpu.dimension_semantics<parallel>], iteration_bounds = array<i64: 2>, scalar_prefetch = 0 : i64, scratch_operands = 0 : i64, tpu.core_type = #tpu.core_type<tc>, window_params = [{transform_indices = @transform_0, window_bounds = array<i64: 1, 480, 30, 64>}, {pipeline_mode = #tpu.pipeline_mode<synchronous>, transform_indices = @transform_1, window_bounds = array<i64: 576, 128>}, {transform_indices = @transform_2, window_bounds = array<i64: 1, 29, 29, 128>}]} {
    %c0_i32 = arith.constant 0 : i32
    %c29_i32 = arith.constant 29 : i32
    %0 = arith.addi %c0_i32, %c29_i32 : i32
    %c1_i32 = arith.constant 1 : i32
    scf.for %arg4 = %c0_i32 to %0 step %c1_i32  : i32 {
      %c0_i32_1 = arith.constant 0 : i32
      %1 = arith.addi %c0_i32_1, %arg4 : i32
      %c0 = arith.constant 0 : index
      %2 = arith.index_cast %1 : i32 to index
      %c0_2 = arith.constant 0 : index
      %c0_3 = arith.constant 0 : index
      %3 = vector.load %arg1[%c0, %2, %c0_2, %c0_3] : memref<1x480x30x64xbf16, #tpu.memory_space<vmem>>, vector<1x1x29x64xbf16>
      %4 = vector.shape_cast %3 : vector<1x1x29x64xbf16> to vector<29x64xbf16>
      %c30_i32 = arith.constant 30 : i32
      %5 = arith.addi %c30_i32, %arg4 : i32
      %c0_4 = arith.constant 0 : index
      %6 = arith.index_cast %5 : i32 to index
      %c0_5 = arith.constant 0 : index
      %c0_6 = arith.constant 0 : index
      %7 = vector.load %arg1[%c0_4, %6, %c0_5, %c0_6] : memref<1x480x30x64xbf16, #tpu.memory_space<vmem>>, vector<1x1x29x64xbf16>
      %8 = vector.shape_cast %7 : vector<1x1x29x64xbf16> to vector<29x64xbf16>
      %c60_i32 = arith.constant 60 : i32
      %9 = arith.addi %c60_i32, %arg4 : i32
      %c0_7 = arith.constant 0 : index
      %10 = arith.index_cast %9 : i32 to index
      %c0_8 = arith.constant 0 : index
      %c0_9 = arith.constant 0 : index
      %11 = vector.load %arg1[%c0_7, %10, %c0_8, %c0_9] : memref<1x480x30x64xbf16, #tpu.memory_space<vmem>>, vector<1x1x29x64xbf16>
      %12 = vector.shape_cast %11 : vector<1x1x29x64xbf16> to vector<29x64xbf16>
      %c120_i32 = arith.constant 120 : i32
      %13 = arith.addi %c120_i32, %arg4 : i32
      %c0_10 = arith.constant 0 : index
      %14 = arith.index_cast %13 : i32 to index
      %c0_11 = arith.constant 0 : index
      %c0_12 = arith.constant 0 : index
      %15 = vector.load %arg1[%c0_10, %14, %c0_11, %c0_12] : memref<1x480x30x64xbf16, #tpu.memory_space<vmem>>, vector<1x1x29x64xbf16>
      %16 = vector.shape_cast %15 : vector<1x1x29x64xbf16> to vector<29x64xbf16>
      %c150_i32 = arith.constant 150 : i32
      %17 = arith.addi %c150_i32, %arg4 : i32
      %c0_13 = arith.constant 0 : index
      %18 = arith.index_cast %17 : i32 to index
      %c0_14 = arith.constant 0 : index
      %c0_15 = arith.constant 0 : index
      %19 = vector.load %arg1[%c0_13, %18, %c0_14, %c0_15] : memref<1x480x30x64xbf16, #tpu.memory_space<vmem>>, vector<1x1x29x64xbf16>
      %20 = vector.shape_cast %19 : vector<1x1x29x64xbf16> to vector<29x64xbf16>
      %c180_i32 = arith.constant 180 : i32
      %21 = arith.addi %c180_i32, %arg4 : i32
      %c0_16 = arith.constant 0 : index
      %22 = arith.index_cast %21 : i32 to index
      %c0_17 = arith.constant 0 : index
      %c0_18 = arith.constant 0 : index
      %23 = vector.load %arg1[%c0_16, %22, %c0_17, %c0_18] : memref<1x480x30x64xbf16, #tpu.memory_space<vmem>>, vector<1x1x29x64xbf16>
      %24 = vector.shape_cast %23 : vector<1x1x29x64xbf16> to vector<29x64xbf16>
      %c240_i32 = arith.constant 240 : i32
      %25 = arith.addi %c240_i32, %arg4 : i32
      %c0_19 = arith.constant 0 : index
      %26 = arith.index_cast %25 : i32 to index
      %c0_20 = arith.constant 0 : index
      %c0_21 = arith.constant 0 : index
      %27 = vector.load %arg1[%c0_19, %26, %c0_20, %c0_21] : memref<1x480x30x64xbf16, #tpu.memory_space<vmem>>, vector<1x1x29x64xbf16>
      %28 = vector.shape_cast %27 : vector<1x1x29x64xbf16> to vector<29x64xbf16>
      %c270_i32 = arith.constant 270 : i32
      %29 = arith.addi %c270_i32, %arg4 : i32
      %c0_22 = arith.constant 0 : index
      %30 = arith.index_cast %29 : i32 to index
      %c0_23 = arith.constant 0 : index
      %c0_24 = arith.constant 0 : index
      %31 = vector.load %arg1[%c0_22, %30, %c0_23, %c0_24] : memref<1x480x30x64xbf16, #tpu.memory_space<vmem>>, vector<1x1x29x64xbf16>
      %32 = vector.shape_cast %31 : vector<1x1x29x64xbf16> to vector<29x64xbf16>
      %c300_i32 = arith.constant 300 : i32
      %33 = arith.addi %c300_i32, %arg4 : i32
      %c0_25 = arith.constant 0 : index
      %34 = arith.index_cast %33 : i32 to index
      %c0_26 = arith.constant 0 : index
      %c0_27 = arith.constant 0 : index
      %35 = vector.load %arg1[%c0_25, %34, %c0_26, %c0_27] : memref<1x480x30x64xbf16, #tpu.memory_space<vmem>>, vector<1x1x29x64xbf16>
      %36 = vector.shape_cast %35 : vector<1x1x29x64xbf16> to vector<29x64xbf16>
      %37 = tpu.concatenate %4, %8, %12, %16, %20, %24, %28, %32, %36 in 1 : vector<29x64xbf16>, vector<29x64xbf16>, vector<29x64xbf16>, vector<29x64xbf16>, vector<29x64xbf16>, vector<29x64xbf16>, vector<29x64xbf16>, vector<29x64xbf16>, vector<29x64xbf16> -> vector<29x576xbf16>
      %c60_i32_28 = arith.constant 60 : i32
      %38 = arith.addi %c60_i32_28, %arg4 : i32
      %c0_29 = arith.constant 0 : index
      %39 = arith.index_cast %38 : i32 to index
      %c0_30 = arith.constant 0 : index
      %c0_31 = arith.constant 0 : index
      %40 = vector.load %arg1[%c0_29, %39, %c0_30, %c0_31] : memref<1x480x30x64xbf16, #tpu.memory_space<vmem>>, vector<1x1x29x64xbf16>
      %41 = vector.shape_cast %40 : vector<1x1x29x64xbf16> to vector<29x64xbf16>
      %c90_i32 = arith.constant 90 : i32
      %42 = arith.addi %c90_i32, %arg4 : i32
      %c0_32 = arith.constant 0 : index
      %43 = arith.index_cast %42 : i32 to index
      %c0_33 = arith.constant 0 : index
      %c0_34 = arith.constant 0 : index
      %44 = vector.load %arg1[%c0_32, %43, %c0_33, %c0_34] : memref<1x480x30x64xbf16, #tpu.memory_space<vmem>>, vector<1x1x29x64xbf16>
      %45 = vector.shape_cast %44 : vector<1x1x29x64xbf16> to vector<29x64xbf16>
      %c0_i32_35 = arith.constant 0 : i32
      %46 = arith.addi %c0_i32_35, %arg4 : i32
      %c0_36 = arith.constant 0 : index
      %47 = arith.index_cast %46 : i32 to index
      %c1 = arith.constant 1 : index
      %c0_37 = arith.constant 0 : index
      %48 = vector.load %arg1[%c0_36, %47, %c1, %c0_37] : memref<1x480x30x64xbf16, #tpu.memory_space<vmem>>, vector<1x1x29x64xbf16>
      %49 = vector.shape_cast %48 : vector<1x1x29x64xbf16> to vector<29x64xbf16>
      %c180_i32_38 = arith.constant 180 : i32
      %50 = arith.addi %c180_i32_38, %arg4 : i32
      %c0_39 = arith.constant 0 : index
      %51 = arith.index_cast %50 : i32 to index
      %c0_40 = arith.constant 0 : index
      %c0_41 = arith.constant 0 : index
      %52 = vector.load %arg1[%c0_39, %51, %c0_40, %c0_41] : memref<1x480x30x64xbf16, #tpu.memory_space<vmem>>, vector<1x1x29x64xbf16>
      %53 = vector.shape_cast %52 : vector<1x1x29x64xbf16> to vector<29x64xbf16>
      %c210_i32 = arith.constant 210 : i32
      %54 = arith.addi %c210_i32, %arg4 : i32
      %c0_42 = arith.constant 0 : index
      %55 = arith.index_cast %54 : i32 to index
      %c0_43 = arith.constant 0 : index
      %c0_44 = arith.constant 0 : index
      %56 = vector.load %arg1[%c0_42, %55, %c0_43, %c0_44] : memref<1x480x30x64xbf16, #tpu.memory_space<vmem>>, vector<1x1x29x64xbf16>
      %57 = vector.shape_cast %56 : vector<1x1x29x64xbf16> to vector<29x64xbf16>
      %c120_i32_45 = arith.constant 120 : i32
      %58 = arith.addi %c120_i32_45, %arg4 : i32
      %c0_46 = arith.constant 0 : index
      %59 = arith.index_cast %58 : i32 to index
      %c1_47 = arith.constant 1 : index
      %c0_48 = arith.constant 0 : index
      %60 = vector.load %arg1[%c0_46, %59, %c1_47, %c0_48] : memref<1x480x30x64xbf16, #tpu.memory_space<vmem>>, vector<1x1x29x64xbf16>
      %61 = vector.shape_cast %60 : vector<1x1x29x64xbf16> to vector<29x64xbf16>
      %c300_i32_49 = arith.constant 300 : i32
      %62 = arith.addi %c300_i32_49, %arg4 : i32
      %c0_50 = arith.constant 0 : index
      %63 = arith.index_cast %62 : i32 to index
      %c0_51 = arith.constant 0 : index
      %c0_52 = arith.constant 0 : index
      %64 = vector.load %arg1[%c0_50, %63, %c0_51, %c0_52] : memref<1x480x30x64xbf16, #tpu.memory_space<vmem>>, vector<1x1x29x64xbf16>
      %65 = vector.shape_cast %64 : vector<1x1x29x64xbf16> to vector<29x64xbf16>
      %c330_i32 = arith.constant 330 : i32
      %66 = arith.addi %c330_i32, %arg4 : i32
      %c0_53 = arith.constant 0 : index
      %67 = arith.index_cast %66 : i32 to index
      %c0_54 = arith.constant 0 : index
      %c0_55 = arith.constant 0 : index
      %68 = vector.load %arg1[%c0_53, %67, %c0_54, %c0_55] : memref<1x480x30x64xbf16, #tpu.memory_space<vmem>>, vector<1x1x29x64xbf16>
      %69 = vector.shape_cast %68 : vector<1x1x29x64xbf16> to vector<29x64xbf16>
      %c240_i32_56 = arith.constant 240 : i32
      %70 = arith.addi %c240_i32_56, %arg4 : i32
      %c0_57 = arith.constant 0 : index
      %71 = arith.index_cast %70 : i32 to index
      %c1_58 = arith.constant 1 : index
      %c0_59 = arith.constant 0 : index
      %72 = vector.load %arg1[%c0_57, %71, %c1_58, %c0_59] : memref<1x480x30x64xbf16, #tpu.memory_space<vmem>>, vector<1x1x29x64xbf16>
      %73 = vector.shape_cast %72 : vector<1x1x29x64xbf16> to vector<29x64xbf16>
      %74 = tpu.concatenate %41, %45, %49, %53, %57, %61, %65, %69, %73 in 1 : vector<29x64xbf16>, vector<29x64xbf16>, vector<29x64xbf16>, vector<29x64xbf16>, vector<29x64xbf16>, vector<29x64xbf16>, vector<29x64xbf16>, vector<29x64xbf16>, vector<29x64xbf16> -> vector<29x576xbf16>
      %c240_i32_60 = arith.constant 240 : i32
      %75 = arith.addi %c240_i32_60, %arg4 : i32
      %c0_61 = arith.constant 0 : index
      %76 = arith.index_cast %75 : i32 to index
      %c0_62 = arith.constant 0 : index
      %c0_63 = arith.constant 0 : index
      %77 = vector.load %arg1[%c0_61, %76, %c0_62, %c0_63] : memref<1x480x30x64xbf16, #tpu.memory_space<vmem>>, vector<1x1x29x64xbf16>
      %78 = vector.shape_cast %77 : vector<1x1x29x64xbf16> to vector<29x64xbf16>
      %c270_i32_64 = arith.constant 270 : i32
      %79 = arith.addi %c270_i32_64, %arg4 : i32
      %c0_65 = arith.constant 0 : index
      %80 = arith.index_cast %79 : i32 to index
      %c0_66 = arith.constant 0 : index
      %c0_67 = arith.constant 0 : index
      %81 = vector.load %arg1[%c0_65, %80, %c0_66, %c0_67] : memref<1x480x30x64xbf16, #tpu.memory_space<vmem>>, vector<1x1x29x64xbf16>
      %82 = vector.shape_cast %81 : vector<1x1x29x64xbf16> to vector<29x64xbf16>
      %c300_i32_68 = arith.constant 300 : i32
      %83 = arith.addi %c300_i32_68, %arg4 : i32
      %c0_69 = arith.constant 0 : index
      %84 = arith.index_cast %83 : i32 to index
      %c0_70 = arith.constant 0 : index
      %c0_71 = arith.constant 0 : index
      %85 = vector.load %arg1[%c0_69, %84, %c0_70, %c0_71] : memref<1x480x30x64xbf16, #tpu.memory_space<vmem>>, vector<1x1x29x64xbf16>
      %86 = vector.shape_cast %85 : vector<1x1x29x64xbf16> to vector<29x64xbf16>
      %c360_i32 = arith.constant 360 : i32
      %87 = arith.addi %c360_i32, %arg4 : i32
      %c0_72 = arith.constant 0 : index
      %88 = arith.index_cast %87 : i32 to index
      %c0_73 = arith.constant 0 : index
      %c0_74 = arith.constant 0 : index
      %89 = vector.load %arg1[%c0_72, %88, %c0_73, %c0_74] : memref<1x480x30x64xbf16, #tpu.memory_space<vmem>>, vector<1x1x29x64xbf16>
      %90 = vector.shape_cast %89 : vector<1x1x29x64xbf16> to vector<29x64xbf16>
      %c390_i32 = arith.constant 390 : i32
      %91 = arith.addi %c390_i32, %arg4 : i32
      %c0_75 = arith.constant 0 : index
      %92 = arith.index_cast %91 : i32 to index
      %c0_76 = arith.constant 0 : index
      %c0_77 = arith.constant 0 : index
      %93 = vector.load %arg1[%c0_75, %92, %c0_76, %c0_77] : memref<1x480x30x64xbf16, #tpu.memory_space<vmem>>, vector<1x1x29x64xbf16>
      %94 = vector.shape_cast %93 : vector<1x1x29x64xbf16> to vector<29x64xbf16>
      %c420_i32 = arith.constant 420 : i32
      %95 = arith.addi %c420_i32, %arg4 : i32
      %c0_78 = arith.constant 0 : index
      %96 = arith.index_cast %95 : i32 to index
      %c0_79 = arith.constant 0 : index
      %c0_80 = arith.constant 0 : index
      %97 = vector.load %arg1[%c0_78, %96, %c0_79, %c0_80] : memref<1x480x30x64xbf16, #tpu.memory_space<vmem>>, vector<1x1x29x64xbf16>
      %98 = vector.shape_cast %97 : vector<1x1x29x64xbf16> to vector<29x64xbf16>
      %c1_i32_81 = arith.constant 1 : i32
      %99 = arith.addi %c1_i32_81, %arg4 : i32
      %c0_82 = arith.constant 0 : index
      %100 = arith.index_cast %99 : i32 to index
      %c0_83 = arith.constant 0 : index
      %c0_84 = arith.constant 0 : index
      %101 = vector.load %arg1[%c0_82, %100, %c0_83, %c0_84] : memref<1x480x30x64xbf16, #tpu.memory_space<vmem>>, vector<1x1x29x64xbf16>
      %102 = vector.shape_cast %101 : vector<1x1x29x64xbf16> to vector<29x64xbf16>
      %c31_i32 = arith.constant 31 : i32
      %103 = arith.addi %c31_i32, %arg4 : i32
      %c0_85 = arith.constant 0 : index
      %104 = arith.index_cast %103 : i32 to index
      %c0_86 = arith.constant 0 : index
      %c0_87 = arith.constant 0 : index
      %105 = vector.load %arg1[%c0_85, %104, %c0_86, %c0_87] : memref<1x480x30x64xbf16, #tpu.memory_space<vmem>>, vector<1x1x29x64xbf16>
      %106 = vector.shape_cast %105 : vector<1x1x29x64xbf16> to vector<29x64xbf16>
      %c61_i32 = arith.constant 61 : i32
      %107 = arith.addi %c61_i32, %arg4 : i32
      %c0_88 = arith.constant 0 : index
      %108 = arith.index_cast %107 : i32 to index
      %c0_89 = arith.constant 0 : index
      %c0_90 = arith.constant 0 : index
      %109 = vector.load %arg1[%c0_88, %108, %c0_89, %c0_90] : memref<1x480x30x64xbf16, #tpu.memory_space<vmem>>, vector<1x1x29x64xbf16>
      %110 = vector.shape_cast %109 : vector<1x1x29x64xbf16> to vector<29x64xbf16>
      %111 = tpu.concatenate %78, %82, %86, %90, %94, %98, %102, %106, %110 in 1 : vector<29x64xbf16>, vector<29x64xbf16>, vector<29x64xbf16>, vector<29x64xbf16>, vector<29x64xbf16>, vector<29x64xbf16>, vector<29x64xbf16>, vector<29x64xbf16>, vector<29x64xbf16> -> vector<29x576xbf16>
      %c300_i32_91 = arith.constant 300 : i32
      %112 = arith.addi %c300_i32_91, %arg4 : i32
      %c0_92 = arith.constant 0 : index
      %113 = arith.index_cast %112 : i32 to index
      %c0_93 = arith.constant 0 : index
      %c0_94 = arith.constant 0 : index
      %114 = vector.load %arg1[%c0_92, %113, %c0_93, %c0_94] : memref<1x480x30x64xbf16, #tpu.memory_space<vmem>>, vector<1x1x29x64xbf16>
      %115 = vector.shape_cast %114 : vector<1x1x29x64xbf16> to vector<29x64xbf16>
      %c330_i32_95 = arith.constant 330 : i32
      %116 = arith.addi %c330_i32_95, %arg4 : i32
      %c0_96 = arith.constant 0 : index
      %117 = arith.index_cast %116 : i32 to index
      %c0_97 = arith.constant 0 : index
      %c0_98 = arith.constant 0 : index
      %118 = vector.load %arg1[%c0_96, %117, %c0_97, %c0_98] : memref<1x480x30x64xbf16, #tpu.memory_space<vmem>>, vector<1x1x29x64xbf16>
      %119 = vector.shape_cast %118 : vector<1x1x29x64xbf16> to vector<29x64xbf16>
      %c240_i32_99 = arith.constant 240 : i32
      %120 = arith.addi %c240_i32_99, %arg4 : i32
      %c0_100 = arith.constant 0 : index
      %121 = arith.index_cast %120 : i32 to index
      %c1_101 = arith.constant 1 : index
      %c0_102 = arith.constant 0 : index
      %122 = vector.load %arg1[%c0_100, %121, %c1_101, %c0_102] : memref<1x480x30x64xbf16, #tpu.memory_space<vmem>>, vector<1x1x29x64xbf16>
      %123 = vector.shape_cast %122 : vector<1x1x29x64xbf16> to vector<29x64xbf16>
      %c420_i32_103 = arith.constant 420 : i32
      %124 = arith.addi %c420_i32_103, %arg4 : i32
      %c0_104 = arith.constant 0 : index
      %125 = arith.index_cast %124 : i32 to index
      %c0_105 = arith.constant 0 : index
      %c0_106 = arith.constant 0 : index
      %126 = vector.load %arg1[%c0_104, %125, %c0_105, %c0_106] : memref<1x480x30x64xbf16, #tpu.memory_space<vmem>>, vector<1x1x29x64xbf16>
      %127 = vector.shape_cast %126 : vector<1x1x29x64xbf16> to vector<29x64xbf16>
      %c450_i32 = arith.constant 450 : i32
      %128 = arith.addi %c450_i32, %arg4 : i32
      %c0_107 = arith.constant 0 : index
      %129 = arith.index_cast %128 : i32 to index
      %c0_108 = arith.constant 0 : index
      %c0_109 = arith.constant 0 : index
      %130 = vector.load %arg1[%c0_107, %129, %c0_108, %c0_109] : memref<1x480x30x64xbf16, #tpu.memory_space<vmem>>, vector<1x1x29x64xbf16>
      %131 = vector.shape_cast %130 : vector<1x1x29x64xbf16> to vector<29x64xbf16>
      %c360_i32_110 = arith.constant 360 : i32
      %132 = arith.addi %c360_i32_110, %arg4 : i32
      %c0_111 = arith.constant 0 : index
      %133 = arith.index_cast %132 : i32 to index
      %c1_112 = arith.constant 1 : index
      %c0_113 = arith.constant 0 : index
      %134 = vector.load %arg1[%c0_111, %133, %c1_112, %c0_113] : memref<1x480x30x64xbf16, #tpu.memory_space<vmem>>, vector<1x1x29x64xbf16>
      %135 = vector.shape_cast %134 : vector<1x1x29x64xbf16> to vector<29x64xbf16>
      %c61_i32_114 = arith.constant 61 : i32
      %136 = arith.addi %c61_i32_114, %arg4 : i32
      %c0_115 = arith.constant 0 : index
      %137 = arith.index_cast %136 : i32 to index
      %c0_116 = arith.constant 0 : index
      %c0_117 = arith.constant 0 : index
      %138 = vector.load %arg1[%c0_115, %137, %c0_116, %c0_117] : memref<1x480x30x64xbf16, #tpu.memory_space<vmem>>, vector<1x1x29x64xbf16>
      %139 = vector.shape_cast %138 : vector<1x1x29x64xbf16> to vector<29x64xbf16>
      %c91_i32 = arith.constant 91 : i32
      %140 = arith.addi %c91_i32, %arg4 : i32
      %c0_118 = arith.constant 0 : index
      %141 = arith.index_cast %140 : i32 to index
      %c0_119 = arith.constant 0 : index
      %c0_120 = arith.constant 0 : index
      %142 = vector.load %arg1[%c0_118, %141, %c0_119, %c0_120] : memref<1x480x30x64xbf16, #tpu.memory_space<vmem>>, vector<1x1x29x64xbf16>
      %143 = vector.shape_cast %142 : vector<1x1x29x64xbf16> to vector<29x64xbf16>
      %c1_i32_121 = arith.constant 1 : i32
      %144 = arith.addi %c1_i32_121, %arg4 : i32
      %c0_122 = arith.constant 0 : index
      %145 = arith.index_cast %144 : i32 to index
      %c1_123 = arith.constant 1 : index
      %c0_124 = arith.constant 0 : index
      %146 = vector.load %arg1[%c0_122, %145, %c1_123, %c0_124] : memref<1x480x30x64xbf16, #tpu.memory_space<vmem>>, vector<1x1x29x64xbf16>
      %147 = vector.shape_cast %146 : vector<1x1x29x64xbf16> to vector<29x64xbf16>
      %148 = tpu.concatenate %115, %119, %123, %127, %131, %135, %139, %143, %147 in 1 : vector<29x64xbf16>, vector<29x64xbf16>, vector<29x64xbf16>, vector<29x64xbf16>, vector<29x64xbf16>, vector<29x64xbf16>, vector<29x64xbf16>, vector<29x64xbf16>, vector<29x64xbf16> -> vector<29x576xbf16>
      %149 = tpu.concatenate %37, %74, %111, %148 in 0 : vector<29x576xbf16>, vector<29x576xbf16>, vector<29x576xbf16>, vector<29x576xbf16> -> vector<116x576xbf16>
      %c0_125 = arith.constant 0 : index
      %c0_126 = arith.constant 0 : index
      %150 = vector.load %arg2[%c0_125, %c0_126] : memref<576x128xbf16, #tpu.memory_space<vmem>>, vector<576x128xbf16>
      %cst = arith.constant dense<0.000000e+00> : vector<116x128xf32>
      %151 = tpu.matmul %149, %150, %cst {dimension_numbers = #tpu.dot_dimension_numbers<[1], [0], [0], [1], [0, 0, 1, 1], [], []>} : vector<116x576xbf16>, vector<576x128xbf16>, vector<116x128xf32> -> vector<116x128xf32>
      %cst_127 = arith.constant 0.000000e+00 : f32
      %152 = vector.broadcast %cst_127 : f32 to vector<116x128xf32>
      %153 = arith.maximumf %151, %152 : vector<116x128xf32>
      %154 = vector.extract_strided_slice %153 {offsets = [0, 0], sizes = [29, 128], strides = [1, 1]} : vector<116x128xf32> to vector<29x128xf32>
      %155 = vector.extract_strided_slice %153 {offsets = [29, 0], sizes = [29, 128], strides = [1, 1]} : vector<116x128xf32> to vector<29x128xf32>
      %156 = arith.maximumf %154, %155 : vector<29x128xf32>
      %157 = vector.extract_strided_slice %153 {offsets = [58, 0], sizes = [29, 128], strides = [1, 1]} : vector<116x128xf32> to vector<29x128xf32>
      %158 = vector.extract_strided_slice %153 {offsets = [87, 0], sizes = [29, 128], strides = [1, 1]} : vector<116x128xf32> to vector<29x128xf32>
      %159 = arith.maximumf %157, %158 : vector<29x128xf32>
      %160 = arith.maximumf %156, %159 : vector<29x128xf32>
      %161 = arith.truncf %160 : vector<29x128xf32> to vector<29x128xbf16>
      %c0_128 = arith.constant 0 : index
      %162 = arith.index_cast %arg4 : i32 to index
      %c0_129 = arith.constant 0 : index
      %c0_130 = arith.constant 0 : index
      %163 = vector.load %arg3[%c0_128, %162, %c0_129, %c0_130] : memref<1x29x29x128xbf16, #tpu.memory_space<vmem>>, vector<1x1x29x128xbf16>
      %164 = vector.shape_cast %163 : vector<1x1x29x128xbf16> to vector<29x128xbf16>
      %165 = vector.shape_cast %161 : vector<29x128xbf16> to vector<1x1x29x128xbf16>
      tpu.vector_store %arg3[%c0_128, %162, %c0_129, %c0_130], %165 {strides = array<i32>} : memref<1x29x29x128xbf16, #tpu.memory_space<vmem>>, vector<1x1x29x128xbf16>,
    }
    %c29_i32_0 = arith.constant 29 : i32
    return
  }
  func.func @transform_0(%arg0: i32) -> (i32, i32, i32, i32) {
    %c0_i32 = arith.constant 0 : i32
    %c0_i32_0 = arith.constant 0 : i32
    %c0_i32_1 = arith.constant 0 : i32
    %c0_i32_2 = arith.constant 0 : i32
    return %arg0, %c0_i32, %c0_i32_0, %c0_i32_1 : i32, i32, i32, i32
  }
  func.func @transform_1(%arg0: i32) -> (i32, i32) {
    %c0_i32 = arith.constant 0 : i32
    %c0_i32_0 = arith.constant 0 : i32
    %c0_i32_1 = arith.constant 0 : i32
    return %c0_i32, %c0_i32_0 : i32, i32
  }
  func.func @transform_2(%arg0: i32) -> (i32, i32, i32, i32) {
    %c0_i32 = arith.constant 0 : i32
    %c0_i32_0 = arith.constant 0 : i32
    %c0_i32_1 = arith.constant 0 : i32
    %c0_i32_2 = arith.constant 0 : i32
    return %arg0, %c0_i32, %c0_i32_0, %c0_i32_1 : i32, i32, i32, i32
  }
}

module attributes {stable_mosaic.version = 11 : i64} {
  func.func @kernel(%arg0: i32, %arg1: memref<1x128x8x128xbf16, #tpu.memory_space<vmem>>, %arg2: memref<1152x256xbf16, #tpu.memory_space<vmem>>, %arg3: memref<1x7x7x256xbf16, #tpu.memory_space<vmem>>) attributes {dimension_semantics = [#tpu.dimension_semantics<parallel>], iteration_bounds = array<i64: 2>, scalar_prefetch = 0 : i64, scratch_operands = 0 : i64, tpu.core_type = #tpu.core_type<tc>, window_params = [{transform_indices = @transform_0, window_bounds = array<i64: 1, 128, 8, 128>}, {pipeline_mode = #tpu.pipeline_mode<synchronous>, transform_indices = @transform_1, window_bounds = array<i64: 1152, 256>}, {transform_indices = @transform_2, window_bounds = array<i64: 1, 7, 7, 256>}]} {
    %c0_i32 = arith.constant 0 : i32
    %c7_i32 = arith.constant 7 : i32
    %0 = arith.addi %c0_i32, %c7_i32 : i32
    %c1_i32 = arith.constant 1 : i32
    scf.for %arg4 = %c0_i32 to %0 step %c1_i32  : i32 {
      %c0_i32_1 = arith.constant 0 : i32
      %1 = arith.addi %c0_i32_1, %arg4 : i32
      %c0 = arith.constant 0 : index
      %2 = arith.index_cast %1 : i32 to index
      %c0_2 = arith.constant 0 : index
      %c0_3 = arith.constant 0 : index
      %3 = vector.load %arg1[%c0, %2, %c0_2, %c0_3] : memref<1x128x8x128xbf16, #tpu.memory_space<vmem>>, vector<1x1x7x128xbf16>
      %4 = vector.shape_cast %3 : vector<1x1x7x128xbf16> to vector<7x128xbf16>
      %c8_i32 = arith.constant 8 : i32
      %5 = arith.addi %c8_i32, %arg4 : i32
      %c0_4 = arith.constant 0 : index
      %6 = arith.index_cast %5 : i32 to index
      %c0_5 = arith.constant 0 : index
      %c0_6 = arith.constant 0 : index
      %7 = vector.load %arg1[%c0_4, %6, %c0_5, %c0_6] : memref<1x128x8x128xbf16, #tpu.memory_space<vmem>>, vector<1x1x7x128xbf16>
      %8 = vector.shape_cast %7 : vector<1x1x7x128xbf16> to vector<7x128xbf16>
      %c16_i32 = arith.constant 16 : i32
      %9 = arith.addi %c16_i32, %arg4 : i32
      %c0_7 = arith.constant 0 : index
      %10 = arith.index_cast %9 : i32 to index
      %c0_8 = arith.constant 0 : index
      %c0_9 = arith.constant 0 : index
      %11 = vector.load %arg1[%c0_7, %10, %c0_8, %c0_9] : memref<1x128x8x128xbf16, #tpu.memory_space<vmem>>, vector<1x1x7x128xbf16>
      %12 = vector.shape_cast %11 : vector<1x1x7x128xbf16> to vector<7x128xbf16>
      %c32_i32 = arith.constant 32 : i32
      %13 = arith.addi %c32_i32, %arg4 : i32
      %c0_10 = arith.constant 0 : index
      %14 = arith.index_cast %13 : i32 to index
      %c0_11 = arith.constant 0 : index
      %c0_12 = arith.constant 0 : index
      %15 = vector.load %arg1[%c0_10, %14, %c0_11, %c0_12] : memref<1x128x8x128xbf16, #tpu.memory_space<vmem>>, vector<1x1x7x128xbf16>
      %16 = vector.shape_cast %15 : vector<1x1x7x128xbf16> to vector<7x128xbf16>
      %c40_i32 = arith.constant 40 : i32
      %17 = arith.addi %c40_i32, %arg4 : i32
      %c0_13 = arith.constant 0 : index
      %18 = arith.index_cast %17 : i32 to index
      %c0_14 = arith.constant 0 : index
      %c0_15 = arith.constant 0 : index
      %19 = vector.load %arg1[%c0_13, %18, %c0_14, %c0_15] : memref<1x128x8x128xbf16, #tpu.memory_space<vmem>>, vector<1x1x7x128xbf16>
      %20 = vector.shape_cast %19 : vector<1x1x7x128xbf16> to vector<7x128xbf16>
      %c48_i32 = arith.constant 48 : i32
      %21 = arith.addi %c48_i32, %arg4 : i32
      %c0_16 = arith.constant 0 : index
      %22 = arith.index_cast %21 : i32 to index
      %c0_17 = arith.constant 0 : index
      %c0_18 = arith.constant 0 : index
      %23 = vector.load %arg1[%c0_16, %22, %c0_17, %c0_18] : memref<1x128x8x128xbf16, #tpu.memory_space<vmem>>, vector<1x1x7x128xbf16>
      %24 = vector.shape_cast %23 : vector<1x1x7x128xbf16> to vector<7x128xbf16>
      %c64_i32 = arith.constant 64 : i32
      %25 = arith.addi %c64_i32, %arg4 : i32
      %c0_19 = arith.constant 0 : index
      %26 = arith.index_cast %25 : i32 to index
      %c0_20 = arith.constant 0 : index
      %c0_21 = arith.constant 0 : index
      %27 = vector.load %arg1[%c0_19, %26, %c0_20, %c0_21] : memref<1x128x8x128xbf16, #tpu.memory_space<vmem>>, vector<1x1x7x128xbf16>
      %28 = vector.shape_cast %27 : vector<1x1x7x128xbf16> to vector<7x128xbf16>
      %c72_i32 = arith.constant 72 : i32
      %29 = arith.addi %c72_i32, %arg4 : i32
      %c0_22 = arith.constant 0 : index
      %30 = arith.index_cast %29 : i32 to index
      %c0_23 = arith.constant 0 : index
      %c0_24 = arith.constant 0 : index
      %31 = vector.load %arg1[%c0_22, %30, %c0_23, %c0_24] : memref<1x128x8x128xbf16, #tpu.memory_space<vmem>>, vector<1x1x7x128xbf16>
      %32 = vector.shape_cast %31 : vector<1x1x7x128xbf16> to vector<7x128xbf16>
      %c80_i32 = arith.constant 80 : i32
      %33 = arith.addi %c80_i32, %arg4 : i32
      %c0_25 = arith.constant 0 : index
      %34 = arith.index_cast %33 : i32 to index
      %c0_26 = arith.constant 0 : index
      %c0_27 = arith.constant 0 : index
      %35 = vector.load %arg1[%c0_25, %34, %c0_26, %c0_27] : memref<1x128x8x128xbf16, #tpu.memory_space<vmem>>, vector<1x1x7x128xbf16>
      %36 = vector.shape_cast %35 : vector<1x1x7x128xbf16> to vector<7x128xbf16>
      %37 = tpu.concatenate %4, %8, %12, %16, %20, %24, %28, %32, %36 in 1 : vector<7x128xbf16>, vector<7x128xbf16>, vector<7x128xbf16>, vector<7x128xbf16>, vector<7x128xbf16>, vector<7x128xbf16>, vector<7x128xbf16>, vector<7x128xbf16>, vector<7x128xbf16> -> vector<7x1152xbf16>
      %c16_i32_28 = arith.constant 16 : i32
      %38 = arith.addi %c16_i32_28, %arg4 : i32
      %c0_29 = arith.constant 0 : index
      %39 = arith.index_cast %38 : i32 to index
      %c0_30 = arith.constant 0 : index
      %c0_31 = arith.constant 0 : index
      %40 = vector.load %arg1[%c0_29, %39, %c0_30, %c0_31] : memref<1x128x8x128xbf16, #tpu.memory_space<vmem>>, vector<1x1x7x128xbf16>
      %41 = vector.shape_cast %40 : vector<1x1x7x128xbf16> to vector<7x128xbf16>
      %c24_i32 = arith.constant 24 : i32
      %42 = arith.addi %c24_i32, %arg4 : i32
      %c0_32 = arith.constant 0 : index
      %43 = arith.index_cast %42 : i32 to index
      %c0_33 = arith.constant 0 : index
      %c0_34 = arith.constant 0 : index
      %44 = vector.load %arg1[%c0_32, %43, %c0_33, %c0_34] : memref<1x128x8x128xbf16, #tpu.memory_space<vmem>>, vector<1x1x7x128xbf16>
      %45 = vector.shape_cast %44 : vector<1x1x7x128xbf16> to vector<7x128xbf16>
      %c0_i32_35 = arith.constant 0 : i32
      %46 = arith.addi %c0_i32_35, %arg4 : i32
      %c0_36 = arith.constant 0 : index
      %47 = arith.index_cast %46 : i32 to index
      %c1 = arith.constant 1 : index
      %c0_37 = arith.constant 0 : index
      %48 = vector.load %arg1[%c0_36, %47, %c1, %c0_37] : memref<1x128x8x128xbf16, #tpu.memory_space<vmem>>, vector<1x1x7x128xbf16>
      %49 = vector.shape_cast %48 : vector<1x1x7x128xbf16> to vector<7x128xbf16>
      %c48_i32_38 = arith.constant 48 : i32
      %50 = arith.addi %c48_i32_38, %arg4 : i32
      %c0_39 = arith.constant 0 : index
      %51 = arith.index_cast %50 : i32 to index
      %c0_40 = arith.constant 0 : index
      %c0_41 = arith.constant 0 : index
      %52 = vector.load %arg1[%c0_39, %51, %c0_40, %c0_41] : memref<1x128x8x128xbf16, #tpu.memory_space<vmem>>, vector<1x1x7x128xbf16>
      %53 = vector.shape_cast %52 : vector<1x1x7x128xbf16> to vector<7x128xbf16>
      %c56_i32 = arith.constant 56 : i32
      %54 = arith.addi %c56_i32, %arg4 : i32
      %c0_42 = arith.constant 0 : index
      %55 = arith.index_cast %54 : i32 to index
      %c0_43 = arith.constant 0 : index
      %c0_44 = arith.constant 0 : index
      %56 = vector.load %arg1[%c0_42, %55, %c0_43, %c0_44] : memref<1x128x8x128xbf16, #tpu.memory_space<vmem>>, vector<1x1x7x128xbf16>
      %57 = vector.shape_cast %56 : vector<1x1x7x128xbf16> to vector<7x128xbf16>
      %c32_i32_45 = arith.constant 32 : i32
      %58 = arith.addi %c32_i32_45, %arg4 : i32
      %c0_46 = arith.constant 0 : index
      %59 = arith.index_cast %58 : i32 to index
      %c1_47 = arith.constant 1 : index
      %c0_48 = arith.constant 0 : index
      %60 = vector.load %arg1[%c0_46, %59, %c1_47, %c0_48] : memref<1x128x8x128xbf16, #tpu.memory_space<vmem>>, vector<1x1x7x128xbf16>
      %61 = vector.shape_cast %60 : vector<1x1x7x128xbf16> to vector<7x128xbf16>
      %c80_i32_49 = arith.constant 80 : i32
      %62 = arith.addi %c80_i32_49, %arg4 : i32
      %c0_50 = arith.constant 0 : index
      %63 = arith.index_cast %62 : i32 to index
      %c0_51 = arith.constant 0 : index
      %c0_52 = arith.constant 0 : index
      %64 = vector.load %arg1[%c0_50, %63, %c0_51, %c0_52] : memref<1x128x8x128xbf16, #tpu.memory_space<vmem>>, vector<1x1x7x128xbf16>
      %65 = vector.shape_cast %64 : vector<1x1x7x128xbf16> to vector<7x128xbf16>
      %c88_i32 = arith.constant 88 : i32
      %66 = arith.addi %c88_i32, %arg4 : i32
      %c0_53 = arith.constant 0 : index
      %67 = arith.index_cast %66 : i32 to index
      %c0_54 = arith.constant 0 : index
      %c0_55 = arith.constant 0 : index
      %68 = vector.load %arg1[%c0_53, %67, %c0_54, %c0_55] : memref<1x128x8x128xbf16, #tpu.memory_space<vmem>>, vector<1x1x7x128xbf16>
      %69 = vector.shape_cast %68 : vector<1x1x7x128xbf16> to vector<7x128xbf16>
      %c64_i32_56 = arith.constant 64 : i32
      %70 = arith.addi %c64_i32_56, %arg4 : i32
      %c0_57 = arith.constant 0 : index
      %71 = arith.index_cast %70 : i32 to index
      %c1_58 = arith.constant 1 : index
      %c0_59 = arith.constant 0 : index
      %72 = vector.load %arg1[%c0_57, %71, %c1_58, %c0_59] : memref<1x128x8x128xbf16, #tpu.memory_space<vmem>>, vector<1x1x7x128xbf16>
      %73 = vector.shape_cast %72 : vector<1x1x7x128xbf16> to vector<7x128xbf16>
      %74 = tpu.concatenate %41, %45, %49, %53, %57, %61, %65, %69, %73 in 1 : vector<7x128xbf16>, vector<7x128xbf16>, vector<7x128xbf16>, vector<7x128xbf16>, vector<7x128xbf16>, vector<7x128xbf16>, vector<7x128xbf16>, vector<7x128xbf16>, vector<7x128xbf16> -> vector<7x1152xbf16>
      %c64_i32_60 = arith.constant 64 : i32
      %75 = arith.addi %c64_i32_60, %arg4 : i32
      %c0_61 = arith.constant 0 : index
      %76 = arith.index_cast %75 : i32 to index
      %c0_62 = arith.constant 0 : index
      %c0_63 = arith.constant 0 : index
      %77 = vector.load %arg1[%c0_61, %76, %c0_62, %c0_63] : memref<1x128x8x128xbf16, #tpu.memory_space<vmem>>, vector<1x1x7x128xbf16>
      %78 = vector.shape_cast %77 : vector<1x1x7x128xbf16> to vector<7x128xbf16>
      %c72_i32_64 = arith.constant 72 : i32
      %79 = arith.addi %c72_i32_64, %arg4 : i32
      %c0_65 = arith.constant 0 : index
      %80 = arith.index_cast %79 : i32 to index
      %c0_66 = arith.constant 0 : index
      %c0_67 = arith.constant 0 : index
      %81 = vector.load %arg1[%c0_65, %80, %c0_66, %c0_67] : memref<1x128x8x128xbf16, #tpu.memory_space<vmem>>, vector<1x1x7x128xbf16>
      %82 = vector.shape_cast %81 : vector<1x1x7x128xbf16> to vector<7x128xbf16>
      %c80_i32_68 = arith.constant 80 : i32
      %83 = arith.addi %c80_i32_68, %arg4 : i32
      %c0_69 = arith.constant 0 : index
      %84 = arith.index_cast %83 : i32 to index
      %c0_70 = arith.constant 0 : index
      %c0_71 = arith.constant 0 : index
      %85 = vector.load %arg1[%c0_69, %84, %c0_70, %c0_71] : memref<1x128x8x128xbf16, #tpu.memory_space<vmem>>, vector<1x1x7x128xbf16>
      %86 = vector.shape_cast %85 : vector<1x1x7x128xbf16> to vector<7x128xbf16>
      %c96_i32 = arith.constant 96 : i32
      %87 = arith.addi %c96_i32, %arg4 : i32
      %c0_72 = arith.constant 0 : index
      %88 = arith.index_cast %87 : i32 to index
      %c0_73 = arith.constant 0 : index
      %c0_74 = arith.constant 0 : index
      %89 = vector.load %arg1[%c0_72, %88, %c0_73, %c0_74] : memref<1x128x8x128xbf16, #tpu.memory_space<vmem>>, vector<1x1x7x128xbf16>
      %90 = vector.shape_cast %89 : vector<1x1x7x128xbf16> to vector<7x128xbf16>
      %c104_i32 = arith.constant 104 : i32
      %91 = arith.addi %c104_i32, %arg4 : i32
      %c0_75 = arith.constant 0 : index
      %92 = arith.index_cast %91 : i32 to index
      %c0_76 = arith.constant 0 : index
      %c0_77 = arith.constant 0 : index
      %93 = vector.load %arg1[%c0_75, %92, %c0_76, %c0_77] : memref<1x128x8x128xbf16, #tpu.memory_space<vmem>>, vector<1x1x7x128xbf16>
      %94 = vector.shape_cast %93 : vector<1x1x7x128xbf16> to vector<7x128xbf16>
      %c112_i32 = arith.constant 112 : i32
      %95 = arith.addi %c112_i32, %arg4 : i32
      %c0_78 = arith.constant 0 : index
      %96 = arith.index_cast %95 : i32 to index
      %c0_79 = arith.constant 0 : index
      %c0_80 = arith.constant 0 : index
      %97 = vector.load %arg1[%c0_78, %96, %c0_79, %c0_80] : memref<1x128x8x128xbf16, #tpu.memory_space<vmem>>, vector<1x1x7x128xbf16>
      %98 = vector.shape_cast %97 : vector<1x1x7x128xbf16> to vector<7x128xbf16>
      %c1_i32_81 = arith.constant 1 : i32
      %99 = arith.addi %c1_i32_81, %arg4 : i32
      %c0_82 = arith.constant 0 : index
      %100 = arith.index_cast %99 : i32 to index
      %c0_83 = arith.constant 0 : index
      %c0_84 = arith.constant 0 : index
      %101 = vector.load %arg1[%c0_82, %100, %c0_83, %c0_84] : memref<1x128x8x128xbf16, #tpu.memory_space<vmem>>, vector<1x1x7x128xbf16>
      %102 = vector.shape_cast %101 : vector<1x1x7x128xbf16> to vector<7x128xbf16>
      %c9_i32 = arith.constant 9 : i32
      %103 = arith.addi %c9_i32, %arg4 : i32
      %c0_85 = arith.constant 0 : index
      %104 = arith.index_cast %103 : i32 to index
      %c0_86 = arith.constant 0 : index
      %c0_87 = arith.constant 0 : index
      %105 = vector.load %arg1[%c0_85, %104, %c0_86, %c0_87] : memref<1x128x8x128xbf16, #tpu.memory_space<vmem>>, vector<1x1x7x128xbf16>
      %106 = vector.shape_cast %105 : vector<1x1x7x128xbf16> to vector<7x128xbf16>
      %c17_i32 = arith.constant 17 : i32
      %107 = arith.addi %c17_i32, %arg4 : i32
      %c0_88 = arith.constant 0 : index
      %108 = arith.index_cast %107 : i32 to index
      %c0_89 = arith.constant 0 : index
      %c0_90 = arith.constant 0 : index
      %109 = vector.load %arg1[%c0_88, %108, %c0_89, %c0_90] : memref<1x128x8x128xbf16, #tpu.memory_space<vmem>>, vector<1x1x7x128xbf16>
      %110 = vector.shape_cast %109 : vector<1x1x7x128xbf16> to vector<7x128xbf16>
      %111 = tpu.concatenate %78, %82, %86, %90, %94, %98, %102, %106, %110 in 1 : vector<7x128xbf16>, vector<7x128xbf16>, vector<7x128xbf16>, vector<7x128xbf16>, vector<7x128xbf16>, vector<7x128xbf16>, vector<7x128xbf16>, vector<7x128xbf16>, vector<7x128xbf16> -> vector<7x1152xbf16>
      %c80_i32_91 = arith.constant 80 : i32
      %112 = arith.addi %c80_i32_91, %arg4 : i32
      %c0_92 = arith.constant 0 : index
      %113 = arith.index_cast %112 : i32 to index
      %c0_93 = arith.constant 0 : index
      %c0_94 = arith.constant 0 : index
      %114 = vector.load %arg1[%c0_92, %113, %c0_93, %c0_94] : memref<1x128x8x128xbf16, #tpu.memory_space<vmem>>, vector<1x1x7x128xbf16>
      %115 = vector.shape_cast %114 : vector<1x1x7x128xbf16> to vector<7x128xbf16>
      %c88_i32_95 = arith.constant 88 : i32
      %116 = arith.addi %c88_i32_95, %arg4 : i32
      %c0_96 = arith.constant 0 : index
      %117 = arith.index_cast %116 : i32 to index
      %c0_97 = arith.constant 0 : index
      %c0_98 = arith.constant 0 : index
      %118 = vector.load %arg1[%c0_96, %117, %c0_97, %c0_98] : memref<1x128x8x128xbf16, #tpu.memory_space<vmem>>, vector<1x1x7x128xbf16>
      %119 = vector.shape_cast %118 : vector<1x1x7x128xbf16> to vector<7x128xbf16>
      %c64_i32_99 = arith.constant 64 : i32
      %120 = arith.addi %c64_i32_99, %arg4 : i32
      %c0_100 = arith.constant 0 : index
      %121 = arith.index_cast %120 : i32 to index
      %c1_101 = arith.constant 1 : index
      %c0_102 = arith.constant 0 : index
      %122 = vector.load %arg1[%c0_100, %121, %c1_101, %c0_102] : memref<1x128x8x128xbf16, #tpu.memory_space<vmem>>, vector<1x1x7x128xbf16>
      %123 = vector.shape_cast %122 : vector<1x1x7x128xbf16> to vector<7x128xbf16>
      %c112_i32_103 = arith.constant 112 : i32
      %124 = arith.addi %c112_i32_103, %arg4 : i32
      %c0_104 = arith.constant 0 : index
      %125 = arith.index_cast %124 : i32 to index
      %c0_105 = arith.constant 0 : index
      %c0_106 = arith.constant 0 : index
      %126 = vector.load %arg1[%c0_104, %125, %c0_105, %c0_106] : memref<1x128x8x128xbf16, #tpu.memory_space<vmem>>, vector<1x1x7x128xbf16>
      %127 = vector.shape_cast %126 : vector<1x1x7x128xbf16> to vector<7x128xbf16>
      %c120_i32 = arith.constant 120 : i32
      %128 = arith.addi %c120_i32, %arg4 : i32
      %c0_107 = arith.constant 0 : index
      %129 = arith.index_cast %128 : i32 to index
      %c0_108 = arith.constant 0 : index
      %c0_109 = arith.constant 0 : index
      %130 = vector.load %arg1[%c0_107, %129, %c0_108, %c0_109] : memref<1x128x8x128xbf16, #tpu.memory_space<vmem>>, vector<1x1x7x128xbf16>
      %131 = vector.shape_cast %130 : vector<1x1x7x128xbf16> to vector<7x128xbf16>
      %c96_i32_110 = arith.constant 96 : i32
      %132 = arith.addi %c96_i32_110, %arg4 : i32
      %c0_111 = arith.constant 0 : index
      %133 = arith.index_cast %132 : i32 to index
      %c1_112 = arith.constant 1 : index
      %c0_113 = arith.constant 0 : index
      %134 = vector.load %arg1[%c0_111, %133, %c1_112, %c0_113] : memref<1x128x8x128xbf16, #tpu.memory_space<vmem>>, vector<1x1x7x128xbf16>
      %135 = vector.shape_cast %134 : vector<1x1x7x128xbf16> to vector<7x128xbf16>
      %c17_i32_114 = arith.constant 17 : i32
      %136 = arith.addi %c17_i32_114, %arg4 : i32
      %c0_115 = arith.constant 0 : index
      %137 = arith.index_cast %136 : i32 to index
      %c0_116 = arith.constant 0 : index
      %c0_117 = arith.constant 0 : index
      %138 = vector.load %arg1[%c0_115, %137, %c0_116, %c0_117] : memref<1x128x8x128xbf16, #tpu.memory_space<vmem>>, vector<1x1x7x128xbf16>
      %139 = vector.shape_cast %138 : vector<1x1x7x128xbf16> to vector<7x128xbf16>
      %c25_i32 = arith.constant 25 : i32
      %140 = arith.addi %c25_i32, %arg4 : i32
      %c0_118 = arith.constant 0 : index
      %141 = arith.index_cast %140 : i32 to index
      %c0_119 = arith.constant 0 : index
      %c0_120 = arith.constant 0 : index
      %142 = vector.load %arg1[%c0_118, %141, %c0_119, %c0_120] : memref<1x128x8x128xbf16, #tpu.memory_space<vmem>>, vector<1x1x7x128xbf16>
      %143 = vector.shape_cast %142 : vector<1x1x7x128xbf16> to vector<7x128xbf16>
      %c1_i32_121 = arith.constant 1 : i32
      %144 = arith.addi %c1_i32_121, %arg4 : i32
      %c0_122 = arith.constant 0 : index
      %145 = arith.index_cast %144 : i32 to index
      %c1_123 = arith.constant 1 : index
      %c0_124 = arith.constant 0 : index
      %146 = vector.load %arg1[%c0_122, %145, %c1_123, %c0_124] : memref<1x128x8x128xbf16, #tpu.memory_space<vmem>>, vector<1x1x7x128xbf16>
      %147 = vector.shape_cast %146 : vector<1x1x7x128xbf16> to vector<7x128xbf16>
      %148 = tpu.concatenate %115, %119, %123, %127, %131, %135, %139, %143, %147 in 1 : vector<7x128xbf16>, vector<7x128xbf16>, vector<7x128xbf16>, vector<7x128xbf16>, vector<7x128xbf16>, vector<7x128xbf16>, vector<7x128xbf16>, vector<7x128xbf16>, vector<7x128xbf16> -> vector<7x1152xbf16>
      %149 = tpu.concatenate %37, %74, %111, %148 in 0 : vector<7x1152xbf16>, vector<7x1152xbf16>, vector<7x1152xbf16>, vector<7x1152xbf16> -> vector<28x1152xbf16>
      %c0_125 = arith.constant 0 : index
      %c0_126 = arith.constant 0 : index
      %150 = vector.load %arg2[%c0_125, %c0_126] : memref<1152x256xbf16, #tpu.memory_space<vmem>>, vector<1152x256xbf16>
      %cst = arith.constant dense<0.000000e+00> : vector<28x256xf32>
      %151 = tpu.matmul %149, %150, %cst {dimension_numbers = #tpu.dot_dimension_numbers<[1], [0], [0], [1], [0, 0, 1, 1], [], []>} : vector<28x1152xbf16>, vector<1152x256xbf16>, vector<28x256xf32> -> vector<28x256xf32>
      %cst_127 = arith.constant 0.000000e+00 : f32
      %152 = vector.broadcast %cst_127 : f32 to vector<28x256xf32>
      %153 = arith.maximumf %151, %152 : vector<28x256xf32>
      %154 = vector.extract_strided_slice %153 {offsets = [0, 0], sizes = [7, 256], strides = [1, 1]} : vector<28x256xf32> to vector<7x256xf32>
      %155 = vector.extract_strided_slice %153 {offsets = [7, 0], sizes = [7, 256], strides = [1, 1]} : vector<28x256xf32> to vector<7x256xf32>
      %156 = arith.maximumf %154, %155 : vector<7x256xf32>
      %157 = vector.extract_strided_slice %153 {offsets = [14, 0], sizes = [7, 256], strides = [1, 1]} : vector<28x256xf32> to vector<7x256xf32>
      %158 = vector.extract_strided_slice %153 {offsets = [21, 0], sizes = [7, 256], strides = [1, 1]} : vector<28x256xf32> to vector<7x256xf32>
      %159 = arith.maximumf %157, %158 : vector<7x256xf32>
      %160 = arith.maximumf %156, %159 : vector<7x256xf32>
      %161 = arith.truncf %160 : vector<7x256xf32> to vector<7x256xbf16>
      %c0_128 = arith.constant 0 : index
      %162 = arith.index_cast %arg4 : i32 to index
      %c0_129 = arith.constant 0 : index
      %c0_130 = arith.constant 0 : index
      %163 = vector.load %arg3[%c0_128, %162, %c0_129, %c0_130] : memref<1x7x7x256xbf16, #tpu.memory_space<vmem>>, vector<1x1x7x256xbf16>
      %164 = vector.shape_cast %163 : vector<1x1x7x256xbf16> to vector<7x256xbf16>
      %165 = vector.shape_cast %161 : vector<7x256xbf16> to vector<1x1x7x256xbf16>
      tpu.vector_store %arg3[%c0_128, %162, %c0_129, %c0_130], %165 {strides = array<i32>} : memref<1x7x7x256xbf16, #tpu.memory_space<vmem>>, vector<1x1x7x256xbf16>,
    }
    %c7_i32_0 = arith.constant 7 : i32
    return
  }
  func.func @transform_0(%arg0: i32) -> (i32, i32, i32, i32) {
    %c0_i32 = arith.constant 0 : i32
    %c0_i32_0 = arith.constant 0 : i32
    %c0_i32_1 = arith.constant 0 : i32
    %c0_i32_2 = arith.constant 0 : i32
    return %arg0, %c0_i32, %c0_i32_0, %c0_i32_1 : i32, i32, i32, i32
  }
  func.func @transform_1(%arg0: i32) -> (i32, i32) {
    %c0_i32 = arith.constant 0 : i32
    %c0_i32_0 = arith.constant 0 : i32
    %c0_i32_1 = arith.constant 0 : i32
    return %c0_i32, %c0_i32_0 : i32, i32
  }
  func.func @transform_2(%arg0: i32) -> (i32, i32, i32, i32) {
    %c0_i32 = arith.constant 0 : i32
    %c0_i32_0 = arith.constant 0 : i32
    %c0_i32_1 = arith.constant 0 : i32
    %c0_i32_2 = arith.constant 0 : i32
    return %arg0, %c0_i32, %c0_i32_0, %c0_i32_1 : i32, i32, i32, i32
  }
}

module attributes {stable_mosaic.version = 11 : i64} {
  func.func @_fc_kernel(%arg0: i32, %arg1: memref<8x12544xbf16, #tpu.memory_space<vmem>>, %arg2: memref<12544x10xbf16, #tpu.memory_space<vmem>>, %arg3: memref<1x10xf32, #tpu.memory_space<vmem>>, %arg4: memref<8x10xf32, #tpu.memory_space<vmem>>) attributes {dimension_semantics = [#tpu.dimension_semantics<arbitrary>], iteration_bounds = array<i64: 1>, scalar_prefetch = 0 : i64, scratch_operands = 0 : i64, tpu.core_type = #tpu.core_type<tc>, window_params = [{pipeline_mode = #tpu.pipeline_mode<synchronous>, transform_indices = @transform_0, window_bounds = array<i64: 8, 12544>}, {pipeline_mode = #tpu.pipeline_mode<synchronous>, transform_indices = @transform_1, window_bounds = array<i64: 12544, 10>}, {pipeline_mode = #tpu.pipeline_mode<synchronous>, transform_indices = @transform_2, window_bounds = array<i64: 1, 10>}, {pipeline_mode = #tpu.pipeline_mode<synchronous>, transform_indices = @transform_3, window_bounds = array<i64: 8, 10>}]} {
    %c0 = arith.constant 0 : index
    %c0_0 = arith.constant 0 : index
    %0 = vector.load %arg1[%c0, %c0_0] : memref<8x12544xbf16, #tpu.memory_space<vmem>>, vector<8x12544xbf16>
    %c0_1 = arith.constant 0 : index
    %c0_2 = arith.constant 0 : index
    %1 = vector.load %arg2[%c0_1, %c0_2] : memref<12544x10xbf16, #tpu.memory_space<vmem>>, vector<12544x10xbf16>
    %cst = arith.constant dense<0.000000e+00> : vector<8x10xf32>
    %2 = tpu.matmul %0, %1, %cst {dimension_numbers = #tpu.dot_dimension_numbers<[1], [0], [0], [1], [0, 0, 1, 1], [], []>} : vector<8x12544xbf16>, vector<12544x10xbf16>, vector<8x10xf32> -> vector<8x10xf32>
    %c0_3 = arith.constant 0 : index
    %c0_4 = arith.constant 0 : index
    %3 = vector.load %arg3[%c0_3, %c0_4] : memref<1x10xf32, #tpu.memory_space<vmem>>, vector<1x10xf32>
    %4 = vector.broadcast %3 : vector<1x10xf32> to vector<8x10xf32>
    %5 = arith.addf %2, %4 : vector<8x10xf32>
    %c0_5 = arith.constant 0 : index
    %c0_6 = arith.constant 0 : index
    %6 = vector.load %arg4[%c0_5, %c0_6] : memref<8x10xf32, #tpu.memory_space<vmem>>, vector<8x10xf32>
    tpu.vector_store %arg4[%c0_5, %c0_6], %5 {strides = array<i32>} : memref<8x10xf32, #tpu.memory_space<vmem>>, vector<8x10xf32>,
    return
  }
  func.func @transform_0(%arg0: i32) -> (i32, i32) {
    %c0_i32 = arith.constant 0 : i32
    %c0_i32_0 = arith.constant 0 : i32
    %c0_i32_1 = arith.constant 0 : i32
    return %c0_i32, %c0_i32_0 : i32, i32
  }
  func.func @transform_1(%arg0: i32) -> (i32, i32) {
    %c0_i32 = arith.constant 0 : i32
    %c0_i32_0 = arith.constant 0 : i32
    %c0_i32_1 = arith.constant 0 : i32
    return %c0_i32, %c0_i32_0 : i32, i32
  }
  func.func @transform_2(%arg0: i32) -> (i32, i32) {
    %c0_i32 = arith.constant 0 : i32
    %c0_i32_0 = arith.constant 0 : i32
    %c0_i32_1 = arith.constant 0 : i32
    return %c0_i32, %c0_i32_0 : i32, i32
  }
  func.func @transform_3(%arg0: i32) -> (i32, i32) {
    %c0_i32 = arith.constant 0 : i32
    %c0_i32_0 = arith.constant 0 : i32
    %c0_i32_1 = arith.constant 0 : i32
    return %c0_i32, %c0_i32_0 : i32, i32
  }
}

</mosaic_0001>

<bundles_post_ra>
// kernel: env_classifier_forward.3
= control target key start
LH: loop header
LB: loop body
LE: loop exit
PB: predicated region body
PF: predicated region fallthrough
CT: control target
= control target key end

     0   :  { %s2292_s9 = smov 0   ;;  %s2760_s0 = inlined_call_operand.vmem [shape: bf16[2,480,30,64], index: 0, kind: input, shape index: {}]   ;;  %s2761_s1 = inlined_call_operand.vmem [shape: bf16[576,128], index: 1, kind: input, shape index: {}]   ;;  %s2762_s2 = inlined_call_operand.vmem [shape: bf16[2,29,29,128], index: 2, kind: output, shape index: {}]  }
   0x1 LB: > { %s1715_s10 = sadd.s32 4294967295, %s2270_s9   ;;  %p1719_p0 = scmp.ge.s32.totalorder %s2270_s9, 1  ;;  %s2270_s9 = sphi %s2292_s9, %s12_s9  }
   0x2   : > { %p112_p1 = scmp.lt.s32.totalorder %s2270_s9, 3 }
   0x4   : > { %p113_p2 = pnand %p1719_p0, %p112_p1 }
   0x5   : > { %p134_p3 = scmp.lt.s32.totalorder (!%p113_p2), %s1715_s10, 1  ;;  %s2310_s19 = smov (!%p113_p2), 0  }
   0x6   : > { %116 = sbr.rel (%p113_p2) target bundleno = 447 (0x1bf), region = 28 }
   0xb   : > { %s2768_s10 = smov (!%p134_p3, %s1715_s10), 1 }
   0xc   : > { %s2241_s11 = smul.u32 7680, %s2768_s10 }
   0xd   : > { %s2242_s12 = smul.u32 464, %s2768_s10 }
   0xe   : > { %s2303_s15 = scalar_lea.vmem %s2760_s0, %s2241_s11 }
   0xf   : > { %s2308_s18 = scalar_lea.vmem %s2762_s2, %s2242_s12 }
  0x10 LB: >> { %s2134_s20 = sshll.u32 %s2274_s19, 4  ;;  %s2276_s22 = smov 64   ;;  %v2182_v18 = vld [vmem:[%s2761_s1 + $0x38] sm:$0xff]  ;;  %v2181_v23 = vld [vmem:[%s2761_s1 + $0x30] sm:$0xff]  ;;  %v2180_v29 = vld [vmem:[%s2761_s1 + $0x28] sm:$0xff]  ;;  %vm329_vm1 = vcmask 523264   ;;  %s2274_s19 = sphi %s2310_s19, %s150_s19  }
  0x11   : >> { %s2319_s21 = scalar_lea.vmem %s2303_s15, %s2134_s20  ;;  %2217 = vmatpush.bf16.msra.mxu1 %v2182_v18  ;;  %2218 = vmatpush.bf16.msra.mxu2 %v2182_v18  ;;  %vm400_vm0 = vsmask.f32 7424  ;;  %v2179_v33 = vld [vmem:[%s2761_s1 + $0x20] sm:$0xff]  ;;  %v2178_v44 = vld [vmem:[%s2761_s1 + $0x18] sm:$0xff]  ;;  %v2177_v46 = vld [vmem:[%s2761_s1 + $0x10] sm:$0xff]  ;;  %vm807_vm3 = vcmask 1044480  }
  0x12   : >> { %v2157_v0 = vld [vmem:[%s2319_s21 + $0x14a0] sm:$0xff]  ;;  %v1873_v3 = vld [vmem:[%s2319_s21 + $0x14a8] sm:$0xf]  ;;  %v2158_v4 = vld [vmem:[%s2319_s21 + $0x14a8] sm:$0x70]  ;;  %2219 = vmatpush.bf16.msra.mxu3 %v2182_v18  ;;  %1259 = vmatpush.bf16.msra.mxu0 %v2182_v18  ;;  %vm942_vm5 = vcmask 1043456  }
  0x13   : >> { %v2153_v1 = vld [vmem:[%s2319_s21 + $0x5a0] sm:$0xff]  ;;  %453 = vrot.lane.b32.xlu0 %v2157_v0, %s2276_s22  ;;  %v1857_v5 = vld [vmem:[%s2319_s21 + $0x5a8] sm:$0xf]  ;;  %v2154_v6 = vld [vmem:[%s2319_s21 + $0x5a8] sm:$0x70]  ;;  %v1874_v9 = vor.u32 %v2158_v4, %v1873_v3  ;;  %vm915_vm7 = vcmask 1046528  }
  0x14   : >> { %v2149_v2 = vld [vmem:[%s2319_s21 + $0x10e0] sm:$0xff]  ;;  %396 = vrot.lane.b32.xlu2 %v2153_v1, %s2276_s22  ;;  %v1826_v7 = vld [vmem:[%s2319_s21 + $0x10e8] sm:$0xf]  ;;  %v2150_v8 = vld [vmem:[%s2319_s21 + $0x10e8] sm:$0x70]  ;;  %v1858_v10 = vor.u32 %v2154_v6, %v1857_v5  ;;  %vm1519_vm9 = vcmask 1042432  }
  0x15   : >> { %314 = vrot.lane.b32.xlu1 %v2149_v2, %s2276_s22  ;;  %v1827_v11 = vor.u32 %v2150_v8, %v1826_v7  ;;  %v2141_v12 = vld [vmem:[%s2319_s21 + $0x780] sm:$0xff]  ;;  %v1794_v13 = vld [vmem:[%s2319_s21 + $0x788] sm:$0xf]  ;;  %v2142_v14 = vld [vmem:[%s2319_s21 + $0x788] sm:$0x70]  ;;  %2220 = vmatpush.bf16.msra.mxu1 %v2181_v23  ;;  %vm1563_vm10 = vcmask 1045504  }
  0x16   : >> { %v1778_v15 = vld [vmem:[%s2319_s21 + $0x1e8] sm:$0xf]  ;;  %v2138_v16 = vld [vmem:[%s2319_s21 + $0x1e8] sm:$0x70]  ;;  %v427_v17 = vshll.u32 %v2141_v12, 16  ;;  %v2137_v19 = vld [vmem:[%s2319_s21 + $0x1e0] sm:$0xff]  ;;  %v1795_v20 = vor.u32 %v2142_v14, %v1794_v13  ;;  %2221 = vmatpush.bf16.msra.mxu2 %v2181_v23  ;;  %2222 = vmatpush.bf16.msra.mxu3 %v2181_v23 }
  0x17   : >> { %v2145_v21 = vld [vmem:[%s2319_s21 + $0xb40] sm:$0xff]  ;;  %v1779_v22 = vor.u32 %v2138_v16, %v1778_v15  ;;  %v425_v24 = vshrl.u32 %v2141_v12, 16  ;;  %v1810_v27 = vld [vmem:[%s2319_s21 + $0xb48] sm:$0xf]  ;;  %v2146_v28 = vld [vmem:[%s2319_s21 + $0xb48] sm:$0x70]  ;;  %1260 = vmatpush.bf16.msra.mxu0 %v2181_v23 }
  0x18   : >> { %v429_v25 = vrot.slane %v427_v17, 1  ;;  %v432_v26 = vshll.u32 %v1795_v20, 16  ;;  %v1811_v32 = vor.u32 %v2146_v28, %v1810_v27  ;;  %v436_v35 = vshrl.u32 %v1795_v20, 16  ;;  %v2167_v37 = vld [vmem:[%s2319_s21 + $0x1f0] sm:$0xff]  ;;  %v2368_v38 = vld [vmem:[%s2319_s21 + $0x1680] sm:$0xff]  ;;  %v2176_v48 = vld [vmem:[%s2761_s1 + $0x8] sm:$0xff] }
  0x19   : >> { %2223 = vmatpush.bf16.msra.mxu1 %v2180_v29  ;;  %v1911_v39 = vld [vmem:[%s2319_s21 + $0x1688] sm:$0xf]  ;;  %v2160_v40 = vld [vmem:[%s2319_s21 + $0x1688] sm:$0x70]  ;;  %v1943_v42 = vld [vmem:[%s2319_s21 + $0x1f8] sm:$0xf] }
  0x1a   : >> { %v430_v30 = vor.u32 %v429_v25, %v425_v24  ;;  %v434_v31 = vrot.slane %v432_v26, 1  ;;  %2224 = vmatpush.bf16.msra.mxu2 %v2180_v29  ;;  %2225 = vmatpush.bf16.msra.mxu3 %v2180_v29  ;;  %v1912_v41 = vor.u32 %v2160_v40, %v1911_v39  ;;  %v2168_v43 = vld [vmem:[%s2319_s21 + $0x1f8] sm:$0x70]  ;;  %v2163_v47 = vld [vmem:[%s2319_s21 + $0x1a40] sm:$0xff]  ;;  %v2173_v50 = vld [vmem:[%s2319_s21 + $0x5b0] sm:$0xff]  ;;  %v655_v61 = vshll.u32 %v2368_v38, 16 }
  0x1b   : >> { %455 = vrot.lane.b32.xlu0 %v1874_v9, %s2276_s22  ;;  %1261 = vmatpush.bf16.msra.mxu0 %v2180_v29  ;;  %v1944_v45 = vor.u32 %v2168_v43, %v1943_v42  ;;  %v2175_v49 = vld [vmem:[%s2761_s1] sm:$0xff]  ;;  %v2190_v51 = vld [vmem:[%s2761_s1 + $0x78] sm:$0xff]  ;;  %v2189_v52 = vld [vmem:[%s2761_s1 + $0x70] sm:$0xff]  ;;  %v653_v1 = vshrl.u32 %v2368_v38, 16  ;;  %vm714_vm2 = vsmask.f32 6400 }
  0x1c   : >> { %398 = vrot.lane.b32.xlu2 %v1858_v10, %s2276_s22  ;;  %v435_v34 = vsel %vm400_vm0, %v430_v30, %v434_v31  ;;  %v438_v36 = vor.u32 %v436_v35, %v434_v31  ;;  %v1927_v53 = vld [vmem:[%s2319_s21 + $0x1a48] sm:$0xf]  ;;  %v2164_v54 = vld [vmem:[%s2319_s21 + $0x1a48] sm:$0x70]  ;;  %v660_v56 = vshll.u32 %v1912_v41, 16  ;;  %v664_v58 = vshrl.u32 %v1912_v41, 16  ;;  %vm2563_vm8 = vmand %vm915_vm7, %vm714_vm2 }
  0x1d   : >> { %316 = vrot.lane.b32.xlu1 %v1827_v11, %s2276_s22  ;;  %2226 = vmatpush.bf16.msra.mxu1 %v2179_v33  ;;  %v1928_v55 = vor.u32 %v2164_v54, %v1927_v53  ;;  %v2188_v59 = vld [vmem:[%s2761_s1 + $0x68] sm:$0xff]  ;;  %v2187_v62 = vld [vmem:[%s2761_s1 + $0x60] sm:$0xff]  ;;  %v657_v2 = vrot.slane %v655_v61, 1  ;;  %v2186_v6 = vld [vmem:[%s2761_s1 + $0x58] sm:$0xff]  ;;  %vm832_vm4 = vsmask.f32 3328 }
  0x1e   : >> { %2227 = vmatpush.bf16.msra.mxu2 %v2179_v33  ;;  %2228 = vmatpush.bf16.msra.mxu3 %v2179_v33  ;;  %v662_v57 = vrot.slane %v660_v56, 1  ;;  %v2412_v63 = vld [vmem:[%s2319_s21 + $0x3c0] sm:$0xff]  ;;  %v1786_v4 = vld [vmem:[%s2319_s21 + $0x3c8] sm:$0xf]  ;;  %v2140_v5 = vld [vmem:[%s2319_s21 + $0x3c8] sm:$0x70] }
  0x1f   : >> { %1262 = vmatpush.bf16.msra.mxu0 %v2179_v33  ;;  %v658_v7 = vor.u32 %v657_v2, %v653_v1  ;;  %v2423_v10 = vor.u32 %v2140_v5, %v1786_v4  ;;  %v2185_v13 = vld [vmem:[%s2761_s1 + $0x50] sm:$0xff]  ;;  %v2206_v18 = vld [vmem:[%s2761_s1 + $0xf8] sm:$0xff]  ;;  %v2196_v24 = vld [vmem:[%s2761_s1 + $0xa8] sm:$0xff]  ;;  %vm1589_vm11 = vsmask.f32 2304  ;;  %s150_s19 = sadd.s32 1, %s2274_s19  }
  0x20   : >> { %v666_v60 = vor.u32 %v664_v58, %v662_v57  ;;  %v2205_v23 = vld [vmem:[%s2761_s1 + $0xf0] sm:$0xff]  ;;  %v2183_v28 = vld [vmem:[%s2761_s1 + $0x40] sm:$0xff]  ;;  %v2204_v31 = vld [vmem:[%s2761_s1 + $0xe8] sm:$0xff]  ;;  %p147_p4 = scmp.ge.s32.totalorder %s150_s19, 29  }
  0x21   : >> { %2229 = vmatpush.bf16.msra.mxu1 %v2178_v44  ;;  %v663_v11 = vsel %vm400_vm0, %v658_v7, %v662_v57  ;;  %v2195_v33 = vld [vmem:[%s2761_s1 + $0xa0] sm:$0xff]  ;;  %v2174_v35 = vld [vmem:[%s2319_s21 + $0x5b8] sm:$0x70]  ;;  %v2192_v54 = vld [vmem:[%s2761_s1 + $0x88] sm:$0xff] }
  0x22   : >> { %2230 = vmatpush.bf16.msra.mxu2 %v2178_v44  ;;  %2231 = vmatpush.bf16.msra.mxu3 %v2178_v44  ;;  %v2475_v39 = vld [vmem:[%s2319_s21 + $0x12c0] sm:$0xff]  ;;  %v2202_v43 = vld [vmem:[%s2761_s1 + $0xd8] sm:$0xff]  ;;  %v2200_v5 = vld [vmem:[%s2761_s1 + $0xc8] sm:$0xff] }
  0x23   : >> { %242 = vrot.lane.b32.xlu0 %v2137_v19, %s2276_s22  ;;  %1263 = vmatpush.bf16.msra.mxu0 %v2178_v44  ;;  %v2197_v19 = vld [vmem:[%s2761_s1 + $0xb0] sm:$0xff]  ;;  %v2478_v40 = vld [vmem:[%s2319_s21 + $0xf00] sm:$0xff]  ;;  %vm2555_vm6 = vmand %vm942_vm5, %vm832_vm4 }
  0x24   : >> { %290 = vrot.lane.b32.xlu2 %v2145_v21, %s2276_s22  ;;  %v2209_v44 = vld [vmem:[%s2761_s1 + $0x110] sm:$0xff]  ;;  %vm1590_vm12 = vmand %vm1519_vm9, %vm1589_vm11 }
  0x25   : >> { %244 = vrot.lane.b32.xlu1 %v1779_v22, %s2276_s22  ;;  %2232 = vmatpush.bf16.msra.mxu1 %v2177_v46  ;;  %v2184_v22 = vld [vmem:[%s2761_s1 + $0x48] sm:$0xff] }
  0x26   : >> { %2233 = vmatpush.bf16.msra.mxu2 %v2177_v46  ;;  %2234 = vmatpush.bf16.msra.mxu3 %v2177_v46 }
  0x27   : >> { %1264 = vmatpush.bf16.msra.mxu0 %v2177_v46 }
  0x29   : >> { %2235 = vmatpush.bf16.msra.mxu1 %v2176_v48 }
  0x2a   : >> { %2236 = vmatpush.bf16.msra.mxu2 %v2176_v48  ;;  %2237 = vmatpush.bf16.msra.mxu3 %v2176_v48 }
  0x2b   : >> { %266 = vrot.lane.b32.xlu0 %v2141_v12, %s2276_s22  ;;  %1265 = vmatpush.bf16.msra.mxu0 %v2176_v48  ;;  %v2198_v12 = vld [vmem:[%s2761_s1 + $0xb8] sm:$0xff]  ;;  %v1834_v48 = vld [vmem:[%s2319_s21 + $0x12c8] sm:$0xf] }
  0x2c   : >> { %292 = vrot.lane.b32.xlu2 %v1811_v32, %s2276_s22  ;;  %v2210_v32 = vld [vmem:[%s2761_s1 + $0x118] sm:$0xff] }
  0x2d   : >> { %439 = vrot.lane.b32.xlu1 %v435_v34, %s2276_s22  ;;  %2238 = vmatpush.bf16.msra.mxu1 %v2175_v49  ;;  %v1977_v34 = vld [vmem:[%s2319_s21 + $0x5b8] sm:$0xf] }
  0x2e   : >> { %2239 = vmatpush.bf16.msra.mxu2 %v2175_v49  ;;  %2240 = vmatpush.bf16.msra.mxu3 %v2175_v49 }
  0x2f   : >> { %1266 = vmatpush.bf16.msra.mxu0 %v2175_v49  ;;  %v2152_v49 = vld [vmem:[%s2319_s21 + $0x12c8] sm:$0x70] }
  0x30   : >> { %v2510_v56 = vor.u32 %v2152_v49, %v1834_v48 }
  0x31   : >> { %1307 = vmatpush.bf16.msrb.mxu1 %v2190_v51  ;;  %v2148_v51 = vld [vmem:[%s2319_s21 + $0xf08] sm:$0x70] }
  0x32   : >> { %1355 = vmatpush.bf16.msrb.mxu2 %v2198_v12  ;;  %1403 = vmatpush.bf16.msrb.mxu3 %v2206_v18  ;;  %v2208_v12 = vld [vmem:[%s2761_s1 + $0x108] sm:$0xff] }
  0x33   : >> { %268 = vrot.lane.b32.xlu0 %v1795_v20, %s2276_s22  ;;  %1455 = vmatpush.bf16.msrb.mxu0 %v2210_v32 }
  0x34   : >> { %572 = vrot.lane.b32.xlu2 %v2163_v47, %s2276_s22 }
  0x35   : >> { %441 = vrot.lane.b32.xlu1 %v438_v36, %s2276_s22  ;;  %1308 = vmatpush.bf16.msrb.mxu1 %v2189_v52  ;;  %v2203_v36 = vld [vmem:[%s2761_s1 + $0xe0] sm:$0xff]  ;;  %v2201_v52 = vld [vmem:[%s2761_s1 + $0xd0] sm:$0xff] }
  0x36   : >> { %1356 = vmatpush.bf16.msrb.mxu2 %v2197_v19  ;;  %1404 = vmatpush.bf16.msrb.mxu3 %v2205_v23 }
  0x37   : >> { %1456 = vmatpush.bf16.msrb.mxu0 %v2209_v44 }
  0x39   : >> { %1309 = vmatpush.bf16.msrb.mxu1 %v2188_v59  ;;  %v2135_v59 = vld [vmem:[%s2319_s21] sm:$0xff] }
  0x3a   : >> { %1357 = vmatpush.bf16.msrb.mxu2 %v2196_v24  ;;  %1405 = vmatpush.bf16.msrb.mxu3 %v2204_v31  ;;  %v403_v4 = vshll.u32 %v2135_v59, 16 }
  0x3b   : >> { %596 = vrot.lane.b32.xlu0 %v2167_v37, %s2276_s22  ;;  %v2194_v37 = vld [vmem:[%s2761_s1 + $0x98] sm:$0xff]  ;;  %1457 = vmatpush.bf16.msrb.mxu0 %v2208_v12 }
  0x3c   : >> { %574 = vrot.lane.b32.xlu2 %v1928_v55, %s2276_s22 }
  0x3d   : >> { %548 = vrot.lane.b32.xlu1 %v2368_v38, %s2276_s22  ;;  %1310 = vmatpush.bf16.msrb.mxu1 %v2187_v62  ;;  %v1978_v38 = vor.u32 %v2174_v35, %v1977_v34  ;;  %v1770_v62 = vld [vmem:[%s2319_s21 + $0x8] sm:$0xf] }
  0x3e   : >> { %1358 = vmatpush.bf16.msrb.mxu2 %v2195_v33  ;;  %1406 = vmatpush.bf16.msrb.mxu3 %v2203_v36 }
  0x41   : >> { %1311 = vmatpush.bf16.msrb.mxu1 %v2186_v6  ;;  %v2191_v6 = vld [vmem:[%s2761_s1 + $0x80] sm:$0xff] }
  0x42   : >> { %1359 = vmatpush.bf16.msrb.mxu2 %v2194_v37  ;;  %1407 = vmatpush.bf16.msrb.mxu3 %v2202_v43 }
  0x43   : >> { %598 = vrot.lane.b32.xlu0 %v1944_v45, %s2276_s22  ;;  %v2193_v45 = vld [vmem:[%s2761_s1 + $0x90] sm:$0xff] }
  0x44   : >> { %667 = vrot.lane.b32.xlu2 %v663_v11, %s2276_s22 }
  0x45   : >> { %550 = vrot.lane.b32.xlu1 %v1912_v41, %s2276_s22  ;;  %1312 = vmatpush.bf16.msrb.mxu1 %v2185_v13 }
  0x46   : >> { %1360 = vmatpush.bf16.msrb.mxu2 %v2193_v45  ;;  %1408 = vmatpush.bf16.msrb.mxu3 %v2201_v52 }
  0x49   : >> { %1313 = vmatpush.bf16.msrb.mxu1 %v2184_v22  ;;  %v405_v22 = vrot.slane %v403_v4, 1  ;;  %v2155_v4 = vld [vmem:[%s2319_s21 + $0xd20] sm:$0xff] }
  0x4a   : >> { %1361 = vmatpush.bf16.msrb.mxu2 %v2192_v54  ;;  %1409 = vmatpush.bf16.msrb.mxu3 %v2200_v5 }
  0x4b   : >> { %681 = vrot.lane.b32.xlu0 %v2173_v50, %s2276_s22  ;;  %v1818_v50 = vld [vmem:[%s2319_s21 + $0xf08] sm:$0xf] }
  0x4c   : >> { %683 = vrot.lane.b32.xlu2 %v1978_v38, %s2276_s22  ;;  %v2513_v58 = vor.u32 %v2148_v51, %v1818_v50 }
  0x4d   : >> { %669 = vrot.lane.b32.xlu1 %v666_v60, %s2276_s22  ;;  %1314 = vmatpush.bf16.msrb.mxu1 %v2183_v28 }
  0x4e   : >> { %1362 = vmatpush.bf16.msrb.mxu2 %v2191_v6 }
  0x6e   : >> { %v397_v0 = vpop.permute.xlu2 %396 }
  0x6f   : >> { %v471_v3 = vsel %vm329_vm1, %v2412_v63, %v397_v0  ;;  %v2136_v0 = vld [vmem:[%s2319_s21 + $0x8] sm:$0x70] }
  0x70   : >> { %v715_v8 = vshrl.u32 %v471_v3, 16  ;;  %v718_v9 = vshll.u32 %v471_v3, 16 }
  0x72   : >> { %v717_v14 = vrot.slane %v715_v8, 1  ;;  %v720_v15 = vrot.slane %v718_v9, 2 }
  0x74   : >> { %v2450_v27 = vor.u32 %v720_v15, %v717_v14  ;;  %v1771_v14 = vor.u32 %v2136_v0, %v1770_v62  ;;  %v2199_v15 = vld [vmem:[%s2761_s1 + $0xc0] sm:$0xff] }
  0x75   : >> { %1410 = vmatpush.bf16.msrb.mxu3 %v2199_v15 }
  0x76   : >> { %v399_v16 = vpop.permute.xlu2 %398  ;;  %v407_v23 = vshll.u32 %v1771_v14, 16  ;;  %v411_v52 = vshrl.u32 %v1771_v14, 16 }
  0x77   : >> { %v473_v17 = vsel %vm329_vm1, %v2423_v10, %v399_v16 }
  0x78   : >> { %v750_v20 = vshrl.u32 %v473_v17, 16  ;;  %v753_v21 = vshll.u32 %v473_v17, 16  ;;  %v409_v33 = vrot.slane %v407_v23, 1 }
  0x7a   : >> { %v752_v25 = vrot.slane %v750_v20, 1  ;;  %v755_v26 = vrot.slane %v753_v21, 2  ;;  %v401_v21 = vshrl.u32 %v2135_v59, 16 }
  0x7c   : >> { %v756_v29 = vor.u32 %v755_v26, %v752_v25  ;;  %v2207_v26 = vld [vmem:[%s2761_s1 + $0x100] sm:$0xff]  ;;  %v406_v32 = vor.u32 %v405_v22, %v401_v21 }
  0x7d   : >> { %1458 = vmatpush.bf16.msrb.mxu0 %v2207_v26  ;;  %v1865_v26 = vld [vmem:[%s2319_s21 + $0xd28] sm:$0xf] }
  0x7e   : >> { %v757_v30 = vsel %vm714_vm2, %v2450_v27, %v756_v29  ;;  %v291_v34 = vpop.permute.xlu2 %290  ;;  %v410_v35 = vsel %vm400_vm0, %v406_v32, %v409_v33 }
  0x7f   : >> { %1277 = vmatmul.bf16.vlgmr.msra.gmra.mxu1 %v757_v30  ;;  %v475_v37 = vsel %vm329_vm1, %v410_v35, %v291_v34 }
  0x80   : >> { %v722_v43 = vshrl.u32 %v475_v37, 16  ;;  %v725_v44 = vshll.u32 %v475_v37, 16 }
  0x82   : >> { %v724_v49 = vrot.slane %v722_v43, 1  ;;  %v727_v50 = vrot.slane %v725_v44, 2 }
  0x84   : >> { %v728_v54 = vor.u32 %v727_v50, %v724_v49 }
  0x85   : >> { %v454_v41 = vpop.permute.xlu0 %453 }
  0x86   : >> { %v2492_v46 = vsel %vm329_vm1, %v2475_v39, %v454_v41  ;;  %v293_v0 = vpop.permute.xlu2 %292 }
  0x87   : >> { %v315_v42 = vpop.permute.xlu1 %314  ;;  %v736_v55 = vshrl.u32 %v2492_v46, 16  ;;  %v739_v57 = vshll.u32 %v2492_v46, 16 }
  0x88   : >> { %v2496_v47 = vsel %vm329_vm1, %v2478_v40, %v315_v42 }
  0x89   : >> { %v808_v53 = vrot.slane %v2496_v47, 3  ;;  %v833_v1 = vrot.slane %v736_v55, 4  ;;  %v834_v7 = vrot.slane %v739_v57, 5  ;;  %v738_v35 = vrot.slane %v736_v55, 1 }
  0x8b   : >> { %v925_v61 = vsel %vm807_vm3, %v756_v29, %v808_v53  ;;  %v835_v24 = vor.u32 %v834_v7, %v833_v1  ;;  %v2143_v1 = vld [vmem:[%s2319_s21 + $0x960] sm:$0xff] }
  0x8c   : >> { %v348_v6 = vsel %vm329_vm1, %v2143_v1, %v291_v34 }
  0x8d   : >> { %v456_v60 = vpop.permute.xlu0 %455 }
  0x8e   : >> { %v489_v2 = vsel %vm329_vm1, %v2510_v56, %v456_v60 }
  0x8f   : >> { %v317_v3 = vpop.permute.xlu1 %316  ;;  %1282 = vmatmul.bf16.gmra.mxu1 %v925_v61  ;;  %v774_v8 = vshrl.u32 %v489_v2, 16  ;;  %v777_v9 = vshll.u32 %v489_v2, 16  ;;  %v413_v61 = vor.u32 %v411_v52, %v409_v33  ;;  %v457_v2 = vshrl.u32 %v2478_v40, 16 }
  0x90   : >> { %v2533_v11 = vsel %vm329_vm1, %v2513_v58, %v317_v3 }
  0x91   : >> { %v813_v13 = vrot.slane %v2533_v11, 3  ;;  %v776_v16 = vrot.slane %v774_v8, 1  ;;  %v779_v17 = vrot.slane %v777_v9, 2  ;;  %v865_v18 = vrot.slane %v774_v8, 4 }
  0x92   : >> { %v866_v19 = vrot.slane %v777_v9, 5  ;;  %v477_v5 = vsel %vm329_vm1, %v413_v61, %v293_v0 }
  0x93   : >> { %v814_v20 = vsel %vm807_vm3, %v808_v53, %v813_v13  ;;  %v2546_v28 = vor.u32 %v779_v17, %v776_v16  ;;  %v944_v45 = vsel %vm2555_vm6, %v813_v13, %v835_v24  ;;  %v758_v12 = vshrl.u32 %v477_v5, 16  ;;  %v1802_v16 = vld [vmem:[%s2319_s21 + $0x968] sm:$0xf]  ;;  %v2144_v17 = vld [vmem:[%s2319_s21 + $0x968] sm:$0x70] }
  0x94   : >> { %1287 = vmatmul.bf16.vlgmr.msra.gmra.mxu2 %v814_v20  ;;  %v867_v25 = vor.u32 %v866_v19, %v865_v18  ;;  %v761_v13 = vshll.u32 %v477_v5, 16 }
  0x95   : >> { %v243_v29 = vpop.permute.xlu0 %242  ;;  %v760_v18 = vrot.slane %v758_v12, 1 }
  0x96   : >> { %v868_v30 = vsel %vm832_vm4, %v835_v24, %v867_v25  ;;  %v332_v31 = vsel %vm329_vm1, %v2135_v59, %v243_v29  ;;  %v459_v59 = vshll.u32 %v2478_v40, 16  ;;  %v763_v19 = vrot.slane %v761_v13, 2  ;;  %v2156_v29 = vld [vmem:[%s2319_s21 + $0xd28] sm:$0x70] }
  0x97   : >> { %1297 = vmatmul.bf16.vlgmr.msra.gmra.mxu3 %v868_v30  ;;  %1267 = vmatmul.bf16.vlgmr.msra.gmra.mxu0 %v332_v31  ;;  %v245_v42 = vpop.permute.xlu1 %244  ;;  %v1803_v24 = vor.u32 %v2144_v17, %v1802_v16  ;;  %v1866_v37 = vor.u32 %v2156_v29, %v1865_v26  ;;  %v2166_v26 = vld [vmem:[%s2319_s21 + $0x18] sm:$0x70] }
  0x98   : >> { %v336_v48 = vsel %vm329_vm1, %v1771_v14, %v245_v42  ;;  %v461_v3 = vrot.slane %v459_v59, 1 }
  0x99   : >> { %v917_v51 = vsel %vm2563_vm8, %v336_v48, %v2450_v27  ;;  %v463_v27 = vshll.u32 %v2513_v58, 16  ;;  %v352_v34 = vsel %vm329_vm1, %v1803_v24, %v293_v0 }
  0x9a   : >> { %v462_v7 = vor.u32 %v461_v3, %v457_v2 }
  0x9b   : >> { %v465_v8 = vrot.slane %v463_v27, 1  ;;  %v2161_v27 = vld [vmem:[%s2319_s21 + $0x1860] sm:$0xff] }
  0x9d   : >> { %v267_v36 = vpop.permute.xlu0 %266  ;;  %v2583_v15 = vsel %vm400_vm0, %v462_v7, %v465_v8 }
  0x9e   : >> { %v340_v38 = vsel %vm329_vm1, %v2412_v63, %v267_v36  ;;  %v743_v22 = vshrl.u32 %v2583_v15, 16  ;;  %v746_v23 = vshll.u32 %v2583_v15, 16  ;;  %v741_v36 = vrot.slane %v739_v57, 2 }
  0x9f   : >> { %1315 = vmatmul.bf16.vlgmr.msrb.gmra.mxu1 %v340_v38  ;;  %v467_v38 = vshrl.u32 %v2513_v58, 16 }
  0xa0   : >> { %v745_v32 = vrot.slane %v743_v22, 1  ;;  %v748_v33 = vrot.slane %v746_v23, 2 }
  0xa1   : >> { %v2604_v48 = vor.u32 %v467_v38, %v465_v8 }
  0xa2   : >> { %v749_v43 = vor.u32 %v748_v33, %v745_v32  ;;  %v2170_v32 = vld [vmem:[%s2319_s21 + $0x3d8] sm:$0x70] }
  0xa3   : >> { %v785_v52 = vshll.u32 %v2604_v48, 16 }
  0xa4   : >> { %1292 = vmatmul.bf16.gmra.mxu2 %v944_v45  ;;  %v742_v45 = vor.u32 %v741_v36, %v738_v35  ;;  %v921_v46 = vsel %vm2563_vm8, %v2510_v56, %v749_v43 }
  0xa5   : >> { %v269_v53 = vpop.permute.xlu0 %268  ;;  %v787_v61 = vrot.slane %v785_v52, 2 }
  0xa6   : >> { %v344_v60 = vsel %vm329_vm1, %v2423_v10, %v269_v53  ;;  %v440_v10 = vpop.permute.xlu1 %439  ;;  %v920_v55 = vsel %vm2563_vm8, %v2533_v11, %v742_v45  ;;  %v781_v2 = vsel %vm714_vm2, %v742_v45, %v2546_v28 }
  0xa7   : >> { %1302 = vmatmul.bf16.gmra.mxu3 %v867_v25  ;;  %1272 = vmatmul.bf16.gmra.mxu0 %v917_v51  ;;  %v918_v62 = vsel %vm2563_vm8, %v344_v60, %v728_v54  ;;  %v480_v9 = vsel %vm329_vm1, %v2155_v4, %v440_v10  ;;  %v764_v25 = vor.u32 %v763_v19, %v760_v18  ;;  %v782_v51 = vshrl.u32 %v2604_v48, 16  ;;  %v573_v4 = vpop.permute.xlu2 %572  ;;  %v1919_v19 = vld [vmem:[%s2319_s21 + $0x1868] sm:$0xf] }
  0xa8   : >> { %v729_v40 = vshrl.u32 %v480_v9, 16  ;;  %v732_v14 = vshll.u32 %v480_v9, 16  ;;  %v616_v7 = vsel %vm329_vm1, %v2161_v27, %v573_v4  ;;  %v2169_v9 = vld [vmem:[%s2319_s21 + $0x3d0] sm:$0xff] }
  0xa9   : >> { %v784_v60 = vrot.slane %v782_v51, 1  ;;  %v810_v13 = vrot.slane %v616_v7, 3  ;;  %v1969_v7 = vld [vmem:[%s2319_s21 + $0x1c28] sm:$0xf] }
  0xaa   : >> { %v731_v20 = vrot.slane %v729_v40, 1  ;;  %v734_v21 = vrot.slane %v732_v14, 2  ;;  %v812_v40 = vrot.slane %v2169_v9, 3 }
  0xac   : >> { %v735_v31 = vor.u32 %v734_v21, %v731_v20  ;;  %v2162_v20 = vld [vmem:[%s2319_s21 + $0x1868] sm:$0x70] }
  0xad   : >> { %v597_v10 = vpop.permute.xlu0 %596  ;;  %v1920_v24 = vor.u32 %v2162_v20, %v1919_v19 }
  0xae   : >> { %v442_v30 = vpop.permute.xlu1 %441  ;;  %v919_v42 = vsel %vm2563_vm8, %v352_v34, %v735_v31 }
  0xaf   : >> { %1320 = vmatmul.bf16.gmra.mxu1 %v918_v62  ;;  %v483_v44 = vsel %vm329_vm1, %v1866_v37, %v442_v30  ;;  %v788_v62 = vor.u32 %v787_v61, %v784_v60  ;;  %v575_v29 = vpop.permute.xlu2 %574 }
  0xb0   : >> { %v766_v57 = vshrl.u32 %v483_v44, 16  ;;  %v769_v58 = vshll.u32 %v483_v44, 16 }
  0xb1   : >> { %v789_v1 = vsel %vm714_vm2, %v749_v43, %v788_v62  ;;  %v941_v21 = vsel %vm807_vm3, %v788_v62, %v812_v40 }
  0xb2   : >> { %v768_v53 = vrot.slane %v766_v57, 1 }
  0xb4   : >> { %1363 = vmatmul.bf16.vlgmr.msrb.gmra.mxu2 %v348_v6  ;;  %v2165_v6 = vld [vmem:[%s2319_s21 + $0x10] sm:$0xff] }
  0xb5   : >> { %v622_v12 = vsel %vm329_vm1, %v2165_v6, %v597_v10  ;;  %v687_v30 = vshll.u32 %v2165_v6, 16  ;;  %v599_v35 = vpop.permute.xlu0 %598  ;;  %v685_v36 = vshrl.u32 %v2165_v6, 16 }
  0xb6   : >> { %v549_v49 = vpop.permute.xlu1 %548  ;;  %v811_v14 = vrot.slane %v622_v12, 3 }
  0xb7   : >> { %1411 = vmatmul.bf16.vlgmr.msrb.gmra.mxu3 %v2496_v47  ;;  %2123 = vmatmul.msk.bf16.vlgmr.msrb.gmra.mxu0 %vm329_vm1, %v2475_v39  ;;  %v765_v47 = vsel %vm714_vm2, %v728_v54, %v764_v25  ;;  %v611_v50 = vsel %vm329_vm1, %v2475_v39, %v549_v49  ;;  %v771_v54 = vrot.slane %v769_v58, 2  ;;  %v689_v37 = vrot.slane %v687_v30, 1  ;;  %v2171_v49 = vld [vmem:[%s2319_s21 + $0x1c20] sm:$0xff] }
  0xb8   : >> { %v809_v59 = vrot.slane %v611_v50, 3  ;;  %v937_v22 = vsel %vm807_vm3, %v2546_v28, %v811_v14 }
  0xb9   : >> { %v772_v63 = vor.u32 %v771_v54, %v768_v53  ;;  %v690_v57 = vor.u32 %v689_v37, %v685_v36 }
  0xba   : >> { %v929_v11 = vsel %vm807_vm3, %v764_v25, %v809_v59  ;;  %v1935_v25 = vld [vmem:[%s2319_s21 + $0x18] sm:$0xf] }
  0xbb   : >> { %v773_v39 = vsel %vm714_vm2, %v735_v31, %v772_v63  ;;  %v933_v18 = vsel %vm807_vm3, %v772_v63, %v810_v13  ;;  %v1951_v31 = vld [vmem:[%s2319_s21 + $0x3d8] sm:$0xf]  ;;  %v2644_v33 = vor.u32 %v2166_v26, %v1935_v25 }
  0xbc   : >> { %v2647_v28 = vor.u32 %v2170_v32, %v1951_v31 }
  0xbd   : >> { %v691_v38 = vshll.u32 %v2644_v33, 16  ;;  %v625_v44 = vsel %vm329_vm1, %v2644_v33, %v599_v35  ;;  %v682_v54 = vpop.permute.xlu0 %681 }
  0xbe   : >> { %v551_v0 = vpop.permute.xlu1 %550  ;;  %v819_v51 = vrot.slane %v625_v44, 3 }
  0xbf   : >> { %1325 = vmatmul.bf16.gmra.mxu1 %v765_v47  ;;  %v613_v3 = vsel %vm329_vm1, %v2510_v56, %v551_v0  ;;  %v699_v56 = vsel %vm329_vm1, %v2583_v15, %v573_v4  ;;  %v619_v47 = vsel %vm329_vm1, %v1920_v24, %v575_v29  ;;  %v693_v50 = vrot.slane %v691_v38, 1 }
  0xc0   : >> { %v815_v5 = vrot.slane %v613_v3, 3  ;;  %v836_v16 = vshrl.u32 %v699_v56, 16  ;;  %v839_v17 = vshll.u32 %v699_v56, 16  ;;  %v817_v43 = vrot.slane %v619_v47, 3 }
  0xc1   : >> { %v820_v61 = vsel %vm807_vm3, %v811_v14, %v819_v51  ;;  %v710_v0 = vsel %vm329_vm1, %v2169_v9, %v682_v54 }
  0xc2   : >> { %v816_v8 = vsel %vm807_vm3, %v809_v59, %v815_v5  ;;  %v838_v15 = vrot.slane %v836_v16, 4  ;;  %v841_v23 = vrot.slane %v839_v17, 5  ;;  %v818_v53 = vsel %vm807_vm3, %v810_v13, %v817_v43 }
  0xc3   : >> { %v850_v3 = vshrl.u32 %v710_v0, 16  ;;  %v853_v27 = vshll.u32 %v710_v0, 16  ;;  %v695_v17 = vshrl.u32 %v2644_v33, 16 }
  0xc4   : >> { %1368 = vmatmul.bf16.gmra.mxu2 %v919_v42  ;;  %v842_v34 = vor.u32 %v841_v23, %v838_v15  ;;  %v701_v42 = vsel %vm329_vm1, %v2604_v48, %v575_v29 }
  0xc5   : >> { %v869_v58 = vshrl.u32 %v701_v42, 16  ;;  %v872_v52 = vshll.u32 %v701_v42, 16  ;;  %v852_v56 = vrot.slane %v850_v3, 4  ;;  %v697_v25 = vor.u32 %v695_v17, %v693_v50 }
  0xc6   : >> { %v945_v45 = vsel %vm2555_vm6, %v815_v5, %v842_v34 }
  0xc7   : >> { %1416 = vmatmul.bf16.gmra.mxu3 %v920_v55  ;;  %2124 = vmatmul.msk.bf16.gmra.mxu0 %vm329_vm1, %v921_v46  ;;  %v668_v46 = vpop.permute.xlu2 %667  ;;  %v821_v55 = vrot.slane %v2647_v28, 3  ;;  %v871_v60 = vrot.slane %v869_v58, 4  ;;  %v874_v63 = vrot.slane %v872_v52, 5  ;;  %v894_v32 = vshrl.u32 %v697_v25, 16 }
  0xc8   : >> { %v704_v48 = vsel %vm329_vm1, %v2171_v49, %v668_v46  ;;  %v897_v33 = vshll.u32 %v697_v25, 16 }
  0xc9   : >> { %v822_v59 = vsel %vm807_vm3, %v812_v40, %v821_v55  ;;  %v843_v62 = vshrl.u32 %v704_v48, 16  ;;  %v875_v6 = vor.u32 %v874_v63, %v871_v60  ;;  %v855_v40 = vrot.slane %v853_v27, 5 }
  0xca   : >> { %v896_v38 = vrot.slane %v894_v32, 4  ;;  %v899_v42 = vrot.slane %v897_v33, 5 }
  0xcb   : >> { %v845_v4 = vrot.slane %v843_v62, 4  ;;  %v876_v9 = vsel %vm832_vm4, %v842_v34, %v875_v6  ;;  %v856_v20 = vor.u32 %v855_v40, %v852_v56 }
  0xcd   : >> { %v947_v26 = vsel %vm2555_vm6, %v819_v51, %v856_v20 }
  0xcf   : >> { %1330 = vmatmul.bf16.gmra.mxu1 %v929_v11  ;;  %v694_v11 = vsel %vm400_vm0, %v690_v57, %v693_v50  ;;  %v684_v15 = vpop.permute.xlu2 %683 }
  0xd0   : >> { %v713_v31 = vsel %vm329_vm1, %v2647_v28, %v684_v15 }
  0xd1   : >> { %v885_v34 = vshrl.u32 %v713_v31, 16  ;;  %v888_v47 = vshll.u32 %v713_v31, 16 }
  0xd3   : >> { %v887_v41 = vrot.slane %v885_v34, 4 }
  0xd4   : >> { %1373 = vmatmul.bf16.gmra.mxu2 %v773_v39  ;;  %v846_v39 = vshll.u32 %v704_v48, 16 }
  0xd6   : >> { %v848_v5 = vrot.slane %v846_v39, 5 }
  0xd7   : >> { %1421 = vmatmul.bf16.gmra.mxu3 %v781_v2  ;;  %2125 = vmatmul.msk.bf16.gmra.mxu0 %vm329_vm1, %v789_v1  ;;  %v858_v1 = vshrl.u32 %v694_v11, 16  ;;  %v861_v2 = vshll.u32 %v694_v11, 16 }
  0xd8   : >> { %v849_v14 = vor.u32 %v848_v5, %v845_v4 }
  0xd9   : >> { %v860_v12 = vrot.slane %v858_v1, 4  ;;  %v863_v13 = vrot.slane %v861_v2, 5 }
  0xdb   : >> { %v864_v19 = vor.u32 %v863_v13, %v860_v12 }
  0xdd   : >> { %v948_v24 = vsel %vm2555_vm6, %v821_v55, %v864_v19 }
  0xdf   : >> { %1335 = vmatmul.bf16.gmra.mxu1 %v816_v8  ;;  %v2172_v8 = vld [vmem:[%s2319_s21 + $0x1c28] sm:$0x70]  ;;  %s1584_s21 = scalar_lea.vmem %s2308_s18, %s2134_s20 }
  0xe0   : >> { %v1970_v16 = vor.u32 %v2172_v8, %v1969_v7 }
  0xe4   : >> { %1378 = vmatmul.bf16.gmra.mxu2 %v933_v18  ;;  %v670_v18 = vpop.permute.xlu1 %669 }
  0xe7   : >> { %1426 = vmatmul.bf16.gmra.mxu3 %v937_v22  ;;  %2126 = vmatmul.msk.bf16.gmra.mxu0 %vm329_vm1, %v941_v21  ;;  %v946_v21 = vsel %vm2555_vm6, %v817_v43, %v849_v14  ;;  %v707_v22 = vsel %vm329_vm1, %v1970_v16, %v670_v18  ;;  %v890_v43 = vrot.slane %v888_v47, 5 }
  0xe8   : >> { %v877_v29 = vshrl.u32 %v707_v22, 16  ;;  %v880_v30 = vshll.u32 %v707_v22, 16 }
  0xe9   : >> { %v891_v49 = vor.u32 %v890_v43, %v887_v41 }
  0xea   : >> { %v879_v35 = vrot.slane %v877_v29, 4  ;;  %v882_v36 = vrot.slane %v880_v30, 5 }
  0xeb   : >> { %v892_v58 = vsel %vm832_vm4, %v856_v20, %v891_v49 }
  0xec   : >> { %v883_v44 = vor.u32 %v882_v36, %v879_v35 }
  0xee   : >> { %v884_v28 = vsel %vm832_vm4, %v849_v14, %v883_v44 }
  0xef   : >> { %1340 = vmatmul.bf16.gmra.mxu1 %v945_v45  ;;  %v900_v45 = vor.u32 %v899_v42, %v896_v38 }
  0xf1   : >> { %v901_v57 = vsel %vm832_vm4, %v864_v19, %v900_v45 }
  0xf4   : >> { %1383 = vmatmul.bf16.gmra.mxu2 %v818_v53 }
  0xf7   : >> { %1431 = vmatmul.bf16.gmra.mxu3 %v820_v61  ;;  %2127 = vmatmul.msk.bf16.gmra.mxu0 %vm329_vm1, %v822_v59 }
  0xfc   : >> { %v2665_v10 = vpop.f32.mrf.mxu1 }
  0xff   : >> { %1345 = vmatmul.bf16.gmra.mxu1 %v876_v9 }
 0x104   : >> { %1388 = vmatmul.bf16.gmra.mxu2 %v946_v21  ;;  %v2674_v23 = vpop.f32.mrf.mxu1 }
 0x107   : >> { %1436 = vmatmul.bf16.gmra.mxu3 %v947_v26  ;;  %2128 = vmatmul.msk.bf16.gmra.mxu0 %vm329_vm1, %v948_v24 }
 0x10c   : >> { %v2683_v37 = vpop.f32.mrf.mxu1 }
 0x10f   : >> { %1350 = vmatmul.bf16.gmra.mxu1 %v875_v6 }
 0x114   : >> { %1393 = vmatmul.bf16.gmra.mxu2 %v884_v28  ;;  %v1285_v46 = vpop.f32.mrf.mxu1  ;;  %v1268_v55 = vpop.f32.mrf.mxu0 }
 0x117   : >> { %v2688_v50 = vpop.f32.mrf.mxu2  ;;  %1441 = vmatmul.bf16.gmra.mxu3 %v892_v58  ;;  %2129 = vmatmul.msk.bf16.gmra.mxu0 %vm329_vm1, %v901_v57 }
 0x11a   : >> { %v2691_v51 = vpop.f32.mrf.mxu3 }
 0x11c   : >> { %v1270_v52 = vpop.f32.mrf.mxu0  ;;  %v1316_v53 = vpop.f32.mrf.mxu1 }
 0x11d   : >> { %v1317_v48 = vadd.f32 %v1316_v53, %v1268_v55 }
 0x11f   : >> { %v2693_v54 = vpop.f32.mrf.mxu2 }
 0x122   : >> { %v2695_v59 = vpop.f32.mrf.mxu3 }
 0x124   : >> { %1398 = vmatmul.bf16.gmra.mxu2 %v883_v44  ;;  %v1273_v60 = vpop.f32.mrf.mxu0  ;;  %v1318_v61 = vpop.f32.mrf.mxu1 }
 0x125   : >> { %v1319_v11 = vadd.f32 %v1318_v61, %v1270_v52 }
 0x127   : >> { %v2697_v63 = vpop.f32.mrf.mxu2  ;;  %1446 = vmatmul.bf16.gmra.mxu3 %v891_v49  ;;  %2130 = vmatmul.msk.bf16.gmra.mxu0 %vm329_vm1, %v900_v45 }
 0x12a   : >> { %v2700_v62 = vpop.f32.mrf.mxu3 }
 0x12c   : >> { %v1275_v39 = vpop.f32.mrf.mxu0  ;;  %v1321_v0 = vpop.f32.mrf.mxu1 }
 0x12d   : >> { %v1322_v1 = vadd.f32 %v1321_v0, %v1273_v60 }
 0x12f   : >> { %v2702_v2 = vpop.f32.mrf.mxu2 }
 0x132   : >> { %v1305_v3 = vpop.f32.mrf.mxu3 }
 0x134   : >> { %v1323_v27 = vpop.f32.mrf.mxu1  ;;  %v1460_v4 = vpop.f32.mrf.mxu0 }
 0x135   : >> { %v1324_v5 = vadd.f32 %v1323_v27, %v1275_v39 }
 0x137   : >> { %v1364_v6 = vpop.f32.mrf.mxu2 }
 0x138   : >> { %v1365_v7 = vadd.f32 %v1364_v6, %v1317_v48 }
 0x13a   : >> { %v1412_v8 = vpop.f32.mrf.mxu3 }
 0x13b   : >> { %v1413_v12 = vadd.f32 %v1412_v8, %v1365_v7 }
 0x13c   : >> { %v1326_v56 = vpop.f32.mrf.mxu1  ;;  %v1462_v40 = vpop.f32.mrf.mxu0 }
 0x13d   : >> { %v1461_v13 = vadd.f32 %v1460_v4, %v1413_v12  ;;  %v1327_v9 = vadd.f32 %v1326_v56, %v2665_v10 }
 0x13f   : >> { %v1366_v14 = vpop.f32.mrf.mxu2  ;;  %v1499_v60 = vmax.f32 %v1461_v13, 0.0 }
 0x140   : >> { %v1367_v16 = vadd.f32 %v1366_v14, %v1319_v11 }
 0x142   : >> { %v1414_v17 = vpop.f32.mrf.mxu3 }
 0x143   : >> { %v1415_v18 = vadd.f32 %v1414_v17, %v1367_v16 }
 0x144   : >> { %v1328_v20 = vpop.f32.mrf.mxu1  ;;  %v1465_v21 = vpop.f32.mrf.mxu0 }
 0x145   : >> { %v1463_v19 = vadd.f32 %v1462_v40, %v1415_v18  ;;  %v1329_v22 = vadd.f32 %v1328_v20, %v2674_v23 }
 0x147   : >> { %v1369_v15 = vpop.f32.mrf.mxu2  ;;  %v1500_v6 = vmax.f32 %v1463_v19, 0.0 }
 0x148   : >> { %v1370_v24 = vadd.f32 %v1369_v15, %v1322_v1 }
 0x14a   : >> { %v1417_v25 = vpop.f32.mrf.mxu3 }
 0x14b   : >> { %v1418_v26 = vadd.f32 %v1417_v25, %v1370_v24 }
 0x14c   : >> { %v1331_v30 = vpop.f32.mrf.mxu1  ;;  %v1467_v31 = vpop.f32.mrf.mxu0 }
 0x14d   : >> { %v1466_v29 = vadd.f32 %v1465_v21, %v1418_v26  ;;  %v1332_v32 = vadd.f32 %v1331_v30, %v2683_v37 }
 0x14f   : >> { %v1371_v33 = vpop.f32.mrf.mxu2  ;;  %v1501_v20 = vmax.f32 %v1466_v29, 0.0 }
 0x150   : >> { %v1372_v10 = vadd.f32 %v1371_v33, %v1324_v5 }
 0x152   : >> { %v1419_v34 = vpop.f32.mrf.mxu3 }
 0x153   : >> { %v1420_v47 = vadd.f32 %v1419_v34, %v1372_v10 }
 0x154   : >> { %v1333_v36 = vpop.f32.mrf.mxu1  ;;  %v1470_v38 = vpop.f32.mrf.mxu0 }
 0x155   : >> { %v1468_v35 = vadd.f32 %v1467_v31, %v1420_v47  ;;  %v1334_v42 = vadd.f32 %v1333_v36, %v1285_v46 }
 0x157   : >> { %v1374_v41 = vpop.f32.mrf.mxu2  ;;  %v1502_v45 = vmax.f32 %v1468_v35, 0.0 }
 0x158   : >> { %v1375_v43 = vadd.f32 %v1374_v41, %v1327_v9 }
 0x159   : >> { %v1520_v53 = vrot.slane %v1502_v45, 5 }
 0x15a   : >> { %v1422_v23 = vpop.f32.mrf.mxu3 }
 0x15b   : >> { %v1423_v44 = vadd.f32 %v1422_v23, %v1375_v43 }
 0x15c   : >> { %v1336_v28 = vpop.f32.mrf.mxu1  ;;  %v1472_v55 = vpop.f32.mrf.mxu0 }
 0x15d   : >> { %v1471_v49 = vadd.f32 %v1470_v38, %v1423_v44  ;;  %v2708_v57 = vadd.f32 %v1336_v28, %v2688_v50 }
 0x15f   : >> { %v1503_v37 = vmax.f32 %v1471_v49, 0.0  ;;  %v1376_v58 = vpop.f32.mrf.mxu2 }
 0x160   : >> { %v1377_v52 = vadd.f32 %v1376_v58, %v1329_v22 }
 0x161   : >> { %v1521_v48 = vrot.slane %v1503_v37, 5 }
 0x162   : >> { %v1424_v61 = vpop.f32.mrf.mxu3 }
 0x163   : >> { %v1522_v46 = vsel %vm1519_vm9, %v1520_v53, %v1521_v48  ;;  %v1425_v11 = vadd.f32 %v1424_v61, %v1377_v52 }
 0x164   : >> { %v2711_v39 = vmax.f32 %v1499_v60, %v1522_v46  ;;  %v2713_v1 = vpop.f32.mrf.mxu1  ;;  %v1475_v3 = vpop.f32.mrf.mxu0 }
 0x165   : >> { %v1473_v0 = vadd.f32 %v1472_v55, %v1425_v11 }
 0x167   : >> { %v1504_v27 = vmax.f32 %v1473_v0, 0.0  ;;  %v1379_v50 = vpop.f32.mrf.mxu2 }
 0x168   : >> { %v1380_v4 = vadd.f32 %v1379_v50, %v1332_v32 }
 0x169   : >> { %v1523_v5 = vrot.slane %v1504_v27, 5 }
 0x16a   : >> { %v1427_v7 = vpop.f32.mrf.mxu3 }
 0x16b   : >> { %v1524_v8 = vsel %vm1519_vm9, %v1521_v48, %v1523_v5  ;;  %v1428_v12 = vadd.f32 %v1427_v7, %v1380_v4 }
 0x16c   : >> { %v2716_v13 = vmax.f32 %v1500_v6, %v1524_v8  ;;  %v1341_v40 = vpop.f32.mrf.mxu1  ;;  %v1477_v9 = vpop.f32.mrf.mxu0 }
 0x16d   : >> { %v1476_v56 = vadd.f32 %v1475_v3, %v1428_v12  ;;  %v1342_v43 = vadd.f32 %v1341_v40, %v2697_v63 }
 0x16f   : >> { %v1505_v14 = vmax.f32 %v1476_v56, 0.0  ;;  %v1381_v16 = vpop.f32.mrf.mxu2 }
 0x170   : >> { %v1382_v18 = vadd.f32 %v1381_v16, %v1334_v42 }
 0x171   : >> { %v1525_v17 = vrot.slane %v1505_v14, 5 }
 0x172   : >> { %v1429_v21 = vpop.f32.mrf.mxu3 }
 0x173   : >> { %v1526_v22 = vsel %vm1519_vm9, %v1523_v5, %v1525_v17  ;;  %v1430_v15 = vadd.f32 %v1429_v21, %v1382_v18 }
 0x174   : >> { %v2719_v24 = vmax.f32 %v1501_v20, %v1526_v22  ;;  %v1343_v25 = vpop.f32.mrf.mxu1  ;;  %v1480_v26 = vpop.f32.mrf.mxu0 }
 0x175   : >> { %v1478_v19 = vadd.f32 %v1477_v9, %v1430_v15  ;;  %v1344_v37 = vadd.f32 %v1343_v25, %v2702_v2 }
 0x177   : >> { %v1506_v30 = vmax.f32 %v1478_v19, 0.0  ;;  %v1384_v31 = vpop.f32.mrf.mxu2 }
 0x178   : >> { %v1385_v27 = vadd.f32 %v1384_v31, %v2708_v57 }
 0x179   : >> { %v1527_v32 = vrot.slane %v1506_v30, 5 }
 0x17a   : >> { %v1432_v33 = vpop.f32.mrf.mxu3 }
 0x17b   : >> { %v1528_v10 = vsel %vm1519_vm9, %v1525_v17, %v1527_v32  ;;  %v1433_v5 = vadd.f32 %v1432_v33, %v1385_v27 }
 0x17c   : >> { %v2722_v34 = vmax.f32 %v1502_v45, %v1528_v10  ;;  %v1346_v47 = vpop.f32.mrf.mxu1  ;;  %v1482_v35 = vpop.f32.mrf.mxu0 }
 0x17d   : >> { %v1347_v63 = vadd.f32 %v1346_v47, %v2691_v51  ;;  %v1339_v51 = vadd.f32 %v2713_v1, %v2693_v54  ;;  %v1481_v9 = vadd.f32 %v1480_v26, %v1433_v5 }
 0x17f   : >> { %v1386_v29 = vpop.f32.mrf.mxu2  ;;  %v1507_v21 = vmax.f32 %v1481_v9, 0.0 }
 0x180   : >> { %v1387_v17 = vadd.f32 %v1386_v29, %v1339_v51 }
 0x182   : >> { %v1434_v36 = vpop.f32.mrf.mxu3 }
 0x183   : >> { %v1435_v22 = vadd.f32 %v1434_v36, %v1387_v17 }
 0x184   : >> { %v1348_v38 = vpop.f32.mrf.mxu1  ;;  %v1485_v42 = vpop.f32.mrf.mxu0 }
 0x185   : >> { %v1349_v14 = vadd.f32 %v1348_v38, %v2695_v59  ;;  %v1483_v33 = vadd.f32 %v1482_v35, %v1435_v22 }
 0x187   : >> { %v1389_v41 = vpop.f32.mrf.mxu2 }
 0x188   : >> { %v1390_v44 = vadd.f32 %v1389_v41, %v1342_v43 }
 0x18a   : >> { %v1437_v23 = vpop.f32.mrf.mxu3 }
 0x18b   : >> { %v1438_v49 = vadd.f32 %v1437_v23, %v1390_v44 }
 0x18c   : >> { %v1351_v28 = vpop.f32.mrf.mxu1  ;;  %v1487_v55 = vpop.f32.mrf.mxu0 }
 0x18d   : >> { %v2726_v52 = vadd.f32 %v1485_v42, %v1438_v49  ;;  %v1352_v59 = vadd.f32 %v1351_v28, %v2700_v62  ;;  %v1508_v42 = vmax.f32 %v1483_v33, 0.0 }
 0x18f   : >> { %v1391_v58 = vpop.f32.mrf.mxu2  ;;  %v1509_v60 = vmax.f32 %v2726_v52, 0.0 }
 0x190   : >> { %v1392_v45 = vadd.f32 %v1391_v58, %v1344_v37 }
 0x191   : >> { %v1542_v2 = vrot.slane %v1509_v60, 5 }
 0x192   : >> { %v1439_v53 = vpop.f32.mrf.mxu3 }
 0x193   : >> { %v1440_v48 = vadd.f32 %v1439_v53, %v1392_v45 }
 0x194   : >> { %v1353_v46 = vpop.f32.mrf.mxu1  ;;  %v1490_v11 = vpop.f32.mrf.mxu0 }
 0x195   : >> { %v1488_v61 = vadd.f32 %v1487_v55, %v1440_v48 }
 0x197   : >> { %v1510_v0 = vmax.f32 %v1488_v61, 0.0  ;;  %v1394_v3 = vpop.f32.mrf.mxu2 }
 0x198   : >> { %v1395_v4 = vadd.f32 %v1394_v3, %v1347_v63 }
 0x199   : >> { %v1543_v50 = vrot.slane %v1510_v0, 5 }
 0x19a   : >> { %v1442_v6 = vpop.f32.mrf.mxu3 }
 0x19b   : >> { %v1544_v7 = vsel %vm1519_vm9, %v1542_v2, %v1543_v50  ;;  %v1443_v8 = vadd.f32 %v1442_v6, %v1395_v4 }
 0x19c   : >> { %v1555_v12 = vmax.f32 %v1506_v30, %v1544_v7  ;;  %v1492_v40 = vpop.f32.mrf.mxu0 }
 0x19d   : >> { %v1491_v56 = vadd.f32 %v1490_v11, %v1443_v8 }
 0x19e   : >> { %v1564_v54 = vrot.slane %v1555_v12, 2 }
 0x19f   : >> { %v1511_v57 = vmax.f32 %v1491_v56, 0.0  ;;  %v1396_v16 = vpop.f32.mrf.mxu2 }
 0x1a0   : >> { %v1397_v20 = vadd.f32 %v1396_v16, %v1349_v14 }
 0x1a1   : >> { %v1545_v18 = vrot.slane %v1511_v57, 5 }
 0x1a2   : >> { %v1444_v15 = vpop.f32.mrf.mxu3 }
 0x1a3   : >> { %v1546_v19 = vsel %vm1519_vm9, %v1543_v50, %v1545_v18  ;;  %v1445_v25 = vadd.f32 %v1444_v15, %v1397_v20 }
 0x1a4   : >> { %v1556_v30 = vmax.f32 %v1507_v21, %v1546_v19  ;;  %v1495_v32 = vpop.f32.mrf.mxu0 }
 0x1a5   : >> { %v1493_v31 = vadd.f32 %v1492_v40, %v1445_v25 }
 0x1a6   : >> { %v1565_v1 = vrot.slane %v1556_v30, 2 }
 0x1a7   : >> { %v1512_v26 = vmax.f32 %v1493_v31, 0.0  ;;  %v1399_v10 = vpop.f32.mrf.mxu2 }
 0x1a8   : >> { %v1566_v47 = vsel %vm1563_vm10, %v1564_v54, %v1565_v1  ;;  %v1400_v38 = vadd.f32 %v1399_v10, %v1352_v59 }
 0x1a9   : >> { %v1575_v29 = vmax.f32 %v2711_v39, %v1566_v47  ;;  %v1547_v36 = vrot.slane %v1512_v26, 5 }
 0x1aa   : >> { %v1447_v41 = vpop.f32.mrf.mxu3 }
 0x1ab   : >> { %v1548_v43 = vsel %vm1519_vm9, %v1545_v18, %v1547_v36  ;;  %v1448_v23 = vadd.f32 %v1447_v41, %v1400_v38 }
 0x1ac   : >> { %v1557_v35 = vmax.f32 %v1508_v42, %v1548_v43  ;;  %v1497_v49 = vpop.f32.mrf.mxu0 }
 0x1ad   : >> { %v1496_v44 = vadd.f32 %v1495_v32, %v1448_v23 }
 0x1ae   : >> { %v1567_v55 = vrot.slane %v1557_v35, 2 }
 0x1af   : >> { %v1513_v62 = vmax.f32 %v1496_v44, 0.0  ;;  %v1401_v28 = vpop.f32.mrf.mxu2 }
 0x1b0   : >> { %v1568_v37 = vsel %vm1563_vm10, %v1565_v1, %v1567_v55 }
 0x1b1   : >> { %v1576_v58 = vmax.f32 %v2716_v13, %v1568_v37  ;;  %v1549_v39 = vrot.slane %v1513_v62, 5  ;;  %v1591_v13 = vld [vmem:[%s1584_s21 + $0xc] sm:$0x7] }
 0x1b2   : >> { %v1449_v45 = vpop.f32.mrf.mxu3 }
 0x1b3   : >> { %v2215_v53 = vpack.c.bf16 %v1576_v58, %v1575_v29  ;;  %v1550_v48 = vsel %vm1519_vm9, %v1547_v36, %v1549_v39 }
 0x1b4   : >> { %v1558_v61 = vmax.f32 %v1509_v60, %v1550_v48 }
 0x1b5   : >> { %2216 = vst [vmem:[%s1584_s21] sm:$0xff] %v2215_v53  }
 0x1b6   : >> { %v1569_v46 = vrot.slane %v1558_v61, 2 }
 0x1b8   : >> { %v1570_v11 = vsel %vm1563_vm10, %v1567_v55, %v1569_v46  ;;  %v1578_v63 = vmax.f32 %v2722_v34, %v1569_v46 }
 0x1b9   : >> { %v1577_v0 = vmax.f32 %v2719_v24, %v1570_v11 }
 0x1ba   : >> { %v1582_v3 = vpack.c.bf16 %v1578_v63, %v1578_v63  ;;  %149 = sbr.rel (!%p147_p4) target bundleno = 16 (0x10), region = 86 }
 0x1bb   : >> { %v1581_v27 = vpack.c.bf16 %v1577_v0, %v1577_v0 }
 0x1bc   : >> { %v1592_v2 = vsel %vm1590_vm12, %v1582_v3, %v1591_v13 }
 0x1bd   : >> { %1587 = vst [vmem:[%s1584_s21 + $0x8] sm:$0xf] %v1581_v27 }
 0x1be   : >> { %1593 = vst [vmem:[%s1584_s21 + $0xc] sm:$0x7] %v1592_v2 }
 0x1bf PF: > { %s12_s9 = sadd.s32 1, %s2270_s9  }
 0x1c0   : > { %p9_p5 = scmp.ge.s32.totalorder %s12_s9, 4  }
 0x1c2   :  { %11 = sbr.rel (!%p9_p5) target bundleno = 1 (0x1), region = 97 }

// kernel: env_classifier_forward.4
= control target key start
LH: loop header
LB: loop body
LE: loop exit
PB: predicated region body
PF: predicated region fallthrough
CT: control target
= control target key end

     0   :  { %s2742_s9 = smov 0   ;;  %s4001_s0 = inlined_call_operand.vmem [shape: bf16[2,128,8,128], index: 0, kind: input, shape index: {}]   ;;  %s4002_s1 = inlined_call_operand.vmem [shape: bf16[1152,256], index: 1, kind: input, shape index: {}]   ;;  %s4003_s2 = inlined_call_operand.vmem [shape: bf16[2,7,7,256], index: 2, kind: output, shape index: {}]  }
   0x1 LB: > { %s1905_s10 = sadd.s32 4294967295, %s2721_s9   ;;  %p1909_p0 = scmp.ge.s32.totalorder %s2721_s9, 1  ;;  %s2721_s9 = sphi %s2742_s9, %s12_s9  }
   0x2   : > { %p112_p1 = scmp.lt.s32.totalorder %s2721_s9, 3 }
   0x4   : > { %p113_p2 = pnand %p1909_p0, %p112_p1 }
   0x5   : > { %p134_p3 = scmp.lt.s32.totalorder (!%p113_p2), %s1905_s10, 1  ;;  %s2760_s19 = smov (!%p113_p2), 0  }
   0x6   : > { %116 = sbr.rel (%p113_p2) target bundleno = 344 (0x158), region = 28 }
   0xb   : > { %s4009_s10 = smov (!%p134_p3, %s1905_s10), 1 }
   0xc   : > { %s2532_s11 = sshll.u32 %s4009_s10, 9  ;;  %s2694_s12 = smul.u32 56, %s4009_s10 }
   0xd   : > { %s2753_s15 = scalar_lea.vmem %s4001_s0, %s2532_s11 }
   0xe   : > { %s2758_s18 = scalar_lea.vmem %s4003_s2, %s2694_s12 }
   0xf LB: >> { %v2010_v0 = vld [vmem:[%s4002_s1 + $0x70] sm:$0xf]  ;;  %v2548_v1 = vld [vmem:[%s4002_s1 + $0x74] sm:$0xf0]  ;;  %v2002_v11 = vld [vmem:[%s4002_s1 + $0x60] sm:$0xf]  ;;  %s2725_s19 = sphi %s2760_s19, %s149_s19  }
  0x10   : >> { %v2138_v2 = vld [vmem:[%s4002_s1 + $0x170] sm:$0xf]  ;;  %v2011_v3 = vor.u32 %v2548_v1, %v2010_v0  ;;  %v2580_v4 = vld [vmem:[%s4002_s1 + $0x174] sm:$0xf0]  ;;  %v2546_v13 = vld [vmem:[%s4002_s1 + $0x64] sm:$0xf0] }
  0x11   : >> { %v2202_v5 = vld [vmem:[%s4002_s1 + $0x1f0] sm:$0xf]  ;;  %v2596_v6 = vld [vmem:[%s4002_s1 + $0x1f4] sm:$0xf0]  ;;  %v2139_v7 = vor.u32 %v2580_v4, %v2138_v2  ;;  %v2130_v14 = vld [vmem:[%s4002_s1 + $0x160] sm:$0xf]  ;;  %v2003_v16 = vor.u32 %v2546_v13, %v2002_v11 }
  0x12   : >> { %v2203_v8 = vor.u32 %v2596_v6, %v2202_v5  ;;  %v2074_v9 = vld [vmem:[%s4002_s1 + $0xf0] sm:$0xf]  ;;  %v2564_v10 = vld [vmem:[%s4002_s1 + $0xf4] sm:$0xf0]  ;;  %1375 = vmatpush.bf16.msra.mxu0 %v2011_v3  ;;  %v2578_v15 = vld [vmem:[%s4002_s1 + $0x164] sm:$0xf0] }
  0x13   : >> { %v2075_v12 = vor.u32 %v2564_v10, %v2074_v9  ;;  %1413 = vmatpush.bf16.msra.mxu2 %v2139_v7  ;;  %v2131_v17 = vor.u32 %v2578_v15, %v2130_v14  ;;  %v2194_v18 = vld [vmem:[%s4002_s1 + $0x1e0] sm:$0xf]  ;;  %v2594_v19 = vld [vmem:[%s4002_s1 + $0x1e4] sm:$0xf0]  ;;  %v1994_v23 = vld [vmem:[%s4002_s1 + $0x50] sm:$0xf] }
  0x14   : >> { %1432 = vmatpush.bf16.msra.mxu3 %v2203_v8  ;;  %v2066_v20 = vld [vmem:[%s4002_s1 + $0xe0] sm:$0xf]  ;;  %v2195_v21 = vor.u32 %v2594_v19, %v2194_v18  ;;  %v2562_v22 = vld [vmem:[%s4002_s1 + $0xe4] sm:$0xf0]  ;;  %v2544_v24 = vld [vmem:[%s4002_s1 + $0x54] sm:$0xf0] }
  0x15   : >> { %1394 = vmatpush.bf16.msra.mxu1 %v2075_v12  ;;  %v2067_v25 = vor.u32 %v2562_v22, %v2066_v20  ;;  %v2122_v26 = vld [vmem:[%s4002_s1 + $0x150] sm:$0xf]  ;;  %v2576_v27 = vld [vmem:[%s4002_s1 + $0x154] sm:$0xf0]  ;;  %v1995_v29 = vor.u32 %v2544_v24, %v1994_v23  ;;  %v1986_v35 = vld [vmem:[%s4002_s1 + $0x40] sm:$0xf] }
  0x16   : >> { %v2186_v28 = vld [vmem:[%s4002_s1 + $0x1d0] sm:$0xf]  ;;  %1376 = vmatpush.bf16.msra.mxu0 %v2003_v16  ;;  %v2592_v30 = vld [vmem:[%s4002_s1 + $0x1d4] sm:$0xf0]  ;;  %v2123_v33 = vor.u32 %v2576_v27, %v2122_v26  ;;  %v2542_v36 = vld [vmem:[%s4002_s1 + $0x44] sm:$0xf0] }
  0x17   : >> { %v2058_v31 = vld [vmem:[%s4002_s1 + $0xd0] sm:$0xf]  ;;  %v2560_v32 = vld [vmem:[%s4002_s1 + $0xd4] sm:$0xf0]  ;;  %1414 = vmatpush.bf16.msra.mxu2 %v2131_v17  ;;  %v2187_v34 = vor.u32 %v2592_v30, %v2186_v28  ;;  %v2114_v37 = vld [vmem:[%s4002_s1 + $0x140] sm:$0xf]  ;;  %v1987_v44 = vor.u32 %v2542_v36, %v1986_v35 }
  0x18   : >> { %1433 = vmatpush.bf16.msra.mxu3 %v2195_v21  ;;  %v2059_v38 = vor.u32 %v2560_v32, %v2058_v31  ;;  %v2574_v39 = vld [vmem:[%s4002_s1 + $0x144] sm:$0xf0]  ;;  %v2178_v40 = vld [vmem:[%s4002_s1 + $0x1c0] sm:$0xf]  ;;  %v1978_v47 = vld [vmem:[%s4002_s1 + $0x30] sm:$0xf] }
  0x19   : >> { %1395 = vmatpush.bf16.msra.mxu1 %v2067_v25  ;;  %v2590_v41 = vld [vmem:[%s4002_s1 + $0x1c4] sm:$0xf0]  ;;  %v2050_v42 = vld [vmem:[%s4002_s1 + $0xc0] sm:$0xf]  ;;  %v2115_v45 = vor.u32 %v2574_v39, %v2114_v37  ;;  %v2540_v48 = vld [vmem:[%s4002_s1 + $0x34] sm:$0xf0] }
  0x1a   : >> { %v2558_v43 = vld [vmem:[%s4002_s1 + $0xc4] sm:$0xf0]  ;;  %1377 = vmatpush.bf16.msra.mxu0 %v1995_v29  ;;  %v2179_v46 = vor.u32 %v2590_v41, %v2178_v40  ;;  %v2106_v49 = vld [vmem:[%s4002_s1 + $0x130] sm:$0xf]  ;;  %v2572_v51 = vld [vmem:[%s4002_s1 + $0x134] sm:$0xf0]  ;;  %v1979_v56 = vor.u32 %v2540_v48, %v1978_v47 }
  0x1b   : >> { %1415 = vmatpush.bf16.msra.mxu2 %v2123_v33  ;;  %v2051_v50 = vor.u32 %v2558_v43, %v2050_v42  ;;  %v2170_v52 = vld [vmem:[%s4002_s1 + $0x1b0] sm:$0xf]  ;;  %v2588_v53 = vld [vmem:[%s4002_s1 + $0x1b4] sm:$0xf0]  ;;  %v1970_v57 = vld [vmem:[%s4002_s1 + $0x20] sm:$0xf]  ;;  %v2107_v60 = vor.u32 %v2572_v51, %v2106_v49 }
  0x1c   : >> { %1434 = vmatpush.bf16.msra.mxu3 %v2187_v34  ;;  %v2042_v54 = vld [vmem:[%s4002_s1 + $0xb0] sm:$0xf]  ;;  %v2556_v55 = vld [vmem:[%s4002_s1 + $0xb4] sm:$0xf0]  ;;  %v2538_v58 = vld [vmem:[%s4002_s1 + $0x24] sm:$0xf0]  ;;  %v2171_v61 = vor.u32 %v2588_v53, %v2170_v52 }
  0x1d   : >> { %1396 = vmatpush.bf16.msra.mxu1 %v2059_v38  ;;  %v2098_v59 = vld [vmem:[%s4002_s1 + $0x120] sm:$0xf]  ;;  %v2570_v62 = vld [vmem:[%s4002_s1 + $0x124] sm:$0xf0]  ;;  %v2043_v1 = vor.u32 %v2556_v55, %v2042_v54  ;;  %v1962_v4 = vld [vmem:[%s4002_s1 + $0x10] sm:$0xf]  ;;  %v1971_v8 = vor.u32 %v2538_v58, %v1970_v57 }
  0x1e   : >> { %1378 = vmatpush.bf16.msra.mxu0 %v1987_v44  ;;  %v2162_v63 = vld [vmem:[%s4002_s1 + $0x1a0] sm:$0xf]  ;;  %v2586_v0 = vld [vmem:[%s4002_s1 + $0x1a4] sm:$0xf0]  ;;  %v2536_v5 = vld [vmem:[%s4002_s1 + $0x14] sm:$0xf0]  ;;  %v2099_v12 = vor.u32 %v2570_v62, %v2098_v59 }
  0x1f   : >> { %1416 = vmatpush.bf16.msra.mxu2 %v2115_v45  ;;  %v2034_v2 = vld [vmem:[%s4002_s1 + $0xa0] sm:$0xf]  ;;  %v2554_v3 = vld [vmem:[%s4002_s1 + $0xa4] sm:$0xf0]  ;;  %v2090_v6 = vld [vmem:[%s4002_s1 + $0x110] sm:$0xf]  ;;  %v2163_v13 = vor.u32 %v2586_v0, %v2162_v63  ;;  %v1963_v20 = vor.u32 %v2536_v5, %v1962_v4 }
  0x20   : >> { %1435 = vmatpush.bf16.msra.mxu3 %v2179_v46  ;;  %v2568_v7 = vld [vmem:[%s4002_s1 + $0x114] sm:$0xf0]  ;;  %v2154_v9 = vld [vmem:[%s4002_s1 + $0x190] sm:$0xf]  ;;  %v2936_v15 = vld [vmem:[%s4002_s1] sm:$0xf]  ;;  %v2035_v17 = vor.u32 %v2554_v3, %v2034_v2 }
  0x21   : >> { %1397 = vmatpush.bf16.msra.mxu1 %v2051_v50  ;;  %v2584_v10 = vld [vmem:[%s4002_s1 + $0x194] sm:$0xf0]  ;;  %v2026_v11 = vld [vmem:[%s4002_s1 + $0x90] sm:$0xf]  ;;  %v2941_v16 = vld [vmem:[%s4002_s1 + $0x4] sm:$0xf0]  ;;  %v2091_v23 = vor.u32 %v2568_v7, %v2090_v6 }
  0x22   : >> { %1379 = vmatpush.bf16.msra.mxu0 %v1979_v56  ;;  %v2552_v14 = vld [vmem:[%s4002_s1 + $0x94] sm:$0xf0]  ;;  %v2946_v18 = vld [vmem:[%s4002_s1 + $0x100] sm:$0xf]  ;;  %v2951_v19 = vld [vmem:[%s4002_s1 + $0x104] sm:$0xf0]  ;;  %v2155_v24 = vor.u32 %v2584_v10, %v2154_v9  ;;  %v1955_v26 = vor.u32 %v2941_v16, %v2936_v15 }
  0x23   : >> { %1417 = vmatpush.bf16.msra.mxu2 %v2107_v60  ;;  %s1913_s20 = sshll.u32 %s2725_s19, 2  ;;  %v2957_v21 = vld [vmem:[%s4002_s1 + $0x180] sm:$0xf]  ;;  %v2962_v22 = vld [vmem:[%s4002_s1 + $0x184] sm:$0xf0]  ;;  %vm450_vm0 = vcmask 1043456   ;;  %v2027_v25 = vor.u32 %v2552_v14, %v2026_v11  ;;  %v2083_v37 = vor.u32 %v2951_v19, %v2946_v18 }
  0x24   : >> { %1436 = vmatpush.bf16.msra.mxu3 %v2171_v61  ;;  %s2965_s25 = scalar_lea.vmem %s2753_s15, %s1913_s20  ;;  %v2018_v30 = vld [vmem:[%s4002_s1 + $0x80] sm:$0xf]  ;;  %v2550_v31 = vld [vmem:[%s4002_s1 + $0x84] sm:$0xf0]  ;;  %v2147_v38 = vor.u32 %v2962_v22, %v2957_v21  ;;  %vm451_vm1 = vsmask.f32 3328 }
  0x25   : >> { %1398 = vmatpush.bf16.msra.mxu1 %v2043_v1  ;;  %v152_v27 = vld [vmem:[%s2965_s25] sm:$0xf]  ;;  %v2394_v46 = vld [vmem:[%s4002_s1 + $0x370] sm:$0xf]  ;;  %v2644_v47 = vld [vmem:[%s4002_s1 + $0x374] sm:$0xf0]  ;;  %v2019_v56 = vor.u32 %v2550_v31, %v2018_v30 }
  0x26   : >> { %1380 = vmatpush.bf16.msra.mxu0 %v1971_v8  ;;  %v2971_v28 = vld [vmem:[%s2965_s25 + $0x40] sm:$0xf]  ;;  %v198_v32 = vunpack.c.l.b16 %v152_v27  ;;  %vm462_vm2 = vcmask 1046528   ;;  %vm3013_vm3 = vmand %vm450_vm0, %vm451_vm1  ;;  %v2395_v60 = vor.u32 %v2644_v47, %v2394_v46  ;;  %v2266_v3 = vld [vmem:[%s4002_s1 + $0x270] sm:$0xf]  ;;  %vm499_vm4 = vcmask 1042432  }
  0x27   : >> { %v2974_v29 = vld [vmem:[%s2965_s25 + $0x100] sm:$0xf]  ;;  %1418 = vmatpush.bf16.msra.mxu2 %v2099_v12  ;;  %v280_v34 = vshrl.u32 %v2971_v28, 16  ;;  %v283_v35 = vshll.u32 %v2971_v28, 16  ;;  %v2612_v4 = vld [vmem:[%s4002_s1 + $0x274] sm:$0xf0] }
  0x28   : >> { %1437 = vmatpush.bf16.msra.mxu3 %v2163_v13  ;;  %v218_v33 = vunpack.c.l.b16 %v2974_v29  ;;  %v2986_v36 = vld [vmem:[%s2965_s25 + $0x80] sm:$0xf]  ;;  %v199_v42 = vpack.c.b16 %v198_v32, %v198_v32  ;;  %v366_v48 = vrot.slane %v2974_v29, 1  ;;  %v2458_v8 = vld [vmem:[%s4002_s1 + $0x3f0] sm:$0xf]  ;;  %v2267_v32 = vor.u32 %v2612_v4, %v2266_v3  ;;  %s2677_s30 = sshll.u32 %s2725_s19, 3 }
  0x29   : >> { %1399 = vmatpush.bf16.msra.mxu1 %v2035_v17  ;;  %v2993_v39 = vld [vmem:[%s2965_s25 + $0x140] sm:$0xf]  ;;  %v208_v41 = vunpack.c.l.b16 %v2986_v36  ;;  %v282_v44 = vrot.slane %v280_v34, 4  ;;  %v285_v45 = vrot.slane %v283_v35, 5  ;;  %v2660_v9 = vld [vmem:[%s4002_s1 + $0x3f4] sm:$0xf0]  ;;  %s1776_s3 = scalar_lea.vmem %s2758_s18, %s2677_s30 }
  0x2a   : >> { %v2996_v40 = vld [vmem:[%s2965_s25 + $0xc0] sm:$0xf]  ;;  %v2999_v43 = vpack.c.b16 %v218_v33, %v218_v33  ;;  %1381 = vmatpush.bf16.msra.mxu0 %v1963_v20  ;;  %v201_v51 = vshrl.u32 %v199_v42, 16  ;;  %v203_v52 = vshll.u32 %v199_v42, 16  ;;  %v368_v55 = vrot.slane %v2993_v39, 1  ;;  %s149_s19 = sadd.s32 1, %s2725_s19  }
  0x2b   : >> { %v304_v49 = vshrl.u32 %v2996_v40, 16  ;;  %v307_v50 = vshll.u32 %v2996_v40, 16  ;;  %1419 = vmatpush.bf16.msra.mxu2 %v2091_v23  ;;  %v286_v57 = vor.u32 %v285_v45, %v282_v44  ;;  %v3018_v58 = vpack.c.b16 %v208_v41, %v208_v41  ;;  %v3021_v59 = vld [vmem:[%s2965_s25 + $0x180] sm:$0xf]  ;;  %v2330_v10 = vld [vmem:[%s4002_s1 + $0x2f0] sm:$0xf] }
  0x2c   : >> { %1438 = vmatpush.bf16.msra.mxu3 %v2155_v24  ;;  %v223_v53 = vshll.u32 %v2999_v43, 16  ;;  %v3024_v61 = vld [vmem:[%s2965_s25 + $0x120] sm:$0xf]  ;;  %v205_v63 = vrot.slane %v203_v52, 1  ;;  %v221_v0 = vshrl.u32 %v2999_v43, 16  ;;  %v369_v14 = vrot.slane %v3021_v59, 1 }
  0x2d   : >> { %1400 = vmatpush.bf16.msra.mxu1 %v2027_v25  ;;  %v1931_v62 = vld [vmem:[%s2965_s25 + $0x60] sm:$0xf]  ;;  %v306_v1 = vrot.slane %v304_v49, 4  ;;  %v309_v2 = vrot.slane %v307_v50, 5  ;;  %v453_v6 = vsel %vm3013_vm3, %v152_v27, %v286_v57  ;;  %v211_v7 = vshrl.u32 %v3018_v58, 16  ;;  %p146_p4 = scmp.ge.s32.totalorder %s149_s19, 7  }
  0x2e   : >> { %1382 = vmatpush.bf16.msra.mxu0 %v1955_v26  ;;  %v225_v5 = vrot.slane %v223_v53, 1  ;;  %v206_v11 = vor.u32 %v205_v63, %v201_v51  ;;  %v3049_v12 = vsel %vm462_vm2, %v453_v6, %v366_v48  ;;  %v2628_v15 = vld [vmem:[%s4002_s1 + $0x2f4] sm:$0xf0]  ;;  %v2386_v16 = vld [vmem:[%s4002_s1 + $0x360] sm:$0xf]  ;;  %v288_v17 = vshrl.u32 %v1931_v62, 16 }
  0x2f   : >> { %1420 = vmatpush.bf16.msra.mxu2 %v2083_v37  ;;  %v310_v13 = vor.u32 %v309_v2, %v306_v1  ;;  %v291_v18 = vshll.u32 %v1931_v62, 16  ;;  %v2642_v19 = vld [vmem:[%s4002_s1 + $0x364] sm:$0xf0]  ;;  %v2258_v20 = vld [vmem:[%s4002_s1 + $0x260] sm:$0xf]  ;;  %v367_v25 = vrot.slane %v3024_v61, 1  ;;  %v2459_v37 = vor.u32 %v2660_v9, %v2458_v8 }
  0x30   : >> { %1439 = vmatpush.bf16.msra.mxu3 %v2147_v38  ;;  %v296_v21 = vshrl.u32 %v206_v11, 16  ;;  %v299_v22 = vshll.u32 %v206_v11, 16  ;;  %v1915_v24 = vld [vmem:[%s2965_s25 + $0x20] sm:$0xf]  ;;  %v2610_v26 = vld [vmem:[%s4002_s1 + $0x264] sm:$0xf0]  ;;  %v2331_v38 = vor.u32 %v2628_v15, %v2330_v10  ;;  %v2387_v46 = vor.u32 %v2642_v19, %v2386_v16 }
  0x31   : >> { %1401 = vmatpush.bf16.msra.mxu1 %v2019_v56  ;;  %1383 = vmatmul.bf16.vlgmr.msra.gmra.mxu0 %v3049_v12  ;;  %v456_v23 = vsel %vm3013_vm3, %v2986_v36, %v310_v13  ;;  %v290_v30 = vrot.slane %v288_v17, 4  ;;  %v293_v31 = vrot.slane %v291_v18, 5  ;;  %v2450_v33 = vld [vmem:[%s4002_s1 + $0x3e0] sm:$0xf]  ;;  %v2658_v34 = vld [vmem:[%s4002_s1 + $0x3e4] sm:$0xf0]  ;;  %v2259_v47 = vor.u32 %v2610_v26, %v2258_v20 }
  0x32   : >> { %v3076_v27 = vsel %vm462_vm2, %v456_v23, %v369_v14  ;;  %v298_v35 = vrot.slane %v296_v21, 4  ;;  %v301_v36 = vrot.slane %v299_v22, 5  ;;  %v2322_v41 = vld [vmem:[%s4002_s1 + $0x2e0] sm:$0xf]  ;;  %v2626_v42 = vld [vmem:[%s4002_s1 + $0x2e4] sm:$0xf0]  ;;  %1451 = vmatpush.bf16.msrb.mxu0 %v2267_v32  ;;  %v2451_v52 = vor.u32 %v2658_v34, %v2450_v33 }
  0x33   : >> { %1489 = vmatpush.bf16.msrb.mxu2 %v2395_v60  ;;  %1440 = vmatmul.bf16.vlgmr.msra.gmra.mxu3 %v3076_v27  ;;  %v213_v44 = vshll.u32 %v3018_v58, 16  ;;  %v294_v45 = vor.u32 %v293_v31, %v290_v30  ;;  %v2378_v49 = vld [vmem:[%s4002_s1 + $0x350] sm:$0xf]  ;;  %v2640_v50 = vld [vmem:[%s4002_s1 + $0x354] sm:$0xf0]  ;;  %v2323_v62 = vor.u32 %v2626_v42, %v2322_v41  ;;  %v3120_v4 = vor.u32 %v225_v5, %v221_v0 }
  0x34   : >> { %v302_v51 = vor.u32 %v301_v36, %v298_v35  ;;  %1508 = vmatpush.bf16.msrb.mxu3 %v2459_v37  ;;  %v2250_v53 = vld [vmem:[%s4002_s1 + $0x250] sm:$0xf]  ;;  %v2608_v56 = vld [vmem:[%s4002_s1 + $0x254] sm:$0xf0]  ;;  %v2379_v63 = vor.u32 %v2640_v50, %v2378_v49  ;;  %v2370_v9 = vld [vmem:[%s4002_s1 + $0x340] sm:$0xf]  ;;  %v260_v0 = vunpack.c.l.b16 %v3021_v59 }
  0x35   : >> { %1470 = vmatpush.bf16.msrb.mxu1 %v2331_v38  ;;  %v2442_v57 = vld [vmem:[%s4002_s1 + $0x3d0] sm:$0xf]  ;;  %v454_v60 = vsel %vm3013_vm3, %v1915_v24, %v294_v45  ;;  %v2656_v1 = vld [vmem:[%s4002_s1 + $0x3d4] sm:$0xf0]  ;;  %v2638_v10 = vld [vmem:[%s4002_s1 + $0x344] sm:$0xf0]  ;;  %v2251_v5 = vor.u32 %v2608_v56, %v2250_v53 }
  0x36   : >> { %v2314_v2 = vld [vmem:[%s4002_s1 + $0x2d0] sm:$0xf]  ;;  %v2624_v3 = vld [vmem:[%s4002_s1 + $0x2d4] sm:$0xf0]  ;;  %v455_v6 = vsel %vm3013_vm3, %v2971_v28, %v302_v51  ;;  %v3128_v8 = vsel %vm462_vm2, %v454_v60, %v367_v25  ;;  %v2242_v43 = vld [vmem:[%s4002_s1 + $0x240] sm:$0xf]  ;;  %1452 = vmatpush.bf16.msrb.mxu0 %v2259_v47  ;;  %v2443_v16 = vor.u32 %v2656_v1, %v2442_v57  ;;  %v2371_v22 = vor.u32 %v2638_v10, %v2370_v9 }
  0x37   : >> { %1490 = vmatpush.bf16.msrb.mxu2 %v2387_v46  ;;  %v3142_v28 = vsel %vm462_vm2, %v455_v6, %v368_v55  ;;  %1402 = vmatmul.bf16.vlgmr.msra.gmra.mxu1 %v3128_v8  ;;  %v2606_v11 = vld [vmem:[%s4002_s1 + $0x244] sm:$0xf0]  ;;  %v2434_v13 = vld [vmem:[%s4002_s1 + $0x3c0] sm:$0xf]  ;;  %v328_v19 = vshrl.u32 %v2993_v39, 16  ;;  %v331_v20 = vshll.u32 %v2993_v39, 16  ;;  %v2315_v21 = vor.u32 %v2624_v3, %v2314_v2 }
  0x38   : >> { %v2654_v15 = vld [vmem:[%s4002_s1 + $0x3c4] sm:$0xf0]  ;;  %1421 = vmatmul.bf16.vlgmr.msra.gmra.mxu2 %v3142_v28  ;;  %1509 = vmatpush.bf16.msrb.mxu3 %v2451_v52  ;;  %v2306_v17 = vld [vmem:[%s4002_s1 + $0x2c0] sm:$0xf]  ;;  %vm500_vm5 = vsmask.f32 2304  ;;  %v3181_v36 = vpack.c.b16 %v260_v0, %v260_v0  ;;  %v2243_v37 = vor.u32 %v2606_v11, %v2242_v43 }
  0x39   : >> { %v2622_v18 = vld [vmem:[%s4002_s1 + $0x2c4] sm:$0xf0]  ;;  %1471 = vmatpush.bf16.msrb.mxu1 %v2323_v62  ;;  %v344_v23 = vshrl.u32 %v3120_v4, 16  ;;  %v347_v24 = vshll.u32 %v3120_v4, 16  ;;  %v3167_v26 = vld [vmem:[%s2965_s25 + $0x1c0] sm:$0xf]  ;;  %vm3185_vm6 = vmand %vm499_vm4, %vm500_vm5  ;;  %v2435_v46 = vor.u32 %v2654_v15, %v2434_v13 }
  0x3a   : >> { %v2362_v30 = vld [vmem:[%s4002_s1 + $0x330] sm:$0xf]  ;;  %v384_v31 = vrot.slane %v328_v19, 5  ;;  %v385_v32 = vrot.slane %v331_v20, 6  ;;  %v394_v33 = vshrl.u32 %v3167_v26, 16  ;;  %v397_v34 = vshll.u32 %v3167_v26, 16  ;;  %1453 = vmatpush.bf16.msrb.mxu0 %v2251_v5 }
  0x3b   : >> { %1491 = vmatpush.bf16.msrb.mxu2 %v2379_v63  ;;  %v2636_v35 = vld [vmem:[%s4002_s1 + $0x334] sm:$0xf0]  ;;  %v3191_v41 = vrot.slane %v344_v23, 5  ;;  %v391_v42 = vrot.slane %v347_v24, 6  ;;  %v3196_v45 = vld [vmem:[%s2965_s25 + $0x160] sm:$0xf]  ;;  %v2307_v53 = vor.u32 %v2622_v18, %v2306_v17 }
  0x3c   : >> { %1510 = vmatpush.bf16.msrb.mxu3 %v2443_v16  ;;  %v386_v47 = vor.u32 %v385_v32, %v384_v31  ;;  %v396_v49 = vrot.slane %v394_v33, 5  ;;  %v399_v50 = vrot.slane %v397_v34, 6  ;;  %v2234_v51 = vld [vmem:[%s4002_s1 + $0x230] sm:$0xf]  ;;  %v2604_v52 = vld [vmem:[%s4002_s1 + $0x234] sm:$0xf0]  ;;  %v2363_v56 = vor.u32 %v2636_v35, %v2362_v30 }
  0x3d   : >> { %1472 = vmatpush.bf16.msrb.mxu1 %v2315_v21  ;;  %v336_v57 = vshrl.u32 %v3196_v45, 16  ;;  %v339_v60 = vshll.u32 %v3196_v45, 16  ;;  %v2426_v62 = vld [vmem:[%s4002_s1 + $0x3b0] sm:$0xf]  ;;  %v2652_v63 = vld [vmem:[%s4002_s1 + $0x3b4] sm:$0xf0]  ;;  %v2235_v0 = vor.u32 %v2604_v52, %v2234_v51  ;;  %v392_v13 = vor.u32 %v391_v42, %v3191_v41 }
  0x3e   : >> { %v3216_v1 = vsel %vm3185_vm6, %v366_v48, %v386_v47  ;;  %v400_v2 = vor.u32 %v399_v50, %v396_v49  ;;  %v2298_v3 = vld [vmem:[%s4002_s1 + $0x2b0] sm:$0xf]  ;;  %v2620_v6 = vld [vmem:[%s4002_s1 + $0x2b4] sm:$0xf0]  ;;  %v2354_v9 = vld [vmem:[%s4002_s1 + $0x320] sm:$0xf]  ;;  %1454 = vmatpush.bf16.msrb.mxu0 %v2243_v37  ;;  %v2427_v16 = vor.u32 %v2652_v63, %v2426_v62 }
  0x3f   : >> { %1492 = vmatpush.bf16.msrb.mxu2 %v2371_v22  ;;  %v265_v10 = vshll.u32 %v3181_v36, 16  ;;  %v387_v48 = vrot.slane %v336_v57, 5  ;;  %v388_v43 = vrot.slane %v339_v60, 6  ;;  %v2634_v5 = vld [vmem:[%s4002_s1 + $0x324] sm:$0xf0]  ;;  %v215_v11 = vrot.slane %v213_v44, 1 }
  0x40   : >> { %1511 = vmatpush.bf16.msrb.mxu3 %v2435_v46  ;;  %v3243_v15 = vsel %vm3185_vm6, %v369_v14, %v400_v2  ;;  %v2226_v17 = vld [vmem:[%s4002_s1 + $0x220] sm:$0xf]  ;;  %v2602_v44 = vld [vmem:[%s4002_s1 + $0x224] sm:$0xf0]  ;;  %v2299_v21 = vor.u32 %v2620_v6, %v2298_v3  ;;  %v2355_v22 = vor.u32 %v2634_v5, %v2354_v9  ;;  %v2346_v32 = vld [vmem:[%s4002_s1 + $0x310] sm:$0xf] }
  0x41   : >> { %1388 = vmatmul.bf16.gmra.mxu0 %v3216_v1  ;;  %1473 = vmatpush.bf16.msrb.mxu1 %v2307_v53  ;;  %v389_v18 = vor.u32 %v388_v43, %v387_v48  ;;  %v2418_v59 = vld [vmem:[%s4002_s1 + $0x3a0] sm:$0xf]  ;;  %v2650_v14 = vld [vmem:[%s4002_s1 + $0x3a4] sm:$0xf0]  ;;  %v2632_v33 = vld [vmem:[%s4002_s1 + $0x314] sm:$0xf0]  ;;  %v2227_v37 = vor.u32 %v2602_v44, %v2226_v17  ;;  %v3322_v6 = vor.u32 %v215_v11, %v211_v7 }
  0x42   : >> { %v2290_v30 = vld [vmem:[%s4002_s1 + $0x2a0] sm:$0xf]  ;;  %v2618_v31 = vld [vmem:[%s4002_s1 + $0x2a4] sm:$0xf0]  ;;  %v263_v34 = vshrl.u32 %v3181_v36, 16  ;;  %v3271_v35 = vrot.slane %v265_v10, 1  ;;  %1455 = vmatpush.bf16.msrb.mxu0 %v2235_v0  ;;  %v2419_v47 = vor.u32 %v2650_v14, %v2418_v59  ;;  %v2347_v53 = vor.u32 %v2632_v33, %v2346_v32 }
  0x43   : >> { %1493 = vmatpush.bf16.msrb.mxu2 %v2363_v56  ;;  %1445 = vmatmul.bf16.gmra.mxu3 %v3243_v15  ;;  %v2218_v41 = vld [vmem:[%s4002_s1 + $0x210] sm:$0xf]  ;;  %v2600_v42 = vld [vmem:[%s4002_s1 + $0x214] sm:$0xf0]  ;;  %v3283_v46 = vsel %vm3185_vm6, %v367_v25, %v389_v18  ;;  %v3298_v25 = vsel %vm3185_vm6, %v368_v55, %v392_v13  ;;  %v2291_v52 = vor.u32 %v2618_v31, %v2290_v30  ;;  %v2338_v62 = vld [vmem:[%s4002_s1 + $0x300] sm:$0xf] }
  0x44   : >> { %1512 = vmatpush.bf16.msrb.mxu3 %v2427_v16  ;;  %v2410_v49 = vld [vmem:[%s4002_s1 + $0x390] sm:$0xf]  ;;  %v2648_v50 = vld [vmem:[%s4002_s1 + $0x394] sm:$0xf0]  ;;  %v2630_v63 = vld [vmem:[%s4002_s1 + $0x304] sm:$0xf0]  ;;  %v2219_v9 = vor.u32 %v2600_v42, %v2218_v41 }
  0x45   : >> { %v2282_v51 = vld [vmem:[%s4002_s1 + $0x290] sm:$0xf]  ;;  %1474 = vmatpush.bf16.msrb.mxu1 %v2299_v21  ;;  %v2616_v56 = vld [vmem:[%s4002_s1 + $0x294] sm:$0xf0]  ;;  %v2210_v55 = vld [vmem:[%s4002_s1 + $0x200] sm:$0xf]  ;;  %v2411_v10 = vor.u32 %v2648_v50, %v2410_v49  ;;  %v2339_v7 = vor.u32 %v2630_v63, %v2338_v62 }
  0x46   : >> { %v2598_v2 = vld [vmem:[%s4002_s1 + $0x204] sm:$0xf0]  ;;  %v3318_v3 = vld [vmem:[%s4002_s1 + $0x380] sm:$0xf]  ;;  %1456 = vmatpush.bf16.msrb.mxu0 %v2227_v37  ;;  %v2283_v58 = vor.u32 %v2616_v56, %v2282_v51  ;;  %v3343_v18 = vrot.slane %v328_v19, 4  ;;  %v3347_v21 = vrot.slane %v331_v20, 5 }
  0x47   : >> { %1494 = vmatpush.bf16.msrb.mxu2 %v2355_v22  ;;  %1407 = vmatmul.bf16.gmra.mxu1 %v3283_v46  ;;  %v2646_v48 = vld [vmem:[%s4002_s1 + $0x384] sm:$0xf0]  ;;  %v1933_v43 = vld [vmem:[%s2965_s25 + $0xe0] sm:$0xf]  ;;  %v3350_v22 = vld [vmem:[%s2965_s25 + $0x24] sm:$0xf]  ;;  %v2211_v20 = vor.u32 %v2598_v2, %v2210_v55  ;;  %v3391_v55 = vor.u32 %v3271_v35, %v263_v34 }
  0x48   : >> { %v3330_v0 = vld [vmem:[%s2965_s25 + $0x1a0] sm:$0xf]  ;;  %1426 = vmatmul.bf16.gmra.mxu2 %v3298_v25  ;;  %1513 = vmatpush.bf16.msrb.mxu3 %v2419_v47  ;;  %v2614_v11 = vld [vmem:[%s4002_s1 + $0x284] sm:$0xf0]  ;;  %v312_v13 = vshrl.u32 %v1933_v43, 16  ;;  %v315_v16 = vshll.u32 %v1933_v43, 16  ;;  %v2403_v33 = vor.u32 %v2646_v48, %v3318_v3  ;;  %v334_v3 = vor.u32 %v3347_v21, %v3343_v18 }
  0x49   : >> { %v2274_v5 = vld [vmem:[%s4002_s1 + $0x280] sm:$0xf]  ;;  %1475 = vmatpush.bf16.msrb.mxu1 %v2291_v52  ;;  %v370_v44 = vrot.slane %v3330_v0, 1  ;;  %v338_v59 = vrot.slane %v336_v57, 4  ;;  %v341_v31 = vrot.slane %v339_v60, 5  ;;  %v373_v32 = vrot.slane %v3350_v22, 1 }
  0x4a   : >> { %v1921_v17 = vld [vmem:[%s2965_s25 + $0xa0] sm:$0xf]  ;;  %v314_v14 = vrot.slane %v312_v13, 4  ;;  %v317_v30 = vrot.slane %v315_v16, 5  ;;  %v2563_v19 = vld [vmem:[%s4002_s1 + $0xf4] sm:$0xf]  ;;  %1457 = vmatpush.bf16.msrb.mxu0 %v2219_v9  ;;  %v2275_v52 = vor.u32 %v2614_v11, %v2274_v5 }
  0x4b   : >> { %1495 = vmatpush.bf16.msrb.mxu2 %v2347_v53  ;;  %v2076_v37 = vld [vmem:[%s4002_s1 + $0xf8] sm:$0xf0]  ;;  %v2522_v57 = vld [vmem:[%s4002_s1 + $0x470] sm:$0xf]  ;;  %v2676_v45 = vld [vmem:[%s4002_s1 + $0x474] sm:$0xf0]  ;;  %v342_v42 = vor.u32 %v341_v31, %v338_v59 }
  0x4c   : >> { %1514 = vmatpush.bf16.msrb.mxu3 %v2411_v10  ;;  %v318_v60 = vor.u32 %v317_v30, %v314_v14  ;;  %v3371_v41 = vld [vmem:[%s2965_s25 + $0x4] sm:$0xf]  ;;  %v2079_v47 = vor.u32 %v2563_v19, %v2076_v37  ;;  %v2523_v49 = vor.u32 %v2676_v45, %v2522_v57  ;;  %v2579_v50 = vld [vmem:[%s4002_s1 + $0x174] sm:$0xf]  ;;  %v2140_v51 = vld [vmem:[%s4002_s1 + $0x178] sm:$0xf0]  ;;  %v459_v19 = vsel %vm3013_vm3, %v2974_v29, %v334_v3 }
  0x4d   : >> { %1476 = vmatpush.bf16.msrb.mxu1 %v2283_v58  ;;  %v2143_v53 = vor.u32 %v2579_v50, %v2140_v51  ;;  %v2547_v56 = vld [vmem:[%s4002_s1 + $0x74] sm:$0xf]  ;;  %v2012_v62 = vld [vmem:[%s4002_s1 + $0x78] sm:$0xf0]  ;;  %v2561_v63 = vld [vmem:[%s4002_s1 + $0xe4] sm:$0xf]  ;;  %v460_v9 = vsel %vm3013_vm3, %v3024_v61, %v342_v42 }
  0x4e   : >> { %v457_v2 = vsel %vm3013_vm3, %v1921_v17, %v318_v60  ;;  %v320_v10 = vshrl.u32 %v3322_v6, 16  ;;  %v2068_v36 = vld [vmem:[%s4002_s1 + $0xe8] sm:$0xf0]  ;;  %v2514_v34 = vld [vmem:[%s4002_s1 + $0x460] sm:$0xf]  ;;  %1458 = vmatpush.bf16.msrb.mxu0 %v2211_v20  ;;  %v372_v48 = vrot.slane %v3371_v41, 1  ;;  %v3416_v61 = vsel %vm462_vm2, %v460_v9, %v373_v32 }
  0x4f   : >> { %1496 = vmatpush.bf16.msrb.mxu2 %v2339_v7  ;;  %v3410_v35 = vsel %vm462_vm2, %v457_v2, %v370_v44  ;;  %v323_v43 = vshll.u32 %v3322_v6, 16  ;;  %v2674_v58 = vld [vmem:[%s4002_s1 + $0x464] sm:$0xf0]  ;;  %v2577_v7 = vld [vmem:[%s4002_s1 + $0x164] sm:$0xf]  ;;  %v371_v11 = vrot.slane %v3167_v26, 1  ;;  %v2015_v13 = vor.u32 %v2547_v56, %v2012_v62 }
  0x50   : >> { %1515 = vmatpush.bf16.msrb.mxu3 %v2403_v33  ;;  %v322_v5 = vrot.slane %v320_v10, 4  ;;  %v2071_v16 = vor.u32 %v2561_v63, %v2068_v36  ;;  %v2132_v17 = vld [vmem:[%s4002_s1 + $0x168] sm:$0xf0]  ;;  %v2545_v6 = vld [vmem:[%s4002_s1 + $0x64] sm:$0xf]  ;;  %v2515_v21 = vor.u32 %v2674_v58, %v2514_v34  ;;  %v410_v31 = vshrl.u32 %v3391_v55, 16 }
  0x51   : >> { %1477 = vmatpush.bf16.msrb.mxu1 %v2275_v52  ;;  %v325_v18 = vrot.slane %v323_v43, 5  ;;  %v2135_v59 = vor.u32 %v2577_v7, %v2132_v17  ;;  %v2004_v14 = vld [vmem:[%s4002_s1 + $0x68] sm:$0xf0]  ;;  %v2559_v30 = vld [vmem:[%s4002_s1 + $0xd4] sm:$0xf]  ;;  %1459 = vmatmul.bf16.vlgmr.msrb.gmra.mxu0 %v3410_v35  ;;  %v270_v43 = vunpack.c.l.b16 %v3371_v41  ;;  %vm1729_vm7 = vcmask 1040384  }
  0x52   : >> { %1527 = vmatpush.bf16.msra.mxu0 %v2523_v49  ;;  %v2007_v20 = vor.u32 %v2545_v6, %v2004_v14  ;;  %v2060_v33 = vld [vmem:[%s4002_s1 + $0xd8] sm:$0xf0]  ;;  %v2506_v37 = vld [vmem:[%s4002_s1 + $0x450] sm:$0xf]  ;;  %v2672_v57 = vld [vmem:[%s4002_s1 + $0x454] sm:$0xf0] }
  0x53   : >> { %1565 = vmatpush.bf16.msra.mxu2 %v2079_v47  ;;  %1516 = vmatmul.bf16.vlgmr.msrb.gmra.mxu3 %v3416_v61  ;;  %v326_v45 = vor.u32 %v325_v18, %v322_v5  ;;  %v2063_v60 = vor.u32 %v2559_v30, %v2060_v33  ;;  %v2575_v29 = vld [vmem:[%s4002_s1 + $0x154] sm:$0xf]  ;;  %v2124_v42 = vld [vmem:[%s4002_s1 + $0x158] sm:$0xf0]  ;;  %v2507_v49 = vor.u32 %v2672_v57, %v2506_v37  ;;  %v2557_v51 = vld [vmem:[%s4002_s1 + $0xc4] sm:$0xf] }
  0x54   : >> { %1584 = vmatpush.bf16.msra.mxu3 %v2143_v53  ;;  %v2543_v47 = vld [vmem:[%s4002_s1 + $0x54] sm:$0xf]  ;;  %v1996_v50 = vld [vmem:[%s4002_s1 + $0x58] sm:$0xf0]  ;;  %v2052_v52 = vld [vmem:[%s4002_s1 + $0xc8] sm:$0xf0]  ;;  %v3474_v53 = vsel %vm462_vm2, %v459_v19, %v372_v48  ;;  %v2127_v62 = vor.u32 %v2575_v29, %v2124_v42  ;;  %v3528_v42 = vpack.c.b16 %v270_v43, %v270_v43 }
  0x55   : >> { %1546 = vmatpush.bf16.msra.mxu1 %v2015_v13  ;;  %v458_v56 = vsel %vm3013_vm3, %v2996_v40, %v326_v45  ;;  %v2498_v63 = vld [vmem:[%s4002_s1 + $0x440] sm:$0xf]  ;;  %v2670_v2 = vld [vmem:[%s4002_s1 + $0x444] sm:$0xf0]  ;;  %v2573_v3 = vld [vmem:[%s4002_s1 + $0x144] sm:$0xf]  ;;  %v1999_v9 = vor.u32 %v2543_v47, %v1996_v50  ;;  %v2055_v58 = vor.u32 %v2557_v51, %v2052_v52 }
  0x56   : >> { %1528 = vmatpush.bf16.msra.mxu0 %v2515_v21  ;;  %v3491_v40 = vsel %vm462_vm2, %v458_v56, %v371_v11  ;;  %v2116_v10 = vld [vmem:[%s4002_s1 + $0x148] sm:$0xf0]  ;;  %v2541_v36 = vld [vmem:[%s4002_s1 + $0x44] sm:$0xf]  ;;  %v2499_v7 = vor.u32 %v2670_v2, %v2498_v63  ;;  %v1949_v5 = vld [vmem:[%s2965_s25 + $0x1e0] sm:$0xf] }
  0x57   : >> { %1566 = vmatpush.bf16.msra.mxu2 %v2071_v16  ;;  %v1988_v34 = vld [vmem:[%s4002_s1 + $0x48] sm:$0xf0]  ;;  %1478 = vmatmul.bf16.vlgmr.msrb.gmra.mxu1 %v3491_v40  ;;  %v3506_v13 = vld [vmem:[%s2965_s25 + $0x44] sm:$0xf]  ;;  %v402_v17 = vshrl.u32 %v1949_v5, 16  ;;  %v405_v6 = vshll.u32 %v1949_v5, 16  ;;  %v2119_v14 = vor.u32 %v2573_v3, %v2116_v10 }
  0x58   : >> { %1585 = vmatpush.bf16.msra.mxu3 %v2135_v59  ;;  %v1951_v16 = vld [vmem:[%s2965_s25 + $0x64] sm:$0xf]  ;;  %1497 = vmatmul.bf16.vlgmr.msrb.gmra.mxu2 %v3474_v53  ;;  %v418_v18 = vshrl.u32 %v3506_v13, 16  ;;  %v421_v21 = vshll.u32 %v3506_v13, 16  ;;  %v2555_v59 = vld [vmem:[%s4002_s1 + $0xb4] sm:$0xf]  ;;  %v1991_v57 = vor.u32 %v2541_v36, %v1988_v34 }
  0x59   : >> { %1547 = vmatpush.bf16.msra.mxu1 %v2007_v20  ;;  %v426_v30 = vshrl.u32 %v1951_v16, 16  ;;  %v429_v19 = vshll.u32 %v1951_v16, 16  ;;  %v2044_v20 = vld [vmem:[%s4002_s1 + $0xb8] sm:$0xf0]  ;;  %v2490_v33 = vld [vmem:[%s4002_s1 + $0x430] sm:$0xf] }
  0x5a   : >> { %1529 = vmatpush.bf16.msra.mxu0 %v2507_v49  ;;  %v3523_v37 = vrot.slane %v344_v23, 4  ;;  %v404_v45 = vrot.slane %v402_v17, 5  ;;  %v2668_v29 = vld [vmem:[%s4002_s1 + $0x434] sm:$0xf0]  ;;  %v2047_v50 = vor.u32 %v2555_v59, %v2044_v20  ;;  %v2571_v51 = vld [vmem:[%s4002_s1 + $0x134] sm:$0xf] }
  0x5b   : >> { %1567 = vmatpush.bf16.msra.mxu2 %v2063_v60  ;;  %v407_v60 = vrot.slane %v405_v6, 6  ;;  %v428_v47 = vrot.slane %v426_v30, 5  ;;  %v431_v49 = vrot.slane %v429_v19, 6  ;;  %v2108_v23 = vld [vmem:[%s4002_s1 + $0x138] sm:$0xf0]  ;;  %v420_v56 = vrot.slane %v418_v18, 5 }
  0x5c   : >> { %1586 = vmatpush.bf16.msra.mxu3 %v2127_v62  ;;  %v423_v62 = vrot.slane %v421_v21, 6  ;;  %v2491_v63 = vor.u32 %v2668_v29, %v2490_v33  ;;  %v2539_v2 = vld [vmem:[%s4002_s1 + $0x34] sm:$0xf]  ;;  %v1980_v3 = vld [vmem:[%s4002_s1 + $0x38] sm:$0xf0]  ;;  %v2111_v10 = vor.u32 %v2571_v51, %v2108_v23  ;;  %v412_v36 = vrot.slane %v410_v31, 5 }
  0x5d   : >> { %1548 = vmatpush.bf16.msra.mxu1 %v1999_v9  ;;  %v408_v52 = vor.u32 %v407_v60, %v404_v45  ;;  %v432_v9 = vor.u32 %v431_v49, %v428_v47  ;;  %v413_v34 = vshll.u32 %v3391_v55, 16  ;;  %v2553_v43 = vld [vmem:[%s4002_s1 + $0xa4] sm:$0xf]  ;;  %v2482_v5 = vld [vmem:[%s4002_s1 + $0x420] sm:$0xf]  ;;  %v3562_v16 = vrot.slane %v347_v24, 5 }
  0x5e   : >> { %1530 = vmatpush.bf16.msra.mxu0 %v2499_v7  ;;  %v1983_v7 = vor.u32 %v2539_v2, %v1980_v3  ;;  %v2666_v31 = vld [vmem:[%s4002_s1 + $0x424] sm:$0xf0]  ;;  %v2569_v55 = vld [vmem:[%s4002_s1 + $0x124] sm:$0xf]  ;;  %v2100_v21 = vld [vmem:[%s4002_s1 + $0x128] sm:$0xf0]  ;;  %v424_v30 = vor.u32 %v423_v62, %v420_v56 }
  0x5f   : >> { %1568 = vmatpush.bf16.msra.mxu2 %v2055_v58  ;;  %v2036_v58 = vld [vmem:[%s4002_s1 + $0xa8] sm:$0xf0]  ;;  %v3568_v17 = vsel %vm3185_vm6, %v370_v44, %v408_v52  ;;  %v415_v6 = vrot.slane %v413_v34, 6  ;;  %v2537_v59 = vld [vmem:[%s4002_s1 + $0x24] sm:$0xf]  ;;  %v3580_v4 = vsel %vm3185_vm6, %v373_v32, %v432_v9  ;;  %v2483_v24 = vor.u32 %v2666_v31, %v2482_v5 }
  0x60   : >> { %1587 = vmatpush.bf16.msra.mxu3 %v2119_v14  ;;  %v2039_v18 = vor.u32 %v2553_v43, %v2036_v58  ;;  %v1972_v0 = vld [vmem:[%s4002_s1 + $0x28] sm:$0xf0]  ;;  %v2551_v44 = vld [vmem:[%s4002_s1 + $0x94] sm:$0xf]  ;;  %v2028_v14 = vld [vmem:[%s4002_s1 + $0x98] sm:$0xf0]  ;;  %v2103_v19 = vor.u32 %v2569_v55, %v2100_v21  ;;  %v3637_v26 = vsel %vm3185_vm6, %v372_v48, %v424_v30  ;;  %v350_v31 = vor.u32 %v3562_v16, %v3523_v37 }
  0x61   : >> { %1549 = vmatpush.bf16.msra.mxu1 %v1991_v57  ;;  %v275_v22 = vshll.u32 %v3528_v42, 16  ;;  %v416_v32 = vor.u32 %v415_v6, %v412_v36  ;;  %v2474_v20 = vld [vmem:[%s4002_s1 + $0x410] sm:$0xf]  ;;  %v2664_v33 = vld [vmem:[%s4002_s1 + $0x414] sm:$0xf0]  ;;  %1464 = vmatmul.bf16.gmra.mxu0 %v3568_v17  ;;  %v1975_v57 = vor.u32 %v2537_v59, %v1972_v0  ;;  %v2031_v47 = vor.u32 %v2551_v44, %v2028_v14 }
  0x62   : >> { %1531 = vmatpush.bf16.msra.mxu0 %v2491_v63  ;;  %v2567_v45 = vld [vmem:[%s4002_s1 + $0x114] sm:$0xf]  ;;  %v2092_v60 = vld [vmem:[%s4002_s1 + $0x118] sm:$0xf0]  ;;  %v2020_v51 = vld [vmem:[%s4002_s1 + $0x88] sm:$0xf0]  ;;  %v2475_v52 = vor.u32 %v2664_v33, %v2474_v20 }
  0x63   : >> { %1569 = vmatpush.bf16.msra.mxu2 %v2047_v50  ;;  %v2535_v29 = vld [vmem:[%s4002_s1 + $0x14] sm:$0xf]  ;;  %1521 = vmatmul.bf16.gmra.mxu3 %v3580_v4  ;;  %v1964_v49 = vld [vmem:[%s4002_s1 + $0x18] sm:$0xf0]  ;;  %v2549_v50 = vld [vmem:[%s4002_s1 + $0x84] sm:$0xf]  ;;  %v3622_v23 = vsel %vm3185_vm6, %v371_v11, %v416_v32  ;;  %v2095_v11 = vor.u32 %v2567_v45, %v2092_v60 }
  0x64   : >> { %1588 = vmatpush.bf16.msra.mxu3 %v2111_v10  ;;  %v2466_v56 = vld [vmem:[%s4002_s1 + $0x400] sm:$0xf]  ;;  %v2662_v62 = vld [vmem:[%s4002_s1 + $0x404] sm:$0xf0]  ;;  %v2565_v63 = vld [vmem:[%s4002_s1 + $0x104] sm:$0xf]  ;;  %v1967_v41 = vor.u32 %v2535_v29, %v1964_v49  ;;  %v2023_v34 = vor.u32 %v2549_v50, %v2020_v51 }
  0x65   : >> { %1550 = vmatpush.bf16.msra.mxu1 %v1983_v7  ;;  %v2084_v2 = vld [vmem:[%s4002_s1 + $0x108] sm:$0xf0]  ;;  %v2533_v3 = vld [vmem:[%s4002_s1 + $0x4] sm:$0xf]  ;;  %v2627_v9 = vld [vmem:[%s4002_s1 + $0x2f4] sm:$0xf]  ;;  %v2467_v5 = vor.u32 %v2662_v62, %v2466_v56 }
  0x66   : >> { %1532 = vmatpush.bf16.msra.mxu0 %v2483_v24  ;;  %v2332_v48 = vld [vmem:[%s4002_s1 + $0x2f8] sm:$0xf0]  ;;  %v2595_v10 = vld [vmem:[%s4002_s1 + $0x1f4] sm:$0xf]  ;;  %v1956_v43 = vld [vmem:[%s4002_s1 + $0x8] sm:$0xf0]  ;;  %v2087_v21 = vor.u32 %v2565_v63, %v2084_v2 }
  0x67   : >> { %1570 = vmatpush.bf16.msra.mxu2 %v2039_v18  ;;  %v2204_v36 = vld [vmem:[%s4002_s1 + $0x1f8] sm:$0xf0]  ;;  %1483 = vmatmul.bf16.gmra.mxu1 %v3622_v23  ;;  %v2643_v58 = vld [vmem:[%s4002_s1 + $0x374] sm:$0xf]  ;;  %v2335_v55 = vor.u32 %v2627_v9, %v2332_v48  ;;  %v2625_v24 = vld [vmem:[%s4002_s1 + $0x2e4] sm:$0xf]  ;;  %v1959_v0 = vor.u32 %v2533_v3, %v1956_v43 }
  0x68   : >> { %1589 = vmatpush.bf16.msra.mxu3 %v2103_v19  ;;  %v2396_v7 = vld [vmem:[%s4002_s1 + $0x378] sm:$0xf0]  ;;  %1502 = vmatmul.bf16.gmra.mxu2 %v3637_v26  ;;  %v2611_v6 = vld [vmem:[%s4002_s1 + $0x274] sm:$0xf]  ;;  %v2207_v59 = vor.u32 %v2595_v10, %v2204_v36  ;;  %v2324_v37 = vld [vmem:[%s4002_s1 + $0x2e8] sm:$0xf0] }
  0x69   : >> { %1551 = vmatpush.bf16.msra.mxu1 %v1975_v57  ;;  %v2268_v18 = vld [vmem:[%s4002_s1 + $0x278] sm:$0xf0]  ;;  %v273_v16 = vshrl.u32 %v3528_v42, 16  ;;  %v2399_v44 = vor.u32 %v2643_v58, %v2396_v7  ;;  %v2593_v14 = vld [vmem:[%s4002_s1 + $0x1e4] sm:$0xf]  ;;  %v277_v32 = vrot.slane %v275_v22, 1  ;;  %v461_v57 = vsel %vm3013_vm3, %v2993_v39, %v350_v31 }
  0x6a   : >> { %1533 = vmatpush.bf16.msra.mxu0 %v2475_v52  ;;  %v2196_v30 = vld [vmem:[%s4002_s1 + $0x1e8] sm:$0xf0]  ;;  %v374_v19 = vrot.slane %v3506_v13, 1  ;;  %v2271_v20 = vor.u32 %v2611_v6, %v2268_v18  ;;  %v2641_v42 = vld [vmem:[%s4002_s1 + $0x364] sm:$0xf]  ;;  %v2327_v45 = vor.u32 %v2625_v24, %v2324_v37  ;;  %vm1762_vm8 = vcmask 1041408  }
  0x6b   : >> { %1571 = vmatpush.bf16.msra.mxu2 %v2031_v47  ;;  %v2388_v33 = vld [vmem:[%s4002_s1 + $0x368] sm:$0xf0]  ;;  %v2609_v22 = vld [vmem:[%s4002_s1 + $0x264] sm:$0xf]  ;;  %v2199_v29 = vor.u32 %v2593_v14, %v2196_v30  ;;  %v2623_v47 = vld [vmem:[%s4002_s1 + $0x2d4] sm:$0xf] }
  0x6c   : >> { %1590 = vmatpush.bf16.msra.mxu3 %v2095_v11  ;;  %v2260_v60 = vld [vmem:[%s4002_s1 + $0x268] sm:$0xf0]  ;;  %v2316_v39 = vld [vmem:[%s4002_s1 + $0x2d8] sm:$0xf0]  ;;  %v2391_v49 = vor.u32 %v2641_v42, %v2388_v33  ;;  %v2591_v50 = vld [vmem:[%s4002_s1 + $0x1d4] sm:$0xf]  ;;  %v3720_v52 = vsel %vm462_vm2, %v461_v57, %v374_v19  ;;  %v278_v11 = vor.u32 %v277_v32, %v273_v16 }
  0x6d   : >> { %1552 = vmatpush.bf16.msra.mxu1 %v1967_v41  ;;  %v2188_v51 = vld [vmem:[%s4002_s1 + $0x1d8] sm:$0xf0]  ;;  %v2263_v56 = vor.u32 %v2609_v22, %v2260_v60  ;;  %v2639_v62 = vld [vmem:[%s4002_s1 + $0x354] sm:$0xf]  ;;  %v2319_v2 = vor.u32 %v2623_v47, %v2316_v39  ;;  %v2621_v48 = vld [vmem:[%s4002_s1 + $0x2c4] sm:$0xf] }
  0x6e   : >> { %1534 = vmatpush.bf16.msra.mxu0 %v2467_v5  ;;  %v2380_v63 = vld [vmem:[%s4002_s1 + $0x358] sm:$0xf0]  ;;  %v2191_v3 = vor.u32 %v2591_v50, %v2188_v51  ;;  %v2607_v9 = vld [vmem:[%s4002_s1 + $0x254] sm:$0xf]  ;;  %v2308_v36 = vld [vmem:[%s4002_s1 + $0x2c8] sm:$0xf0] }
  0x6f   : >> { %1572 = vmatpush.bf16.msra.mxu2 %v2023_v34  ;;  %v2252_v41 = vld [vmem:[%s4002_s1 + $0x258] sm:$0xf0]  ;;  %v2383_v10 = vor.u32 %v2639_v62, %v2380_v63  ;;  %v2589_v34 = vld [vmem:[%s4002_s1 + $0x1c4] sm:$0xf]  ;;  %v2180_v43 = vld [vmem:[%s4002_s1 + $0x1c8] sm:$0xf0]  ;;  %v2311_v6 = vor.u32 %v2621_v48, %v2308_v36 }
  0x70   : >> { %1591 = vmatpush.bf16.msra.mxu3 %v2087_v21  ;;  %v2637_v58 = vld [vmem:[%s4002_s1 + $0x344] sm:$0xf]  ;;  %v2372_v7 = vld [vmem:[%s4002_s1 + $0x348] sm:$0xf0]  ;;  %v434_v5 = vshrl.u32 %v278_v11, 16  ;;  %v437_v31 = vshll.u32 %v278_v11, 16  ;;  %v2183_v18 = vor.u32 %v2589_v34, %v2180_v43 }
  0x71   : >> { %1553 = vmatpush.bf16.msra.mxu1 %v1959_v0  ;;  %1535 = vmatmul.bf16.vlgmr.msra.gmra.mxu0 %v3720_v52  ;;  %v2244_v21 = vld [vmem:[%s4002_s1 + $0x248] sm:$0xf0]  ;;  %v2375_v24 = vor.u32 %v2637_v58, %v2372_v7  ;;  %v2300_v37 = vld [vmem:[%s4002_s1 + $0x2b8] sm:$0xf0]  ;;  %v2587_v16 = vld [vmem:[%s4002_s1 + $0x1b4] sm:$0xf] }
  0x72   : >> { %1603 = vmatpush.bf16.msrb.mxu0 %v2207_v59  ;;  %v2619_v59 = vld [vmem:[%s4002_s1 + $0x2b4] sm:$0xf]  ;;  %v2172_v0 = vld [vmem:[%s4002_s1 + $0x1b8] sm:$0xf0]  ;;  %v439_v14 = vrot.slane %v437_v31, 6  ;;  %vm1777_vm9 = vcmask 1047556  }
  0x73   : >> { %1641 = vmatpush.bf16.msrb.mxu2 %v2335_v55  ;;  %1592 = vmatmul.bf16.vlgmr.msra.gmra.mxu3 %v3142_v28  ;;  %v2255_v55 = vor.u32 %v2607_v9, %v2252_v41  ;;  %v2605_v28 = vld [vmem:[%s4002_s1 + $0x244] sm:$0xf]  ;;  %v2635_v30 = vld [vmem:[%s4002_s1 + $0x334] sm:$0xf]  ;;  %v2364_v32 = vld [vmem:[%s4002_s1 + $0x338] sm:$0xf0]  ;;  %v2303_v42 = vor.u32 %v2619_v59, %v2300_v37  ;;  %v2175_v33 = vor.u32 %v2587_v16, %v2172_v0 }
  0x74   : >> { %1660 = vmatpush.bf16.msrb.mxu3 %v2399_v44  ;;  %v436_v44 = vrot.slane %v434_v5, 5  ;;  %v2236_v57 = vld [vmem:[%s4002_s1 + $0x238] sm:$0xf0]  ;;  %v2292_v22 = vld [vmem:[%s4002_s1 + $0x2a8] sm:$0xf0] }
  0x75   : >> { %1622 = vmatpush.bf16.msrb.mxu1 %v2271_v20  ;;  %v2247_v20 = vor.u32 %v2605_v28, %v2244_v21  ;;  %v2585_v60 = vld [vmem:[%s4002_s1 + $0x1a4] sm:$0xf]  ;;  %v2228_v63 = vld [vmem:[%s4002_s1 + $0x228] sm:$0xf0]  ;;  %v2615_v11 = vld [vmem:[%s4002_s1 + $0x294] sm:$0xf] }
  0x76   : >> { %1604 = vmatpush.bf16.msrb.mxu0 %v2199_v29  ;;  %v2164_v29 = vld [vmem:[%s4002_s1 + $0x1a8] sm:$0xf0]  ;;  %v440_v47 = vor.u32 %v439_v14, %v436_v44  ;;  %v2633_v39 = vld [vmem:[%s4002_s1 + $0x324] sm:$0xf]  ;;  %v2583_v9 = vld [vmem:[%s4002_s1 + $0x194] sm:$0xf] }
  0x77   : >> { %1642 = vmatpush.bf16.msrb.mxu2 %v2327_v45  ;;  %1554 = vmatmul.bf16.vlgmr.msra.gmra.mxu1 %v3049_v12  ;;  %v2603_v12 = vld [vmem:[%s4002_s1 + $0x234] sm:$0xf]  ;;  %v2617_v45 = vld [vmem:[%s4002_s1 + $0x2a4] sm:$0xf]  ;;  %v2156_v41 = vld [vmem:[%s4002_s1 + $0x198] sm:$0xf0] }
  0x78   : >> { %1661 = vmatpush.bf16.msrb.mxu3 %v2391_v49  ;;  %1573 = vmatmul.bf16.vlgmr.msra.gmra.mxu2 %v3128_v8  ;;  %v2367_v8 = vor.u32 %v2635_v30, %v2364_v32  ;;  %v2356_v49 = vld [vmem:[%s4002_s1 + $0x328] sm:$0xf0]  ;;  %v2239_v50 = vor.u32 %v2603_v12, %v2236_v57  ;;  %v2295_v51 = vor.u32 %v2617_v45, %v2292_v22  ;;  %v2601_v62 = vld [vmem:[%s4002_s1 + $0x224] sm:$0xf]  ;;  %v2348_v36 = vld [vmem:[%s4002_s1 + $0x318] sm:$0xf0] }
  0x79   : >> { %1623 = vmatpush.bf16.msrb.mxu1 %v2263_v56  ;;  %v2167_v56 = vor.u32 %v2585_v60, %v2164_v29  ;;  %v3826_v48 = vsel %vm3185_vm6, %v374_v19, %v440_v47  ;;  %v2231_v34 = vor.u32 %v2601_v62, %v2228_v63  ;;  %v2599_v43 = vld [vmem:[%s4002_s1 + $0x214] sm:$0xf]  ;;  %v2159_v38 = vor.u32 %v2583_v9, %v2156_v41  ;;  %v2220_v19 = vld [vmem:[%s4002_s1 + $0x218] sm:$0xf0]  ;;  %v2613_v58 = vld [vmem:[%s4002_s1 + $0x284] sm:$0xf] }
  0x7a   : >> { %1605 = vmatpush.bf16.msrb.mxu0 %v2191_v3  ;;  %v2284_v3 = vld [vmem:[%s4002_s1 + $0x298] sm:$0xf0]  ;;  %v2276_v7 = vld [vmem:[%s4002_s1 + $0x288] sm:$0xf0]  ;;  %v2581_v31 = vld [vmem:[%s4002_s1 + $0x184] sm:$0xf]  ;;  %v2223_v59 = vor.u32 %v2599_v43, %v2220_v19 }
  0x7b   : >> { %1643 = vmatpush.bf16.msrb.mxu2 %v2319_v2  ;;  %v2359_v2 = vor.u32 %v2633_v39, %v2356_v49  ;;  %v2287_v13 = vor.u32 %v2615_v11, %v2284_v3  ;;  %v2659_v28 = vld [vmem:[%s4002_s1 + $0x3f4] sm:$0xf]  ;;  %v2460_v21 = vld [vmem:[%s4002_s1 + $0x3f8] sm:$0xf0]  ;;  %v2279_v37 = vor.u32 %v2613_v58, %v2276_v7  ;;  %v2597_v0 = vld [vmem:[%s4002_s1 + $0x204] sm:$0xf] }
  0x7c   : >> { %1662 = vmatpush.bf16.msrb.mxu3 %v2383_v10  ;;  %v2631_v10 = vld [vmem:[%s4002_s1 + $0x314] sm:$0xf]  ;;  %v2212_v44 = vld [vmem:[%s4002_s1 + $0x208] sm:$0xf0]  ;;  %v2463_v30 = vor.u32 %v2659_v28, %v2460_v21  ;;  %v2673_v12 = vld [vmem:[%s4002_s1 + $0x464] sm:$0xf] }
  0x7d   : >> { %1624 = vmatpush.bf16.msrb.mxu1 %v2255_v55  ;;  %v2351_v5 = vor.u32 %v2631_v10, %v2348_v36  ;;  %v2148_v55 = vld [vmem:[%s4002_s1 + $0x188] sm:$0xf0]  ;;  %v2671_v22 = vld [vmem:[%s4002_s1 + $0x454] sm:$0xf]  ;;  %v2508_v60 = vld [vmem:[%s4002_s1 + $0x458] sm:$0xf0] }
  0x7e   : >> { %1606 = vmatpush.bf16.msrb.mxu0 %v2183_v18  ;;  %v2340_v18 = vld [vmem:[%s4002_s1 + $0x308] sm:$0xf0]  ;;  %v2151_v16 = vor.u32 %v2581_v31, %v2148_v55  ;;  %v2653_v47 = vld [vmem:[%s4002_s1 + $0x3c4] sm:$0xf]  ;;  %v2511_v49 = vor.u32 %v2671_v22, %v2508_v60  ;;  %v2651_v62 = vld [vmem:[%s4002_s1 + $0x3b4] sm:$0xf] }
  0x7f   : >> { %1644 = vmatpush.bf16.msrb.mxu2 %v2311_v6  ;;  %v2629_v6 = vld [vmem:[%s4002_s1 + $0x304] sm:$0xf]  ;;  %v2436_v39 = vld [vmem:[%s4002_s1 + $0x3c8] sm:$0xf0]  ;;  %v2428_v63 = vld [vmem:[%s4002_s1 + $0x3b8] sm:$0xf0] }
  0x80   : >> { %1663 = vmatpush.bf16.msrb.mxu3 %v2375_v24  ;;  %v2675_v24 = vld [vmem:[%s4002_s1 + $0x474] sm:$0xf]  ;;  %v2343_v14 = vor.u32 %v2629_v6, %v2340_v18  ;;  %v2649_v3 = vld [vmem:[%s4002_s1 + $0x3a4] sm:$0xf]  ;;  %v2420_v9 = vld [vmem:[%s4002_s1 + $0x3a8] sm:$0xf0] }
  0x81   : >> { %1625 = vmatpush.bf16.msrb.mxu1 %v2247_v20  ;;  %1540 = vmatmul.bf16.gmra.mxu0 %v3826_v48  ;;  %v2657_v20 = vld [vmem:[%s4002_s1 + $0x3e4] sm:$0xf]  ;;  %v2423_v36 = vor.u32 %v2649_v3, %v2420_v9  ;;  %v2404_v7 = vld [vmem:[%s4002_s1 + $0x388] sm:$0xf0]  ;;  %vm1778_vm10 = vsmask.f32 7424 }
  0x82   : >> { %1607 = vmatpush.bf16.msrb.mxu0 %v2175_v33  ;;  %v2215_v33 = vor.u32 %v2597_v0, %v2212_v44  ;;  %v2665_v10 = vld [vmem:[%s4002_s1 + $0x424] sm:$0xf]  ;;  %v2468_v55 = vld [vmem:[%s4002_s1 + $0x408] sm:$0xf0]  ;;  %vm1779_vm11 = vmand %vm1777_vm9, %vm1778_vm10 }
  0x83   : >> { %1645 = vmatpush.bf16.msrb.mxu2 %v2303_v42  ;;  %1597 = vmatmul.bf16.gmra.mxu3 %v3298_v25  ;;  %v2524_v25 = vld [vmem:[%s4002_s1 + $0x478] sm:$0xf0]  ;;  %v2452_v42 = vld [vmem:[%s4002_s1 + $0x3e8] sm:$0xf0]  ;;  %v2645_v58 = vld [vmem:[%s4002_s1 + $0x384] sm:$0xf] }
  0x84   : >> { %1664 = vmatpush.bf16.msrb.mxu3 %v2367_v8  ;;  %v2527_v32 = vor.u32 %v2675_v24, %v2524_v25  ;;  %v2455_v57 = vor.u32 %v2657_v20, %v2452_v42  ;;  %v2444_v8 = vld [vmem:[%s4002_s1 + $0x3d8] sm:$0xf0]  ;;  %v2661_v31 = vld [vmem:[%s4002_s1 + $0x404] sm:$0xf]  ;;  %v2407_v6 = vor.u32 %v2645_v58, %v2404_v7  ;;  %vm1780_vm12 = vmor %vm1779_vm11, %vm3013_vm3 }
  0x85   : >> { %1626 = vmatpush.bf16.msrb.mxu1 %v2239_v50  ;;  %v2669_v50 = vld [vmem:[%s4002_s1 + $0x444] sm:$0xf]  ;;  %v2471_v18 = vor.u32 %v2661_v31, %v2468_v55 }
  0x86   : >> { %1608 = vmatpush.bf16.msrb.mxu0 %v2167_v56  ;;  %v2439_v56 = vor.u32 %v2653_v47, %v2436_v39 }
  0x87   : >> { %1646 = vmatpush.bf16.msrb.mxu2 %v2295_v51  ;;  %1559 = vmatmul.bf16.gmra.mxu1 %v3216_v1  ;;  %v2516_v1 = vld [vmem:[%s4002_s1 + $0x468] sm:$0xf0] }
  0x88   : >> { %1665 = vmatpush.bf16.msrb.mxu3 %v2359_v2  ;;  %1578 = vmatmul.bf16.gmra.mxu2 %v3283_v46  ;;  %v2519_v45 = vor.u32 %v2673_v12, %v2516_v1  ;;  %v2655_v46 = vld [vmem:[%s4002_s1 + $0x3d4] sm:$0xf]  ;;  %v2500_v51 = vld [vmem:[%s4002_s1 + $0x448] sm:$0xf0]  ;;  %v2431_v2 = vor.u32 %v2651_v62, %v2428_v63 }
  0x89   : >> { %1627 = vmatpush.bf16.msrb.mxu1 %v2231_v34  ;;  %v2447_v29 = vor.u32 %v2655_v46, %v2444_v8  ;;  %v2503_v11 = vor.u32 %v2669_v50, %v2500_v51  ;;  %v2647_v34 = vld [vmem:[%s4002_s1 + $0x394] sm:$0xf] }
  0x8a   : >> { %1609 = vmatpush.bf16.msrb.mxu0 %v2159_v38  ;;  %v2476_v38 = vld [vmem:[%s4002_s1 + $0x418] sm:$0xf0] }
  0x8b   : >> { %1647 = vmatpush.bf16.msrb.mxu2 %v2287_v13  ;;  %v2663_v13 = vld [vmem:[%s4002_s1 + $0x414] sm:$0xf] }
  0x8c   : >> { %1666 = vmatpush.bf16.msrb.mxu3 %v2351_v5  ;;  %v2479_v5 = vor.u32 %v2663_v13, %v2476_v38 }
  0x8d   : >> { %1628 = vmatpush.bf16.msrb.mxu1 %v2223_v59 }
  0x8e   : >> { %1610 = vmatpush.bf16.msrb.mxu0 %v2151_v16 }
  0x8f   : >> { %1648 = vmatpush.bf16.msrb.mxu2 %v2279_v37 }
  0x90   : >> { %1667 = vmatpush.bf16.msrb.mxu3 %v2343_v14 }
  0x91   : >> { %1629 = vmatpush.bf16.msrb.mxu1 %v2215_v33  ;;  %1611 = vmatmul.bf16.vlgmr.msrb.gmra.mxu0 %v3076_v27  ;;  %v2667_v27 = vld [vmem:[%s4002_s1 + $0x434] sm:$0xf] }
  0x92   : >> { %1679 = vmatpush.bf16.msra.mxu0 %v2463_v30 }
  0x93   : >> { %2678 = vmatpush.bf16.msra.mxu2 %v2463_v30  ;;  %1668 = vmatmul.bf16.vlgmr.msrb.gmra.mxu3 %v3474_v53  ;;  %v2492_v53 = vld [vmem:[%s4002_s1 + $0x438] sm:$0xf0] }
  0x94   : >> { %2686 = vmatpush.bf16.msra.mxu3 %v2527_v32  ;;  %v2495_v41 = vor.u32 %v2667_v27, %v2492_v53 }
  0x95   : >> { %1698 = vmatpush.bf16.msra.mxu1 %v2527_v32 }
  0x96   : >> { %1680 = vmatpush.bf16.msra.mxu0 %v2455_v57 }
  0x97   : >> { %2679 = vmatpush.bf16.msra.mxu2 %v2455_v57  ;;  %1630 = vmatmul.bf16.vlgmr.msrb.gmra.mxu1 %v3410_v35  ;;  %v2484_v35 = vld [vmem:[%s4002_s1 + $0x428] sm:$0xf0] }
  0x98   : >> { %2687 = vmatpush.bf16.msra.mxu3 %v2519_v45  ;;  %1649 = vmatmul.bf16.vlgmr.msrb.gmra.mxu2 %v3491_v40  ;;  %v2412_v40 = vld [vmem:[%s4002_s1 + $0x398] sm:$0xf0]  ;;  %v2487_v43 = vor.u32 %v2665_v10, %v2484_v35 }
  0x99   : >> { %1699 = vmatpush.bf16.msra.mxu1 %v2519_v45  ;;  %v2415_v19 = vor.u32 %v2647_v34, %v2412_v40 }
  0x9a   : >> { %1681 = vmatpush.bf16.msra.mxu0 %v2447_v29 }
  0x9b   : >> { %2680 = vmatpush.bf16.msra.mxu2 %v2447_v29 }
  0x9c   : >> { %2688 = vmatpush.bf16.msra.mxu3 %v2511_v49 }
  0x9d   : >> { %1700 = vmatpush.bf16.msra.mxu1 %v2511_v49 }
  0x9e   : >> { %1682 = vmatpush.bf16.msra.mxu0 %v2439_v56 }
  0x9f   : >> { %2681 = vmatpush.bf16.msra.mxu2 %v2439_v56 }
  0xa0   : >> { %2689 = vmatpush.bf16.msra.mxu3 %v2503_v11 }
  0xa1   : >> { %1701 = vmatpush.bf16.msra.mxu1 %v2503_v11  ;;  %1616 = vmatmul.bf16.gmra.mxu0 %v3243_v15 }
  0xa2   : >> { %1683 = vmatpush.bf16.msra.mxu0 %v2431_v2 }
  0xa3   : >> { %2682 = vmatpush.bf16.msra.mxu2 %v2431_v2  ;;  %1673 = vmatmul.bf16.gmra.mxu3 %v3637_v26 }
  0xa4   : >> { %2690 = vmatpush.bf16.msra.mxu3 %v2495_v41 }
  0xa5   : >> { %1702 = vmatpush.bf16.msra.mxu1 %v2495_v41 }
  0xa6   : >> { %1684 = vmatpush.bf16.msra.mxu0 %v2423_v36 }
  0xa7   : >> { %2683 = vmatpush.bf16.msra.mxu2 %v2423_v36  ;;  %1635 = vmatmul.bf16.gmra.mxu1 %v3568_v17 }
  0xa8   : >> { %2691 = vmatpush.bf16.msra.mxu3 %v2487_v43  ;;  %1654 = vmatmul.bf16.gmra.mxu2 %v3622_v23 }
  0xa9   : >> { %1703 = vmatpush.bf16.msra.mxu1 %v2487_v43 }
  0xaa   : >> { %1685 = vmatpush.bf16.msra.mxu0 %v2415_v19 }
  0xab   : >> { %2684 = vmatpush.bf16.msra.mxu2 %v2415_v19 }
  0xac   : >> { %2692 = vmatpush.bf16.msra.mxu3 %v2479_v5 }
  0xad   : >> { %1704 = vmatpush.bf16.msra.mxu1 %v2479_v5 }
  0xae   : >> { %1686 = vmatpush.bf16.msra.mxu0 %v2407_v6  ;;  %v1384_v28 = vpop.f32.mrf.mxu0 }
  0xaf   : >> { %2685 = vmatpush.bf16.msra.mxu2 %v2407_v6 }
  0xb0   : >> { %2693 = vmatpush.bf16.msra.mxu3 %v2471_v18 }
  0xb1   : >> { %1705 = vmatpush.bf16.msra.mxu1 %v2471_v18  ;;  %1687 = vmatmul.bf16.vlgmr.msra.gmra.mxu0 %v3416_v61 }
  0xb3   : >> { %1711 = vmatmul.bf16.vlgmr.msra.gmra.mxu3 %v3826_v48 }
  0xb4   : >> { %v1403_v15 = vpop.f32.mrf.mxu1 }
  0xb5   : >> { %v1404_v21 = vadd.f32 %v1403_v15, %v1384_v28 }
  0xb6   : >> { %v1441_v26 = vpop.f32.mrf.mxu3  ;;  %v1386_v59 = vpop.f32.mrf.mxu0 }
  0xb7   : >> { %1706 = vmatmul.bf16.vlgmr.msra.gmra.mxu1 %v3720_v52 }
  0xb8   : >> { %1692 = vmatmul.bf16.vlgmr.msra.gmra.mxu2 %v3580_v4 }
  0xbb   : >> { %v1422_v24 = vpop.f32.mrf.mxu2 }
  0xbc   : >> { %v1423_v17 = vadd.f32 %v1422_v24, %v1404_v21  ;;  %v1405_v25 = vpop.f32.mrf.mxu1 }
  0xbd   : >> { %v1406_v37 = vadd.f32 %v1405_v25, %v1386_v59 }
  0xbe   : >> { %v1443_v23 = vpop.f32.mrf.mxu3  ;;  %v1389_v16 = vpop.f32.mrf.mxu0  ;;  %v1442_v0 = vadd.f32 %v1441_v26, %v1423_v17 }
  0xc3   : >> { %v1424_v44 = vpop.f32.mrf.mxu2 }
  0xc4   : >> { %v1425_v14 = vadd.f32 %v1424_v44, %v1406_v37  ;;  %v1408_v61 = vpop.f32.mrf.mxu1 }
  0xc5   : >> { %v1409_v30 = vadd.f32 %v1408_v61, %v1389_v16 }
  0xc6   : >> { %v1446_v48 = vpop.f32.mrf.mxu3  ;;  %v1391_v32 = vpop.f32.mrf.mxu0  ;;  %v1444_v20 = vadd.f32 %v1443_v23, %v1425_v14 }
  0xcb   : >> { %v1427_v42 = vpop.f32.mrf.mxu2 }
  0xcc   : >> { %v1428_v33 = vadd.f32 %v1427_v42, %v1409_v30  ;;  %v1410_v12 = vpop.f32.mrf.mxu1 }
  0xcd   : >> { %v1411_v52 = vadd.f32 %v1410_v12, %v1391_v32 }
  0xce   : >> { %v1448_v1 = vpop.f32.mrf.mxu3  ;;  %v1447_v4 = vadd.f32 %v1446_v48, %v1428_v33  ;;  %v1460_v57 = vpop.f32.mrf.mxu0 }
  0xcf   : >> { %v1461_v45 = vadd.f32 %v1460_v57, %v1442_v0 }
  0xd3   : >> { %v1429_v46 = vpop.f32.mrf.mxu2 }
  0xd4   : >> { %v1430_v8 = vadd.f32 %v1429_v46, %v1411_v52  ;;  %v1479_v22 = vpop.f32.mrf.mxu1 }
  0xd5   : >> { %v1480_v60 = vadd.f32 %v1479_v22, %v1461_v45 }
  0xd6   : >> { %v1449_v29 = vadd.f32 %v1448_v1, %v1430_v8  ;;  %v1517_v47 = vpop.f32.mrf.mxu3  ;;  %v1462_v39 = vpop.f32.mrf.mxu0 }
  0xd7   : >> { %v1463_v49 = vadd.f32 %v1462_v39, %v1444_v20 }
  0xdb   : >> { %v1498_v50 = vpop.f32.mrf.mxu2 }
  0xdc   : >> { %v1499_v51 = vadd.f32 %v1498_v50, %v1480_v60  ;;  %v1481_v56 = vpop.f32.mrf.mxu1 }
  0xdd   : >> { %v1482_v62 = vadd.f32 %v1481_v56, %v1463_v49 }
  0xde   : >> { %v1518_v63 = vadd.f32 %v1517_v47, %v1499_v51  ;;  %v1519_v11 = vpop.f32.mrf.mxu3  ;;  %v1465_v27 = vpop.f32.mrf.mxu0 }
  0xdf   : >> { %v1466_v53 = vadd.f32 %v1465_v27, %v1447_v4 }
  0xe3   : >> { %v1500_v2 = vpop.f32.mrf.mxu2 }
  0xe4   : >> { %v1501_v3 = vadd.f32 %v1500_v2, %v1482_v62  ;;  %v1484_v9 = vpop.f32.mrf.mxu1 }
  0xe5   : >> { %v1485_v41 = vadd.f32 %v1484_v9, %v1466_v53 }
  0xe6   : >> { %v1520_v10 = vadd.f32 %v1519_v11, %v1501_v3  ;;  %v1522_v35 = vpop.f32.mrf.mxu3  ;;  %v1467_v36 = vpop.f32.mrf.mxu0 }
  0xe7   : >> { %v1468_v34 = vadd.f32 %v1467_v36, %v1449_v29 }
  0xeb   : >> { %v1503_v40 = vpop.f32.mrf.mxu2 }
  0xec   : >> { %v1504_v43 = vadd.f32 %v1503_v40, %v1485_v41  ;;  %v1486_v13 = vpop.f32.mrf.mxu1 }
  0xed   : >> { %v1487_v38 = vadd.f32 %v1486_v13, %v1468_v34 }
  0xee   : >> { %v1523_v19 = vadd.f32 %v1522_v35, %v1504_v43  ;;  %v1524_v58 = vpop.f32.mrf.mxu3  ;;  %v1536_v7 = vpop.f32.mrf.mxu0 }
  0xef   : >> { %v1537_v5 = vadd.f32 %v1536_v7, %v1518_v63 }
  0xf1   : >> { %v1717_v21 = vmax.f32 %v1537_v5, 0.0 }
  0xf3   : >> { %v1505_v31 = vpop.f32.mrf.mxu2  ;;  %v1730_v17 = vrot.slane %v1717_v21, 7 }
  0xf4   : >> { %v1506_v55 = vadd.f32 %v1505_v31, %v1487_v38  ;;  %v1555_v6 = vpop.f32.mrf.mxu1 }
  0xf6   : >> { %v1525_v18 = vadd.f32 %v1524_v58, %v1506_v55  ;;  %v1593_v28 = vpop.f32.mrf.mxu3  ;;  %v1538_v15 = vpop.f32.mrf.mxu0 }
  0xf7   : >> { %v1539_v26 = vadd.f32 %v1538_v15, %v1520_v10 }
  0xf9   : >> { %v1719_v59 = vmax.f32 %v1539_v26, 0.0 }
  0xfb   : >> { %v1574_v24 = vpop.f32.mrf.mxu2  ;;  %v1731_v25 = vrot.slane %v1719_v59, 7 }
  0xfc   : >> { %v1557_v37 = vpop.f32.mrf.mxu1  ;;  %v1575_v34 = vadd.f32 %v1574_v24, %v1555_v6 }
  0xfd   : >> { %v1732_v23 = vsel %vm1729_vm7, %v1730_v17, %v1731_v25 }
  0xfe   : >> { %v1595_v16 = vpop.f32.mrf.mxu3  ;;  %v3977_v0 = vmax.f32 %v1717_v21, %v1732_v23  ;;  %v1541_v44 = vpop.f32.mrf.mxu0 }
  0xff   : >> { %v1542_v14 = vadd.f32 %v1541_v44, %v1523_v19  ;;  %v1594_v19 = vadd.f32 %v1593_v28, %v1575_v34 }
 0x101   : >> { %v1721_v61 = vmax.f32 %v1542_v14, 0.0 }
 0x103   : >> { %v1576_v30 = vpop.f32.mrf.mxu2  ;;  %v1744_v48 = vrot.slane %v1721_v61, 7 }
 0x104   : >> { %v1560_v32 = vpop.f32.mrf.mxu1  ;;  %v1577_v10 = vadd.f32 %v1576_v30, %v1557_v37 }
 0x105   : >> { %v1754_v20 = vmax.f32 %v1719_v59, %v1744_v48 }
 0x106   : >> { %v1598_v42 = vpop.f32.mrf.mxu3  ;;  %v1543_v33 = vpop.f32.mrf.mxu0  ;;  %v1596_v43 = vadd.f32 %v1595_v16, %v1577_v10  ;;  %v1781_v10 = vld [vmem:[%s1776_s3] sm:$0xff] }
 0x107   : >> { %v1544_v12 = vadd.f32 %v1543_v33, %v1525_v18  ;;  %v1763_v60 = vrot.slane %v1754_v20, 6 }
 0x109   : >> { %v1723_v52 = vmax.f32 %v1544_v12, 0.0 }
 0x10b   : >> { %v1579_v1 = vpop.f32.mrf.mxu2  ;;  %v1746_v4 = vrot.slane %v1723_v52, 7 }
 0x10c   : >> { %v1562_v57 = vpop.f32.mrf.mxu1  ;;  %v1580_v41 = vadd.f32 %v1579_v1, %v1560_v32 }
 0x10d   : >> { %v1747_v45 = vsel %vm1729_vm7, %v1744_v48, %v1746_v4 }
 0x10e   : >> { %v1600_v46 = vpop.f32.mrf.mxu3  ;;  %v1756_v8 = vmax.f32 %v1721_v61, %v1747_v45  ;;  %v1612_v22 = vpop.f32.mrf.mxu0  ;;  %v1599_v40 = vadd.f32 %v1598_v42, %v1580_v41 }
 0x10f   : >> { %v1613_v31 = vadd.f32 %v1612_v22, %v1594_v19 }
 0x110   : >> { %v1764_v29 = vrot.slane %v1756_v8, 6 }
 0x112   : >> { %v3981_v47 = vsel %vm1762_vm8, %v1763_v60, %v1764_v29 }
 0x113   : >> { %v1581_v39 = vpop.f32.mrf.mxu2  ;;  %v1771_v49 = vmax.f32 %v3977_v0, %v3981_v47 }
 0x114   : >> { %v1631_v50 = vpop.f32.mrf.mxu1  ;;  %v1582_v5 = vadd.f32 %v1581_v39, %v1562_v57 }
 0x115   : >> { %v1632_v17 = vadd.f32 %v1631_v50, %v1613_v31 }
 0x116   : >> { %v1669_v51 = vpop.f32.mrf.mxu3  ;;  %v1614_v56 = vpop.f32.mrf.mxu0  ;;  %v1601_v26 = vadd.f32 %v1600_v46, %v1582_v5 }
 0x117   : >> { %v1615_v58 = vadd.f32 %v1614_v56, %v1596_v43 }
 0x11b   : >> { %v1650_v62 = vpop.f32.mrf.mxu2 }
 0x11c   : >> { %v1633_v63 = vpop.f32.mrf.mxu1  ;;  %v1651_v23 = vadd.f32 %v1650_v62, %v1632_v17 }
 0x11d   : >> { %v1634_v21 = vadd.f32 %v1633_v63, %v1615_v58 }
 0x11e   : >> { %v1671_v11 = vpop.f32.mrf.mxu3  ;;  %v1617_v27 = vpop.f32.mrf.mxu0  ;;  %v1670_v30 = vadd.f32 %v1669_v51, %v1651_v23 }
 0x11f   : >> { %v1618_v13 = vadd.f32 %v1617_v27, %v1599_v40 }
 0x123   : >> { %v1652_v53 = vpop.f32.mrf.mxu2 }
 0x124   : >> { %v1636_v2 = vpop.f32.mrf.mxu1  ;;  %v1653_v25 = vadd.f32 %v1652_v53, %v1634_v21 }
 0x125   : >> { %v1637_v18 = vadd.f32 %v1636_v2, %v1618_v13 }
 0x126   : >> { %v1674_v3 = vpop.f32.mrf.mxu3  ;;  %v1619_v9 = vpop.f32.mrf.mxu0  ;;  %v1672_v16 = vadd.f32 %v1671_v11, %v1653_v25 }
 0x127   : >> { %v1620_v37 = vadd.f32 %v1619_v9, %v1601_v26 }
 0x12b   : >> { %v1655_v35 = vpop.f32.mrf.mxu2 }
 0x12c   : >> { %v1638_v36 = vpop.f32.mrf.mxu1  ;;  %v1656_v59 = vadd.f32 %v1655_v35, %v1637_v18 }
 0x12d   : >> { %v1639_v28 = vadd.f32 %v1638_v36, %v1620_v37 }
 0x12e   : >> { %v1688_v38 = vpop.f32.mrf.mxu0  ;;  %v1676_v7 = vpop.f32.mrf.mxu3  ;;  %v1675_v6 = vadd.f32 %v1674_v3, %v1656_v59 }
 0x12f   : >> { %v1689_v42 = vadd.f32 %v1688_v38, %v1670_v30 }
 0x133   : >> { %v1657_v55 = vpop.f32.mrf.mxu2 }
 0x134   : >> { %v1707_v15 = vpop.f32.mrf.mxu1  ;;  %v1658_v32 = vadd.f32 %v1657_v55, %v1639_v28 }
 0x135   : >> { %v1708_v1 = vadd.f32 %v1707_v15, %v1689_v42 }
 0x136   : >> { %v1690_v24 = vpop.f32.mrf.mxu0  ;;  %v1712_v14 = vpop.f32.mrf.mxu3  ;;  %v1677_v52 = vadd.f32 %v1676_v7, %v1658_v32 }
 0x137   : >> { %v1691_v48 = vadd.f32 %v1690_v24, %v1672_v16  ;;  %v1718_v60 = vmax.f32 %v1708_v1, 0.0 }
 0x139   : >> { %v1733_v56 = vrot.slane %v1718_v60, 7 }
 0x13b   : >> { %v1693_v44 = vpop.f32.mrf.mxu2 }
 0x13c   : >> { %v1694_v61 = vadd.f32 %v1693_v44, %v1675_v6  ;;  %v1709_v20 = vpop.f32.mrf.mxu1 }
 0x13d   : >> { %v1710_v12 = vadd.f32 %v1709_v20, %v1691_v48 }
 0x13e   : >> { %v1713_v33 = vadd.f32 %v1712_v14, %v1694_v61  ;;  %v1714_v8 = vpop.f32.mrf.mxu3 }
 0x13f   : >> { %v1720_v46 = vmax.f32 %v1710_v12, 0.0 }
 0x140   : >> { %v1722_v4 = vmax.f32 %v1713_v33, 0.0 }
 0x141   : >> { %v1734_v50 = vrot.slane %v1720_v46, 7 }
 0x142   : >> { %v1745_v29 = vrot.slane %v1722_v4, 7 }
 0x143   : >> { %v1695_v57 = vpop.f32.mrf.mxu2  ;;  %v1735_v11 = vsel %vm1729_vm7, %v1733_v56, %v1734_v50 }
 0x144   : >> { %v1696_v45 = vadd.f32 %v1695_v57, %v1677_v52  ;;  %v1755_v62 = vmax.f32 %v1720_v46, %v1745_v29  ;;  %v1739_v3 = vmax.f32 %v1718_v60, %v1735_v11 }
 0x146   : >> { %v1715_v22 = vadd.f32 %v1714_v8, %v1696_v45  ;;  %v1766_v53 = vrot.slane %v1755_v62, 6 }
 0x148   : >> { %v1724_v39 = vmax.f32 %v1715_v22, 0.0 }
 0x14a   : >> { %v1748_v51 = vrot.slane %v1724_v39, 7 }
 0x14c   : >> { %v1749_v63 = vsel %vm1729_vm7, %v1745_v29, %v1748_v51 }
 0x14d   : >> { %v1757_v27 = vmax.f32 %v1722_v4, %v1749_v63 }
 0x14f   : >> { %v1767_v2 = vrot.slane %v1757_v27, 6 }
 0x151   : >> { %v1768_v9 = vsel %vm1762_vm8, %v1766_v53, %v1767_v2 }
 0x152   : >> { %v1772_v41 = vmax.f32 %v1739_v3, %v1768_v9 }
 0x153   : > { %148 = sbr.rel (!%p146_p4) target bundleno = 15 (0xf), region = 86 }
 0x154   : >> { %v1773_v35 = vpack.c.bf16 %v1772_v41, %v1771_v49 }
 0x156   : >> { %v1782_v36 = vsel %vm1780_vm12, %v1773_v35, %v1781_v10 }
 0x157   : >> { %1783 = vst [vmem:[%s1776_s3] sm:$0xff] %v1782_v36 }
 0x158 PF: > { %s12_s9 = sadd.s32 1, %s2721_s9  }
 0x159   : > { %p9_p5 = scmp.ge.s32.totalorder %s12_s9, 4  }
 0x15b   :  { %11 = sbr.rel (!%p9_p5) target bundleno = 1 (0x1), region = 97 }

// kernel: env_classifier_forward.5
= control target key start
LH: loop header
LB: loop body
LE: loop exit
PB: predicated region body
PF: predicated region fallthrough
CT: control target
= control target key end

     0   :  { %vm7956_vm0 = vcmask 80896   ;;  %s14459_s1 = inlined_call_operand.vmem [shape: bf16[12544,10], index: 1, kind: input, shape index: {}]   ;;  %s14460_s0 = inlined_call_operand.vmem [shape: bf16[8,12544], index: 0, kind: input, shape index: {}]   ;;  %s14461_s2 = inlined_call_operand.vmem [shape: f32[1,10], index: 2, kind: input, shape index: {}]   ;;  %s14462_s3 = inlined_call_operand.vmem [shape: f32[8,10], index: 3, kind: output, shape index: {}]  }
   0x1   :  { %v11105_v0 = vld [vmem:[%s14459_s1 + $0x38] sm:$0xff]  ;;  %v11104_v4 = vld [vmem:[%s14459_s1 + $0x30] sm:$0xff]  ;;  %v11103_v8 = vld [vmem:[%s14459_s1 + $0x28] sm:$0xff] }
   0x2   :  { %v11113_v1 = vld [vmem:[%s14459_s1 + $0x78] sm:$0xff]  ;;  %6682 = vmatpush.bf16.msra.mxu0 %v11105_v0  ;;  %v11112_v5 = vld [vmem:[%s14459_s1 + $0x70] sm:$0xff]  ;;  %v11111_v9 = vld [vmem:[%s14459_s1 + $0x68] sm:$0xff] }
   0x3   :  { %v11121_v2 = vld [vmem:[%s14459_s1 + $0xb8] sm:$0xff]  ;;  %6695 = vmatpush.bf16.msra.mxu1 %v11113_v1  ;;  %v11120_v6 = vld [vmem:[%s14459_s1 + $0xb0] sm:$0xff]  ;;  %v11119_v10 = vld [vmem:[%s14459_s1 + $0xa8] sm:$0xff] }
   0x4   :  { %v11129_v3 = vld [vmem:[%s14459_s1 + $0xf8] sm:$0xff]  ;;  %6708 = vmatpush.bf16.msra.mxu2 %v11121_v2  ;;  %v11128_v7 = vld [vmem:[%s14459_s1 + $0xf0] sm:$0xff]  ;;  %v11127_v11 = vld [vmem:[%s14459_s1 + $0xe8] sm:$0xff] }
   0x5   :  { %6721 = vmatpush.bf16.msra.mxu3 %v11129_v3  ;;  %v11102_v12 = vld [vmem:[%s14459_s1 + $0x20] sm:$0xff]  ;;  %v11101_v16 = vld [vmem:[%s14459_s1 + $0x18] sm:$0xff]  ;;  %v11100_v20 = vld [vmem:[%s14459_s1 + $0x10] sm:$0xff] }
   0x6   :  { %6683 = vmatpush.bf16.msra.mxu0 %v11104_v4  ;;  %v11110_v13 = vld [vmem:[%s14459_s1 + $0x60] sm:$0xff]  ;;  %v11109_v17 = vld [vmem:[%s14459_s1 + $0x58] sm:$0xff]  ;;  %v11108_v21 = vld [vmem:[%s14459_s1 + $0x50] sm:$0xff] }
   0x7   :  { %6696 = vmatpush.bf16.msra.mxu1 %v11112_v5  ;;  %v11118_v14 = vld [vmem:[%s14459_s1 + $0xa0] sm:$0xff]  ;;  %v11117_v18 = vld [vmem:[%s14459_s1 + $0x98] sm:$0xff]  ;;  %v11116_v22 = vld [vmem:[%s14459_s1 + $0x90] sm:$0xff] }
   0x8   :  { %6709 = vmatpush.bf16.msra.mxu2 %v11120_v6  ;;  %v11126_v15 = vld [vmem:[%s14459_s1 + $0xe0] sm:$0xff]  ;;  %v11125_v19 = vld [vmem:[%s14459_s1 + $0xd8] sm:$0xff]  ;;  %v11124_v23 = vld [vmem:[%s14459_s1 + $0xd0] sm:$0xff] }
   0x9   :  { %6722 = vmatpush.bf16.msra.mxu3 %v11128_v7  ;;  %v11099_v24 = vld [vmem:[%s14459_s1 + $0x8] sm:$0xff]  ;;  %v14_v26 = vld [vmem:[%s14460_s0] sm:$0xff]  ;;  %v11137_v35 = vld [vmem:[%s14459_s1 + $0x138] sm:$0xff] }
   0xa   :  { %6684 = vmatpush.bf16.msra.mxu0 %v11103_v8  ;;  %v11107_v25 = vld [vmem:[%s14459_s1 + $0x48] sm:$0xff]  ;;  %v1684_v30 = vunpack.c.l.b16 %v14_v26  ;;  %v11098_v31 = vld [vmem:[%s14459_s1] sm:$0xff]  ;;  %v1685_v36 = vunpack.c.h.b16 %v14_v26  ;;  %v11145_v37 = vld [vmem:[%s14459_s1 + $0x178] sm:$0xff] }
   0xb   :  { %6697 = vmatpush.bf16.msra.mxu1 %v11111_v9  ;;  %v11115_v27 = vld [vmem:[%s14459_s1 + $0x88] sm:$0xff]  ;;  %v11106_v32 = vld [vmem:[%s14459_s1 + $0x40] sm:$0xff]  ;;  %v11153_v38 = vld [vmem:[%s14459_s1 + $0x1b8] sm:$0xff] }
   0xc   :  { %6710 = vmatpush.bf16.msra.mxu2 %v11119_v10  ;;  %v11123_v28 = vld [vmem:[%s14459_s1 + $0xc8] sm:$0xff]  ;;  %v11114_v34 = vld [vmem:[%s14459_s1 + $0x80] sm:$0xff]  ;;  %v1782_v40 = vpack.c.b16 %v1684_v30, %v1684_v30  ;;  %v11161_v42 = vld [vmem:[%s14459_s1 + $0x1f8] sm:$0xff]  ;;  %v1783_v45 = vpack.c.b16 %v1685_v36, %v1685_v36 }
   0xd   :  { %6723 = vmatpush.bf16.msra.mxu3 %v11127_v11  ;;  %v15_v29 = vld [vmem:[%s14460_s0 + $0x8] sm:$0xff]  ;;  %v11122_v39 = vld [vmem:[%s14459_s1 + $0xc0] sm:$0xff]  ;;  %v11136_v44 = vld [vmem:[%s14459_s1 + $0x130] sm:$0xff] }
   0xe   :  { %6685 = vmatpush.bf16.msra.mxu0 %v11102_v12  ;;  %v1686_v33 = vunpack.c.l.b16 %v15_v29  ;;  %v1687_v41 = vunpack.c.h.b16 %v15_v29  ;;  %v11144_v46 = vld [vmem:[%s14459_s1 + $0x170] sm:$0xff]  ;;  %v11135_v50 = vld [vmem:[%s14459_s1 + $0x128] sm:$0xff]  ;;  %v11134_v54 = vld [vmem:[%s14459_s1 + $0x120] sm:$0xff] }
   0xf   :  { %6698 = vmatpush.bf16.msra.mxu1 %v11110_v13  ;;  %v11152_v47 = vld [vmem:[%s14459_s1 + $0x1b0] sm:$0xff]  ;;  %v11143_v51 = vld [vmem:[%s14459_s1 + $0x168] sm:$0xff]  ;;  %v11142_v55 = vld [vmem:[%s14459_s1 + $0x160] sm:$0xff] }
  0x10   :  { %6711 = vmatpush.bf16.msra.mxu2 %v11118_v14  ;;  %v1784_v43 = vpack.c.b16 %v1686_v33, %v1686_v33  ;;  %v1785_v48 = vpack.c.b16 %v1687_v41, %v1687_v41  ;;  %v11160_v49 = vld [vmem:[%s14459_s1 + $0x1f0] sm:$0xff]  ;;  %v11151_v52 = vld [vmem:[%s14459_s1 + $0x1a8] sm:$0xff]  ;;  %v11150_v56 = vld [vmem:[%s14459_s1 + $0x1a0] sm:$0xff] }
  0x11   :  { %6724 = vmatpush.bf16.msra.mxu3 %v11126_v15  ;;  %v11159_v53 = vld [vmem:[%s14459_s1 + $0x1e8] sm:$0xff]  ;;  %v11158_v57 = vld [vmem:[%s14459_s1 + $0x1e0] sm:$0xff]  ;;  %v11133_v58 = vld [vmem:[%s14459_s1 + $0x118] sm:$0xff] }
  0x12   :  { %6686 = vmatpush.bf16.msra.mxu0 %v11101_v16  ;;  %v11141_v59 = vld [vmem:[%s14459_s1 + $0x158] sm:$0xff]  ;;  %v11132_v62 = vld [vmem:[%s14459_s1 + $0x110] sm:$0xff]  ;;  %v11131_v2 = vld [vmem:[%s14459_s1 + $0x108] sm:$0xff] }
  0x13   :  { %6699 = vmatpush.bf16.msra.mxu1 %v11109_v17  ;;  %v11149_v60 = vld [vmem:[%s14459_s1 + $0x198] sm:$0xff]  ;;  %v11140_v63 = vld [vmem:[%s14459_s1 + $0x150] sm:$0xff]  ;;  %v11139_v3 = vld [vmem:[%s14459_s1 + $0x148] sm:$0xff] }
  0x14   :  { %6712 = vmatpush.bf16.msra.mxu2 %v11117_v18  ;;  %v11157_v61 = vld [vmem:[%s14459_s1 + $0x1d8] sm:$0xff]  ;;  %v11148_v0 = vld [vmem:[%s14459_s1 + $0x190] sm:$0xff]  ;;  %v11147_v4 = vld [vmem:[%s14459_s1 + $0x188] sm:$0xff] }
  0x15   :  { %6725 = vmatpush.bf16.msra.mxu3 %v11125_v19  ;;  %v11156_v1 = vld [vmem:[%s14459_s1 + $0x1d0] sm:$0xff]  ;;  %v17_v5 = vld [vmem:[%s14460_s0 + $0x18] sm:$0xff]  ;;  %v11155_v7 = vld [vmem:[%s14459_s1 + $0x1c8] sm:$0xff] }
  0x16   :  { %6687 = vmatpush.bf16.msra.mxu0 %v11100_v20  ;;  %v16_v6 = vld [vmem:[%s14460_s0 + $0x10] sm:$0xff]  ;;  %v11130_v8 = vld [vmem:[%s14459_s1 + $0x100] sm:$0xff]  ;;  %v1690_v9 = vunpack.c.l.b16 %v17_v5  ;;  %v11169_v14 = vld [vmem:[%s14459_s1 + $0x238] sm:$0xff]  ;;  %v1691_v18 = vunpack.c.h.b16 %v17_v5 }
  0x17   :  { %6700 = vmatpush.bf16.msra.mxu1 %v11108_v21  ;;  %v11138_v10 = vld [vmem:[%s14459_s1 + $0x140] sm:$0xff]  ;;  %v1688_v12 = vunpack.c.l.b16 %v16_v6  ;;  %v1689_v13 = vunpack.c.h.b16 %v16_v6  ;;  %v11177_v15 = vld [vmem:[%s14459_s1 + $0x278] sm:$0xff]  ;;  %v11175_v29 = vld [vmem:[%s14459_s1 + $0x268] sm:$0xff] }
  0x18   :  { %6713 = vmatpush.bf16.msra.mxu2 %v11116_v22  ;;  %v11146_v11 = vld [vmem:[%s14459_s1 + $0x180] sm:$0xff]  ;;  %v11185_v16 = vld [vmem:[%s14459_s1 + $0x2b8] sm:$0xff]  ;;  %v1788_v20 = vpack.c.b16 %v1690_v9, %v1690_v9  ;;  %v1789_v26 = vpack.c.b16 %v1691_v18, %v1691_v18  ;;  %v11183_v30 = vld [vmem:[%s14459_s1 + $0x2a8] sm:$0xff] }
  0x19   :  { %6726 = vmatpush.bf16.msra.mxu3 %v11124_v23  ;;  %v11154_v17 = vld [vmem:[%s14459_s1 + $0x1c0] sm:$0xff]  ;;  %v11193_v19 = vld [vmem:[%s14459_s1 + $0x2f8] sm:$0xff]  ;;  %v1786_v21 = vpack.c.b16 %v1688_v12, %v1688_v12  ;;  %v1787_v22 = vpack.c.b16 %v1689_v13, %v1689_v13  ;;  %v11168_v23 = vld [vmem:[%s14459_s1 + $0x230] sm:$0xff] }
  0x1a   :  { %6688 = vmatpush.bf16.msra.mxu0 %v11099_v24  ;;  %v11176_v24 = vld [vmem:[%s14459_s1 + $0x270] sm:$0xff]  ;;  %v11174_v33 = vld [vmem:[%s14459_s1 + $0x260] sm:$0xff]  ;;  %v11165_v36 = vld [vmem:[%s14459_s1 + $0x218] sm:$0xff] }
  0x1b   :  { %6701 = vmatpush.bf16.msra.mxu1 %v11107_v25  ;;  %v11184_v25 = vld [vmem:[%s14459_s1 + $0x2b0] sm:$0xff]  ;;  %v11199_v6 = vld [vmem:[%s14459_s1 + $0x328] sm:$0xff]  ;;  %v11214_v12 = vld [vmem:[%s14459_s1 + $0x3a0] sm:$0xff] }
  0x1c   :  { %6714 = vmatpush.bf16.msra.mxu2 %v11115_v27  ;;  %v11192_v27 = vld [vmem:[%s14459_s1 + $0x2f0] sm:$0xff]  ;;  %v11223_v9 = vld [vmem:[%s14459_s1 + $0x3e8] sm:$0xff]  ;;  %v11222_v13 = vld [vmem:[%s14459_s1 + $0x3e0] sm:$0xff] }
  0x1d   :  { %6727 = vmatpush.bf16.msra.mxu3 %v11123_v28  ;;  %v11167_v28 = vld [vmem:[%s14459_s1 + $0x228] sm:$0xff]  ;;  %v11172_v41 = vld [vmem:[%s14459_s1 + $0x250] sm:$0xff] }
  0x1e   :  { %6689 = vmatpush.bf16.msra.mxu0 %v11098_v31  ;;  %v11191_v31 = vld [vmem:[%s14459_s1 + $0x2e8] sm:$0xff]  ;;  %v11224_v5 = vld [vmem:[%s14459_s1 + $0x3f0] sm:$0xff] }
  0x1f   :  { %6702 = vmatpush.bf16.msra.mxu1 %v11106_v32  ;;  %v11166_v32 = vld [vmem:[%s14459_s1 + $0x220] sm:$0xff]  ;;  %v11196_v18 = vld [vmem:[%s14459_s1 + $0x310] sm:$0xff] }
  0x20   :  { %6715 = vmatpush.bf16.msra.mxu2 %v11114_v34  ;;  %v11182_v34 = vld [vmem:[%s14459_s1 + $0x2a0] sm:$0xff] }
  0x21   :  { %6728 = vmatpush.bf16.msra.mxu3 %v11122_v39  ;;  %6690 = vmatmul.bf16.vlgmr.msra.gmra.mxu0 %v1782_v40  ;;  %v11189_v39 = vld [vmem:[%s14459_s1 + $0x2d8] sm:$0xff]  ;;  %v11164_v40 = vld [vmem:[%s14459_s1 + $0x210] sm:$0xff] }
  0x22   :  { %6734 = vmatpush.bf16.msrb.mxu0 %v11137_v35  ;;  %6703 = vmatmul.bf16.vlgmr.msra.gmra.mxu1 %v1783_v45  ;;  %v11190_v35 = vld [vmem:[%s14459_s1 + $0x2e0] sm:$0xff]  ;;  %v11171_v45 = vld [vmem:[%s14459_s1 + $0x248] sm:$0xff] }
  0x23   :  { %6747 = vmatpush.bf16.msrb.mxu1 %v11145_v37  ;;  %6716 = vmatmul.bf16.vlgmr.msra.gmra.mxu2 %v1784_v43  ;;  %v11173_v37 = vld [vmem:[%s14459_s1 + $0x258] sm:$0xff]  ;;  %v11188_v43 = vld [vmem:[%s14459_s1 + $0x2d0] sm:$0xff] }
  0x24   :  { %6760 = vmatpush.bf16.msrb.mxu2 %v11153_v38  ;;  %6729 = vmatmul.bf16.vlgmr.msra.gmra.mxu3 %v1785_v48  ;;  %v11181_v38 = vld [vmem:[%s14459_s1 + $0x298] sm:$0xff]  ;;  %v19_v48 = vld [vmem:[%s14460_s0 + $0x28] sm:$0xff] }
  0x25   :  { %6773 = vmatpush.bf16.msrb.mxu3 %v11161_v42  ;;  %v11180_v42 = vld [vmem:[%s14459_s1 + $0x290] sm:$0xff] }
  0x26   :  { %6735 = vmatpush.bf16.msrb.mxu0 %v11136_v44  ;;  %v11163_v44 = vld [vmem:[%s14459_s1 + $0x208] sm:$0xff] }
  0x27   :  { %6748 = vmatpush.bf16.msrb.mxu1 %v11144_v46  ;;  %v18_v46 = vld [vmem:[%s14460_s0 + $0x20] sm:$0xff] }
  0x28   :  { %6761 = vmatpush.bf16.msrb.mxu2 %v11152_v47  ;;  %v11179_v47 = vld [vmem:[%s14459_s1 + $0x288] sm:$0xff] }
  0x29   :  { %6774 = vmatpush.bf16.msrb.mxu3 %v11160_v49  ;;  %v11187_v49 = vld [vmem:[%s14459_s1 + $0x2c8] sm:$0xff] }
  0x2a   :  { %6736 = vmatpush.bf16.msrb.mxu0 %v11135_v50  ;;  %v1692_v50 = vunpack.c.l.b16 %v18_v46 }
  0x2b   :  { %6749 = vmatpush.bf16.msrb.mxu1 %v11143_v51  ;;  %v11162_v51 = vld [vmem:[%s14459_s1 + $0x200] sm:$0xff] }
  0x2c   :  { %6762 = vmatpush.bf16.msrb.mxu2 %v11151_v52  ;;  %v11170_v52 = vld [vmem:[%s14459_s1 + $0x240] sm:$0xff] }
  0x2d   :  { %6775 = vmatpush.bf16.msrb.mxu3 %v11159_v53  ;;  %v1694_v53 = vunpack.c.l.b16 %v19_v48 }
  0x2e   :  { %6737 = vmatpush.bf16.msrb.mxu0 %v11134_v54  ;;  %v11178_v54 = vld [vmem:[%s14459_s1 + $0x280] sm:$0xff] }
  0x2f   :  { %6750 = vmatpush.bf16.msrb.mxu1 %v11142_v55  ;;  %v11201_v55 = vld [vmem:[%s14459_s1 + $0x338] sm:$0xff] }
  0x30   :  { %6763 = vmatpush.bf16.msrb.mxu2 %v11150_v56  ;;  %v1693_v56 = vunpack.c.h.b16 %v18_v46  ;;  %v11248_v46 = vld [vmem:[%s14459_s1 + $0x4b0] sm:$0xff] }
  0x31   :  { %6776 = vmatpush.bf16.msrb.mxu3 %v11158_v57  ;;  %v11209_v57 = vld [vmem:[%s14459_s1 + $0x378] sm:$0xff] }
  0x32   :  { %6738 = vmatpush.bf16.msrb.mxu0 %v11133_v58  ;;  %v11217_v58 = vld [vmem:[%s14459_s1 + $0x3b8] sm:$0xff] }
  0x33   :  { %6751 = vmatpush.bf16.msrb.mxu1 %v11141_v59  ;;  %v1695_v59 = vunpack.c.h.b16 %v19_v48  ;;  %v11231_v48 = vld [vmem:[%s14459_s1 + $0x428] sm:$0xff] }
  0x34   :  { %6764 = vmatpush.bf16.msrb.mxu2 %v11149_v60  ;;  %v11186_v60 = vld [vmem:[%s14459_s1 + $0x2c0] sm:$0xff] }
  0x35   :  { %6777 = vmatpush.bf16.msrb.mxu3 %v11157_v61  ;;  %v1790_v61 = vpack.c.b16 %v1692_v50, %v1692_v50  ;;  %v11247_v50 = vld [vmem:[%s14459_s1 + $0x4a8] sm:$0xff] }
  0x36   :  { %6739 = vmatpush.bf16.msrb.mxu0 %v11132_v62  ;;  %v1792_v62 = vpack.c.b16 %v1694_v53, %v1694_v53  ;;  %v11238_v53 = vld [vmem:[%s14459_s1 + $0x460] sm:$0xff] }
  0x37   :  { %6752 = vmatpush.bf16.msrb.mxu1 %v11140_v63  ;;  %v11225_v63 = vld [vmem:[%s14459_s1 + $0x3f8] sm:$0xff] }
  0x38   :  { %6765 = vmatpush.bf16.msrb.mxu2 %v11148_v0  ;;  %v1791_v0 = vpack.c.b16 %v1693_v56, %v1693_v56  ;;  %v11229_v56 = vld [vmem:[%s14459_s1 + $0x418] sm:$0xff] }
  0x39   :  { %6778 = vmatpush.bf16.msrb.mxu3 %v11156_v1  ;;  %v11200_v1 = vld [vmem:[%s14459_s1 + $0x330] sm:$0xff] }
  0x3a   :  { %6740 = vmatpush.bf16.msrb.mxu0 %v11131_v2  ;;  %v1793_v2 = vpack.c.b16 %v1695_v59, %v1695_v59  ;;  %v11253_v59 = vld [vmem:[%s14459_s1 + $0x4d8] sm:$0xff] }
  0x3b   :  { %6753 = vmatpush.bf16.msrb.mxu1 %v11139_v3  ;;  %v11208_v3 = vld [vmem:[%s14459_s1 + $0x370] sm:$0xff] }
  0x3c   :  { %6766 = vmatpush.bf16.msrb.mxu2 %v11147_v4  ;;  %v11216_v4 = vld [vmem:[%s14459_s1 + $0x3b0] sm:$0xff] }
  0x3d   :  { %6779 = vmatpush.bf16.msrb.mxu3 %v11155_v7  ;;  %v11207_v7 = vld [vmem:[%s14459_s1 + $0x368] sm:$0xff] }
  0x3e   :  { %6741 = vmatpush.bf16.msrb.mxu0 %v11130_v8  ;;  %v11215_v8 = vld [vmem:[%s14459_s1 + $0x3a8] sm:$0xff] }
  0x3f   :  { %6754 = vmatpush.bf16.msrb.mxu1 %v11138_v10  ;;  %v11198_v10 = vld [vmem:[%s14459_s1 + $0x320] sm:$0xff] }
  0x40   :  { %6767 = vmatpush.bf16.msrb.mxu2 %v11146_v11  ;;  %v11206_v11 = vld [vmem:[%s14459_s1 + $0x360] sm:$0xff] }
  0x41   :  { %6780 = vmatpush.bf16.msrb.mxu3 %v11154_v17  ;;  %6742 = vmatmul.bf16.vlgmr.msrb.gmra.mxu0 %v1786_v21  ;;  %v11221_v17 = vld [vmem:[%s14459_s1 + $0x3d8] sm:$0xff]  ;;  %v11220_v21 = vld [vmem:[%s14459_s1 + $0x3d0] sm:$0xff] }
  0x42   :  { %6786 = vmatpush.bf16.msra.mxu0 %v11169_v14  ;;  %6755 = vmatmul.bf16.vlgmr.msrb.gmra.mxu1 %v1787_v22  ;;  %v11197_v14 = vld [vmem:[%s14459_s1 + $0x318] sm:$0xff]  ;;  %v11195_v22 = vld [vmem:[%s14459_s1 + $0x308] sm:$0xff] }
  0x43   :  { %6799 = vmatpush.bf16.msra.mxu1 %v11177_v15  ;;  %6768 = vmatmul.bf16.vlgmr.msrb.gmra.mxu2 %v1788_v20  ;;  %v11205_v15 = vld [vmem:[%s14459_s1 + $0x358] sm:$0xff]  ;;  %v11212_v20 = vld [vmem:[%s14459_s1 + $0x390] sm:$0xff] }
  0x44   :  { %6812 = vmatpush.bf16.msra.mxu2 %v11185_v16  ;;  %6781 = vmatmul.bf16.vlgmr.msrb.gmra.mxu3 %v1789_v26  ;;  %v11213_v16 = vld [vmem:[%s14459_s1 + $0x398] sm:$0xff] }
  0x45   :  { %6825 = vmatpush.bf16.msra.mxu3 %v11193_v19  ;;  %v11204_v19 = vld [vmem:[%s14459_s1 + $0x350] sm:$0xff]  ;;  %v21_v26 = vld [vmem:[%s14460_s0 + $0x38] sm:$0xff] }
  0x46   :  { %6787 = vmatpush.bf16.msra.mxu0 %v11168_v23  ;;  %v11203_v23 = vld [vmem:[%s14459_s1 + $0x348] sm:$0xff] }
  0x47   :  { %6800 = vmatpush.bf16.msra.mxu1 %v11176_v24  ;;  %v20_v24 = vld [vmem:[%s14460_s0 + $0x30] sm:$0xff] }
  0x48   :  { %6813 = vmatpush.bf16.msra.mxu2 %v11184_v25  ;;  %v11211_v25 = vld [vmem:[%s14459_s1 + $0x388] sm:$0xff] }
  0x49   :  { %6826 = vmatpush.bf16.msra.mxu3 %v11192_v27  ;;  %v11219_v27 = vld [vmem:[%s14459_s1 + $0x3c8] sm:$0xff] }
  0x4a   :  { %6788 = vmatpush.bf16.msra.mxu0 %v11167_v28  ;;  %v11194_v28 = vld [vmem:[%s14459_s1 + $0x300] sm:$0xff] }
  0x4b   :  { %6801 = vmatpush.bf16.msra.mxu1 %v11175_v29  ;;  %v1696_v29 = vunpack.c.l.b16 %v20_v24 }
  0x4c   :  { %6814 = vmatpush.bf16.msra.mxu2 %v11183_v30  ;;  %v11202_v30 = vld [vmem:[%s14459_s1 + $0x340] sm:$0xff] }
  0x4d   :  { %6827 = vmatpush.bf16.msra.mxu3 %v11191_v31  ;;  %v11233_v31 = vld [vmem:[%s14459_s1 + $0x438] sm:$0xff] }
  0x4e   :  { %6789 = vmatpush.bf16.msra.mxu0 %v11166_v32  ;;  %v1698_v32 = vunpack.c.l.b16 %v21_v26 }
  0x4f   :  { %6802 = vmatpush.bf16.msra.mxu1 %v11174_v33  ;;  %v1697_v33 = vunpack.c.h.b16 %v20_v24  ;;  %v11280_v24 = vld [vmem:[%s14459_s1 + $0x5b0] sm:$0xff] }
  0x50   :  { %6815 = vmatpush.bf16.msra.mxu2 %v11182_v34  ;;  %v11210_v34 = vld [vmem:[%s14459_s1 + $0x380] sm:$0xff] }
  0x51   :  { %6828 = vmatpush.bf16.msra.mxu3 %v11190_v35  ;;  %v11241_v35 = vld [vmem:[%s14459_s1 + $0x478] sm:$0xff] }
  0x52   :  { %6790 = vmatpush.bf16.msra.mxu0 %v11165_v36  ;;  %v1699_v36 = vunpack.c.h.b16 %v21_v26  ;;  %v11263_v26 = vld [vmem:[%s14459_s1 + $0x528] sm:$0xff] }
  0x53   :  { %6803 = vmatpush.bf16.msra.mxu1 %v11173_v37  ;;  %v11249_v37 = vld [vmem:[%s14459_s1 + $0x4b8] sm:$0xff] }
  0x54   :  { %6816 = vmatpush.bf16.msra.mxu2 %v11181_v38  ;;  %v11218_v38 = vld [vmem:[%s14459_s1 + $0x3c0] sm:$0xff] }
  0x55   :  { %6829 = vmatpush.bf16.msra.mxu3 %v11189_v39  ;;  %v1794_v39 = vpack.c.b16 %v1696_v29, %v1696_v29  ;;  %v11882_v29 = vld [vmem:[%s14461_s2] ss:$0 sm:$0xff] }
  0x56   :  { %6791 = vmatpush.bf16.msra.mxu0 %v11164_v40  ;;  %v11257_v40 = vld [vmem:[%s14459_s1 + $0x4f8] sm:$0xff] }
  0x57   :  { %6804 = vmatpush.bf16.msra.mxu1 %v11172_v41  ;;  %v1796_v41 = vpack.c.b16 %v1698_v32, %v1698_v32 }
  0x58   :  { %6817 = vmatpush.bf16.msra.mxu2 %v11180_v42  ;;  %v1795_v42 = vpack.c.b16 %v1697_v33, %v1697_v33  ;;  %v11270_v33 = vld [vmem:[%s14459_s1 + $0x560] sm:$0xff] }
  0x59   :  { %6830 = vmatpush.bf16.msra.mxu3 %v11188_v43  ;;  %v1797_v43 = vpack.c.b16 %v1699_v36, %v1699_v36 }
  0x5a   :  { %6792 = vmatpush.bf16.msra.mxu0 %v11163_v44  ;;  %v11232_v44 = vld [vmem:[%s14459_s1 + $0x430] sm:$0xff] }
  0x5b   :  { %6805 = vmatpush.bf16.msra.mxu1 %v11171_v45  ;;  %v11240_v45 = vld [vmem:[%s14459_s1 + $0x470] sm:$0xff] }
  0x5c   :  { %6818 = vmatpush.bf16.msra.mxu2 %v11179_v47  ;;  %v11256_v47 = vld [vmem:[%s14459_s1 + $0x4f0] sm:$0xff] }
  0x5d   :  { %6831 = vmatpush.bf16.msra.mxu3 %v11187_v49  ;;  %v11239_v49 = vld [vmem:[%s14459_s1 + $0x468] sm:$0xff] }
  0x5e   :  { %6793 = vmatpush.bf16.msra.mxu0 %v11162_v51  ;;  %v11255_v51 = vld [vmem:[%s14459_s1 + $0x4e8] sm:$0xff] }
  0x5f   :  { %6806 = vmatpush.bf16.msra.mxu1 %v11170_v52  ;;  %v11230_v52 = vld [vmem:[%s14459_s1 + $0x420] sm:$0xff] }
  0x60   :  { %6819 = vmatpush.bf16.msra.mxu2 %v11178_v54  ;;  %v11246_v54 = vld [vmem:[%s14459_s1 + $0x4a0] sm:$0xff] }
  0x61   :  { %6832 = vmatpush.bf16.msra.mxu3 %v11186_v60  ;;  %6794 = vmatmul.bf16.vlgmr.msra.gmra.mxu0 %v1790_v61  ;;  %v11228_v60 = vld [vmem:[%s14459_s1 + $0x410] sm:$0xff] }
  0x62   :  { %6838 = vmatpush.bf16.msrb.mxu0 %v11201_v55  ;;  %6807 = vmatmul.bf16.vlgmr.msra.gmra.mxu1 %v1791_v0  ;;  %v11254_v55 = vld [vmem:[%s14459_s1 + $0x4e0] sm:$0xff]  ;;  %v11236_v61 = vld [vmem:[%s14459_s1 + $0x450] sm:$0xff]  ;;  %v11227_v0 = vld [vmem:[%s14459_s1 + $0x408] sm:$0xff] }
  0x63   :  { %6851 = vmatpush.bf16.msrb.mxu1 %v11209_v57  ;;  %6820 = vmatmul.bf16.vlgmr.msra.gmra.mxu2 %v1792_v62  ;;  %v11237_v57 = vld [vmem:[%s14459_s1 + $0x458] sm:$0xff]  ;;  %v11244_v62 = vld [vmem:[%s14459_s1 + $0x490] sm:$0xff] }
  0x64   :  { %6864 = vmatpush.bf16.msrb.mxu2 %v11217_v58  ;;  %6833 = vmatmul.bf16.vlgmr.msra.gmra.mxu3 %v1793_v2  ;;  %v11245_v58 = vld [vmem:[%s14459_s1 + $0x498] sm:$0xff]  ;;  %v11243_v2 = vld [vmem:[%s14459_s1 + $0x488] sm:$0xff] }
  0x65   :  { %6877 = vmatpush.bf16.msrb.mxu3 %v11225_v63  ;;  %v11252_v63 = vld [vmem:[%s14459_s1 + $0x4d0] sm:$0xff] }
  0x66   :  { %6839 = vmatpush.bf16.msrb.mxu0 %v11200_v1  ;;  %v11235_v1 = vld [vmem:[%s14459_s1 + $0x448] sm:$0xff] }
  0x67   :  { %6852 = vmatpush.bf16.msrb.mxu1 %v11208_v3  ;;  %v22_v3 = vld [vmem:[%s14460_s0 + $0x40] sm:$0xff] }
  0x68   :  { %6865 = vmatpush.bf16.msrb.mxu2 %v11216_v4  ;;  %v23_v4 = vld [vmem:[%s14460_s0 + $0x48] sm:$0xff] }
  0x69   :  { %6878 = vmatpush.bf16.msrb.mxu3 %v11224_v5  ;;  %v11251_v5 = vld [vmem:[%s14459_s1 + $0x4c8] sm:$0xff] }
  0x6a   :  { %6840 = vmatpush.bf16.msrb.mxu0 %v11199_v6  ;;  %v11226_v6 = vld [vmem:[%s14459_s1 + $0x400] sm:$0xff] }
  0x6b   :  { %6853 = vmatpush.bf16.msrb.mxu1 %v11207_v7  ;;  %v1700_v7 = vunpack.c.l.b16 %v22_v3 }
  0x6c   :  { %6866 = vmatpush.bf16.msrb.mxu2 %v11215_v8  ;;  %v1702_v8 = vunpack.c.l.b16 %v23_v4 }
  0x6d   :  { %6879 = vmatpush.bf16.msrb.mxu3 %v11223_v9  ;;  %v11234_v9 = vld [vmem:[%s14459_s1 + $0x440] sm:$0xff] }
  0x6e   :  { %6841 = vmatpush.bf16.msrb.mxu0 %v11198_v10  ;;  %v11242_v10 = vld [vmem:[%s14459_s1 + $0x480] sm:$0xff] }
  0x6f   :  { %6854 = vmatpush.bf16.msrb.mxu1 %v11206_v11  ;;  %v1701_v11 = vunpack.c.h.b16 %v22_v3  ;;  %v11305_v3 = vld [vmem:[%s14459_s1 + $0x678] sm:$0xff] }
  0x70   :  { %6867 = vmatpush.bf16.msrb.mxu2 %v11214_v12  ;;  %v11265_v12 = vld [vmem:[%s14459_s1 + $0x538] sm:$0xff] }
  0x71   :  { %6880 = vmatpush.bf16.msrb.mxu3 %v11222_v13  ;;  %v11273_v13 = vld [vmem:[%s14459_s1 + $0x578] sm:$0xff] }
  0x72   :  { %6842 = vmatpush.bf16.msrb.mxu0 %v11197_v14  ;;  %v1703_v14 = vunpack.c.h.b16 %v23_v4 }
  0x73   :  { %6855 = vmatpush.bf16.msrb.mxu1 %v11205_v15  ;;  %v11281_v15 = vld [vmem:[%s14459_s1 + $0x5b8] sm:$0xff] }
  0x74   :  { %6868 = vmatpush.bf16.msrb.mxu2 %v11213_v16  ;;  %v11250_v16 = vld [vmem:[%s14459_s1 + $0x4c0] sm:$0xff] }
  0x75   :  { %6881 = vmatpush.bf16.msrb.mxu3 %v11221_v17  ;;  %v1798_v17 = vpack.c.b16 %v1700_v7, %v1700_v7  ;;  %v11282_v7 = vld [vmem:[%s14459_s1 + $0x5c0] sm:$0xff] }
  0x76   :  { %6843 = vmatpush.bf16.msrb.mxu0 %v11196_v18  ;;  %v1800_v18 = vpack.c.b16 %v1702_v8, %v1702_v8 }
  0x77   :  { %6856 = vmatpush.bf16.msrb.mxu1 %v11204_v19  ;;  %v11289_v19 = vld [vmem:[%s14459_s1 + $0x5f8] sm:$0xff] }
  0x78   :  { %6869 = vmatpush.bf16.msrb.mxu2 %v11212_v20  ;;  %v1799_v20 = vpack.c.b16 %v1701_v11, %v1701_v11 }
  0x79   :  { %6882 = vmatpush.bf16.msrb.mxu3 %v11220_v21  ;;  %v1801_v21 = vpack.c.b16 %v1703_v14, %v1703_v14  ;;  %v11304_v14 = vld [vmem:[%s14459_s1 + $0x670] sm:$0xff] }
  0x7a   :  { %6844 = vmatpush.bf16.msrb.mxu0 %v11195_v22  ;;  %v11264_v22 = vld [vmem:[%s14459_s1 + $0x530] sm:$0xff] }
  0x7b   :  { %6857 = vmatpush.bf16.msrb.mxu1 %v11203_v23  ;;  %v11272_v23 = vld [vmem:[%s14459_s1 + $0x570] sm:$0xff] }
  0x7c   :  { %6870 = vmatpush.bf16.msrb.mxu2 %v11211_v25  ;;  %v11288_v25 = vld [vmem:[%s14459_s1 + $0x5f0] sm:$0xff] }
  0x7d   :  { %6883 = vmatpush.bf16.msrb.mxu3 %v11219_v27  ;;  %v11271_v27 = vld [vmem:[%s14459_s1 + $0x568] sm:$0xff] }
  0x7e   :  { %6845 = vmatpush.bf16.msrb.mxu0 %v11194_v28  ;;  %v11279_v28 = vld [vmem:[%s14459_s1 + $0x5a8] sm:$0xff] }
  0x7f   :  { %6858 = vmatpush.bf16.msrb.mxu1 %v11202_v30  ;;  %v11287_v30 = vld [vmem:[%s14459_s1 + $0x5e8] sm:$0xff] }
  0x80   :  { %6871 = vmatpush.bf16.msrb.mxu2 %v11210_v34  ;;  %v11278_v34 = vld [vmem:[%s14459_s1 + $0x5a0] sm:$0xff] }
  0x81   :  { %6884 = vmatpush.bf16.msrb.mxu3 %v11218_v38  ;;  %6846 = vmatmul.bf16.vlgmr.msrb.gmra.mxu0 %v1794_v39  ;;  %v11261_v39 = vld [vmem:[%s14459_s1 + $0x518] sm:$0xff] }
  0x82   :  { %6890 = vmatpush.bf16.msra.mxu0 %v11233_v31  ;;  %6859 = vmatmul.bf16.vlgmr.msrb.gmra.mxu1 %v1795_v42  ;;  %v11262_v31 = vld [vmem:[%s14459_s1 + $0x520] sm:$0xff]  ;;  %v11285_v42 = vld [vmem:[%s14459_s1 + $0x5d8] sm:$0xff] }
  0x83   :  { %6903 = vmatpush.bf16.msra.mxu1 %v11241_v35  ;;  %6872 = vmatmul.bf16.vlgmr.msrb.gmra.mxu2 %v1796_v41  ;;  %v11277_v41 = vld [vmem:[%s14459_s1 + $0x598] sm:$0xff] }
  0x84   :  { %6916 = vmatpush.bf16.msra.mxu2 %v11249_v37  ;;  %6885 = vmatmul.bf16.vlgmr.msrb.gmra.mxu3 %v1797_v43  ;;  %v11286_v37 = vld [vmem:[%s14459_s1 + $0x5e0] sm:$0xff] }
  0x85   :  { %6929 = vmatpush.bf16.msra.mxu3 %v11257_v40  ;;  %v11269_v40 = vld [vmem:[%s14459_s1 + $0x558] sm:$0xff] }
  0x86   :  { %6891 = vmatpush.bf16.msra.mxu0 %v11232_v44  ;;  %v11260_v44 = vld [vmem:[%s14459_s1 + $0x510] sm:$0xff] }
  0x87   :  { %6904 = vmatpush.bf16.msra.mxu1 %v11240_v45 }
  0x88   :  { %6917 = vmatpush.bf16.msra.mxu2 %v11248_v46 }
  0x89   :  { %6930 = vmatpush.bf16.msra.mxu3 %v11256_v47  ;;  %v11268_v47 = vld [vmem:[%s14459_s1 + $0x550] sm:$0xff] }
  0x8a   :  { %6892 = vmatpush.bf16.msra.mxu0 %v11231_v48  ;;  %v11276_v48 = vld [vmem:[%s14459_s1 + $0x590] sm:$0xff] }
  0x8b   :  { %6905 = vmatpush.bf16.msra.mxu1 %v11239_v49 }
  0x8c   :  { %6918 = vmatpush.bf16.msra.mxu2 %v11247_v50 }
  0x8d   :  { %6931 = vmatpush.bf16.msra.mxu3 %v11255_v51  ;;  %v11284_v51 = vld [vmem:[%s14459_s1 + $0x5d0] sm:$0xff] }
  0x8e   :  { %6893 = vmatpush.bf16.msra.mxu0 %v11230_v52 }
  0x8f   :  { %6906 = vmatpush.bf16.msra.mxu1 %v11238_v53  ;;  %v11259_v53 = vld [vmem:[%s14459_s1 + $0x508] sm:$0xff] }
  0x90   :  { %6919 = vmatpush.bf16.msra.mxu2 %v11246_v54  ;;  %v11267_v54 = vld [vmem:[%s14459_s1 + $0x548] sm:$0xff] }
  0x91   :  { %6932 = vmatpush.bf16.msra.mxu3 %v11254_v55  ;;  %v11275_v55 = vld [vmem:[%s14459_s1 + $0x588] sm:$0xff] }
  0x92   :  { %6894 = vmatpush.bf16.msra.mxu0 %v11229_v56  ;;  %v24_v56 = vld [vmem:[%s14460_s0 + $0x50] sm:$0xff] }
  0x93   :  { %6907 = vmatpush.bf16.msra.mxu1 %v11237_v57  ;;  %v25_v57 = vld [vmem:[%s14460_s0 + $0x58] sm:$0xff] }
  0x94   :  { %6920 = vmatpush.bf16.msra.mxu2 %v11245_v58  ;;  %v11283_v58 = vld [vmem:[%s14459_s1 + $0x5c8] sm:$0xff]  ;;  %v1707_v4 = vunpack.c.h.b16 %v25_v57 }
  0x95   :  { %6933 = vmatpush.bf16.msra.mxu3 %v11253_v59 }
  0x96   :  { %6895 = vmatpush.bf16.msra.mxu0 %v11228_v60  ;;  %v11258_v60 = vld [vmem:[%s14459_s1 + $0x500] sm:$0xff] }
  0x97   :  { %6908 = vmatpush.bf16.msra.mxu1 %v11236_v61  ;;  %v1704_v61 = vunpack.c.l.b16 %v24_v56 }
  0x98   :  { %6921 = vmatpush.bf16.msra.mxu2 %v11244_v62  ;;  %v1706_v62 = vunpack.c.l.b16 %v25_v57  ;;  %v11329_v57 = vld [vmem:[%s14459_s1 + $0x738] sm:$0xff] }
  0x99   :  { %6934 = vmatpush.bf16.msra.mxu3 %v11252_v63  ;;  %v11266_v63 = vld [vmem:[%s14459_s1 + $0x540] sm:$0xff]  ;;  %v1802_v8 = vpack.c.b16 %v1704_v61, %v1704_v61 }
  0x9a   :  { %6896 = vmatpush.bf16.msra.mxu0 %v11227_v0  ;;  %v11274_v0 = vld [vmem:[%s14459_s1 + $0x580] sm:$0xff] }
  0x9b   :  { %6909 = vmatpush.bf16.msra.mxu1 %v11235_v1  ;;  %v1705_v1 = vunpack.c.h.b16 %v24_v56  ;;  %v11314_v61 = vld [vmem:[%s14459_s1 + $0x6c0] sm:$0xff] }
  0x9c   :  { %6922 = vmatpush.bf16.msra.mxu2 %v11243_v2  ;;  %v11297_v2 = vld [vmem:[%s14459_s1 + $0x638] sm:$0xff] }
  0x9d   :  { %6935 = vmatpush.bf16.msra.mxu3 %v11251_v5  ;;  %v1803_v11 = vpack.c.b16 %v1705_v1, %v1705_v1 }
  0x9e   :  { %6897 = vmatpush.bf16.msra.mxu0 %v11226_v6  ;;  %v6691_v32 = vpop.f32.mrf.mxu0  ;;  %v11313_v6 = vld [vmem:[%s14459_s1 + $0x6b8] sm:$0xff] }
  0x9f   :  { %6910 = vmatpush.bf16.msra.mxu1 %v11234_v9  ;;  %v6692_v35 = vadd.f32 %v11882_v29, %v6691_v32  ;;  %v6704_v36 = vpop.f32.mrf.mxu1  ;;  %v1804_v9 = vpack.c.b16 %v1706_v62, %v1706_v62 }
  0xa0   :  { %6923 = vmatpush.bf16.msra.mxu2 %v11242_v10  ;;  %v11321_v10 = vld [vmem:[%s14459_s1 + $0x6f8] sm:$0xff] }
  0xa1   :  { %6936 = vmatpush.bf16.msra.mxu3 %v11250_v16  ;;  %6898 = vmatmul.bf16.vlgmr.msra.gmra.mxu0 %v1798_v17  ;;  %v6705_v38 = vadd.f32 %v6704_v36, %v6692_v35  ;;  %v11320_v16 = vld [vmem:[%s14459_s1 + $0x6f0] sm:$0xff]  ;;  %v11295_v17 = vld [vmem:[%s14459_s1 + $0x628] sm:$0xff] }
  0xa2   :  { %6942 = vmatpush.bf16.msrb.mxu0 %v11265_v12  ;;  %6911 = vmatmul.bf16.vlgmr.msra.gmra.mxu1 %v1799_v20  ;;  %v1805_v12 = vpack.c.b16 %v1707_v4, %v1707_v4  ;;  %v11319_v20 = vld [vmem:[%s14459_s1 + $0x6e8] sm:$0xff]  ;;  %v11292_v35 = vld [vmem:[%s14459_s1 + $0x610] sm:$0xff] }
  0xa3   :  { %6955 = vmatpush.bf16.msrb.mxu1 %v11273_v13  ;;  %6924 = vmatmul.bf16.vlgmr.msra.gmra.mxu2 %v1800_v18  ;;  %v11296_v13 = vld [vmem:[%s14459_s1 + $0x630] sm:$0xff]  ;;  %v11303_v18 = vld [vmem:[%s14459_s1 + $0x668] sm:$0xff] }
  0xa4   :  { %6968 = vmatpush.bf16.msrb.mxu2 %v11281_v15  ;;  %6937 = vmatmul.bf16.vlgmr.msra.gmra.mxu3 %v1801_v21  ;;  %v11312_v15 = vld [vmem:[%s14459_s1 + $0x6b0] sm:$0xff]  ;;  %v11294_v21 = vld [vmem:[%s14459_s1 + $0x620] sm:$0xff] }
  0xa5   :  { %6981 = vmatpush.bf16.msrb.mxu3 %v11289_v19  ;;  %v11311_v19 = vld [vmem:[%s14459_s1 + $0x6a8] sm:$0xff]  ;;  %v11300_v36 = vld [vmem:[%s14459_s1 + $0x650] sm:$0xff] }
  0xa6   :  { %6943 = vmatpush.bf16.msrb.mxu0 %v11264_v22  ;;  %v6717_v43 = vpop.f32.mrf.mxu2  ;;  %v6693_v46 = vpop.f32.mrf.mxu0  ;;  %v11302_v22 = vld [vmem:[%s14459_s1 + $0x660] sm:$0xff]  ;;  %v11336_v4 = vld [vmem:[%s14459_s1 + $0x770] sm:$0xff] }
  0xa7   :  { %6956 = vmatpush.bf16.msrb.mxu1 %v11272_v23  ;;  %v6718_v45 = vadd.f32 %v6717_v43, %v6705_v38  ;;  %v6730_v49 = vpop.f32.mrf.mxu3  ;;  %v6706_v50 = vpop.f32.mrf.mxu1  ;;  %v11310_v23 = vld [vmem:[%s14459_s1 + $0x6a0] sm:$0xff]  ;;  %v11291_v43 = vld [vmem:[%s14459_s1 + $0x608] sm:$0xff] }
  0xa8   :  { %6969 = vmatpush.bf16.msrb.mxu2 %v11280_v24  ;;  %v26_v46 = vld [vmem:[%s14460_s0 + $0x60] sm:$0xff] }
  0xa9   :  { %6982 = vmatpush.bf16.msrb.mxu3 %v11288_v25  ;;  %v12488_v52 = vadd.f32 %v6730_v49, %v6718_v45  ;;  %v11307_v45 = vld [vmem:[%s14459_s1 + $0x688] sm:$0xff]  ;;  %v11290_v50 = vld [vmem:[%s14459_s1 + $0x600] sm:$0xff] }
  0xaa   :  { %6944 = vmatpush.bf16.msrb.mxu0 %v11263_v26  ;;  %v11315_v49 = vld [vmem:[%s14459_s1 + $0x6c8] sm:$0xff] }
  0xab   :  { %6957 = vmatpush.bf16.msrb.mxu1 %v11271_v27  ;;  %v11318_v27 = vld [vmem:[%s14459_s1 + $0x6e0] sm:$0xff] }
  0xac   :  { %6970 = vmatpush.bf16.msrb.mxu2 %v11279_v28  ;;  %v11293_v28 = vld [vmem:[%s14459_s1 + $0x618] sm:$0xff] }
  0xad   :  { %6983 = vmatpush.bf16.msrb.mxu3 %v11287_v30  ;;  %v11301_v30 = vld [vmem:[%s14459_s1 + $0x658] sm:$0xff] }
  0xae   :  { %6945 = vmatpush.bf16.msrb.mxu0 %v11262_v31  ;;  %v6719_v59 = vpop.f32.mrf.mxu2  ;;  %v11309_v31 = vld [vmem:[%s14459_s1 + $0x698] sm:$0xff] }
  0xaf   :  { %6958 = vmatpush.bf16.msrb.mxu1 %v11270_v33  ;;  %v6732_v5 = vpop.f32.mrf.mxu3  ;;  %v11317_v33 = vld [vmem:[%s14459_s1 + $0x6d8] sm:$0xff] }
  0xb0   :  { %6971 = vmatpush.bf16.msrb.mxu2 %v11278_v34  ;;  %v11344_v5 = vld [vmem:[%s14459_s1 + $0x7b0] sm:$0xff] }
  0xb1   :  { %6984 = vmatpush.bf16.msrb.mxu3 %v11286_v37  ;;  %v11308_v37 = vld [vmem:[%s14459_s1 + $0x690] sm:$0xff] }
  0xb2   :  { %6946 = vmatpush.bf16.msrb.mxu0 %v11261_v39 }
  0xb3   :  { %6959 = vmatpush.bf16.msrb.mxu1 %v11269_v40 }
  0xb4   :  { %6972 = vmatpush.bf16.msrb.mxu2 %v11277_v41 }
  0xb5   :  { %6985 = vmatpush.bf16.msrb.mxu3 %v11285_v42  ;;  %v11316_v42 = vld [vmem:[%s14459_s1 + $0x6d0] sm:$0xff] }
  0xb6   :  { %6947 = vmatpush.bf16.msrb.mxu0 %v11260_v44  ;;  %v11299_v44 = vld [vmem:[%s14459_s1 + $0x648] sm:$0xff] }
  0xb7   :  { %6960 = vmatpush.bf16.msrb.mxu1 %v11268_v47  ;;  %v27_v47 = vld [vmem:[%s14460_s0 + $0x68] sm:$0xff] }
  0xb8   :  { %6973 = vmatpush.bf16.msrb.mxu2 %v11276_v48  ;;  %v1711_v59 = vunpack.c.h.b16 %v27_v47 }
  0xb9   :  { %6986 = vmatpush.bf16.msrb.mxu3 %v11284_v51  ;;  %v1708_v51 = vunpack.c.l.b16 %v26_v46 }
  0xba   :  { %6948 = vmatpush.bf16.msrb.mxu0 %v11259_v53  ;;  %v11298_v53 = vld [vmem:[%s14459_s1 + $0x640] sm:$0xff] }
  0xbb   :  { %6961 = vmatpush.bf16.msrb.mxu1 %v11267_v54  ;;  %v11306_v54 = vld [vmem:[%s14459_s1 + $0x680] sm:$0xff]  ;;  %v1806_v62 = vpack.c.b16 %v1708_v51, %v1708_v51 }
  0xbc   :  { %6974 = vmatpush.bf16.msrb.mxu2 %v11275_v55  ;;  %v1709_v55 = vunpack.c.h.b16 %v26_v46  ;;  %v11346_v51 = vld [vmem:[%s14459_s1 + $0x7c0] sm:$0xff] }
  0xbd   :  { %6987 = vmatpush.bf16.msrb.mxu3 %v11283_v58  ;;  %v11337_v58 = vld [vmem:[%s14459_s1 + $0x778] sm:$0xff] }
  0xbe   :  { %6949 = vmatpush.bf16.msrb.mxu0 %v11258_v60  ;;  %v6743_v24 = vpop.f32.mrf.mxu0  ;;  %v11345_v60 = vld [vmem:[%s14459_s1 + $0x7b8] sm:$0xff]  ;;  %v1807_v1 = vpack.c.b16 %v1709_v55, %v1709_v55 }
  0xbf   :  { %6962 = vmatpush.bf16.msrb.mxu1 %v11266_v63  ;;  %v6756_v25 = vpop.f32.mrf.mxu1  ;;  %v6744_v26 = vadd.f32 %v6743_v24, %v12488_v52  ;;  %v1710_v52 = vunpack.c.l.b16 %v27_v47  ;;  %v11349_v24 = vld [vmem:[%s14459_s1 + $0x7d8] sm:$0xff] }
  0xc0   :  { %6975 = vmatpush.bf16.msrb.mxu2 %v11274_v0  ;;  %v11353_v0 = vld [vmem:[%s14459_s1 + $0x7f8] sm:$0xff] }
  0xc1   :  { %6988 = vmatpush.bf16.msrb.mxu3 %v11282_v7  ;;  %6950 = vmatmul.bf16.vlgmr.msrb.gmra.mxu0 %v1802_v8  ;;  %v6757_v29 = vadd.f32 %v6756_v25, %v6744_v26  ;;  %v1808_v63 = vpack.c.b16 %v1710_v52, %v1710_v52  ;;  %v11327_v7 = vld [vmem:[%s14459_s1 + $0x728] sm:$0xff]  ;;  %v11361_v47 = vld [vmem:[%s14459_s1 + $0x838] sm:$0xff] }
  0xc2   :  { %6994 = vmatpush.bf16.msra.mxu0 %v11297_v2  ;;  %6963 = vmatmul.bf16.vlgmr.msrb.gmra.mxu1 %v1803_v11  ;;  %v1809_v2 = vpack.c.b16 %v1711_v59, %v1711_v59  ;;  %v11335_v8 = vld [vmem:[%s14459_s1 + $0x768] sm:$0xff]  ;;  %v11376_v59 = vld [vmem:[%s14459_s1 + $0x8b0] sm:$0xff] }
  0xc3   :  { %7007 = vmatpush.bf16.msra.mxu1 %v11305_v3  ;;  %6976 = vmatmul.bf16.vlgmr.msrb.gmra.mxu2 %v1804_v9  ;;  %v11328_v3 = vld [vmem:[%s14459_s1 + $0x730] sm:$0xff]  ;;  %v11343_v9 = vld [vmem:[%s14459_s1 + $0x7a8] sm:$0xff] }
  0xc4   :  { %7020 = vmatpush.bf16.msra.mxu2 %v11313_v6  ;;  %6989 = vmatmul.bf16.vlgmr.msrb.gmra.mxu3 %v1805_v12  ;;  %v11352_v6 = vld [vmem:[%s14459_s1 + $0x7f0] sm:$0xff] }
  0xc5   :  { %7033 = vmatpush.bf16.msra.mxu3 %v11321_v10  ;;  %v11351_v10 = vld [vmem:[%s14459_s1 + $0x7e8] sm:$0xff] }
  0xc6   :  { %6995 = vmatpush.bf16.msra.mxu0 %v11296_v13  ;;  %v6769_v32 = vpop.f32.mrf.mxu2  ;;  %v6745_v39 = vpop.f32.mrf.mxu0  ;;  %v11326_v13 = vld [vmem:[%s14459_s1 + $0x720] sm:$0xff] }
  0xc7   :  { %7008 = vmatpush.bf16.msra.mxu1 %v11304_v14  ;;  %v6770_v34 = vadd.f32 %v6769_v32, %v6757_v29  ;;  %v6782_v38 = vpop.f32.mrf.mxu3  ;;  %v6758_v41 = vpop.f32.mrf.mxu1  ;;  %v11334_v14 = vld [vmem:[%s14459_s1 + $0x760] sm:$0xff]  ;;  %v11332_v29 = vld [vmem:[%s14459_s1 + $0x750] sm:$0xff]  ;;  %v11347_v39 = vld [vmem:[%s14459_s1 + $0x7c8] sm:$0xff] }
  0xc8   :  { %7021 = vmatpush.bf16.msra.mxu2 %v11312_v15  ;;  %v11342_v15 = vld [vmem:[%s14459_s1 + $0x7a0] sm:$0xff]  ;;  %v11348_v32 = vld [vmem:[%s14459_s1 + $0x7d0] sm:$0xff] }
  0xc9   :  { %7034 = vmatpush.bf16.msra.mxu3 %v11320_v16  ;;  %v6783_v40 = vadd.f32 %v6782_v38, %v6770_v34  ;;  %v11331_v34 = vld [vmem:[%s14459_s1 + $0x748] sm:$0xff] }
  0xca   :  { %6996 = vmatpush.bf16.msra.mxu0 %v11295_v17 }
  0xcb   :  { %7009 = vmatpush.bf16.msra.mxu1 %v11303_v18  ;;  %v11350_v18 = vld [vmem:[%s14459_s1 + $0x7e0] sm:$0xff] }
  0xcc   :  { %7022 = vmatpush.bf16.msra.mxu2 %v11311_v19  ;;  %v11325_v19 = vld [vmem:[%s14459_s1 + $0x718] sm:$0xff] }
  0xcd   :  { %7035 = vmatpush.bf16.msra.mxu3 %v11319_v20  ;;  %v11333_v20 = vld [vmem:[%s14459_s1 + $0x758] sm:$0xff] }
  0xce   :  { %6997 = vmatpush.bf16.msra.mxu0 %v11294_v21  ;;  %v6771_v48 = vpop.f32.mrf.mxu2  ;;  %v11341_v21 = vld [vmem:[%s14459_s1 + $0x798] sm:$0xff] }
  0xcf   :  { %7010 = vmatpush.bf16.msra.mxu1 %v11302_v22  ;;  %v6784_v56 = vpop.f32.mrf.mxu3  ;;  %v11369_v48 = vld [vmem:[%s14459_s1 + $0x878] sm:$0xff] }
  0xd0   :  { %7023 = vmatpush.bf16.msra.mxu2 %v11310_v23 }
  0xd1   :  { %7036 = vmatpush.bf16.msra.mxu3 %v11318_v27  ;;  %v11324_v27 = vld [vmem:[%s14459_s1 + $0x710] sm:$0xff] }
  0xd2   :  { %6998 = vmatpush.bf16.msra.mxu0 %v11293_v28 }
  0xd3   :  { %7011 = vmatpush.bf16.msra.mxu1 %v11301_v30  ;;  %v11340_v30 = vld [vmem:[%s14459_s1 + $0x790] sm:$0xff] }
  0xd4   :  { %7024 = vmatpush.bf16.msra.mxu2 %v11309_v31 }
  0xd5   :  { %7037 = vmatpush.bf16.msra.mxu3 %v11317_v33  ;;  %v11323_v33 = vld [vmem:[%s14459_s1 + $0x708] sm:$0xff] }
  0xd6   :  { %6999 = vmatpush.bf16.msra.mxu0 %v11292_v35  ;;  %v11339_v35 = vld [vmem:[%s14459_s1 + $0x788] sm:$0xff] }
  0xd7   :  { %7012 = vmatpush.bf16.msra.mxu1 %v11300_v36  ;;  %v28_v36 = vld [vmem:[%s14460_s0 + $0x70] sm:$0xff] }
  0xd8   :  { %7025 = vmatpush.bf16.msra.mxu2 %v11308_v37  ;;  %v29_v37 = vld [vmem:[%s14460_s0 + $0x78] sm:$0xff]  ;;  %v1712_v41 = vunpack.c.l.b16 %v28_v36  ;;  %v1713_v46 = vunpack.c.h.b16 %v28_v36 }
  0xd9   :  { %7038 = vmatpush.bf16.msra.mxu3 %v11316_v42  ;;  %v1714_v42 = vunpack.c.l.b16 %v29_v37 }
  0xda   :  { %7000 = vmatpush.bf16.msra.mxu0 %v11291_v43  ;;  %v1810_v52 = vpack.c.b16 %v1712_v41, %v1712_v41  ;;  %v1811_v55 = vpack.c.b16 %v1713_v46, %v1713_v46  ;;  %v11378_v41 = vld [vmem:[%s14459_s1 + $0x8c0] sm:$0xff] }
  0xdb   :  { %7013 = vmatpush.bf16.msra.mxu1 %v11299_v44  ;;  %v11330_v44 = vld [vmem:[%s14459_s1 + $0x740] sm:$0xff] }
  0xdc   :  { %7026 = vmatpush.bf16.msra.mxu2 %v11307_v45  ;;  %v11338_v45 = vld [vmem:[%s14459_s1 + $0x780] sm:$0xff] }
  0xdd   :  { %7039 = vmatpush.bf16.msra.mxu3 %v11315_v49  ;;  %v1715_v49 = vunpack.c.h.b16 %v29_v37  ;;  %v11393_v37 = vld [vmem:[%s14459_s1 + $0x938] sm:$0xff] }
  0xde   :  { %7001 = vmatpush.bf16.msra.mxu0 %v11290_v50  ;;  %v6795_v11 = vpop.f32.mrf.mxu0  ;;  %v11377_v50 = vld [vmem:[%s14459_s1 + $0x8b8] sm:$0xff] }
  0xdf   :  { %7014 = vmatpush.bf16.msra.mxu1 %v11298_v53  ;;  %v6796_v12 = vadd.f32 %v6795_v11, %v6783_v40  ;;  %v6808_v16 = vpop.f32.mrf.mxu1  ;;  %v11322_v40 = vld [vmem:[%s14459_s1 + $0x700] sm:$0xff]  ;;  %v1812_v53 = vpack.c.b16 %v1714_v42, %v1714_v42  ;;  %v1813_v56 = vpack.c.b16 %v1715_v49, %v1715_v49  ;;  %v11373_v11 = vld [vmem:[%s14459_s1 + $0x898] sm:$0xff]  ;;  %v11408_v49 = vld [vmem:[%s14459_s1 + $0x9b0] sm:$0xff] }
  0xe0   :  { %7027 = vmatpush.bf16.msra.mxu2 %v11306_v54  ;;  %v11385_v54 = vld [vmem:[%s14459_s1 + $0x8f8] sm:$0xff] }
  0xe1   :  { %7040 = vmatpush.bf16.msra.mxu3 %v11314_v61  ;;  %7002 = vmatmul.bf16.vlgmr.msra.gmra.mxu0 %v1806_v62  ;;  %v6809_v17 = vadd.f32 %v6808_v16, %v6796_v12  ;;  %v11359_v61 = vld [vmem:[%s14459_s1 + $0x828] sm:$0xff] }
  0xe2   :  { %7046 = vmatpush.bf16.msrb.mxu0 %v11329_v57  ;;  %7015 = vmatmul.bf16.vlgmr.msra.gmra.mxu1 %v1807_v1  ;;  %v11360_v57 = vld [vmem:[%s14459_s1 + $0x830] sm:$0xff]  ;;  %v11367_v62 = vld [vmem:[%s14459_s1 + $0x868] sm:$0xff] }
  0xe3   :  { %7059 = vmatpush.bf16.msrb.mxu1 %v11337_v58  ;;  %7028 = vmatmul.bf16.vlgmr.msra.gmra.mxu2 %v1808_v63  ;;  %v11368_v58 = vld [vmem:[%s14459_s1 + $0x870] sm:$0xff]  ;;  %v11375_v63 = vld [vmem:[%s14459_s1 + $0x8a8] sm:$0xff] }
  0xe4   :  { %7072 = vmatpush.bf16.msrb.mxu2 %v11345_v60  ;;  %7041 = vmatmul.bf16.vlgmr.msra.gmra.mxu3 %v1809_v2  ;;  %v11384_v60 = vld [vmem:[%s14459_s1 + $0x8f0] sm:$0xff] }
  0xe5   :  { %7085 = vmatpush.bf16.msrb.mxu3 %v11353_v0  ;;  %v11383_v0 = vld [vmem:[%s14459_s1 + $0x8e8] sm:$0xff] }
  0xe6   :  { %7047 = vmatpush.bf16.msrb.mxu0 %v11328_v3  ;;  %v6821_v22 = vpop.f32.mrf.mxu2  ;;  %v6797_v25 = vpop.f32.mrf.mxu0  ;;  %v11358_v3 = vld [vmem:[%s14459_s1 + $0x820] sm:$0xff] }
  0xe7   :  { %7060 = vmatpush.bf16.msrb.mxu1 %v11336_v4  ;;  %v6822_v23 = vadd.f32 %v6821_v22, %v6809_v17  ;;  %v6834_v26 = vpop.f32.mrf.mxu3  ;;  %v6810_v31 = vpop.f32.mrf.mxu1  ;;  %v11356_v17 = vld [vmem:[%s14459_s1 + $0x810] sm:$0xff]  ;;  %v11371_v25 = vld [vmem:[%s14459_s1 + $0x888] sm:$0xff] }
  0xe8   :  { %7073 = vmatpush.bf16.msrb.mxu2 %v11344_v5  ;;  %v11366_v5 = vld [vmem:[%s14459_s1 + $0x860] sm:$0xff]  ;;  %v11380_v22 = vld [vmem:[%s14459_s1 + $0x8d0] sm:$0xff] }
  0xe9   :  { %7086 = vmatpush.bf16.msrb.mxu3 %v11352_v6  ;;  %v12686_v28 = vadd.f32 %v6834_v26, %v6822_v23  ;;  %v11374_v6 = vld [vmem:[%s14459_s1 + $0x8a0] sm:$0xff]  ;;  %v11355_v23 = vld [vmem:[%s14459_s1 + $0x808] sm:$0xff] }
  0xea   :  { %7048 = vmatpush.bf16.msrb.mxu0 %v11327_v7  ;;  %v30_v26 = vld [vmem:[%s14460_s0 + $0x80] sm:$0xff] }
  0xeb   :  { %7061 = vmatpush.bf16.msrb.mxu1 %v11335_v8  ;;  %v11382_v8 = vld [vmem:[%s14459_s1 + $0x8e0] sm:$0xff]  ;;  %v1717_v36 = vunpack.c.h.b16 %v30_v26 }
  0xec   :  { %7074 = vmatpush.bf16.msrb.mxu2 %v11343_v9  ;;  %v11357_v9 = vld [vmem:[%s14459_s1 + $0x818] sm:$0xff]  ;;  %v11354_v31 = vld [vmem:[%s14459_s1 + $0x800] sm:$0xff] }
  0xed   :  { %7087 = vmatpush.bf16.msrb.mxu3 %v11351_v10  ;;  %v11365_v10 = vld [vmem:[%s14459_s1 + $0x858] sm:$0xff] }
  0xee   :  { %7049 = vmatpush.bf16.msrb.mxu0 %v11326_v13  ;;  %v6823_v38 = vpop.f32.mrf.mxu2 }
  0xef   :  { %7062 = vmatpush.bf16.msrb.mxu1 %v11334_v14  ;;  %v6836_v43 = vpop.f32.mrf.mxu3  ;;  %v11381_v14 = vld [vmem:[%s14459_s1 + $0x8d8] sm:$0xff] }
  0xf0   :  { %7075 = vmatpush.bf16.msrb.mxu2 %v11342_v15  ;;  %v11401_v38 = vld [vmem:[%s14459_s1 + $0x978] sm:$0xff] }
  0xf1   :  { %7088 = vmatpush.bf16.msrb.mxu3 %v11350_v18 }
  0xf2   :  { %7050 = vmatpush.bf16.msrb.mxu0 %v11325_v19 }
  0xf3   :  { %7063 = vmatpush.bf16.msrb.mxu1 %v11333_v20  ;;  %v11364_v20 = vld [vmem:[%s14459_s1 + $0x850] sm:$0xff] }
  0xf4   :  { %7076 = vmatpush.bf16.msrb.mxu2 %v11341_v21  ;;  %v11372_v21 = vld [vmem:[%s14459_s1 + $0x890] sm:$0xff] }
  0xf5   :  { %7089 = vmatpush.bf16.msrb.mxu3 %v11349_v24  ;;  %v11363_v24 = vld [vmem:[%s14459_s1 + $0x848] sm:$0xff] }
  0xf6   :  { %7051 = vmatpush.bf16.msrb.mxu0 %v11324_v27  ;;  %v31_v27 = vld [vmem:[%s14460_s0 + $0x88] sm:$0xff] }
  0xf7   :  { %7064 = vmatpush.bf16.msrb.mxu1 %v11332_v29  ;;  %v11379_v29 = vld [vmem:[%s14459_s1 + $0x8c8] sm:$0xff] }
  0xf8   :  { %7077 = vmatpush.bf16.msrb.mxu2 %v11340_v30 }
  0xf9   :  { %7090 = vmatpush.bf16.msrb.mxu3 %v11348_v32  ;;  %v1716_v32 = vunpack.c.l.b16 %v30_v26 }
  0xfa   :  { %7052 = vmatpush.bf16.msrb.mxu0 %v11323_v33  ;;  %v1718_v33 = vunpack.c.l.b16 %v31_v27 }
  0xfb   :  { %7065 = vmatpush.bf16.msrb.mxu1 %v11331_v34  ;;  %v11362_v34 = vld [vmem:[%s14459_s1 + $0x840] sm:$0xff]  ;;  %v1814_v42 = vpack.c.b16 %v1716_v32, %v1716_v32 }
  0xfc   :  { %7078 = vmatpush.bf16.msrb.mxu2 %v11339_v35  ;;  %v11370_v35 = vld [vmem:[%s14459_s1 + $0x880] sm:$0xff]  ;;  %v1816_v43 = vpack.c.b16 %v1718_v33, %v1718_v33 }
  0xfd   :  { %7091 = vmatpush.bf16.msrb.mxu3 %v11347_v39  ;;  %v1719_v39 = vunpack.c.h.b16 %v31_v27  ;;  %v11425_v27 = vld [vmem:[%s14459_s1 + $0xa38] sm:$0xff] }
  0xfe   :  { %7053 = vmatpush.bf16.msrb.mxu0 %v11322_v40  ;;  %v6847_v1 = vpop.f32.mrf.mxu0  ;;  %v11409_v40 = vld [vmem:[%s14459_s1 + $0x9b8] sm:$0xff] }
  0xff   :  { %7066 = vmatpush.bf16.msrb.mxu1 %v11330_v44  ;;  %v6848_v2 = vadd.f32 %v6847_v1, %v12686_v28  ;;  %v6860_v4 = vpop.f32.mrf.mxu1  ;;  %v11417_v44 = vld [vmem:[%s14459_s1 + $0x9f8] sm:$0xff]  ;;  %v1817_v46 = vpack.c.b16 %v1719_v39, %v1719_v39  ;;  %v11440_v39 = vld [vmem:[%s14459_s1 + $0xab0] sm:$0xff] }
 0x100   :  { %7079 = vmatpush.bf16.msrb.mxu2 %v11338_v45  ;;  %v1815_v45 = vpack.c.b16 %v1717_v36, %v1717_v36  ;;  %v11405_v1 = vld [vmem:[%s14459_s1 + $0x998] sm:$0xff] }
 0x101   :  { %7092 = vmatpush.bf16.msrb.mxu3 %v11346_v51  ;;  %7054 = vmatmul.bf16.vlgmr.msrb.gmra.mxu0 %v1810_v52  ;;  %v6861_v7 = vadd.f32 %v6860_v4, %v6848_v2  ;;  %v11391_v51 = vld [vmem:[%s14459_s1 + $0x928] sm:$0xff]  ;;  %v11413_v4 = vld [vmem:[%s14459_s1 + $0x9d8] sm:$0xff] }
 0x102   :  { %7098 = vmatpush.bf16.msra.mxu0 %v11361_v47  ;;  %7067 = vmatmul.bf16.vlgmr.msrb.gmra.mxu1 %v1811_v55  ;;  %v11392_v47 = vld [vmem:[%s14459_s1 + $0x930] sm:$0xff]  ;;  %v11399_v52 = vld [vmem:[%s14459_s1 + $0x968] sm:$0xff] }
 0x103   :  { %7111 = vmatpush.bf16.msra.mxu1 %v11369_v48  ;;  %7080 = vmatmul.bf16.vlgmr.msrb.gmra.mxu2 %v1812_v53  ;;  %v11400_v48 = vld [vmem:[%s14459_s1 + $0x970] sm:$0xff]  ;;  %v11407_v53 = vld [vmem:[%s14459_s1 + $0x9a8] sm:$0xff] }
 0x104   :  { %7124 = vmatpush.bf16.msra.mxu2 %v11377_v50  ;;  %7093 = vmatmul.bf16.vlgmr.msrb.gmra.mxu3 %v1813_v56  ;;  %v11416_v50 = vld [vmem:[%s14459_s1 + $0x9f0] sm:$0xff] }
 0x105   :  { %7137 = vmatpush.bf16.msra.mxu3 %v11385_v54  ;;  %v11415_v54 = vld [vmem:[%s14459_s1 + $0x9e8] sm:$0xff] }
 0x106   :  { %7099 = vmatpush.bf16.msra.mxu0 %v11360_v57  ;;  %v6873_v12 = vpop.f32.mrf.mxu2  ;;  %v6849_v16 = vpop.f32.mrf.mxu0  ;;  %v11390_v57 = vld [vmem:[%s14459_s1 + $0x920] sm:$0xff] }
 0x107   :  { %7112 = vmatpush.bf16.msra.mxu1 %v11368_v58  ;;  %v6874_v13 = vadd.f32 %v6873_v12, %v6861_v7  ;;  %v6886_v15 = vpop.f32.mrf.mxu3  ;;  %v6862_v18 = vpop.f32.mrf.mxu1  ;;  %v11412_v12 = vld [vmem:[%s14459_s1 + $0x9d0] sm:$0xff] }
 0x108   :  { %7125 = vmatpush.bf16.msra.mxu2 %v11376_v59  ;;  %v11398_v59 = vld [vmem:[%s14459_s1 + $0x960] sm:$0xff]  ;;  %v32_v16 = vld [vmem:[%s14460_s0 + $0x90] sm:$0xff] }
 0x109   :  { %7138 = vmatpush.bf16.msra.mxu3 %v11384_v60  ;;  %v12791_v19 = vadd.f32 %v6886_v15, %v6874_v13  ;;  %v11406_v60 = vld [vmem:[%s14459_s1 + $0x9a0] sm:$0xff]  ;;  %v11387_v13 = vld [vmem:[%s14459_s1 + $0x908] sm:$0xff]  ;;  %v1721_v26 = vunpack.c.h.b16 %v32_v16 }
 0x10a   :  { %7100 = vmatpush.bf16.msra.mxu0 %v11359_v61  ;;  %v11403_v15 = vld [vmem:[%s14459_s1 + $0x988] sm:$0xff] }
 0x10b   :  { %7113 = vmatpush.bf16.msra.mxu1 %v11367_v62  ;;  %v11414_v62 = vld [vmem:[%s14459_s1 + $0x9e0] sm:$0xff] }
 0x10c   :  { %7126 = vmatpush.bf16.msra.mxu2 %v11375_v63  ;;  %v11389_v63 = vld [vmem:[%s14459_s1 + $0x918] sm:$0xff] }
 0x10d   :  { %7139 = vmatpush.bf16.msra.mxu3 %v11383_v0  ;;  %v11397_v0 = vld [vmem:[%s14459_s1 + $0x958] sm:$0xff] }
 0x10e   :  { %7101 = vmatpush.bf16.msra.mxu0 %v11358_v3  ;;  %v6875_v28 = vpop.f32.mrf.mxu2 }
 0x10f   :  { %7114 = vmatpush.bf16.msra.mxu1 %v11366_v5  ;;  %v6888_v30 = vpop.f32.mrf.mxu3  ;;  %v11433_v28 = vld [vmem:[%s14459_s1 + $0xa78] sm:$0xff] }
 0x110   :  { %7127 = vmatpush.bf16.msra.mxu2 %v11374_v6  ;;  %v11441_v30 = vld [vmem:[%s14459_s1 + $0xab8] sm:$0xff] }
 0x111   :  { %7140 = vmatpush.bf16.msra.mxu3 %v11382_v8  ;;  %v11388_v8 = vld [vmem:[%s14459_s1 + $0x910] sm:$0xff] }
 0x112   :  { %7102 = vmatpush.bf16.msra.mxu0 %v11357_v9 }
 0x113   :  { %7115 = vmatpush.bf16.msra.mxu1 %v11365_v10  ;;  %v11396_v10 = vld [vmem:[%s14459_s1 + $0x950] sm:$0xff] }
 0x114   :  { %7128 = vmatpush.bf16.msra.mxu2 %v11373_v11  ;;  %v11404_v11 = vld [vmem:[%s14459_s1 + $0x990] sm:$0xff] }
 0x115   :  { %7141 = vmatpush.bf16.msra.mxu3 %v11381_v14  ;;  %v11395_v14 = vld [vmem:[%s14459_s1 + $0x948] sm:$0xff] }
 0x116   :  { %7103 = vmatpush.bf16.msra.mxu0 %v11356_v17  ;;  %v33_v17 = vld [vmem:[%s14460_s0 + $0x98] sm:$0xff] }
 0x117   :  { %7116 = vmatpush.bf16.msra.mxu1 %v11364_v20 }
 0x118   :  { %7129 = vmatpush.bf16.msra.mxu2 %v11372_v21  ;;  %v11386_v21 = vld [vmem:[%s14459_s1 + $0x900] sm:$0xff] }
 0x119   :  { %7142 = vmatpush.bf16.msra.mxu3 %v11380_v22  ;;  %v1720_v22 = vunpack.c.l.b16 %v32_v16 }
 0x11a   :  { %7104 = vmatpush.bf16.msra.mxu0 %v11355_v23  ;;  %v1722_v23 = vunpack.c.l.b16 %v33_v17 }
 0x11b   :  { %7117 = vmatpush.bf16.msra.mxu1 %v11363_v24  ;;  %v11394_v24 = vld [vmem:[%s14459_s1 + $0x940] sm:$0xff]  ;;  %v1818_v32 = vpack.c.b16 %v1720_v22, %v1720_v22 }
 0x11c   :  { %7130 = vmatpush.bf16.msra.mxu2 %v11371_v25  ;;  %v11402_v25 = vld [vmem:[%s14459_s1 + $0x980] sm:$0xff]  ;;  %v1820_v33 = vpack.c.b16 %v1722_v23, %v1722_v23 }
 0x11d   :  { %7143 = vmatpush.bf16.msra.mxu3 %v11379_v29  ;;  %v1723_v29 = vunpack.c.h.b16 %v33_v17  ;;  %v11457_v17 = vld [vmem:[%s14459_s1 + $0xb38] sm:$0xff] }
 0x11e   :  { %7105 = vmatpush.bf16.msra.mxu0 %v11354_v31  ;;  %v6899_v55 = vpop.f32.mrf.mxu0  ;;  %v11410_v31 = vld [vmem:[%s14459_s1 + $0x9c0] sm:$0xff] }
 0x11f   :  { %7118 = vmatpush.bf16.msra.mxu1 %v11362_v34  ;;  %v6900_v56 = vadd.f32 %v6899_v55, %v12791_v19  ;;  %v6912_v58 = vpop.f32.mrf.mxu1  ;;  %v11411_v19 = vld [vmem:[%s14459_s1 + $0x9c8] sm:$0xff]  ;;  %v11449_v34 = vld [vmem:[%s14459_s1 + $0xaf8] sm:$0xff]  ;;  %v1821_v36 = vpack.c.b16 %v1723_v29, %v1723_v29  ;;  %v11472_v29 = vld [vmem:[%s14459_s1 + $0xbb0] sm:$0xff] }
 0x120   :  { %7131 = vmatpush.bf16.msra.mxu2 %v11370_v35  ;;  %v1819_v35 = vpack.c.b16 %v1721_v26, %v1721_v26  ;;  %v11437_v55 = vld [vmem:[%s14459_s1 + $0xa98] sm:$0xff] }
 0x121   :  { %7144 = vmatpush.bf16.msra.mxu3 %v11378_v41  ;;  %7106 = vmatmul.bf16.vlgmr.msra.gmra.mxu0 %v1814_v42  ;;  %v6913_v61 = vadd.f32 %v6912_v58, %v6900_v56  ;;  %v11423_v41 = vld [vmem:[%s14459_s1 + $0xa28] sm:$0xff]  ;;  %v11445_v58 = vld [vmem:[%s14459_s1 + $0xad8] sm:$0xff] }
 0x122   :  { %7150 = vmatpush.bf16.msrb.mxu0 %v11393_v37  ;;  %7119 = vmatmul.bf16.vlgmr.msra.gmra.mxu1 %v1815_v45  ;;  %v11424_v37 = vld [vmem:[%s14459_s1 + $0xa30] sm:$0xff]  ;;  %v11431_v42 = vld [vmem:[%s14459_s1 + $0xa68] sm:$0xff] }
 0x123   :  { %7163 = vmatpush.bf16.msrb.mxu1 %v11401_v38  ;;  %7132 = vmatmul.bf16.vlgmr.msra.gmra.mxu2 %v1816_v43  ;;  %v11432_v38 = vld [vmem:[%s14459_s1 + $0xa70] sm:$0xff]  ;;  %v11439_v43 = vld [vmem:[%s14459_s1 + $0xaa8] sm:$0xff] }
 0x124   :  { %7176 = vmatpush.bf16.msrb.mxu2 %v11409_v40  ;;  %7145 = vmatmul.bf16.vlgmr.msra.gmra.mxu3 %v1817_v46  ;;  %v11448_v40 = vld [vmem:[%s14459_s1 + $0xaf0] sm:$0xff] }
 0x125   :  { %7189 = vmatpush.bf16.msrb.mxu3 %v11417_v44  ;;  %v11447_v44 = vld [vmem:[%s14459_s1 + $0xae8] sm:$0xff] }
 0x126   :  { %7151 = vmatpush.bf16.msrb.mxu0 %v11392_v47  ;;  %v6925_v2 = vpop.f32.mrf.mxu2  ;;  %v6901_v6 = vpop.f32.mrf.mxu0  ;;  %v11422_v47 = vld [vmem:[%s14459_s1 + $0xa20] sm:$0xff] }
 0x127   :  { %7164 = vmatpush.bf16.msrb.mxu1 %v11400_v48  ;;  %v6926_v3 = vadd.f32 %v6925_v2, %v6913_v61  ;;  %v6938_v5 = vpop.f32.mrf.mxu3  ;;  %v6914_v9 = vpop.f32.mrf.mxu1  ;;  %v11444_v2 = vld [vmem:[%s14459_s1 + $0xad0] sm:$0xff]  ;;  %v34_v6 = vld [vmem:[%s14460_s0 + $0xa0] sm:$0xff] }
 0x128   :  { %7177 = vmatpush.bf16.msrb.mxu2 %v11408_v49  ;;  %v11430_v49 = vld [vmem:[%s14459_s1 + $0xa60] sm:$0xff]  ;;  %v11443_v9 = vld [vmem:[%s14459_s1 + $0xac8] sm:$0xff]  ;;  %v1725_v16 = vunpack.c.h.b16 %v34_v6 }
 0x129   :  { %7190 = vmatpush.bf16.msrb.mxu3 %v11416_v50  ;;  %v12893_v7 = vadd.f32 %v6938_v5, %v6926_v3  ;;  %v11438_v50 = vld [vmem:[%s14459_s1 + $0xaa0] sm:$0xff]  ;;  %v11419_v3 = vld [vmem:[%s14459_s1 + $0xa08] sm:$0xff] }
 0x12a   :  { %7152 = vmatpush.bf16.msrb.mxu0 %v11391_v51  ;;  %v11435_v5 = vld [vmem:[%s14459_s1 + $0xa88] sm:$0xff] }
 0x12b   :  { %7165 = vmatpush.bf16.msrb.mxu1 %v11399_v52  ;;  %v11446_v52 = vld [vmem:[%s14459_s1 + $0xae0] sm:$0xff] }
 0x12c   :  { %7178 = vmatpush.bf16.msrb.mxu2 %v11407_v53  ;;  %v11421_v53 = vld [vmem:[%s14459_s1 + $0xa18] sm:$0xff] }
 0x12d   :  { %7191 = vmatpush.bf16.msrb.mxu3 %v11415_v54  ;;  %v11429_v54 = vld [vmem:[%s14459_s1 + $0xa58] sm:$0xff] }
 0x12e   :  { %7153 = vmatpush.bf16.msrb.mxu0 %v11390_v57  ;;  %v6927_v18 = vpop.f32.mrf.mxu2 }
 0x12f   :  { %7166 = vmatpush.bf16.msrb.mxu1 %v11398_v59  ;;  %v6940_v20 = vpop.f32.mrf.mxu3  ;;  %v11465_v18 = vld [vmem:[%s14459_s1 + $0xb78] sm:$0xff] }
 0x130   :  { %7179 = vmatpush.bf16.msrb.mxu2 %v11406_v60  ;;  %v11473_v20 = vld [vmem:[%s14459_s1 + $0xbb8] sm:$0xff] }
 0x131   :  { %7192 = vmatpush.bf16.msrb.mxu3 %v11414_v62  ;;  %v11420_v62 = vld [vmem:[%s14459_s1 + $0xa10] sm:$0xff] }
 0x132   :  { %7154 = vmatpush.bf16.msrb.mxu0 %v11389_v63 }
 0x133   :  { %7167 = vmatpush.bf16.msrb.mxu1 %v11397_v0  ;;  %v11428_v0 = vld [vmem:[%s14459_s1 + $0xa50] sm:$0xff] }
 0x134   :  { %7180 = vmatpush.bf16.msrb.mxu2 %v11405_v1  ;;  %v11436_v1 = vld [vmem:[%s14459_s1 + $0xa90] sm:$0xff] }
 0x135   :  { %7193 = vmatpush.bf16.msrb.mxu3 %v11413_v4  ;;  %v11427_v4 = vld [vmem:[%s14459_s1 + $0xa48] sm:$0xff] }
 0x136   :  { %7155 = vmatpush.bf16.msrb.mxu0 %v11388_v8 }
 0x137   :  { %7168 = vmatpush.bf16.msrb.mxu1 %v11396_v10 }
 0x138   :  { %7181 = vmatpush.bf16.msrb.mxu2 %v11404_v11  ;;  %v11418_v11 = vld [vmem:[%s14459_s1 + $0xa00] sm:$0xff] }
 0x139   :  { %7194 = vmatpush.bf16.msrb.mxu3 %v11412_v12  ;;  %v1724_v12 = vunpack.c.l.b16 %v34_v6 }
 0x13a   :  { %7156 = vmatpush.bf16.msrb.mxu0 %v11387_v13 }
 0x13b   :  { %7169 = vmatpush.bf16.msrb.mxu1 %v11395_v14  ;;  %v11426_v14 = vld [vmem:[%s14459_s1 + $0xa40] sm:$0xff]  ;;  %v1822_v22 = vpack.c.b16 %v1724_v12, %v1724_v12 }
 0x13c   :  { %7182 = vmatpush.bf16.msrb.mxu2 %v11403_v15  ;;  %v11434_v15 = vld [vmem:[%s14459_s1 + $0xa80] sm:$0xff] }
 0x13d   :  { %7195 = vmatpush.bf16.msrb.mxu3 %v11411_v19 }
 0x13e   :  { %7157 = vmatpush.bf16.msrb.mxu0 %v11386_v21  ;;  %v6951_v45 = vpop.f32.mrf.mxu0  ;;  %v11442_v21 = vld [vmem:[%s14459_s1 + $0xac0] sm:$0xff] }
 0x13f   :  { %7170 = vmatpush.bf16.msrb.mxu1 %v11394_v24  ;;  %v6952_v46 = vadd.f32 %v6951_v45, %v12893_v7  ;;  %v6964_v48 = vpop.f32.mrf.mxu1  ;;  %v35_v7 = vld [vmem:[%s14460_s0 + $0xa8] sm:$0xff]  ;;  %v11481_v24 = vld [vmem:[%s14459_s1 + $0xbf8] sm:$0xff] }
 0x140   :  { %7183 = vmatpush.bf16.msrb.mxu2 %v11402_v25  ;;  %v1726_v13 = vunpack.c.l.b16 %v35_v7  ;;  %v1727_v19 = vunpack.c.h.b16 %v35_v7  ;;  %v1823_v25 = vpack.c.b16 %v1725_v16, %v1725_v16  ;;  %v11469_v45 = vld [vmem:[%s14459_s1 + $0xb98] sm:$0xff] }
 0x141   :  { %7196 = vmatpush.bf16.msrb.mxu3 %v11410_v31  ;;  %7158 = vmatmul.bf16.vlgmr.msrb.gmra.mxu0 %v1818_v32  ;;  %v6965_v51 = vadd.f32 %v6964_v48, %v6952_v46  ;;  %v11455_v31 = vld [vmem:[%s14459_s1 + $0xb28] sm:$0xff]  ;;  %v11477_v48 = vld [vmem:[%s14459_s1 + $0xbd8] sm:$0xff] }
 0x142   :  { %7202 = vmatpush.bf16.msra.mxu0 %v11425_v27  ;;  %7171 = vmatmul.bf16.vlgmr.msrb.gmra.mxu1 %v1819_v35  ;;  %v1824_v23 = vpack.c.b16 %v1726_v13, %v1726_v13  ;;  %v1825_v26 = vpack.c.b16 %v1727_v19, %v1727_v19  ;;  %v11456_v27 = vld [vmem:[%s14459_s1 + $0xb30] sm:$0xff]  ;;  %v11463_v32 = vld [vmem:[%s14459_s1 + $0xb68] sm:$0xff]  ;;  %v11489_v7 = vld [vmem:[%s14459_s1 + $0xc38] sm:$0xff] }
 0x143   :  { %7215 = vmatpush.bf16.msra.mxu1 %v11433_v28  ;;  %7184 = vmatmul.bf16.vlgmr.msrb.gmra.mxu2 %v1820_v33  ;;  %v11464_v28 = vld [vmem:[%s14459_s1 + $0xb70] sm:$0xff]  ;;  %v11471_v33 = vld [vmem:[%s14459_s1 + $0xba8] sm:$0xff] }
 0x144   :  { %7228 = vmatpush.bf16.msra.mxu2 %v11441_v30  ;;  %7197 = vmatmul.bf16.vlgmr.msrb.gmra.mxu3 %v1821_v36  ;;  %v11480_v30 = vld [vmem:[%s14459_s1 + $0xbf0] sm:$0xff] }
 0x145   :  { %7241 = vmatpush.bf16.msra.mxu3 %v11449_v34  ;;  %v11479_v34 = vld [vmem:[%s14459_s1 + $0xbe8] sm:$0xff]  ;;  %v11504_v19 = vld [vmem:[%s14459_s1 + $0xcb0] sm:$0xff] }
 0x146   :  { %7203 = vmatpush.bf16.msra.mxu0 %v11424_v37  ;;  %v6977_v56 = vpop.f32.mrf.mxu2  ;;  %v6953_v60 = vpop.f32.mrf.mxu0  ;;  %v11454_v37 = vld [vmem:[%s14459_s1 + $0xb20] sm:$0xff] }
 0x147   :  { %7216 = vmatpush.bf16.msra.mxu1 %v11432_v38  ;;  %v6978_v57 = vadd.f32 %v6977_v56, %v6965_v51  ;;  %v6990_v59 = vpop.f32.mrf.mxu3  ;;  %v6966_v63 = vpop.f32.mrf.mxu1  ;;  %v11476_v56 = vld [vmem:[%s14459_s1 + $0xbd0] sm:$0xff] }
 0x148   :  { %7229 = vmatpush.bf16.msra.mxu2 %v11440_v39  ;;  %v11462_v39 = vld [vmem:[%s14459_s1 + $0xb60] sm:$0xff]  ;;  %v36_v60 = vld [vmem:[%s14460_s0 + $0xb0] sm:$0xff]  ;;  %v11475_v63 = vld [vmem:[%s14459_s1 + $0xbc8] sm:$0xff] }
 0x149   :  { %7242 = vmatpush.bf16.msra.mxu3 %v11448_v40  ;;  %v12998_v61 = vadd.f32 %v6990_v59, %v6978_v57  ;;  %v11470_v40 = vld [vmem:[%s14459_s1 + $0xba0] sm:$0xff]  ;;  %v11451_v57 = vld [vmem:[%s14459_s1 + $0xb08] sm:$0xff]  ;;  %v1729_v6 = vunpack.c.h.b16 %v36_v60 }
 0x14a   :  { %7204 = vmatpush.bf16.msra.mxu0 %v11423_v41  ;;  %v11467_v59 = vld [vmem:[%s14459_s1 + $0xb88] sm:$0xff] }
 0x14b   :  { %7217 = vmatpush.bf16.msra.mxu1 %v11431_v42  ;;  %v11478_v42 = vld [vmem:[%s14459_s1 + $0xbe0] sm:$0xff] }
 0x14c   :  { %7230 = vmatpush.bf16.msra.mxu2 %v11439_v43  ;;  %v11453_v43 = vld [vmem:[%s14459_s1 + $0xb18] sm:$0xff] }
 0x14d   :  { %7243 = vmatpush.bf16.msra.mxu3 %v11447_v44  ;;  %v11461_v44 = vld [vmem:[%s14459_s1 + $0xb58] sm:$0xff] }
 0x14e   :  { %7205 = vmatpush.bf16.msra.mxu0 %v11422_v47  ;;  %v6979_v8 = vpop.f32.mrf.mxu2 }
 0x14f   :  { %7218 = vmatpush.bf16.msra.mxu1 %v11430_v49  ;;  %v6992_v10 = vpop.f32.mrf.mxu3  ;;  %v11497_v8 = vld [vmem:[%s14459_s1 + $0xc78] sm:$0xff] }
 0x150   :  { %7231 = vmatpush.bf16.msra.mxu2 %v11438_v50  ;;  %v11505_v10 = vld [vmem:[%s14459_s1 + $0xcb8] sm:$0xff] }
 0x151   :  { %7244 = vmatpush.bf16.msra.mxu3 %v11446_v52  ;;  %v11452_v52 = vld [vmem:[%s14459_s1 + $0xb10] sm:$0xff] }
 0x152   :  { %7206 = vmatpush.bf16.msra.mxu0 %v11421_v53 }
 0x153   :  { %7219 = vmatpush.bf16.msra.mxu1 %v11429_v54  ;;  %v11460_v54 = vld [vmem:[%s14459_s1 + $0xb50] sm:$0xff] }
 0x154   :  { %7232 = vmatpush.bf16.msra.mxu2 %v11437_v55  ;;  %v11468_v55 = vld [vmem:[%s14459_s1 + $0xb90] sm:$0xff] }
 0x155   :  { %7245 = vmatpush.bf16.msra.mxu3 %v11445_v58  ;;  %v11459_v58 = vld [vmem:[%s14459_s1 + $0xb48] sm:$0xff] }
 0x156   :  { %7207 = vmatpush.bf16.msra.mxu0 %v11420_v62 }
 0x157   :  { %7220 = vmatpush.bf16.msra.mxu1 %v11428_v0 }
 0x158   :  { %7233 = vmatpush.bf16.msra.mxu2 %v11436_v1  ;;  %v11450_v1 = vld [vmem:[%s14459_s1 + $0xb00] sm:$0xff] }
 0x159   :  { %7246 = vmatpush.bf16.msra.mxu3 %v11444_v2  ;;  %v1728_v2 = vunpack.c.l.b16 %v36_v60 }
 0x15a   :  { %7208 = vmatpush.bf16.msra.mxu0 %v11419_v3 }
 0x15b   :  { %7221 = vmatpush.bf16.msra.mxu1 %v11427_v4  ;;  %v11458_v4 = vld [vmem:[%s14459_s1 + $0xb40] sm:$0xff]  ;;  %v1826_v12 = vpack.c.b16 %v1728_v2, %v1728_v2 }
 0x15c   :  { %7234 = vmatpush.bf16.msra.mxu2 %v11435_v5  ;;  %v11466_v5 = vld [vmem:[%s14459_s1 + $0xb80] sm:$0xff] }
 0x15d   :  { %7247 = vmatpush.bf16.msra.mxu3 %v11443_v9 }
 0x15e   :  { %7209 = vmatpush.bf16.msra.mxu0 %v11418_v11  ;;  %v7003_v35 = vpop.f32.mrf.mxu0  ;;  %v11474_v11 = vld [vmem:[%s14459_s1 + $0xbc0] sm:$0xff] }
 0x15f   :  { %7222 = vmatpush.bf16.msra.mxu1 %v11426_v14  ;;  %v7004_v36 = vadd.f32 %v7003_v35, %v12998_v61  ;;  %v7016_v38 = vpop.f32.mrf.mxu1  ;;  %v37_v61 = vld [vmem:[%s14460_s0 + $0xb8] sm:$0xff] }
 0x160   :  { %7235 = vmatpush.bf16.msra.mxu2 %v11434_v15  ;;  %v1730_v3 = vunpack.c.l.b16 %v37_v61  ;;  %v1731_v9 = vunpack.c.h.b16 %v37_v61  ;;  %v11513_v14 = vld [vmem:[%s14459_s1 + $0xcf8] sm:$0xff]  ;;  %v1827_v15 = vpack.c.b16 %v1729_v6, %v1729_v6 }
 0x161   :  { %7248 = vmatpush.bf16.msra.mxu3 %v11442_v21  ;;  %7210 = vmatmul.bf16.vlgmr.msra.gmra.mxu0 %v1822_v22  ;;  %v7017_v41 = vadd.f32 %v7016_v38, %v7004_v36  ;;  %v11487_v21 = vld [vmem:[%s14459_s1 + $0xc28] sm:$0xff]  ;;  %v11501_v35 = vld [vmem:[%s14459_s1 + $0xc98] sm:$0xff] }
 0x162   :  { %7254 = vmatpush.bf16.msrb.mxu0 %v11457_v17  ;;  %7223 = vmatmul.bf16.vlgmr.msra.gmra.mxu1 %v1823_v25  ;;  %v1828_v13 = vpack.c.b16 %v1730_v3, %v1730_v3  ;;  %v1829_v16 = vpack.c.b16 %v1731_v9, %v1731_v9  ;;  %v11488_v17 = vld [vmem:[%s14459_s1 + $0xc30] sm:$0xff]  ;;  %v11495_v22 = vld [vmem:[%s14459_s1 + $0xc68] sm:$0xff]  ;;  %v11509_v38 = vld [vmem:[%s14459_s1 + $0xcd8] sm:$0xff] }
 0x163   :  { %7267 = vmatpush.bf16.msrb.mxu1 %v11465_v18  ;;  %7236 = vmatmul.bf16.vlgmr.msra.gmra.mxu2 %v1824_v23  ;;  %v11496_v18 = vld [vmem:[%s14459_s1 + $0xc70] sm:$0xff]  ;;  %v11503_v23 = vld [vmem:[%s14459_s1 + $0xca8] sm:$0xff]  ;;  %v11521_v61 = vld [vmem:[%s14459_s1 + $0xd38] sm:$0xff] }
 0x164   :  { %7280 = vmatpush.bf16.msrb.mxu2 %v11473_v20  ;;  %7249 = vmatmul.bf16.vlgmr.msra.gmra.mxu3 %v1825_v26  ;;  %v11512_v20 = vld [vmem:[%s14459_s1 + $0xcf0] sm:$0xff] }
 0x165   :  { %7293 = vmatpush.bf16.msrb.mxu3 %v11481_v24  ;;  %v11511_v24 = vld [vmem:[%s14459_s1 + $0xce8] sm:$0xff]  ;;  %v11536_v9 = vld [vmem:[%s14459_s1 + $0xdb0] sm:$0xff] }
 0x166   :  { %7255 = vmatpush.bf16.msrb.mxu0 %v11456_v27  ;;  %v7029_v46 = vpop.f32.mrf.mxu2  ;;  %v7005_v50 = vpop.f32.mrf.mxu0  ;;  %v11486_v27 = vld [vmem:[%s14459_s1 + $0xc20] sm:$0xff] }
 0x167   :  { %7268 = vmatpush.bf16.msrb.mxu1 %v11464_v28  ;;  %v7030_v47 = vadd.f32 %v7029_v46, %v7017_v41  ;;  %v7042_v49 = vpop.f32.mrf.mxu3  ;;  %v7018_v53 = vpop.f32.mrf.mxu1  ;;  %v11508_v46 = vld [vmem:[%s14459_s1 + $0xcd0] sm:$0xff]  ;;  %v38_v50 = vld [vmem:[%s14460_s0 + $0xc0] sm:$0xff] }
 0x168   :  { %7281 = vmatpush.bf16.msrb.mxu2 %v11472_v29  ;;  %v11494_v29 = vld [vmem:[%s14459_s1 + $0xc60] sm:$0xff]  ;;  %v11507_v53 = vld [vmem:[%s14459_s1 + $0xcc8] sm:$0xff]  ;;  %v1733_v60 = vunpack.c.h.b16 %v38_v50 }
 0x169   :  { %7294 = vmatpush.bf16.msrb.mxu3 %v11480_v30  ;;  %v13103_v51 = vadd.f32 %v7042_v49, %v7030_v47  ;;  %v11502_v30 = vld [vmem:[%s14459_s1 + $0xca0] sm:$0xff]  ;;  %v11483_v47 = vld [vmem:[%s14459_s1 + $0xc08] sm:$0xff] }
 0x16a   :  { %7256 = vmatpush.bf16.msrb.mxu0 %v11455_v31  ;;  %v11499_v49 = vld [vmem:[%s14459_s1 + $0xc88] sm:$0xff] }
 0x16b   :  { %7269 = vmatpush.bf16.msrb.mxu1 %v11463_v32  ;;  %v11510_v32 = vld [vmem:[%s14459_s1 + $0xce0] sm:$0xff] }
 0x16c   :  { %7282 = vmatpush.bf16.msrb.mxu2 %v11471_v33  ;;  %v11485_v33 = vld [vmem:[%s14459_s1 + $0xc18] sm:$0xff] }
 0x16d   :  { %7295 = vmatpush.bf16.msrb.mxu3 %v11479_v34  ;;  %v11493_v34 = vld [vmem:[%s14459_s1 + $0xc58] sm:$0xff] }
 0x16e   :  { %7257 = vmatpush.bf16.msrb.mxu0 %v11454_v37  ;;  %v7031_v62 = vpop.f32.mrf.mxu2 }
 0x16f   :  { %7270 = vmatpush.bf16.msrb.mxu1 %v11462_v39  ;;  %v7044_v0 = vpop.f32.mrf.mxu3  ;;  %v11529_v62 = vld [vmem:[%s14459_s1 + $0xd78] sm:$0xff] }
 0x170   :  { %7283 = vmatpush.bf16.msrb.mxu2 %v11470_v40  ;;  %v11537_v0 = vld [vmem:[%s14459_s1 + $0xdb8] sm:$0xff] }
 0x171   :  { %7296 = vmatpush.bf16.msrb.mxu3 %v11478_v42  ;;  %v11484_v42 = vld [vmem:[%s14459_s1 + $0xc10] sm:$0xff] }
 0x172   :  { %7258 = vmatpush.bf16.msrb.mxu0 %v11453_v43 }
 0x173   :  { %7271 = vmatpush.bf16.msrb.mxu1 %v11461_v44  ;;  %v11492_v44 = vld [vmem:[%s14459_s1 + $0xc50] sm:$0xff] }
 0x174   :  { %7284 = vmatpush.bf16.msrb.mxu2 %v11469_v45  ;;  %v11500_v45 = vld [vmem:[%s14459_s1 + $0xc90] sm:$0xff] }
 0x175   :  { %7297 = vmatpush.bf16.msrb.mxu3 %v11477_v48  ;;  %v11491_v48 = vld [vmem:[%s14459_s1 + $0xc48] sm:$0xff] }
 0x176   :  { %7259 = vmatpush.bf16.msrb.mxu0 %v11452_v52 }
 0x177   :  { %7272 = vmatpush.bf16.msrb.mxu1 %v11460_v54 }
 0x178   :  { %7285 = vmatpush.bf16.msrb.mxu2 %v11468_v55  ;;  %v11482_v55 = vld [vmem:[%s14459_s1 + $0xc00] sm:$0xff] }
 0x179   :  { %7298 = vmatpush.bf16.msrb.mxu3 %v11476_v56  ;;  %v1732_v56 = vunpack.c.l.b16 %v38_v50 }
 0x17a   :  { %7260 = vmatpush.bf16.msrb.mxu0 %v11451_v57 }
 0x17b   :  { %7273 = vmatpush.bf16.msrb.mxu1 %v11459_v58  ;;  %v11490_v58 = vld [vmem:[%s14459_s1 + $0xc40] sm:$0xff]  ;;  %v1830_v2 = vpack.c.b16 %v1732_v56, %v1732_v56 }
 0x17c   :  { %7286 = vmatpush.bf16.msrb.mxu2 %v11467_v59  ;;  %v11498_v59 = vld [vmem:[%s14459_s1 + $0xc80] sm:$0xff] }
 0x17d   :  { %7299 = vmatpush.bf16.msrb.mxu3 %v11475_v63 }
 0x17e   :  { %7261 = vmatpush.bf16.msrb.mxu0 %v11450_v1  ;;  %v7055_v25 = vpop.f32.mrf.mxu0  ;;  %v11506_v1 = vld [vmem:[%s14459_s1 + $0xcc0] sm:$0xff] }
 0x17f   :  { %7274 = vmatpush.bf16.msrb.mxu1 %v11458_v4  ;;  %v7056_v26 = vadd.f32 %v7055_v25, %v13103_v51  ;;  %v7068_v28 = vpop.f32.mrf.mxu1  ;;  %v39_v51 = vld [vmem:[%s14460_s0 + $0xc8] sm:$0xff]  ;;  %v11545_v4 = vld [vmem:[%s14459_s1 + $0xdf8] sm:$0xff] }
 0x180   :  { %7287 = vmatpush.bf16.msrb.mxu2 %v11466_v5  ;;  %v1734_v57 = vunpack.c.l.b16 %v39_v51  ;;  %v1735_v63 = vunpack.c.h.b16 %v39_v51  ;;  %v1831_v5 = vpack.c.b16 %v1733_v60, %v1733_v60  ;;  %v11533_v25 = vld [vmem:[%s14459_s1 + $0xd98] sm:$0xff] }
 0x181   :  { %7300 = vmatpush.bf16.msrb.mxu3 %v11474_v11  ;;  %7262 = vmatmul.bf16.vlgmr.msrb.gmra.mxu0 %v1826_v12  ;;  %v7069_v31 = vadd.f32 %v7068_v28, %v7056_v26  ;;  %v11519_v11 = vld [vmem:[%s14459_s1 + $0xd28] sm:$0xff]  ;;  %v11541_v28 = vld [vmem:[%s14459_s1 + $0xdd8] sm:$0xff] }
 0x182   :  { %7306 = vmatpush.bf16.msra.mxu0 %v11489_v7  ;;  %7275 = vmatmul.bf16.vlgmr.msrb.gmra.mxu1 %v1827_v15  ;;  %v1832_v3 = vpack.c.b16 %v1734_v57, %v1734_v57  ;;  %v1833_v6 = vpack.c.b16 %v1735_v63, %v1735_v63  ;;  %v11520_v7 = vld [vmem:[%s14459_s1 + $0xd30] sm:$0xff]  ;;  %v11527_v12 = vld [vmem:[%s14459_s1 + $0xd68] sm:$0xff]  ;;  %v11553_v51 = vld [vmem:[%s14459_s1 + $0xe38] sm:$0xff] }
 0x183   :  { %7319 = vmatpush.bf16.msra.mxu1 %v11497_v8  ;;  %7288 = vmatmul.bf16.vlgmr.msrb.gmra.mxu2 %v1828_v13  ;;  %v11528_v8 = vld [vmem:[%s14459_s1 + $0xd70] sm:$0xff]  ;;  %v11535_v13 = vld [vmem:[%s14459_s1 + $0xda8] sm:$0xff] }
 0x184   :  { %7332 = vmatpush.bf16.msra.mxu2 %v11505_v10  ;;  %7301 = vmatmul.bf16.vlgmr.msrb.gmra.mxu3 %v1829_v16  ;;  %v11544_v10 = vld [vmem:[%s14459_s1 + $0xdf0] sm:$0xff] }
 0x185   :  { %7345 = vmatpush.bf16.msra.mxu3 %v11513_v14  ;;  %v11543_v14 = vld [vmem:[%s14459_s1 + $0xde8] sm:$0xff]  ;;  %v11568_v63 = vld [vmem:[%s14459_s1 + $0xeb0] sm:$0xff] }
 0x186   :  { %7307 = vmatpush.bf16.msra.mxu0 %v11488_v17  ;;  %v7081_v36 = vpop.f32.mrf.mxu2  ;;  %v7057_v40 = vpop.f32.mrf.mxu0  ;;  %v11518_v17 = vld [vmem:[%s14459_s1 + $0xd20] sm:$0xff] }
 0x187   :  { %7320 = vmatpush.bf16.msra.mxu1 %v11496_v18  ;;  %v7082_v37 = vadd.f32 %v7081_v36, %v7069_v31  ;;  %v7094_v39 = vpop.f32.mrf.mxu3  ;;  %v7070_v43 = vpop.f32.mrf.mxu1  ;;  %v11540_v36 = vld [vmem:[%s14459_s1 + $0xdd0] sm:$0xff] }
 0x188   :  { %7333 = vmatpush.bf16.msra.mxu2 %v11504_v19  ;;  %v11526_v19 = vld [vmem:[%s14459_s1 + $0xd60] sm:$0xff]  ;;  %v40_v40 = vld [vmem:[%s14460_s0 + $0xd0] sm:$0xff]  ;;  %v11539_v43 = vld [vmem:[%s14459_s1 + $0xdc8] sm:$0xff] }
 0x189   :  { %7346 = vmatpush.bf16.msra.mxu3 %v11512_v20  ;;  %v13208_v41 = vadd.f32 %v7094_v39, %v7082_v37  ;;  %v11534_v20 = vld [vmem:[%s14459_s1 + $0xda0] sm:$0xff]  ;;  %v11515_v37 = vld [vmem:[%s14459_s1 + $0xd08] sm:$0xff]  ;;  %v1737_v50 = vunpack.c.h.b16 %v40_v40 }
 0x18a   :  { %7308 = vmatpush.bf16.msra.mxu0 %v11487_v21  ;;  %v11531_v39 = vld [vmem:[%s14459_s1 + $0xd88] sm:$0xff] }
 0x18b   :  { %7321 = vmatpush.bf16.msra.mxu1 %v11495_v22  ;;  %v11542_v22 = vld [vmem:[%s14459_s1 + $0xde0] sm:$0xff] }
 0x18c   :  { %7334 = vmatpush.bf16.msra.mxu2 %v11503_v23  ;;  %v11517_v23 = vld [vmem:[%s14459_s1 + $0xd18] sm:$0xff] }
 0x18d   :  { %7347 = vmatpush.bf16.msra.mxu3 %v11511_v24  ;;  %v11525_v24 = vld [vmem:[%s14459_s1 + $0xd58] sm:$0xff] }
 0x18e   :  { %7309 = vmatpush.bf16.msra.mxu0 %v11486_v27  ;;  %v7083_v52 = vpop.f32.mrf.mxu2 }
 0x18f   :  { %7322 = vmatpush.bf16.msra.mxu1 %v11494_v29  ;;  %v7096_v54 = vpop.f32.mrf.mxu3  ;;  %v11561_v52 = vld [vmem:[%s14459_s1 + $0xe78] sm:$0xff] }
 0x190   :  { %7335 = vmatpush.bf16.msra.mxu2 %v11502_v30  ;;  %v11569_v54 = vld [vmem:[%s14459_s1 + $0xeb8] sm:$0xff] }
 0x191   :  { %7348 = vmatpush.bf16.msra.mxu3 %v11510_v32  ;;  %v11516_v32 = vld [vmem:[%s14459_s1 + $0xd10] sm:$0xff] }
 0x192   :  { %7310 = vmatpush.bf16.msra.mxu0 %v11485_v33 }
 0x193   :  { %7323 = vmatpush.bf16.msra.mxu1 %v11493_v34  ;;  %v11524_v34 = vld [vmem:[%s14459_s1 + $0xd50] sm:$0xff] }
 0x194   :  { %7336 = vmatpush.bf16.msra.mxu2 %v11501_v35  ;;  %v11532_v35 = vld [vmem:[%s14459_s1 + $0xd90] sm:$0xff] }
 0x195   :  { %7349 = vmatpush.bf16.msra.mxu3 %v11509_v38  ;;  %v11523_v38 = vld [vmem:[%s14459_s1 + $0xd48] sm:$0xff] }
 0x196   :  { %7311 = vmatpush.bf16.msra.mxu0 %v11484_v42 }
 0x197   :  { %7324 = vmatpush.bf16.msra.mxu1 %v11492_v44 }
 0x198   :  { %7337 = vmatpush.bf16.msra.mxu2 %v11500_v45  ;;  %v11514_v45 = vld [vmem:[%s14459_s1 + $0xd00] sm:$0xff] }
 0x199   :  { %7350 = vmatpush.bf16.msra.mxu3 %v11508_v46  ;;  %v1736_v46 = vunpack.c.l.b16 %v40_v40 }
 0x19a   :  { %7312 = vmatpush.bf16.msra.mxu0 %v11483_v47 }
 0x19b   :  { %7325 = vmatpush.bf16.msra.mxu1 %v11491_v48  ;;  %v11522_v48 = vld [vmem:[%s14459_s1 + $0xd40] sm:$0xff]  ;;  %v1834_v56 = vpack.c.b16 %v1736_v46, %v1736_v46 }
 0x19c   :  { %7338 = vmatpush.bf16.msra.mxu2 %v11499_v49  ;;  %v11530_v49 = vld [vmem:[%s14459_s1 + $0xd80] sm:$0xff] }
 0x19d   :  { %7351 = vmatpush.bf16.msra.mxu3 %v11507_v53 }
 0x19e   :  { %7313 = vmatpush.bf16.msra.mxu0 %v11482_v55  ;;  %v7107_v15 = vpop.f32.mrf.mxu0  ;;  %v11538_v55 = vld [vmem:[%s14459_s1 + $0xdc0] sm:$0xff] }
 0x19f   :  { %7326 = vmatpush.bf16.msra.mxu1 %v11490_v58  ;;  %v7108_v16 = vadd.f32 %v7107_v15, %v13208_v41  ;;  %v7120_v18 = vpop.f32.mrf.mxu1  ;;  %v41_v41 = vld [vmem:[%s14460_s0 + $0xd8] sm:$0xff] }
 0x1a0   :  { %7339 = vmatpush.bf16.msra.mxu2 %v11498_v59  ;;  %v1738_v47 = vunpack.c.l.b16 %v41_v41  ;;  %v1739_v53 = vunpack.c.h.b16 %v41_v41  ;;  %v11577_v58 = vld [vmem:[%s14459_s1 + $0xef8] sm:$0xff]  ;;  %v1835_v59 = vpack.c.b16 %v1737_v50, %v1737_v50 }
 0x1a1   :  { %7352 = vmatpush.bf16.msra.mxu3 %v11506_v1  ;;  %7314 = vmatmul.bf16.vlgmr.msra.gmra.mxu0 %v1830_v2  ;;  %v7121_v21 = vadd.f32 %v7120_v18, %v7108_v16  ;;  %v11551_v1 = vld [vmem:[%s14459_s1 + $0xe28] sm:$0xff]  ;;  %v11565_v15 = vld [vmem:[%s14459_s1 + $0xe98] sm:$0xff] }
 0x1a2   :  { %7358 = vmatpush.bf16.msrb.mxu0 %v11521_v61  ;;  %7327 = vmatmul.bf16.vlgmr.msra.gmra.mxu1 %v1831_v5  ;;  %v1836_v57 = vpack.c.b16 %v1738_v47, %v1738_v47  ;;  %v1837_v60 = vpack.c.b16 %v1739_v53, %v1739_v53  ;;  %v11552_v61 = vld [vmem:[%s14459_s1 + $0xe30] sm:$0xff]  ;;  %v11559_v2 = vld [vmem:[%s14459_s1 + $0xe68] sm:$0xff]  ;;  %v11573_v18 = vld [vmem:[%s14459_s1 + $0xed8] sm:$0xff] }
 0x1a3   :  { %7371 = vmatpush.bf16.msrb.mxu1 %v11529_v62  ;;  %7340 = vmatmul.bf16.vlgmr.msra.gmra.mxu2 %v1832_v3  ;;  %v11560_v62 = vld [vmem:[%s14459_s1 + $0xe70] sm:$0xff]  ;;  %v11567_v3 = vld [vmem:[%s14459_s1 + $0xea8] sm:$0xff]  ;;  %v11585_v41 = vld [vmem:[%s14459_s1 + $0xf38] sm:$0xff] }
 0x1a4   :  { %7384 = vmatpush.bf16.msrb.mxu2 %v11537_v0  ;;  %7353 = vmatmul.bf16.vlgmr.msra.gmra.mxu3 %v1833_v6  ;;  %v11576_v0 = vld [vmem:[%s14459_s1 + $0xef0] sm:$0xff] }
 0x1a5   :  { %7397 = vmatpush.bf16.msrb.mxu3 %v11545_v4  ;;  %v11575_v4 = vld [vmem:[%s14459_s1 + $0xee8] sm:$0xff]  ;;  %v11600_v53 = vld [vmem:[%s14459_s1 + $0xfb0] sm:$0xff] }
 0x1a6   :  { %7359 = vmatpush.bf16.msrb.mxu0 %v11520_v7  ;;  %v7133_v26 = vpop.f32.mrf.mxu2  ;;  %v7109_v30 = vpop.f32.mrf.mxu0  ;;  %v11550_v7 = vld [vmem:[%s14459_s1 + $0xe20] sm:$0xff] }
 0x1a7   :  { %7372 = vmatpush.bf16.msrb.mxu1 %v11528_v8  ;;  %v7134_v27 = vadd.f32 %v7133_v26, %v7121_v21  ;;  %v7146_v29 = vpop.f32.mrf.mxu3  ;;  %v7122_v33 = vpop.f32.mrf.mxu1  ;;  %v11572_v26 = vld [vmem:[%s14459_s1 + $0xed0] sm:$0xff]  ;;  %v42_v30 = vld [vmem:[%s14460_s0 + $0xe0] sm:$0xff] }
 0x1a8   :  { %7385 = vmatpush.bf16.msrb.mxu2 %v11536_v9  ;;  %v11558_v9 = vld [vmem:[%s14459_s1 + $0xe60] sm:$0xff]  ;;  %v11571_v33 = vld [vmem:[%s14459_s1 + $0xec8] sm:$0xff]  ;;  %v1741_v40 = vunpack.c.h.b16 %v42_v30 }
 0x1a9   :  { %7398 = vmatpush.bf16.msrb.mxu3 %v11544_v10  ;;  %v13313_v31 = vadd.f32 %v7146_v29, %v7134_v27  ;;  %v11566_v10 = vld [vmem:[%s14459_s1 + $0xea0] sm:$0xff]  ;;  %v11547_v27 = vld [vmem:[%s14459_s1 + $0xe08] sm:$0xff] }
 0x1aa   :  { %7360 = vmatpush.bf16.msrb.mxu0 %v11519_v11  ;;  %v11563_v29 = vld [vmem:[%s14459_s1 + $0xe88] sm:$0xff] }
 0x1ab   :  { %7373 = vmatpush.bf16.msrb.mxu1 %v11527_v12  ;;  %v11574_v12 = vld [vmem:[%s14459_s1 + $0xee0] sm:$0xff] }
 0x1ac   :  { %7386 = vmatpush.bf16.msrb.mxu2 %v11535_v13  ;;  %v11549_v13 = vld [vmem:[%s14459_s1 + $0xe18] sm:$0xff] }
 0x1ad   :  { %7399 = vmatpush.bf16.msrb.mxu3 %v11543_v14  ;;  %v11557_v14 = vld [vmem:[%s14459_s1 + $0xe58] sm:$0xff] }
 0x1ae   :  { %7361 = vmatpush.bf16.msrb.mxu0 %v11518_v17  ;;  %v7135_v42 = vpop.f32.mrf.mxu2 }
 0x1af   :  { %7374 = vmatpush.bf16.msrb.mxu1 %v11526_v19  ;;  %v7148_v44 = vpop.f32.mrf.mxu3  ;;  %v11593_v42 = vld [vmem:[%s14459_s1 + $0xf78] sm:$0xff] }
 0x1b0   :  { %7387 = vmatpush.bf16.msrb.mxu2 %v11534_v20  ;;  %v11601_v44 = vld [vmem:[%s14459_s1 + $0xfb8] sm:$0xff] }
 0x1b1   :  { %7400 = vmatpush.bf16.msrb.mxu3 %v11542_v22  ;;  %v11548_v22 = vld [vmem:[%s14459_s1 + $0xe10] sm:$0xff] }
 0x1b2   :  { %7362 = vmatpush.bf16.msrb.mxu0 %v11517_v23 }
 0x1b3   :  { %7375 = vmatpush.bf16.msrb.mxu1 %v11525_v24  ;;  %v11556_v24 = vld [vmem:[%s14459_s1 + $0xe50] sm:$0xff] }
 0x1b4   :  { %7388 = vmatpush.bf16.msrb.mxu2 %v11533_v25  ;;  %v11564_v25 = vld [vmem:[%s14459_s1 + $0xe90] sm:$0xff] }
 0x1b5   :  { %7401 = vmatpush.bf16.msrb.mxu3 %v11541_v28  ;;  %v11555_v28 = vld [vmem:[%s14459_s1 + $0xe48] sm:$0xff] }
 0x1b6   :  { %7363 = vmatpush.bf16.msrb.mxu0 %v11516_v32 }
 0x1b7   :  { %7376 = vmatpush.bf16.msrb.mxu1 %v11524_v34 }
 0x1b8   :  { %7389 = vmatpush.bf16.msrb.mxu2 %v11532_v35  ;;  %v11546_v35 = vld [vmem:[%s14459_s1 + $0xe00] sm:$0xff] }
 0x1b9   :  { %7402 = vmatpush.bf16.msrb.mxu3 %v11540_v36  ;;  %v1740_v36 = vunpack.c.l.b16 %v42_v30 }
 0x1ba   :  { %7364 = vmatpush.bf16.msrb.mxu0 %v11515_v37 }
 0x1bb   :  { %7377 = vmatpush.bf16.msrb.mxu1 %v11523_v38  ;;  %v11554_v38 = vld [vmem:[%s14459_s1 + $0xe40] sm:$0xff]  ;;  %v1838_v46 = vpack.c.b16 %v1740_v36, %v1740_v36 }
 0x1bc   :  { %7390 = vmatpush.bf16.msrb.mxu2 %v11531_v39  ;;  %v11562_v39 = vld [vmem:[%s14459_s1 + $0xe80] sm:$0xff] }
 0x1bd   :  { %7403 = vmatpush.bf16.msrb.mxu3 %v11539_v43 }
 0x1be   :  { %7365 = vmatpush.bf16.msrb.mxu0 %v11514_v45  ;;  %v7159_v5 = vpop.f32.mrf.mxu0  ;;  %v11570_v45 = vld [vmem:[%s14459_s1 + $0xec0] sm:$0xff] }
 0x1bf   :  { %7378 = vmatpush.bf16.msrb.mxu1 %v11522_v48  ;;  %v7160_v6 = vadd.f32 %v7159_v5, %v13313_v31  ;;  %v7172_v8 = vpop.f32.mrf.mxu1  ;;  %v43_v31 = vld [vmem:[%s14460_s0 + $0xe8] sm:$0xff]  ;;  %v11609_v48 = vld [vmem:[%s14459_s1 + $0xff8] sm:$0xff] }
 0x1c0   :  { %7391 = vmatpush.bf16.msrb.mxu2 %v11530_v49  ;;  %v1742_v37 = vunpack.c.l.b16 %v43_v31  ;;  %v1743_v43 = vunpack.c.h.b16 %v43_v31  ;;  %v1839_v49 = vpack.c.b16 %v1741_v40, %v1741_v40  ;;  %v11597_v5 = vld [vmem:[%s14459_s1 + $0xf98] sm:$0xff] }
 0x1c1   :  { %7404 = vmatpush.bf16.msrb.mxu3 %v11538_v55  ;;  %7366 = vmatmul.bf16.vlgmr.msrb.gmra.mxu0 %v1834_v56  ;;  %v7173_v11 = vadd.f32 %v7172_v8, %v7160_v6  ;;  %v11583_v55 = vld [vmem:[%s14459_s1 + $0xf28] sm:$0xff]  ;;  %v11605_v8 = vld [vmem:[%s14459_s1 + $0xfd8] sm:$0xff] }
 0x1c2   :  { %7410 = vmatpush.bf16.msra.mxu0 %v11553_v51  ;;  %7379 = vmatmul.bf16.vlgmr.msrb.gmra.mxu1 %v1835_v59  ;;  %v1840_v47 = vpack.c.b16 %v1742_v37, %v1742_v37  ;;  %v1841_v50 = vpack.c.b16 %v1743_v43, %v1743_v43  ;;  %v11584_v51 = vld [vmem:[%s14459_s1 + $0xf30] sm:$0xff]  ;;  %v11591_v56 = vld [vmem:[%s14459_s1 + $0xf68] sm:$0xff]  ;;  %v11617_v31 = vld [vmem:[%s14459_s1 + $0x1038] sm:$0xff] }
 0x1c3   :  { %7423 = vmatpush.bf16.msra.mxu1 %v11561_v52  ;;  %7392 = vmatmul.bf16.vlgmr.msrb.gmra.mxu2 %v1836_v57  ;;  %v11592_v52 = vld [vmem:[%s14459_s1 + $0xf70] sm:$0xff]  ;;  %v11599_v57 = vld [vmem:[%s14459_s1 + $0xfa8] sm:$0xff] }
 0x1c4   :  { %7436 = vmatpush.bf16.msra.mxu2 %v11569_v54  ;;  %7405 = vmatmul.bf16.vlgmr.msrb.gmra.mxu3 %v1837_v60  ;;  %v11608_v54 = vld [vmem:[%s14459_s1 + $0xff0] sm:$0xff] }
 0x1c5   :  { %7449 = vmatpush.bf16.msra.mxu3 %v11577_v58  ;;  %v11607_v58 = vld [vmem:[%s14459_s1 + $0xfe8] sm:$0xff]  ;;  %v11632_v43 = vld [vmem:[%s14459_s1 + $0x10b0] sm:$0xff] }
 0x1c6   :  { %7411 = vmatpush.bf16.msra.mxu0 %v11552_v61  ;;  %v7185_v16 = vpop.f32.mrf.mxu2  ;;  %v7161_v20 = vpop.f32.mrf.mxu0  ;;  %v11582_v61 = vld [vmem:[%s14459_s1 + $0xf20] sm:$0xff] }
 0x1c7   :  { %7424 = vmatpush.bf16.msra.mxu1 %v11560_v62  ;;  %v7186_v17 = vadd.f32 %v7185_v16, %v7173_v11  ;;  %v7198_v19 = vpop.f32.mrf.mxu3  ;;  %v7174_v23 = vpop.f32.mrf.mxu1  ;;  %v11604_v16 = vld [vmem:[%s14459_s1 + $0xfd0] sm:$0xff] }
 0x1c8   :  { %7437 = vmatpush.bf16.msra.mxu2 %v11568_v63  ;;  %v11590_v63 = vld [vmem:[%s14459_s1 + $0xf60] sm:$0xff]  ;;  %v44_v20 = vld [vmem:[%s14460_s0 + $0xf0] sm:$0xff]  ;;  %v11603_v23 = vld [vmem:[%s14459_s1 + $0xfc8] sm:$0xff] }
 0x1c9   :  { %7450 = vmatpush.bf16.msra.mxu3 %v11576_v0  ;;  %v13418_v21 = vadd.f32 %v7198_v19, %v7186_v17  ;;  %v11598_v0 = vld [vmem:[%s14459_s1 + $0xfa0] sm:$0xff]  ;;  %v11579_v17 = vld [vmem:[%s14459_s1 + $0xf08] sm:$0xff]  ;;  %v1745_v30 = vunpack.c.h.b16 %v44_v20 }
 0x1ca   :  { %7412 = vmatpush.bf16.msra.mxu0 %v11551_v1  ;;  %v11595_v19 = vld [vmem:[%s14459_s1 + $0xf88] sm:$0xff] }
 0x1cb   :  { %7425 = vmatpush.bf16.msra.mxu1 %v11559_v2  ;;  %v11606_v2 = vld [vmem:[%s14459_s1 + $0xfe0] sm:$0xff] }
 0x1cc   :  { %7438 = vmatpush.bf16.msra.mxu2 %v11567_v3  ;;  %v11581_v3 = vld [vmem:[%s14459_s1 + $0xf18] sm:$0xff] }
 0x1cd   :  { %7451 = vmatpush.bf16.msra.mxu3 %v11575_v4  ;;  %v11589_v4 = vld [vmem:[%s14459_s1 + $0xf58] sm:$0xff] }
 0x1ce   :  { %7413 = vmatpush.bf16.msra.mxu0 %v11550_v7  ;;  %v7187_v32 = vpop.f32.mrf.mxu2 }
 0x1cf   :  { %7426 = vmatpush.bf16.msra.mxu1 %v11558_v9  ;;  %v7200_v34 = vpop.f32.mrf.mxu3  ;;  %v11625_v32 = vld [vmem:[%s14459_s1 + $0x1078] sm:$0xff] }
 0x1d0   :  { %7439 = vmatpush.bf16.msra.mxu2 %v11566_v10  ;;  %v11633_v34 = vld [vmem:[%s14459_s1 + $0x10b8] sm:$0xff] }
 0x1d1   :  { %7452 = vmatpush.bf16.msra.mxu3 %v11574_v12  ;;  %v11580_v12 = vld [vmem:[%s14459_s1 + $0xf10] sm:$0xff] }
 0x1d2   :  { %7414 = vmatpush.bf16.msra.mxu0 %v11549_v13 }
 0x1d3   :  { %7427 = vmatpush.bf16.msra.mxu1 %v11557_v14  ;;  %v11588_v14 = vld [vmem:[%s14459_s1 + $0xf50] sm:$0xff] }
 0x1d4   :  { %7440 = vmatpush.bf16.msra.mxu2 %v11565_v15  ;;  %v11596_v15 = vld [vmem:[%s14459_s1 + $0xf90] sm:$0xff] }
 0x1d5   :  { %7453 = vmatpush.bf16.msra.mxu3 %v11573_v18  ;;  %v11587_v18 = vld [vmem:[%s14459_s1 + $0xf48] sm:$0xff] }
 0x1d6   :  { %7415 = vmatpush.bf16.msra.mxu0 %v11548_v22 }
 0x1d7   :  { %7428 = vmatpush.bf16.msra.mxu1 %v11556_v24 }
 0x1d8   :  { %7441 = vmatpush.bf16.msra.mxu2 %v11564_v25  ;;  %v11578_v25 = vld [vmem:[%s14459_s1 + $0xf00] sm:$0xff] }
 0x1d9   :  { %7454 = vmatpush.bf16.msra.mxu3 %v11572_v26  ;;  %v1744_v26 = vunpack.c.l.b16 %v44_v20 }
 0x1da   :  { %7416 = vmatpush.bf16.msra.mxu0 %v11547_v27 }
 0x1db   :  { %7429 = vmatpush.bf16.msra.mxu1 %v11555_v28  ;;  %v11586_v28 = vld [vmem:[%s14459_s1 + $0xf40] sm:$0xff]  ;;  %v1842_v36 = vpack.c.b16 %v1744_v26, %v1744_v26 }
 0x1dc   :  { %7442 = vmatpush.bf16.msra.mxu2 %v11563_v29  ;;  %v11594_v29 = vld [vmem:[%s14459_s1 + $0xf80] sm:$0xff] }
 0x1dd   :  { %7455 = vmatpush.bf16.msra.mxu3 %v11571_v33 }
 0x1de   :  { %7417 = vmatpush.bf16.msra.mxu0 %v11546_v35  ;;  %v7211_v59 = vpop.f32.mrf.mxu0  ;;  %v11602_v35 = vld [vmem:[%s14459_s1 + $0xfc0] sm:$0xff] }
 0x1df   :  { %7430 = vmatpush.bf16.msra.mxu1 %v11554_v38  ;;  %v7212_v60 = vadd.f32 %v7211_v59, %v13418_v21  ;;  %v7224_v62 = vpop.f32.mrf.mxu1  ;;  %v45_v21 = vld [vmem:[%s14460_s0 + $0xf8] sm:$0xff] }
 0x1e0   :  { %7443 = vmatpush.bf16.msra.mxu2 %v11562_v39  ;;  %v1746_v27 = vunpack.c.l.b16 %v45_v21  ;;  %v1747_v33 = vunpack.c.h.b16 %v45_v21  ;;  %v11641_v38 = vld [vmem:[%s14459_s1 + $0x10f8] sm:$0xff]  ;;  %v1843_v39 = vpack.c.b16 %v1745_v30, %v1745_v30 }
 0x1e1   :  { %7456 = vmatpush.bf16.msra.mxu3 %v11570_v45  ;;  %7418 = vmatmul.bf16.vlgmr.msra.gmra.mxu0 %v1838_v46  ;;  %v7225_v1 = vadd.f32 %v7224_v62, %v7212_v60  ;;  %v11615_v45 = vld [vmem:[%s14459_s1 + $0x1028] sm:$0xff]  ;;  %v11629_v59 = vld [vmem:[%s14459_s1 + $0x1098] sm:$0xff] }
 0x1e2   :  { %7462 = vmatpush.bf16.msrb.mxu0 %v11585_v41  ;;  %7431 = vmatmul.bf16.vlgmr.msra.gmra.mxu1 %v1839_v49  ;;  %v1844_v37 = vpack.c.b16 %v1746_v27, %v1746_v27  ;;  %v1845_v40 = vpack.c.b16 %v1747_v33, %v1747_v33  ;;  %v11616_v41 = vld [vmem:[%s14459_s1 + $0x1030] sm:$0xff]  ;;  %v11623_v46 = vld [vmem:[%s14459_s1 + $0x1068] sm:$0xff]  ;;  %v11637_v62 = vld [vmem:[%s14459_s1 + $0x10d8] sm:$0xff] }
 0x1e3   :  { %7475 = vmatpush.bf16.msrb.mxu1 %v11593_v42  ;;  %7444 = vmatmul.bf16.vlgmr.msra.gmra.mxu2 %v1840_v47  ;;  %v11624_v42 = vld [vmem:[%s14459_s1 + $0x1070] sm:$0xff]  ;;  %v11631_v47 = vld [vmem:[%s14459_s1 + $0x10a8] sm:$0xff]  ;;  %v11649_v21 = vld [vmem:[%s14459_s1 + $0x1138] sm:$0xff] }
 0x1e4   :  { %7488 = vmatpush.bf16.msrb.mxu2 %v11601_v44  ;;  %7457 = vmatmul.bf16.vlgmr.msra.gmra.mxu3 %v1841_v50  ;;  %v11640_v44 = vld [vmem:[%s14459_s1 + $0x10f0] sm:$0xff] }
 0x1e5   :  { %7501 = vmatpush.bf16.msrb.mxu3 %v11609_v48  ;;  %v11639_v48 = vld [vmem:[%s14459_s1 + $0x10e8] sm:$0xff]  ;;  %v11664_v33 = vld [vmem:[%s14459_s1 + $0x11b0] sm:$0xff] }
 0x1e6   :  { %7463 = vmatpush.bf16.msrb.mxu0 %v11584_v51  ;;  %v7237_v6 = vpop.f32.mrf.mxu2  ;;  %v7213_v10 = vpop.f32.mrf.mxu0  ;;  %v11614_v51 = vld [vmem:[%s14459_s1 + $0x1020] sm:$0xff] }
 0x1e7   :  { %7476 = vmatpush.bf16.msrb.mxu1 %v11592_v52  ;;  %v7238_v7 = vadd.f32 %v7237_v6, %v7225_v1  ;;  %v7250_v9 = vpop.f32.mrf.mxu3  ;;  %v7226_v13 = vpop.f32.mrf.mxu1  ;;  %v11636_v6 = vld [vmem:[%s14459_s1 + $0x10d0] sm:$0xff]  ;;  %v46_v10 = vld [vmem:[%s14460_s0 + $0x100] sm:$0xff] }
 0x1e8   :  { %7489 = vmatpush.bf16.msrb.mxu2 %v11600_v53  ;;  %v11622_v53 = vld [vmem:[%s14459_s1 + $0x1060] sm:$0xff]  ;;  %v11635_v13 = vld [vmem:[%s14459_s1 + $0x10c8] sm:$0xff]  ;;  %v1749_v20 = vunpack.c.h.b16 %v46_v10 }
 0x1e9   :  { %7502 = vmatpush.bf16.msrb.mxu3 %v11608_v54  ;;  %v13523_v11 = vadd.f32 %v7250_v9, %v7238_v7  ;;  %v11630_v54 = vld [vmem:[%s14459_s1 + $0x10a0] sm:$0xff]  ;;  %v11611_v7 = vld [vmem:[%s14459_s1 + $0x1008] sm:$0xff] }
 0x1ea   :  { %7464 = vmatpush.bf16.msrb.mxu0 %v11583_v55  ;;  %v11627_v9 = vld [vmem:[%s14459_s1 + $0x1088] sm:$0xff] }
 0x1eb   :  { %7477 = vmatpush.bf16.msrb.mxu1 %v11591_v56  ;;  %v11638_v56 = vld [vmem:[%s14459_s1 + $0x10e0] sm:$0xff] }
 0x1ec   :  { %7490 = vmatpush.bf16.msrb.mxu2 %v11599_v57  ;;  %v11613_v57 = vld [vmem:[%s14459_s1 + $0x1018] sm:$0xff] }
 0x1ed   :  { %7503 = vmatpush.bf16.msrb.mxu3 %v11607_v58  ;;  %v11621_v58 = vld [vmem:[%s14459_s1 + $0x1058] sm:$0xff] }
 0x1ee   :  { %7465 = vmatpush.bf16.msrb.mxu0 %v11582_v61  ;;  %v7239_v22 = vpop.f32.mrf.mxu2 }
 0x1ef   :  { %7478 = vmatpush.bf16.msrb.mxu1 %v11590_v63  ;;  %v7252_v24 = vpop.f32.mrf.mxu3  ;;  %v11657_v22 = vld [vmem:[%s14459_s1 + $0x1178] sm:$0xff] }
 0x1f0   :  { %7491 = vmatpush.bf16.msrb.mxu2 %v11598_v0  ;;  %v11665_v24 = vld [vmem:[%s14459_s1 + $0x11b8] sm:$0xff] }
 0x1f1   :  { %7504 = vmatpush.bf16.msrb.mxu3 %v11606_v2  ;;  %v11612_v2 = vld [vmem:[%s14459_s1 + $0x1010] sm:$0xff] }
 0x1f2   :  { %7466 = vmatpush.bf16.msrb.mxu0 %v11581_v3 }
 0x1f3   :  { %7479 = vmatpush.bf16.msrb.mxu1 %v11589_v4  ;;  %v11620_v4 = vld [vmem:[%s14459_s1 + $0x1050] sm:$0xff] }
 0x1f4   :  { %7492 = vmatpush.bf16.msrb.mxu2 %v11597_v5  ;;  %v11628_v5 = vld [vmem:[%s14459_s1 + $0x1090] sm:$0xff] }
 0x1f5   :  { %7505 = vmatpush.bf16.msrb.mxu3 %v11605_v8  ;;  %v11619_v8 = vld [vmem:[%s14459_s1 + $0x1048] sm:$0xff] }
 0x1f6   :  { %7467 = vmatpush.bf16.msrb.mxu0 %v11580_v12 }
 0x1f7   :  { %7480 = vmatpush.bf16.msrb.mxu1 %v11588_v14 }
 0x1f8   :  { %7493 = vmatpush.bf16.msrb.mxu2 %v11596_v15  ;;  %v11610_v15 = vld [vmem:[%s14459_s1 + $0x1000] sm:$0xff] }
 0x1f9   :  { %7506 = vmatpush.bf16.msrb.mxu3 %v11604_v16  ;;  %v1748_v16 = vunpack.c.l.b16 %v46_v10 }
 0x1fa   :  { %7468 = vmatpush.bf16.msrb.mxu0 %v11579_v17 }
 0x1fb   :  { %7481 = vmatpush.bf16.msrb.mxu1 %v11587_v18  ;;  %v11618_v18 = vld [vmem:[%s14459_s1 + $0x1040] sm:$0xff]  ;;  %v1846_v26 = vpack.c.b16 %v1748_v16, %v1748_v16 }
 0x1fc   :  { %7494 = vmatpush.bf16.msrb.mxu2 %v11595_v19  ;;  %v11626_v19 = vld [vmem:[%s14459_s1 + $0x1080] sm:$0xff] }
 0x1fd   :  { %7507 = vmatpush.bf16.msrb.mxu3 %v11603_v23 }
 0x1fe   :  { %7469 = vmatpush.bf16.msrb.mxu0 %v11578_v25  ;;  %v7263_v49 = vpop.f32.mrf.mxu0  ;;  %v11634_v25 = vld [vmem:[%s14459_s1 + $0x10c0] sm:$0xff] }
 0x1ff   :  { %7482 = vmatpush.bf16.msrb.mxu1 %v11586_v28  ;;  %v7264_v50 = vadd.f32 %v7263_v49, %v13523_v11  ;;  %v7276_v52 = vpop.f32.mrf.mxu1  ;;  %v47_v11 = vld [vmem:[%s14460_s0 + $0x108] sm:$0xff]  ;;  %v11673_v28 = vld [vmem:[%s14459_s1 + $0x11f8] sm:$0xff] }
 0x200   :  { %7495 = vmatpush.bf16.msrb.mxu2 %v11594_v29  ;;  %v1750_v17 = vunpack.c.l.b16 %v47_v11  ;;  %v1751_v23 = vunpack.c.h.b16 %v47_v11  ;;  %v1847_v29 = vpack.c.b16 %v1749_v20, %v1749_v20  ;;  %v11661_v49 = vld [vmem:[%s14459_s1 + $0x1198] sm:$0xff] }
 0x201   :  { %7508 = vmatpush.bf16.msrb.mxu3 %v11602_v35  ;;  %7470 = vmatmul.bf16.vlgmr.msrb.gmra.mxu0 %v1842_v36  ;;  %v7277_v55 = vadd.f32 %v7276_v52, %v7264_v50  ;;  %v11647_v35 = vld [vmem:[%s14459_s1 + $0x1128] sm:$0xff]  ;;  %v11669_v52 = vld [vmem:[%s14459_s1 + $0x11d8] sm:$0xff] }
 0x202   :  { %7514 = vmatpush.bf16.msra.mxu0 %v11617_v31  ;;  %7483 = vmatmul.bf16.vlgmr.msrb.gmra.mxu1 %v1843_v39  ;;  %v1848_v27 = vpack.c.b16 %v1750_v17, %v1750_v17  ;;  %v1849_v30 = vpack.c.b16 %v1751_v23, %v1751_v23  ;;  %v11648_v31 = vld [vmem:[%s14459_s1 + $0x1130] sm:$0xff]  ;;  %v11655_v36 = vld [vmem:[%s14459_s1 + $0x1168] sm:$0xff]  ;;  %v11681_v11 = vld [vmem:[%s14459_s1 + $0x1238] sm:$0xff] }
 0x203   :  { %7527 = vmatpush.bf16.msra.mxu1 %v11625_v32  ;;  %7496 = vmatmul.bf16.vlgmr.msrb.gmra.mxu2 %v1844_v37  ;;  %v11656_v32 = vld [vmem:[%s14459_s1 + $0x1170] sm:$0xff]  ;;  %v11663_v37 = vld [vmem:[%s14459_s1 + $0x11a8] sm:$0xff] }
 0x204   :  { %7540 = vmatpush.bf16.msra.mxu2 %v11633_v34  ;;  %7509 = vmatmul.bf16.vlgmr.msrb.gmra.mxu3 %v1845_v40  ;;  %v11672_v34 = vld [vmem:[%s14459_s1 + $0x11f0] sm:$0xff] }
 0x205   :  { %7553 = vmatpush.bf16.msra.mxu3 %v11641_v38  ;;  %v11671_v38 = vld [vmem:[%s14459_s1 + $0x11e8] sm:$0xff]  ;;  %v11696_v23 = vld [vmem:[%s14459_s1 + $0x12b0] sm:$0xff] }
 0x206   :  { %7515 = vmatpush.bf16.msra.mxu0 %v11616_v41  ;;  %v7289_v60 = vpop.f32.mrf.mxu2  ;;  %v7265_v0 = vpop.f32.mrf.mxu0  ;;  %v11646_v41 = vld [vmem:[%s14459_s1 + $0x1120] sm:$0xff] }
 0x207   :  { %7528 = vmatpush.bf16.msra.mxu1 %v11624_v42  ;;  %v7290_v61 = vadd.f32 %v7289_v60, %v7277_v55  ;;  %v7302_v63 = vpop.f32.mrf.mxu3  ;;  %v7278_v3 = vpop.f32.mrf.mxu1  ;;  %v11668_v60 = vld [vmem:[%s14459_s1 + $0x11d0] sm:$0xff] }
 0x208   :  { %7541 = vmatpush.bf16.msra.mxu2 %v11632_v43  ;;  %v11654_v43 = vld [vmem:[%s14459_s1 + $0x1160] sm:$0xff]  ;;  %v48_v0 = vld [vmem:[%s14460_s0 + $0x110] sm:$0xff]  ;;  %v11667_v3 = vld [vmem:[%s14459_s1 + $0x11c8] sm:$0xff] }
 0x209   :  { %7554 = vmatpush.bf16.msra.mxu3 %v11640_v44  ;;  %v13628_v1 = vadd.f32 %v7302_v63, %v7290_v61  ;;  %v11662_v44 = vld [vmem:[%s14459_s1 + $0x11a0] sm:$0xff]  ;;  %v11643_v61 = vld [vmem:[%s14459_s1 + $0x1108] sm:$0xff]  ;;  %v1753_v10 = vunpack.c.h.b16 %v48_v0 }
 0x20a   :  { %7516 = vmatpush.bf16.msra.mxu0 %v11615_v45  ;;  %v11659_v63 = vld [vmem:[%s14459_s1 + $0x1188] sm:$0xff] }
 0x20b   :  { %7529 = vmatpush.bf16.msra.mxu1 %v11623_v46  ;;  %v11670_v46 = vld [vmem:[%s14459_s1 + $0x11e0] sm:$0xff] }
 0x20c   :  { %7542 = vmatpush.bf16.msra.mxu2 %v11631_v47  ;;  %v11645_v47 = vld [vmem:[%s14459_s1 + $0x1118] sm:$0xff] }
 0x20d   :  { %7555 = vmatpush.bf16.msra.mxu3 %v11639_v48  ;;  %v11653_v48 = vld [vmem:[%s14459_s1 + $0x1158] sm:$0xff] }
 0x20e   :  { %7517 = vmatpush.bf16.msra.mxu0 %v11614_v51  ;;  %v7291_v12 = vpop.f32.mrf.mxu2 }
 0x20f   :  { %7530 = vmatpush.bf16.msra.mxu1 %v11622_v53  ;;  %v7304_v14 = vpop.f32.mrf.mxu3  ;;  %v11689_v12 = vld [vmem:[%s14459_s1 + $0x1278] sm:$0xff] }
 0x210   :  { %7543 = vmatpush.bf16.msra.mxu2 %v11630_v54  ;;  %v11697_v14 = vld [vmem:[%s14459_s1 + $0x12b8] sm:$0xff] }
 0x211   :  { %7556 = vmatpush.bf16.msra.mxu3 %v11638_v56  ;;  %v11644_v56 = vld [vmem:[%s14459_s1 + $0x1110] sm:$0xff] }
 0x212   :  { %7518 = vmatpush.bf16.msra.mxu0 %v11613_v57 }
 0x213   :  { %7531 = vmatpush.bf16.msra.mxu1 %v11621_v58  ;;  %v11652_v58 = vld [vmem:[%s14459_s1 + $0x1150] sm:$0xff] }
 0x214   :  { %7544 = vmatpush.bf16.msra.mxu2 %v11629_v59  ;;  %v11660_v59 = vld [vmem:[%s14459_s1 + $0x1190] sm:$0xff] }
 0x215   :  { %7557 = vmatpush.bf16.msra.mxu3 %v11637_v62  ;;  %v11651_v62 = vld [vmem:[%s14459_s1 + $0x1148] sm:$0xff] }
 0x216   :  { %7519 = vmatpush.bf16.msra.mxu0 %v11612_v2 }
 0x217   :  { %7532 = vmatpush.bf16.msra.mxu1 %v11620_v4 }
 0x218   :  { %7545 = vmatpush.bf16.msra.mxu2 %v11628_v5  ;;  %v11642_v5 = vld [vmem:[%s14459_s1 + $0x1100] sm:$0xff] }
 0x219   :  { %7558 = vmatpush.bf16.msra.mxu3 %v11636_v6  ;;  %v1752_v6 = vunpack.c.l.b16 %v48_v0 }
 0x21a   :  { %7520 = vmatpush.bf16.msra.mxu0 %v11611_v7 }
 0x21b   :  { %7533 = vmatpush.bf16.msra.mxu1 %v11619_v8  ;;  %v11650_v8 = vld [vmem:[%s14459_s1 + $0x1140] sm:$0xff]  ;;  %v1850_v16 = vpack.c.b16 %v1752_v6, %v1752_v6 }
 0x21c   :  { %7546 = vmatpush.bf16.msra.mxu2 %v11627_v9  ;;  %v11658_v9 = vld [vmem:[%s14459_s1 + $0x1180] sm:$0xff] }
 0x21d   :  { %7559 = vmatpush.bf16.msra.mxu3 %v11635_v13 }
 0x21e   :  { %7521 = vmatpush.bf16.msra.mxu0 %v11610_v15  ;;  %v7315_v39 = vpop.f32.mrf.mxu0  ;;  %v11666_v15 = vld [vmem:[%s14459_s1 + $0x11c0] sm:$0xff] }
 0x21f   :  { %7534 = vmatpush.bf16.msra.mxu1 %v11618_v18  ;;  %v7316_v40 = vadd.f32 %v7315_v39, %v13628_v1  ;;  %v7328_v42 = vpop.f32.mrf.mxu1  ;;  %v49_v1 = vld [vmem:[%s14460_s0 + $0x118] sm:$0xff] }
 0x220   :  { %7547 = vmatpush.bf16.msra.mxu2 %v11626_v19  ;;  %v1754_v7 = vunpack.c.l.b16 %v49_v1  ;;  %v1755_v13 = vunpack.c.h.b16 %v49_v1  ;;  %v11705_v18 = vld [vmem:[%s14459_s1 + $0x12f8] sm:$0xff]  ;;  %v1851_v19 = vpack.c.b16 %v1753_v10, %v1753_v10 }
 0x221   :  { %7560 = vmatpush.bf16.msra.mxu3 %v11634_v25  ;;  %7522 = vmatmul.bf16.vlgmr.msra.gmra.mxu0 %v1846_v26  ;;  %v7329_v45 = vadd.f32 %v7328_v42, %v7316_v40  ;;  %v11679_v25 = vld [vmem:[%s14459_s1 + $0x1228] sm:$0xff]  ;;  %v11693_v39 = vld [vmem:[%s14459_s1 + $0x1298] sm:$0xff] }
 0x222   :  { %7566 = vmatpush.bf16.msrb.mxu0 %v11649_v21  ;;  %7535 = vmatmul.bf16.vlgmr.msra.gmra.mxu1 %v1847_v29  ;;  %v1852_v17 = vpack.c.b16 %v1754_v7, %v1754_v7  ;;  %v1853_v20 = vpack.c.b16 %v1755_v13, %v1755_v13  ;;  %v11680_v21 = vld [vmem:[%s14459_s1 + $0x1230] sm:$0xff]  ;;  %v11687_v26 = vld [vmem:[%s14459_s1 + $0x1268] sm:$0xff]  ;;  %v11701_v42 = vld [vmem:[%s14459_s1 + $0x12d8] sm:$0xff] }
 0x223   :  { %7579 = vmatpush.bf16.msrb.mxu1 %v11657_v22  ;;  %7548 = vmatmul.bf16.vlgmr.msra.gmra.mxu2 %v1848_v27  ;;  %v11688_v22 = vld [vmem:[%s14459_s1 + $0x1270] sm:$0xff]  ;;  %v11695_v27 = vld [vmem:[%s14459_s1 + $0x12a8] sm:$0xff]  ;;  %v11713_v1 = vld [vmem:[%s14459_s1 + $0x1338] sm:$0xff] }
 0x224   :  { %7592 = vmatpush.bf16.msrb.mxu2 %v11665_v24  ;;  %7561 = vmatmul.bf16.vlgmr.msra.gmra.mxu3 %v1849_v30  ;;  %v11704_v24 = vld [vmem:[%s14459_s1 + $0x12f0] sm:$0xff] }
 0x225   :  { %7605 = vmatpush.bf16.msrb.mxu3 %v11673_v28  ;;  %v11703_v28 = vld [vmem:[%s14459_s1 + $0x12e8] sm:$0xff]  ;;  %v11728_v13 = vld [vmem:[%s14459_s1 + $0x13b0] sm:$0xff] }
 0x226   :  { %7567 = vmatpush.bf16.msrb.mxu0 %v11648_v31  ;;  %v7341_v50 = vpop.f32.mrf.mxu2  ;;  %v7317_v54 = vpop.f32.mrf.mxu0  ;;  %v11678_v31 = vld [vmem:[%s14459_s1 + $0x1220] sm:$0xff] }
 0x227   :  { %7580 = vmatpush.bf16.msrb.mxu1 %v11656_v32  ;;  %v7342_v51 = vadd.f32 %v7341_v50, %v7329_v45  ;;  %v7354_v53 = vpop.f32.mrf.mxu3  ;;  %v7330_v57 = vpop.f32.mrf.mxu1  ;;  %v11700_v50 = vld [vmem:[%s14459_s1 + $0x12d0] sm:$0xff]  ;;  %v50_v54 = vld [vmem:[%s14460_s0 + $0x120] sm:$0xff] }
 0x228   :  { %7593 = vmatpush.bf16.msrb.mxu2 %v11664_v33  ;;  %v11686_v33 = vld [vmem:[%s14459_s1 + $0x1260] sm:$0xff]  ;;  %v11699_v57 = vld [vmem:[%s14459_s1 + $0x12c8] sm:$0xff]  ;;  %v1757_v0 = vunpack.c.h.b16 %v50_v54 }
 0x229   :  { %7606 = vmatpush.bf16.msrb.mxu3 %v11672_v34  ;;  %v13733_v55 = vadd.f32 %v7354_v53, %v7342_v51  ;;  %v11694_v34 = vld [vmem:[%s14459_s1 + $0x12a0] sm:$0xff]  ;;  %v11675_v51 = vld [vmem:[%s14459_s1 + $0x1208] sm:$0xff] }
 0x22a   :  { %7568 = vmatpush.bf16.msrb.mxu0 %v11647_v35  ;;  %v11691_v53 = vld [vmem:[%s14459_s1 + $0x1288] sm:$0xff] }
 0x22b   :  { %7581 = vmatpush.bf16.msrb.mxu1 %v11655_v36  ;;  %v11702_v36 = vld [vmem:[%s14459_s1 + $0x12e0] sm:$0xff] }
 0x22c   :  { %7594 = vmatpush.bf16.msrb.mxu2 %v11663_v37  ;;  %v11677_v37 = vld [vmem:[%s14459_s1 + $0x1218] sm:$0xff] }
 0x22d   :  { %7607 = vmatpush.bf16.msrb.mxu3 %v11671_v38  ;;  %v11685_v38 = vld [vmem:[%s14459_s1 + $0x1258] sm:$0xff] }
 0x22e   :  { %7569 = vmatpush.bf16.msrb.mxu0 %v11646_v41  ;;  %v7343_v2 = vpop.f32.mrf.mxu2 }
 0x22f   :  { %7582 = vmatpush.bf16.msrb.mxu1 %v11654_v43  ;;  %v7356_v4 = vpop.f32.mrf.mxu3  ;;  %v11721_v2 = vld [vmem:[%s14459_s1 + $0x1378] sm:$0xff] }
 0x230   :  { %7595 = vmatpush.bf16.msrb.mxu2 %v11662_v44  ;;  %v11729_v4 = vld [vmem:[%s14459_s1 + $0x13b8] sm:$0xff] }
 0x231   :  { %7608 = vmatpush.bf16.msrb.mxu3 %v11670_v46  ;;  %v11676_v46 = vld [vmem:[%s14459_s1 + $0x1210] sm:$0xff] }
 0x232   :  { %7570 = vmatpush.bf16.msrb.mxu0 %v11645_v47 }
 0x233   :  { %7583 = vmatpush.bf16.msrb.mxu1 %v11653_v48  ;;  %v11684_v48 = vld [vmem:[%s14459_s1 + $0x1250] sm:$0xff] }
 0x234   :  { %7596 = vmatpush.bf16.msrb.mxu2 %v11661_v49  ;;  %v11692_v49 = vld [vmem:[%s14459_s1 + $0x1290] sm:$0xff] }
 0x235   :  { %7609 = vmatpush.bf16.msrb.mxu3 %v11669_v52  ;;  %v11683_v52 = vld [vmem:[%s14459_s1 + $0x1248] sm:$0xff] }
 0x236   :  { %7571 = vmatpush.bf16.msrb.mxu0 %v11644_v56 }
 0x237   :  { %7584 = vmatpush.bf16.msrb.mxu1 %v11652_v58 }
 0x238   :  { %7597 = vmatpush.bf16.msrb.mxu2 %v11660_v59  ;;  %v11674_v59 = vld [vmem:[%s14459_s1 + $0x1200] sm:$0xff] }
 0x239   :  { %7610 = vmatpush.bf16.msrb.mxu3 %v11668_v60  ;;  %v1756_v60 = vunpack.c.l.b16 %v50_v54 }
 0x23a   :  { %7572 = vmatpush.bf16.msrb.mxu0 %v11643_v61 }
 0x23b   :  { %7585 = vmatpush.bf16.msrb.mxu1 %v11651_v62  ;;  %v11682_v62 = vld [vmem:[%s14459_s1 + $0x1240] sm:$0xff]  ;;  %v1854_v6 = vpack.c.b16 %v1756_v60, %v1756_v60 }
 0x23c   :  { %7598 = vmatpush.bf16.msrb.mxu2 %v11659_v63  ;;  %v11690_v63 = vld [vmem:[%s14459_s1 + $0x1280] sm:$0xff] }
 0x23d   :  { %7611 = vmatpush.bf16.msrb.mxu3 %v11667_v3 }
 0x23e   :  { %7573 = vmatpush.bf16.msrb.mxu0 %v11642_v5  ;;  %v7367_v29 = vpop.f32.mrf.mxu0  ;;  %v11698_v5 = vld [vmem:[%s14459_s1 + $0x12c0] sm:$0xff] }
 0x23f   :  { %7586 = vmatpush.bf16.msrb.mxu1 %v11650_v8  ;;  %v7368_v30 = vadd.f32 %v7367_v29, %v13733_v55  ;;  %v7380_v32 = vpop.f32.mrf.mxu1  ;;  %v51_v55 = vld [vmem:[%s14460_s0 + $0x128] sm:$0xff]  ;;  %v11737_v8 = vld [vmem:[%s14459_s1 + $0x13f8] sm:$0xff] }
 0x240   :  { %7599 = vmatpush.bf16.msrb.mxu2 %v11658_v9  ;;  %v1758_v61 = vunpack.c.l.b16 %v51_v55  ;;  %v1759_v3 = vunpack.c.h.b16 %v51_v55  ;;  %v1855_v9 = vpack.c.b16 %v1757_v0, %v1757_v0  ;;  %v11725_v29 = vld [vmem:[%s14459_s1 + $0x1398] sm:$0xff] }
 0x241   :  { %7612 = vmatpush.bf16.msrb.mxu3 %v11666_v15  ;;  %7574 = vmatmul.bf16.vlgmr.msrb.gmra.mxu0 %v1850_v16  ;;  %v7381_v35 = vadd.f32 %v7380_v32, %v7368_v30  ;;  %v11711_v15 = vld [vmem:[%s14459_s1 + $0x1328] sm:$0xff]  ;;  %v11733_v32 = vld [vmem:[%s14459_s1 + $0x13d8] sm:$0xff] }
 0x242   :  { %7618 = vmatpush.bf16.msra.mxu0 %v11681_v11  ;;  %7587 = vmatmul.bf16.vlgmr.msrb.gmra.mxu1 %v1851_v19  ;;  %v1856_v7 = vpack.c.b16 %v1758_v61, %v1758_v61  ;;  %v1857_v10 = vpack.c.b16 %v1759_v3, %v1759_v3  ;;  %v11712_v11 = vld [vmem:[%s14459_s1 + $0x1330] sm:$0xff]  ;;  %v11719_v16 = vld [vmem:[%s14459_s1 + $0x1368] sm:$0xff]  ;;  %v11745_v55 = vld [vmem:[%s14459_s1 + $0x1438] sm:$0xff] }
 0x243   :  { %7631 = vmatpush.bf16.msra.mxu1 %v11689_v12  ;;  %7600 = vmatmul.bf16.vlgmr.msrb.gmra.mxu2 %v1852_v17  ;;  %v11720_v12 = vld [vmem:[%s14459_s1 + $0x1370] sm:$0xff]  ;;  %v11727_v17 = vld [vmem:[%s14459_s1 + $0x13a8] sm:$0xff] }
 0x244   :  { %7644 = vmatpush.bf16.msra.mxu2 %v11697_v14  ;;  %7613 = vmatmul.bf16.vlgmr.msrb.gmra.mxu3 %v1853_v20  ;;  %v11736_v14 = vld [vmem:[%s14459_s1 + $0x13f0] sm:$0xff] }
 0x245   :  { %7657 = vmatpush.bf16.msra.mxu3 %v11705_v18  ;;  %v11735_v18 = vld [vmem:[%s14459_s1 + $0x13e8] sm:$0xff]  ;;  %v11760_v3 = vld [vmem:[%s14459_s1 + $0x14b0] sm:$0xff] }
 0x246   :  { %7619 = vmatpush.bf16.msra.mxu0 %v11680_v21  ;;  %v7393_v40 = vpop.f32.mrf.mxu2  ;;  %v7369_v44 = vpop.f32.mrf.mxu0  ;;  %v11710_v21 = vld [vmem:[%s14459_s1 + $0x1320] sm:$0xff] }
 0x247   :  { %7632 = vmatpush.bf16.msra.mxu1 %v11688_v22  ;;  %v7394_v41 = vadd.f32 %v7393_v40, %v7381_v35  ;;  %v7406_v43 = vpop.f32.mrf.mxu3  ;;  %v7382_v47 = vpop.f32.mrf.mxu1  ;;  %v11732_v40 = vld [vmem:[%s14459_s1 + $0x13d0] sm:$0xff] }
 0x248   :  { %7645 = vmatpush.bf16.msra.mxu2 %v11696_v23  ;;  %v11718_v23 = vld [vmem:[%s14459_s1 + $0x1360] sm:$0xff]  ;;  %v52_v44 = vld [vmem:[%s14460_s0 + $0x130] sm:$0xff]  ;;  %v11731_v47 = vld [vmem:[%s14459_s1 + $0x13c8] sm:$0xff] }
 0x249   :  { %7658 = vmatpush.bf16.msra.mxu3 %v11704_v24  ;;  %v13838_v45 = vadd.f32 %v7406_v43, %v7394_v41  ;;  %v11726_v24 = vld [vmem:[%s14459_s1 + $0x13a0] sm:$0xff]  ;;  %v11707_v41 = vld [vmem:[%s14459_s1 + $0x1308] sm:$0xff]  ;;  %v1761_v54 = vunpack.c.h.b16 %v52_v44 }
 0x24a   :  { %7620 = vmatpush.bf16.msra.mxu0 %v11679_v25  ;;  %v11723_v43 = vld [vmem:[%s14459_s1 + $0x1388] sm:$0xff] }
 0x24b   :  { %7633 = vmatpush.bf16.msra.mxu1 %v11687_v26  ;;  %v11734_v26 = vld [vmem:[%s14459_s1 + $0x13e0] sm:$0xff] }
 0x24c   :  { %7646 = vmatpush.bf16.msra.mxu2 %v11695_v27  ;;  %v11709_v27 = vld [vmem:[%s14459_s1 + $0x1318] sm:$0xff] }
 0x24d   :  { %7659 = vmatpush.bf16.msra.mxu3 %v11703_v28  ;;  %v11717_v28 = vld [vmem:[%s14459_s1 + $0x1358] sm:$0xff] }
 0x24e   :  { %7621 = vmatpush.bf16.msra.mxu0 %v11678_v31  ;;  %v7395_v56 = vpop.f32.mrf.mxu2 }
 0x24f   :  { %7634 = vmatpush.bf16.msra.mxu1 %v11686_v33  ;;  %v7408_v58 = vpop.f32.mrf.mxu3  ;;  %v11753_v56 = vld [vmem:[%s14459_s1 + $0x1478] sm:$0xff] }
 0x250   :  { %7647 = vmatpush.bf16.msra.mxu2 %v11694_v34  ;;  %v11761_v58 = vld [vmem:[%s14459_s1 + $0x14b8] sm:$0xff] }
 0x251   :  { %7660 = vmatpush.bf16.msra.mxu3 %v11702_v36  ;;  %v11708_v36 = vld [vmem:[%s14459_s1 + $0x1310] sm:$0xff] }
 0x252   :  { %7622 = vmatpush.bf16.msra.mxu0 %v11677_v37 }
 0x253   :  { %7635 = vmatpush.bf16.msra.mxu1 %v11685_v38  ;;  %v11716_v38 = vld [vmem:[%s14459_s1 + $0x1350] sm:$0xff] }
 0x254   :  { %7648 = vmatpush.bf16.msra.mxu2 %v11693_v39  ;;  %v11724_v39 = vld [vmem:[%s14459_s1 + $0x1390] sm:$0xff] }
 0x255   :  { %7661 = vmatpush.bf16.msra.mxu3 %v11701_v42  ;;  %v11715_v42 = vld [vmem:[%s14459_s1 + $0x1348] sm:$0xff] }
 0x256   :  { %7623 = vmatpush.bf16.msra.mxu0 %v11676_v46 }
 0x257   :  { %7636 = vmatpush.bf16.msra.mxu1 %v11684_v48 }
 0x258   :  { %7649 = vmatpush.bf16.msra.mxu2 %v11692_v49  ;;  %v11706_v49 = vld [vmem:[%s14459_s1 + $0x1300] sm:$0xff] }
 0x259   :  { %7662 = vmatpush.bf16.msra.mxu3 %v11700_v50  ;;  %v1760_v50 = vunpack.c.l.b16 %v52_v44 }
 0x25a   :  { %7624 = vmatpush.bf16.msra.mxu0 %v11675_v51 }
 0x25b   :  { %7637 = vmatpush.bf16.msra.mxu1 %v11683_v52  ;;  %v11714_v52 = vld [vmem:[%s14459_s1 + $0x1340] sm:$0xff]  ;;  %v1858_v60 = vpack.c.b16 %v1760_v50, %v1760_v50 }
 0x25c   :  { %7650 = vmatpush.bf16.msra.mxu2 %v11691_v53  ;;  %v11722_v53 = vld [vmem:[%s14459_s1 + $0x1380] sm:$0xff] }
 0x25d   :  { %7663 = vmatpush.bf16.msra.mxu3 %v11699_v57 }
 0x25e   :  { %7625 = vmatpush.bf16.msra.mxu0 %v11674_v59  ;;  %v7419_v19 = vpop.f32.mrf.mxu0  ;;  %v11730_v59 = vld [vmem:[%s14459_s1 + $0x13c0] sm:$0xff] }
 0x25f   :  { %7638 = vmatpush.bf16.msra.mxu1 %v11682_v62  ;;  %v7420_v20 = vadd.f32 %v7419_v19, %v13838_v45  ;;  %v7432_v22 = vpop.f32.mrf.mxu1  ;;  %v53_v45 = vld [vmem:[%s14460_s0 + $0x138] sm:$0xff] }
 0x260   :  { %7651 = vmatpush.bf16.msra.mxu2 %v11690_v63  ;;  %v1762_v51 = vunpack.c.l.b16 %v53_v45  ;;  %v1763_v57 = vunpack.c.h.b16 %v53_v45  ;;  %v11769_v62 = vld [vmem:[%s14459_s1 + $0x14f8] sm:$0xff]  ;;  %v1859_v63 = vpack.c.b16 %v1761_v54, %v1761_v54 }
 0x261   :  { %7664 = vmatpush.bf16.msra.mxu3 %v11698_v5  ;;  %7626 = vmatmul.bf16.vlgmr.msra.gmra.mxu0 %v1854_v6  ;;  %v7433_v25 = vadd.f32 %v7432_v22, %v7420_v20  ;;  %v11743_v5 = vld [vmem:[%s14459_s1 + $0x1428] sm:$0xff]  ;;  %v11757_v19 = vld [vmem:[%s14459_s1 + $0x1498] sm:$0xff] }
 0x262   :  { %7670 = vmatpush.bf16.msrb.mxu0 %v11713_v1  ;;  %7639 = vmatmul.bf16.vlgmr.msra.gmra.mxu1 %v1855_v9  ;;  %v1860_v61 = vpack.c.b16 %v1762_v51, %v1762_v51  ;;  %v1861_v0 = vpack.c.b16 %v1763_v57, %v1763_v57  ;;  %v11744_v1 = vld [vmem:[%s14459_s1 + $0x1430] sm:$0xff]  ;;  %v11751_v6 = vld [vmem:[%s14459_s1 + $0x1468] sm:$0xff]  ;;  %v11765_v22 = vld [vmem:[%s14459_s1 + $0x14d8] sm:$0xff] }
 0x263   :  { %7683 = vmatpush.bf16.msrb.mxu1 %v11721_v2  ;;  %7652 = vmatmul.bf16.vlgmr.msra.gmra.mxu2 %v1856_v7  ;;  %v11752_v2 = vld [vmem:[%s14459_s1 + $0x1470] sm:$0xff]  ;;  %v11759_v7 = vld [vmem:[%s14459_s1 + $0x14a8] sm:$0xff]  ;;  %v11777_v45 = vld [vmem:[%s14459_s1 + $0x1538] sm:$0xff] }
 0x264   :  { %7696 = vmatpush.bf16.msrb.mxu2 %v11729_v4  ;;  %7665 = vmatmul.bf16.vlgmr.msra.gmra.mxu3 %v1857_v10  ;;  %v11768_v4 = vld [vmem:[%s14459_s1 + $0x14f0] sm:$0xff] }
 0x265   :  { %7709 = vmatpush.bf16.msrb.mxu3 %v11737_v8  ;;  %v11767_v8 = vld [vmem:[%s14459_s1 + $0x14e8] sm:$0xff]  ;;  %v11792_v57 = vld [vmem:[%s14459_s1 + $0x15b0] sm:$0xff] }
 0x266   :  { %7671 = vmatpush.bf16.msrb.mxu0 %v11712_v11  ;;  %v7445_v30 = vpop.f32.mrf.mxu2  ;;  %v7421_v34 = vpop.f32.mrf.mxu0  ;;  %v11742_v11 = vld [vmem:[%s14459_s1 + $0x1420] sm:$0xff] }
 0x267   :  { %7684 = vmatpush.bf16.msrb.mxu1 %v11720_v12  ;;  %v7446_v31 = vadd.f32 %v7445_v30, %v7433_v25  ;;  %v7458_v33 = vpop.f32.mrf.mxu3  ;;  %v7434_v37 = vpop.f32.mrf.mxu1  ;;  %v11764_v30 = vld [vmem:[%s14459_s1 + $0x14d0] sm:$0xff]  ;;  %v54_v34 = vld [vmem:[%s14460_s0 + $0x140] sm:$0xff] }
 0x268   :  { %7697 = vmatpush.bf16.msrb.mxu2 %v11728_v13  ;;  %v11750_v13 = vld [vmem:[%s14459_s1 + $0x1460] sm:$0xff]  ;;  %v11763_v37 = vld [vmem:[%s14459_s1 + $0x14c8] sm:$0xff]  ;;  %v1765_v44 = vunpack.c.h.b16 %v54_v34 }
 0x269   :  { %7710 = vmatpush.bf16.msrb.mxu3 %v11736_v14  ;;  %v13943_v35 = vadd.f32 %v7458_v33, %v7446_v31  ;;  %v11758_v14 = vld [vmem:[%s14459_s1 + $0x14a0] sm:$0xff]  ;;  %v11739_v31 = vld [vmem:[%s14459_s1 + $0x1408] sm:$0xff] }
 0x26a   :  { %7672 = vmatpush.bf16.msrb.mxu0 %v11711_v15  ;;  %v11755_v33 = vld [vmem:[%s14459_s1 + $0x1488] sm:$0xff] }
 0x26b   :  { %7685 = vmatpush.bf16.msrb.mxu1 %v11719_v16  ;;  %v11766_v16 = vld [vmem:[%s14459_s1 + $0x14e0] sm:$0xff] }
 0x26c   :  { %7698 = vmatpush.bf16.msrb.mxu2 %v11727_v17  ;;  %v11741_v17 = vld [vmem:[%s14459_s1 + $0x1418] sm:$0xff] }
 0x26d   :  { %7711 = vmatpush.bf16.msrb.mxu3 %v11735_v18  ;;  %v11749_v18 = vld [vmem:[%s14459_s1 + $0x1458] sm:$0xff] }
 0x26e   :  { %7673 = vmatpush.bf16.msrb.mxu0 %v11710_v21  ;;  %v7447_v46 = vpop.f32.mrf.mxu2 }
 0x26f   :  { %7686 = vmatpush.bf16.msrb.mxu1 %v11718_v23  ;;  %v7460_v48 = vpop.f32.mrf.mxu3  ;;  %v11785_v46 = vld [vmem:[%s14459_s1 + $0x1578] sm:$0xff] }
 0x270   :  { %7699 = vmatpush.bf16.msrb.mxu2 %v11726_v24  ;;  %v11793_v48 = vld [vmem:[%s14459_s1 + $0x15b8] sm:$0xff] }
 0x271   :  { %7712 = vmatpush.bf16.msrb.mxu3 %v11734_v26  ;;  %v11740_v26 = vld [vmem:[%s14459_s1 + $0x1410] sm:$0xff] }
 0x272   :  { %7674 = vmatpush.bf16.msrb.mxu0 %v11709_v27 }
 0x273   :  { %7687 = vmatpush.bf16.msrb.mxu1 %v11717_v28  ;;  %v11748_v28 = vld [vmem:[%s14459_s1 + $0x1450] sm:$0xff] }
 0x274   :  { %7700 = vmatpush.bf16.msrb.mxu2 %v11725_v29  ;;  %v11756_v29 = vld [vmem:[%s14459_s1 + $0x1490] sm:$0xff] }
 0x275   :  { %7713 = vmatpush.bf16.msrb.mxu3 %v11733_v32  ;;  %v11747_v32 = vld [vmem:[%s14459_s1 + $0x1448] sm:$0xff] }
 0x276   :  { %7675 = vmatpush.bf16.msrb.mxu0 %v11708_v36 }
 0x277   :  { %7688 = vmatpush.bf16.msrb.mxu1 %v11716_v38 }
 0x278   :  { %7701 = vmatpush.bf16.msrb.mxu2 %v11724_v39  ;;  %v11738_v39 = vld [vmem:[%s14459_s1 + $0x1400] sm:$0xff] }
 0x279   :  { %7714 = vmatpush.bf16.msrb.mxu3 %v11732_v40  ;;  %v1764_v40 = vunpack.c.l.b16 %v54_v34 }
 0x27a   :  { %7676 = vmatpush.bf16.msrb.mxu0 %v11707_v41 }
 0x27b   :  { %7689 = vmatpush.bf16.msrb.mxu1 %v11715_v42  ;;  %v11746_v42 = vld [vmem:[%s14459_s1 + $0x1440] sm:$0xff]  ;;  %v1862_v50 = vpack.c.b16 %v1764_v40, %v1764_v40 }
 0x27c   :  { %7702 = vmatpush.bf16.msrb.mxu2 %v11723_v43  ;;  %v11754_v43 = vld [vmem:[%s14459_s1 + $0x1480] sm:$0xff] }
 0x27d   :  { %7715 = vmatpush.bf16.msrb.mxu3 %v11731_v47 }
 0x27e   :  { %7677 = vmatpush.bf16.msrb.mxu0 %v11706_v49  ;;  %v7471_v9 = vpop.f32.mrf.mxu0  ;;  %v11762_v49 = vld [vmem:[%s14459_s1 + $0x14c0] sm:$0xff] }
 0x27f   :  { %7690 = vmatpush.bf16.msrb.mxu1 %v11714_v52  ;;  %v7472_v10 = vadd.f32 %v7471_v9, %v13943_v35  ;;  %v7484_v12 = vpop.f32.mrf.mxu1  ;;  %v55_v35 = vld [vmem:[%s14460_s0 + $0x148] sm:$0xff]  ;;  %v11801_v52 = vld [vmem:[%s14459_s1 + $0x15f8] sm:$0xff] }
 0x280   :  { %7703 = vmatpush.bf16.msrb.mxu2 %v11722_v53  ;;  %v1766_v41 = vunpack.c.l.b16 %v55_v35  ;;  %v1767_v47 = vunpack.c.h.b16 %v55_v35  ;;  %v1863_v53 = vpack.c.b16 %v1765_v44, %v1765_v44  ;;  %v11789_v9 = vld [vmem:[%s14459_s1 + $0x1598] sm:$0xff] }
 0x281   :  { %7716 = vmatpush.bf16.msrb.mxu3 %v11730_v59  ;;  %7678 = vmatmul.bf16.vlgmr.msrb.gmra.mxu0 %v1858_v60  ;;  %v7485_v15 = vadd.f32 %v7484_v12, %v7472_v10  ;;  %v11775_v59 = vld [vmem:[%s14459_s1 + $0x1528] sm:$0xff]  ;;  %v11797_v12 = vld [vmem:[%s14459_s1 + $0x15d8] sm:$0xff] }
 0x282   :  { %7722 = vmatpush.bf16.msra.mxu0 %v11745_v55  ;;  %7691 = vmatmul.bf16.vlgmr.msrb.gmra.mxu1 %v1859_v63  ;;  %v1864_v51 = vpack.c.b16 %v1766_v41, %v1766_v41  ;;  %v1865_v54 = vpack.c.b16 %v1767_v47, %v1767_v47  ;;  %v11776_v55 = vld [vmem:[%s14459_s1 + $0x1530] sm:$0xff]  ;;  %v11783_v60 = vld [vmem:[%s14459_s1 + $0x1568] sm:$0xff]  ;;  %v11809_v35 = vld [vmem:[%s14459_s1 + $0x1638] sm:$0xff] }
 0x283   :  { %7735 = vmatpush.bf16.msra.mxu1 %v11753_v56  ;;  %7704 = vmatmul.bf16.vlgmr.msrb.gmra.mxu2 %v1860_v61  ;;  %v11784_v56 = vld [vmem:[%s14459_s1 + $0x1570] sm:$0xff]  ;;  %v11791_v61 = vld [vmem:[%s14459_s1 + $0x15a8] sm:$0xff] }
 0x284   :  { %7748 = vmatpush.bf16.msra.mxu2 %v11761_v58  ;;  %7717 = vmatmul.bf16.vlgmr.msrb.gmra.mxu3 %v1861_v0  ;;  %v11800_v58 = vld [vmem:[%s14459_s1 + $0x15f0] sm:$0xff] }
 0x285   :  { %7761 = vmatpush.bf16.msra.mxu3 %v11769_v62  ;;  %v11799_v62 = vld [vmem:[%s14459_s1 + $0x15e8] sm:$0xff]  ;;  %v11824_v47 = vld [vmem:[%s14459_s1 + $0x16b0] sm:$0xff] }
 0x286   :  { %7723 = vmatpush.bf16.msra.mxu0 %v11744_v1  ;;  %v7497_v20 = vpop.f32.mrf.mxu2  ;;  %v7473_v24 = vpop.f32.mrf.mxu0  ;;  %v11774_v1 = vld [vmem:[%s14459_s1 + $0x1520] sm:$0xff] }
 0x287   :  { %7736 = vmatpush.bf16.msra.mxu1 %v11752_v2  ;;  %v7498_v21 = vadd.f32 %v7497_v20, %v7485_v15  ;;  %v7510_v23 = vpop.f32.mrf.mxu3  ;;  %v7486_v27 = vpop.f32.mrf.mxu1  ;;  %v11796_v20 = vld [vmem:[%s14459_s1 + $0x15d0] sm:$0xff] }
 0x288   :  { %7749 = vmatpush.bf16.msra.mxu2 %v11760_v3  ;;  %v11782_v3 = vld [vmem:[%s14459_s1 + $0x1560] sm:$0xff]  ;;  %v56_v24 = vld [vmem:[%s14460_s0 + $0x150] sm:$0xff]  ;;  %v11795_v27 = vld [vmem:[%s14459_s1 + $0x15c8] sm:$0xff] }
 0x289   :  { %7762 = vmatpush.bf16.msra.mxu3 %v11768_v4  ;;  %v14048_v25 = vadd.f32 %v7510_v23, %v7498_v21  ;;  %v11790_v4 = vld [vmem:[%s14459_s1 + $0x15a0] sm:$0xff]  ;;  %v11771_v21 = vld [vmem:[%s14459_s1 + $0x1508] sm:$0xff]  ;;  %v1769_v34 = vunpack.c.h.b16 %v56_v24 }
 0x28a   :  { %7724 = vmatpush.bf16.msra.mxu0 %v11743_v5  ;;  %v11787_v23 = vld [vmem:[%s14459_s1 + $0x1588] sm:$0xff] }
 0x28b   :  { %7737 = vmatpush.bf16.msra.mxu1 %v11751_v6  ;;  %v11798_v6 = vld [vmem:[%s14459_s1 + $0x15e0] sm:$0xff] }
 0x28c   :  { %7750 = vmatpush.bf16.msra.mxu2 %v11759_v7  ;;  %v11773_v7 = vld [vmem:[%s14459_s1 + $0x1518] sm:$0xff] }
 0x28d   :  { %7763 = vmatpush.bf16.msra.mxu3 %v11767_v8  ;;  %v11781_v8 = vld [vmem:[%s14459_s1 + $0x1558] sm:$0xff] }
 0x28e   :  { %7725 = vmatpush.bf16.msra.mxu0 %v11742_v11  ;;  %v7499_v36 = vpop.f32.mrf.mxu2 }
 0x28f   :  { %7738 = vmatpush.bf16.msra.mxu1 %v11750_v13  ;;  %v7512_v38 = vpop.f32.mrf.mxu3  ;;  %v11817_v36 = vld [vmem:[%s14459_s1 + $0x1678] sm:$0xff] }
 0x290   :  { %7751 = vmatpush.bf16.msra.mxu2 %v11758_v14  ;;  %v11825_v38 = vld [vmem:[%s14459_s1 + $0x16b8] sm:$0xff] }
 0x291   :  { %7764 = vmatpush.bf16.msra.mxu3 %v11766_v16  ;;  %v11772_v16 = vld [vmem:[%s14459_s1 + $0x1510] sm:$0xff] }
 0x292   :  { %7726 = vmatpush.bf16.msra.mxu0 %v11741_v17 }
 0x293   :  { %7739 = vmatpush.bf16.msra.mxu1 %v11749_v18  ;;  %v11780_v18 = vld [vmem:[%s14459_s1 + $0x1550] sm:$0xff] }
 0x294   :  { %7752 = vmatpush.bf16.msra.mxu2 %v11757_v19  ;;  %v11788_v19 = vld [vmem:[%s14459_s1 + $0x1590] sm:$0xff] }
 0x295   :  { %7765 = vmatpush.bf16.msra.mxu3 %v11765_v22  ;;  %v11779_v22 = vld [vmem:[%s14459_s1 + $0x1548] sm:$0xff] }
 0x296   :  { %7727 = vmatpush.bf16.msra.mxu0 %v11740_v26 }
 0x297   :  { %7740 = vmatpush.bf16.msra.mxu1 %v11748_v28 }
 0x298   :  { %7753 = vmatpush.bf16.msra.mxu2 %v11756_v29  ;;  %v11770_v29 = vld [vmem:[%s14459_s1 + $0x1500] sm:$0xff] }
 0x299   :  { %7766 = vmatpush.bf16.msra.mxu3 %v11764_v30  ;;  %v1768_v30 = vunpack.c.l.b16 %v56_v24 }
 0x29a   :  { %7728 = vmatpush.bf16.msra.mxu0 %v11739_v31 }
 0x29b   :  { %7741 = vmatpush.bf16.msra.mxu1 %v11747_v32  ;;  %v11778_v32 = vld [vmem:[%s14459_s1 + $0x1540] sm:$0xff]  ;;  %v1866_v40 = vpack.c.b16 %v1768_v30, %v1768_v30 }
 0x29c   :  { %7754 = vmatpush.bf16.msra.mxu2 %v11755_v33  ;;  %v11786_v33 = vld [vmem:[%s14459_s1 + $0x1580] sm:$0xff] }
 0x29d   :  { %7767 = vmatpush.bf16.msra.mxu3 %v11763_v37 }
 0x29e   :  { %7729 = vmatpush.bf16.msra.mxu0 %v11738_v39  ;;  %v7523_v63 = vpop.f32.mrf.mxu0  ;;  %v11794_v39 = vld [vmem:[%s14459_s1 + $0x15c0] sm:$0xff] }
 0x29f   :  { %7742 = vmatpush.bf16.msra.mxu1 %v11746_v42  ;;  %v7524_v0 = vadd.f32 %v7523_v63, %v14048_v25  ;;  %v7536_v2 = vpop.f32.mrf.mxu1  ;;  %v57_v25 = vld [vmem:[%s14460_s0 + $0x158] sm:$0xff] }
 0x2a0   :  { %7755 = vmatpush.bf16.msra.mxu2 %v11754_v43  ;;  %v1770_v31 = vunpack.c.l.b16 %v57_v25  ;;  %v1771_v37 = vunpack.c.h.b16 %v57_v25  ;;  %v11833_v42 = vld [vmem:[%s14459_s1 + $0x16f8] sm:$0xff]  ;;  %v1867_v43 = vpack.c.b16 %v1769_v34, %v1769_v34 }
 0x2a1   :  { %7768 = vmatpush.bf16.msra.mxu3 %v11762_v49  ;;  %7730 = vmatmul.bf16.vlgmr.msra.gmra.mxu0 %v1862_v50  ;;  %v7537_v5 = vadd.f32 %v7536_v2, %v7524_v0  ;;  %v11807_v49 = vld [vmem:[%s14459_s1 + $0x1628] sm:$0xff]  ;;  %v11821_v63 = vld [vmem:[%s14459_s1 + $0x1698] sm:$0xff] }
 0x2a2   :  { %7774 = vmatpush.bf16.msrb.mxu0 %v11777_v45  ;;  %7743 = vmatmul.bf16.vlgmr.msra.gmra.mxu1 %v1863_v53  ;;  %v1868_v41 = vpack.c.b16 %v1770_v31, %v1770_v31  ;;  %v1869_v44 = vpack.c.b16 %v1771_v37, %v1771_v37  ;;  %v11808_v45 = vld [vmem:[%s14459_s1 + $0x1630] sm:$0xff]  ;;  %v11815_v50 = vld [vmem:[%s14459_s1 + $0x1668] sm:$0xff]  ;;  %v11829_v2 = vld [vmem:[%s14459_s1 + $0x16d8] sm:$0xff] }
 0x2a3   :  { %7787 = vmatpush.bf16.msrb.mxu1 %v11785_v46  ;;  %7756 = vmatmul.bf16.vlgmr.msra.gmra.mxu2 %v1864_v51  ;;  %v11816_v46 = vld [vmem:[%s14459_s1 + $0x1670] sm:$0xff]  ;;  %v11823_v51 = vld [vmem:[%s14459_s1 + $0x16a8] sm:$0xff]  ;;  %v11841_v25 = vld [vmem:[%s14459_s1 + $0x1738] sm:$0xff] }
 0x2a4   :  { %7800 = vmatpush.bf16.msrb.mxu2 %v11793_v48  ;;  %7769 = vmatmul.bf16.vlgmr.msra.gmra.mxu3 %v1865_v54  ;;  %v11832_v48 = vld [vmem:[%s14459_s1 + $0x16f0] sm:$0xff] }
 0x2a5   :  { %7813 = vmatpush.bf16.msrb.mxu3 %v11801_v52  ;;  %v11831_v52 = vld [vmem:[%s14459_s1 + $0x16e8] sm:$0xff]  ;;  %v11856_v37 = vld [vmem:[%s14459_s1 + $0x17b0] sm:$0xff] }
 0x2a6   :  { %7775 = vmatpush.bf16.msrb.mxu0 %v11776_v55  ;;  %v7549_v10 = vpop.f32.mrf.mxu2  ;;  %v7525_v14 = vpop.f32.mrf.mxu0  ;;  %v11806_v55 = vld [vmem:[%s14459_s1 + $0x1620] sm:$0xff] }
 0x2a7   :  { %7788 = vmatpush.bf16.msrb.mxu1 %v11784_v56  ;;  %v7550_v11 = vadd.f32 %v7549_v10, %v7537_v5  ;;  %v7562_v13 = vpop.f32.mrf.mxu3  ;;  %v7538_v17 = vpop.f32.mrf.mxu1  ;;  %v11828_v10 = vld [vmem:[%s14459_s1 + $0x16d0] sm:$0xff]  ;;  %v58_v14 = vld [vmem:[%s14460_s0 + $0x160] sm:$0xff] }
 0x2a8   :  { %7801 = vmatpush.bf16.msrb.mxu2 %v11792_v57  ;;  %v11814_v57 = vld [vmem:[%s14459_s1 + $0x1660] sm:$0xff]  ;;  %v11827_v17 = vld [vmem:[%s14459_s1 + $0x16c8] sm:$0xff]  ;;  %v1773_v24 = vunpack.c.h.b16 %v58_v14 }
 0x2a9   :  { %7814 = vmatpush.bf16.msrb.mxu3 %v11800_v58  ;;  %v14153_v15 = vadd.f32 %v7562_v13, %v7550_v11  ;;  %v11822_v58 = vld [vmem:[%s14459_s1 + $0x16a0] sm:$0xff]  ;;  %v11803_v11 = vld [vmem:[%s14459_s1 + $0x1608] sm:$0xff] }
 0x2aa   :  { %7776 = vmatpush.bf16.msrb.mxu0 %v11775_v59  ;;  %v11819_v13 = vld [vmem:[%s14459_s1 + $0x1688] sm:$0xff] }
 0x2ab   :  { %7789 = vmatpush.bf16.msrb.mxu1 %v11783_v60  ;;  %v11830_v60 = vld [vmem:[%s14459_s1 + $0x16e0] sm:$0xff] }
 0x2ac   :  { %7802 = vmatpush.bf16.msrb.mxu2 %v11791_v61  ;;  %v11805_v61 = vld [vmem:[%s14459_s1 + $0x1618] sm:$0xff] }
 0x2ad   :  { %7815 = vmatpush.bf16.msrb.mxu3 %v11799_v62  ;;  %v11813_v62 = vld [vmem:[%s14459_s1 + $0x1658] sm:$0xff] }
 0x2ae   :  { %7777 = vmatpush.bf16.msrb.mxu0 %v11774_v1  ;;  %v7551_v26 = vpop.f32.mrf.mxu2 }
 0x2af   :  { %7790 = vmatpush.bf16.msrb.mxu1 %v11782_v3  ;;  %v7564_v28 = vpop.f32.mrf.mxu3  ;;  %v11849_v26 = vld [vmem:[%s14459_s1 + $0x1778] sm:$0xff] }
 0x2b0   :  { %7803 = vmatpush.bf16.msrb.mxu2 %v11790_v4  ;;  %v11857_v28 = vld [vmem:[%s14459_s1 + $0x17b8] sm:$0xff] }
 0x2b1   :  { %7816 = vmatpush.bf16.msrb.mxu3 %v11798_v6  ;;  %v11804_v6 = vld [vmem:[%s14459_s1 + $0x1610] sm:$0xff] }
 0x2b2   :  { %7778 = vmatpush.bf16.msrb.mxu0 %v11773_v7 }
 0x2b3   :  { %7791 = vmatpush.bf16.msrb.mxu1 %v11781_v8  ;;  %v11812_v8 = vld [vmem:[%s14459_s1 + $0x1650] sm:$0xff] }
 0x2b4   :  { %7804 = vmatpush.bf16.msrb.mxu2 %v11789_v9  ;;  %v11820_v9 = vld [vmem:[%s14459_s1 + $0x1690] sm:$0xff] }
 0x2b5   :  { %7817 = vmatpush.bf16.msrb.mxu3 %v11797_v12  ;;  %v11811_v12 = vld [vmem:[%s14459_s1 + $0x1648] sm:$0xff] }
 0x2b6   :  { %7779 = vmatpush.bf16.msrb.mxu0 %v11772_v16 }
 0x2b7   :  { %7792 = vmatpush.bf16.msrb.mxu1 %v11780_v18 }
 0x2b8   :  { %7805 = vmatpush.bf16.msrb.mxu2 %v11788_v19  ;;  %v11802_v19 = vld [vmem:[%s14459_s1 + $0x1600] sm:$0xff] }
 0x2b9   :  { %7818 = vmatpush.bf16.msrb.mxu3 %v11796_v20  ;;  %v1772_v20 = vunpack.c.l.b16 %v58_v14  ;;  %v11850_v14 = vld [vmem:[%s14459_s1 + $0x1780] sm:$0xff] }
 0x2ba   :  { %7780 = vmatpush.bf16.msrb.mxu0 %v11771_v21 }
 0x2bb   :  { %7793 = vmatpush.bf16.msrb.mxu1 %v11779_v22  ;;  %v11810_v22 = vld [vmem:[%s14459_s1 + $0x1640] sm:$0xff]  ;;  %v1870_v30 = vpack.c.b16 %v1772_v20, %v1772_v20 }
 0x2bc   :  { %7806 = vmatpush.bf16.msrb.mxu2 %v11787_v23  ;;  %v11818_v23 = vld [vmem:[%s14459_s1 + $0x1680] sm:$0xff] }
 0x2bd   :  { %7819 = vmatpush.bf16.msrb.mxu3 %v11795_v27 }
 0x2be   :  { %7781 = vmatpush.bf16.msrb.mxu0 %v11770_v29  ;;  %v7575_v53 = vpop.f32.mrf.mxu0  ;;  %v11826_v29 = vld [vmem:[%s14459_s1 + $0x16c0] sm:$0xff] }
 0x2bf   :  { %7794 = vmatpush.bf16.msrb.mxu1 %v11778_v32  ;;  %v7576_v54 = vadd.f32 %v7575_v53, %v14153_v15  ;;  %v7588_v56 = vpop.f32.mrf.mxu1  ;;  %v59_v15 = vld [vmem:[%s14460_s0 + $0x168] sm:$0xff]  ;;  %v11865_v32 = vld [vmem:[%s14459_s1 + $0x17f8] sm:$0xff] }
 0x2c0   :  { %7807 = vmatpush.bf16.msrb.mxu2 %v11786_v33  ;;  %v1774_v21 = vunpack.c.l.b16 %v59_v15  ;;  %v1775_v27 = vunpack.c.h.b16 %v59_v15  ;;  %v1871_v33 = vpack.c.b16 %v1773_v24, %v1773_v24  ;;  %v11853_v53 = vld [vmem:[%s14459_s1 + $0x1798] sm:$0xff]  ;;  %v11880_v24 = vld [vmem:[%s14459_s1 + $0x1870] sm:$0xff] }
 0x2c1   :  { %7820 = vmatpush.bf16.msrb.mxu3 %v11794_v39  ;;  %7782 = vmatmul.bf16.vlgmr.msrb.gmra.mxu0 %v1866_v40  ;;  %v7589_v59 = vadd.f32 %v7588_v56, %v7576_v54  ;;  %v11839_v39 = vld [vmem:[%s14459_s1 + $0x1728] sm:$0xff]  ;;  %v11861_v56 = vld [vmem:[%s14459_s1 + $0x17d8] sm:$0xff] }
 0x2c2   :  { %7826 = vmatpush.bf16.msra.mxu0 %v11809_v35  ;;  %7795 = vmatmul.bf16.vlgmr.msrb.gmra.mxu1 %v1867_v43  ;;  %v1872_v31 = vpack.c.b16 %v1774_v21, %v1774_v21  ;;  %v1873_v34 = vpack.c.b16 %v1775_v27, %v1775_v27  ;;  %v11840_v35 = vld [vmem:[%s14459_s1 + $0x1730] sm:$0xff]  ;;  %v11847_v40 = vld [vmem:[%s14459_s1 + $0x1768] sm:$0xff]  ;;  %v11873_v15 = vld [vmem:[%s14459_s1 + $0x1838] sm:$0xff] }
 0x2c3   :  { %7839 = vmatpush.bf16.msra.mxu1 %v11817_v36  ;;  %7808 = vmatmul.bf16.vlgmr.msrb.gmra.mxu2 %v1868_v41  ;;  %v11848_v36 = vld [vmem:[%s14459_s1 + $0x1770] sm:$0xff]  ;;  %v11855_v41 = vld [vmem:[%s14459_s1 + $0x17a8] sm:$0xff] }
 0x2c4   :  { %7852 = vmatpush.bf16.msra.mxu2 %v11825_v38  ;;  %7821 = vmatmul.bf16.vlgmr.msrb.gmra.mxu3 %v1869_v44  ;;  %v11864_v38 = vld [vmem:[%s14459_s1 + $0x17f0] sm:$0xff] }
 0x2c5   :  { %7865 = vmatpush.bf16.msra.mxu3 %v11833_v42  ;;  %v11863_v42 = vld [vmem:[%s14459_s1 + $0x17e8] sm:$0xff] }
 0x2c6   :  { %7827 = vmatpush.bf16.msra.mxu0 %v11808_v45  ;;  %v7601_v0 = vpop.f32.mrf.mxu2  ;;  %v7577_v4 = vpop.f32.mrf.mxu0  ;;  %v11838_v45 = vld [vmem:[%s14459_s1 + $0x1720] sm:$0xff] }
 0x2c7   :  { %7840 = vmatpush.bf16.msra.mxu1 %v11816_v46  ;;  %v7602_v1 = vadd.f32 %v7601_v0, %v7589_v59  ;;  %v7614_v3 = vpop.f32.mrf.mxu3  ;;  %v7590_v7 = vpop.f32.mrf.mxu1  ;;  %v11860_v0 = vld [vmem:[%s14459_s1 + $0x17d0] sm:$0xff]  ;;  %v11851_v4 = vld [vmem:[%s14459_s1 + $0x1788] sm:$0xff] }
 0x2c8   :  { %7853 = vmatpush.bf16.msra.mxu2 %v11824_v47  ;;  %v11846_v47 = vld [vmem:[%s14459_s1 + $0x1760] sm:$0xff]  ;;  %v11859_v7 = vld [vmem:[%s14459_s1 + $0x17c8] sm:$0xff] }
 0x2c9   :  { %7866 = vmatpush.bf16.msra.mxu3 %v11832_v48  ;;  %v14258_v5 = vadd.f32 %v7614_v3, %v7602_v1  ;;  %v11854_v48 = vld [vmem:[%s14459_s1 + $0x17a0] sm:$0xff]  ;;  %v11835_v1 = vld [vmem:[%s14459_s1 + $0x1708] sm:$0xff] }
 0x2ca   :  { %7828 = vmatpush.bf16.msra.mxu0 %v11807_v49  ;;  %v11843_v3 = vld [vmem:[%s14459_s1 + $0x1748] sm:$0xff] }
 0x2cb   :  { %7841 = vmatpush.bf16.msra.mxu1 %v11815_v50  ;;  %v11862_v50 = vld [vmem:[%s14459_s1 + $0x17e0] sm:$0xff] }
 0x2cc   :  { %7854 = vmatpush.bf16.msra.mxu2 %v11823_v51  ;;  %v11837_v51 = vld [vmem:[%s14459_s1 + $0x1718] sm:$0xff] }
 0x2cd   :  { %7867 = vmatpush.bf16.msra.mxu3 %v11831_v52  ;;  %v11845_v52 = vld [vmem:[%s14459_s1 + $0x1758] sm:$0xff] }
 0x2ce   :  { %7829 = vmatpush.bf16.msra.mxu0 %v11806_v55  ;;  %v7603_v16 = vpop.f32.mrf.mxu2 }
 0x2cf   :  { %7842 = vmatpush.bf16.msra.mxu1 %v11814_v57  ;;  %v7616_v18 = vpop.f32.mrf.mxu3  ;;  %v11881_v16 = vld [vmem:[%s14459_s1 + $0x1878] sm:$0xff] }
 0x2d0   :  { %7855 = vmatpush.bf16.msra.mxu2 %v11822_v58  ;;  %v11858_v18 = vld [vmem:[%s14459_s1 + $0x17c0] sm:$0xff] }
 0x2d1   :  { %7868 = vmatpush.bf16.msra.mxu3 %v11830_v60  ;;  %v11836_v60 = vld [vmem:[%s14459_s1 + $0x1710] sm:$0xff] }
 0x2d2   :  { %7830 = vmatpush.bf16.msra.mxu0 %v11805_v61 }
 0x2d3   :  { %7843 = vmatpush.bf16.msra.mxu1 %v11813_v62  ;;  %v11844_v62 = vld [vmem:[%s14459_s1 + $0x1750] sm:$0xff] }
 0x2d4   :  { %7856 = vmatpush.bf16.msra.mxu2 %v11821_v63  ;;  %v11852_v63 = vld [vmem:[%s14459_s1 + $0x1790] sm:$0xff] }
 0x2d5   :  { %7869 = vmatpush.bf16.msra.mxu3 %v11829_v2  ;;  %v60_v2 = vld [vmem:[%s14460_s0 + $0x170] sm:$0xff] }
 0x2d6   :  { %7831 = vmatpush.bf16.msra.mxu0 %v11804_v6 }
 0x2d7   :  { %7844 = vmatpush.bf16.msra.mxu1 %v11812_v8  ;;  %v1776_v8 = vunpack.c.l.b16 %v60_v2 }
 0x2d8   :  { %7857 = vmatpush.bf16.msra.mxu2 %v11820_v9 }
 0x2d9   :  { %7870 = vmatpush.bf16.msra.mxu3 %v11828_v10  ;;  %v11834_v10 = vld [vmem:[%s14459_s1 + $0x1700] sm:$0xff] }
 0x2da   :  { %7832 = vmatpush.bf16.msra.mxu0 %v11803_v11 }
 0x2db   :  { %7845 = vmatpush.bf16.msra.mxu1 %v11811_v12  ;;  %v1777_v12 = vunpack.c.h.b16 %v60_v2 }
 0x2dc   :  { %7858 = vmatpush.bf16.msra.mxu2 %v11819_v13  ;;  %v11842_v13 = vld [vmem:[%s14459_s1 + $0x1740] sm:$0xff] }
 0x2dd   :  { %7871 = vmatpush.bf16.msra.mxu3 %v11827_v17  ;;  %v1875_v21 = vpack.c.b16 %v1777_v12, %v1777_v12 }
 0x2de   :  { %7833 = vmatpush.bf16.msra.mxu0 %v11802_v19  ;;  %v7627_v43 = vpop.f32.mrf.mxu0  ;;  %v1874_v19 = vpack.c.b16 %v1776_v8, %v1776_v8 }
 0x2df   :  { %7846 = vmatpush.bf16.msra.mxu1 %v11810_v22  ;;  %v7628_v44 = vadd.f32 %v7627_v43, %v14258_v5  ;;  %v7640_v46 = vpop.f32.mrf.mxu1  ;;  %v61_v5 = vld [vmem:[%s14460_s0 + $0x178] sm:$0xff]  ;;  %v11867_v43 = vld [vmem:[%s14459_s1 + $0x1808] sm:$0xff] }
 0x2e0   :  { %7859 = vmatpush.bf16.msra.mxu2 %v11818_v23  ;;  %v1778_v11 = vunpack.c.l.b16 %v61_v5  ;;  %v1779_v17 = vunpack.c.h.b16 %v61_v5  ;;  %v11872_v23 = vld [vmem:[%s14459_s1 + $0x1830] sm:$0xff] }
 0x2e1   :  { %7872 = vmatpush.bf16.msra.mxu3 %v11826_v29  ;;  %7834 = vmatmul.bf16.vlgmr.msra.gmra.mxu0 %v1870_v30  ;;  %v7641_v49 = vadd.f32 %v7640_v46, %v7628_v44  ;;  %v11870_v29 = vld [vmem:[%s14459_s1 + $0x1820] sm:$0xff] }
 0x2e2   :  { %7878 = vmatpush.bf16.msrb.mxu0 %v11841_v25  ;;  %7847 = vmatmul.bf16.vlgmr.msra.gmra.mxu1 %v1871_v33  ;;  %v1876_v20 = vpack.c.b16 %v1778_v11, %v1778_v11  ;;  %v1877_v22 = vpack.c.b16 %v1779_v17, %v1779_v17  ;;  %v11871_v25 = vld [vmem:[%s14459_s1 + $0x1828] sm:$0xff]  ;;  %v11869_v33 = vld [vmem:[%s14459_s1 + $0x1818] sm:$0xff]  ;;  %v62_v44 = vld [vmem:[%s14460_s0 + $0x180] sm:$0xff] }
 0x2e3   :  { %7891 = vmatpush.bf16.msrb.mxu1 %v11849_v26  ;;  %7860 = vmatmul.bf16.vlgmr.msra.gmra.mxu2 %v1872_v31  ;;  %v11879_v26 = vld [vmem:[%s14459_s1 + $0x1868] sm:$0xff]  ;;  %v11878_v31 = vld [vmem:[%s14459_s1 + $0x1860] sm:$0xff] }
 0x2e4   :  { %7904 = vmatpush.bf16.msrb.mxu2 %v11857_v28  ;;  %7873 = vmatmul.bf16.vlgmr.msra.gmra.mxu3 %v1873_v34  ;;  %v11877_v34 = vld [vmem:[%s14459_s1 + $0x1858] sm:$0xff] }
 0x2e5   :  { %7917 = vmatpush.bf16.msrb.mxu3 %v11865_v32 }
 0x2e6   :  { %7879 = vmatpush.bf16.msrb.mxu0 %v11840_v35  ;;  %v7653_v54 = vpop.f32.mrf.mxu2  ;;  %v7629_v58 = vpop.f32.mrf.mxu0 }
 0x2e7   :  { %7892 = vmatpush.bf16.msrb.mxu1 %v11848_v36  ;;  %v7654_v55 = vadd.f32 %v7653_v54, %v7641_v49  ;;  %v7666_v57 = vpop.f32.mrf.mxu3  ;;  %v7642_v61 = vpop.f32.mrf.mxu1  ;;  %v11866_v49 = vld [vmem:[%s14459_s1 + $0x1800] sm:$0xff] }
 0x2e8   :  { %7905 = vmatpush.bf16.msrb.mxu2 %v11856_v37 }
 0x2e9   :  { %7918 = vmatpush.bf16.msrb.mxu3 %v11864_v38  ;;  %v7667_v59 = vadd.f32 %v7666_v57, %v7654_v55 }
 0x2ea   :  { %7880 = vmatpush.bf16.msrb.mxu0 %v11839_v39 }
 0x2eb   :  { %7893 = vmatpush.bf16.msrb.mxu1 %v11847_v40  ;;  %v11868_v40 = vld [vmem:[%s14459_s1 + $0x1810] sm:$0xff] }
 0x2ec   :  { %7906 = vmatpush.bf16.msrb.mxu2 %v11855_v41 }
 0x2ed   :  { %7919 = vmatpush.bf16.msrb.mxu3 %v11863_v42  ;;  %v11876_v42 = vld [vmem:[%s14459_s1 + $0x1850] sm:$0xff] }
 0x2ee   :  { %7881 = vmatpush.bf16.msrb.mxu0 %v11838_v45  ;;  %v7655_v6 = vpop.f32.mrf.mxu2  ;;  %v11875_v45 = vld [vmem:[%s14459_s1 + $0x1848] sm:$0xff] }
 0x2ef   :  { %7894 = vmatpush.bf16.msrb.mxu1 %v11846_v47  ;;  %v7668_v9 = vpop.f32.mrf.mxu3  ;;  %v1780_v47 = vunpack.c.l.b16 %v62_v44 }
 0x2f0   :  { %7907 = vmatpush.bf16.msrb.mxu2 %v11854_v48 }
 0x2f1   :  { %7920 = vmatpush.bf16.msrb.mxu3 %v11862_v50  ;;  %v1781_v50 = vunpack.c.h.b16 %v62_v44 }
 0x2f2   :  { %7882 = vmatpush.bf16.msrb.mxu0 %v11837_v51  ;;  %v11874_v51 = vld [vmem:[%s14459_s1 + $0x1840] sm:$0xff] }
 0x2f3   :  { %7895 = vmatpush.bf16.msrb.mxu1 %v11845_v52  ;;  %v1878_v52 = vpack.c.b16 %v1780_v47, %v1780_v47 }
 0x2f4   :  { %7908 = vmatpush.bf16.msrb.mxu2 %v11853_v53  ;;  %v1879_v53 = vpack.c.b16 %v1781_v50, %v1781_v50 }
 0x2f5   :  { %7921 = vmatpush.bf16.msrb.mxu3 %v11861_v56 }
 0x2f6   :  { %7883 = vmatpush.bf16.msrb.mxu0 %v11836_v60 }
 0x2f7   :  { %7896 = vmatpush.bf16.msrb.mxu1 %v11844_v62 }
 0x2f8   :  { %7909 = vmatpush.bf16.msrb.mxu2 %v11852_v63 }
 0x2f9   :  { %7922 = vmatpush.bf16.msrb.mxu3 %v11860_v0 }
 0x2fa   :  { %7884 = vmatpush.bf16.msrb.mxu0 %v11835_v1 }
 0x2fb   :  { %7897 = vmatpush.bf16.msrb.mxu1 %v11843_v3 }
 0x2fc   :  { %7910 = vmatpush.bf16.msrb.mxu2 %v11851_v4 }
 0x2fd   :  { %7923 = vmatpush.bf16.msrb.mxu3 %v11859_v7 }
 0x2fe   :  { %7885 = vmatpush.bf16.msrb.mxu0 %v11834_v10  ;;  %v7679_v27 = vpop.f32.mrf.mxu0 }
 0x2ff   :  { %7898 = vmatpush.bf16.msrb.mxu1 %v11842_v13  ;;  %v7680_v28 = vadd.f32 %v7679_v27, %v7667_v59  ;;  %v7692_v30 = vpop.f32.mrf.mxu1 }
 0x300   :  { %7911 = vmatpush.bf16.msrb.mxu2 %v11850_v14 }
 0x301   :  { %7924 = vmatpush.bf16.msrb.mxu3 %v11858_v18  ;;  %7886 = vmatmul.bf16.vlgmr.msrb.gmra.mxu0 %v1874_v19  ;;  %v7693_v32 = vadd.f32 %v7692_v30, %v7680_v28 }
 0x302   :  { %7930 = vmatpush.bf16.msra.mxu0 %v11873_v15  ;;  %7899 = vmatmul.bf16.vlgmr.msrb.gmra.mxu1 %v1875_v21 }
 0x303   :  { %7943 = vmatpush.bf16.msra.mxu1 %v11881_v16  ;;  %7912 = vmatmul.bf16.vlgmr.msrb.gmra.mxu2 %v1876_v20 }
 0x304   :  { %7925 = vmatmul.bf16.vlgmr.msrb.gmra.mxu3 %v1877_v22 }
 0x306   :  { %7931 = vmatpush.bf16.msra.mxu0 %v11872_v23  ;;  %v7705_v35 = vpop.f32.mrf.mxu2  ;;  %v7681_v38 = vpop.f32.mrf.mxu0 }
 0x307   :  { %7944 = vmatpush.bf16.msra.mxu1 %v11880_v24  ;;  %v7706_v36 = vadd.f32 %v7705_v35, %v7693_v32  ;;  %v7718_v37 = vpop.f32.mrf.mxu3  ;;  %v7694_v41 = vpop.f32.mrf.mxu1 }
 0x309   :  { %v7719_v39 = vadd.f32 %v7718_v37, %v7706_v36 }
 0x30a   :  { %7932 = vmatpush.bf16.msra.mxu0 %v11871_v25 }
 0x30b   :  { %7945 = vmatpush.bf16.msra.mxu1 %v11879_v26 }
 0x30e   :  { %7933 = vmatpush.bf16.msra.mxu0 %v11870_v29  ;;  %v7707_v46 = vpop.f32.mrf.mxu2 }
 0x30f   :  { %7946 = vmatpush.bf16.msra.mxu1 %v11878_v31  ;;  %v7720_v48 = vpop.f32.mrf.mxu3 }
 0x312   :  { %7934 = vmatpush.bf16.msra.mxu0 %v11869_v33 }
 0x313   :  { %7947 = vmatpush.bf16.msra.mxu1 %v11877_v34 }
 0x316   :  { %7935 = vmatpush.bf16.msra.mxu0 %v11868_v40 }
 0x317   :  { %7948 = vmatpush.bf16.msra.mxu1 %v11876_v42 }
 0x31a   :  { %7936 = vmatpush.bf16.msra.mxu0 %v11867_v43 }
 0x31b   :  { %7949 = vmatpush.bf16.msra.mxu1 %v11875_v45 }
 0x31e   :  { %7937 = vmatpush.bf16.msra.mxu0 %v11866_v49  ;;  %v7731_v54 = vpop.f32.mrf.mxu0 }
 0x31f   :  { %7950 = vmatpush.bf16.msra.mxu1 %v11874_v51  ;;  %v7732_v55 = vadd.f32 %v7731_v54, %v7719_v39  ;;  %v7744_v56 = vpop.f32.mrf.mxu1 }
 0x321   :  { %7938 = vmatmul.bf16.vlgmr.msra.gmra.mxu0 %v1878_v52  ;;  %v7745_v57 = vadd.f32 %v7744_v56, %v7732_v55 }
 0x322   :  { %7951 = vmatmul.bf16.vlgmr.msra.gmra.mxu1 %v1879_v53 }
 0x326   :  { %v7757_v58 = vpop.f32.mrf.mxu2  ;;  %v7733_v61 = vpop.f32.mrf.mxu0 }
 0x327   :  { %v7758_v59 = vadd.f32 %v7757_v58, %v7745_v57  ;;  %v7770_v60 = vpop.f32.mrf.mxu3  ;;  %v7746_v63 = vpop.f32.mrf.mxu1 }
 0x329   :  { %v7771_v62 = vadd.f32 %v7770_v60, %v7758_v59 }
 0x32e   :  { %v7759_v0 = vpop.f32.mrf.mxu2 }
 0x32f   :  { %v7772_v1 = vpop.f32.mrf.mxu3 }
 0x33e   :  { %v7783_v2 = vpop.f32.mrf.mxu0 }
 0x33f   :  { %v7784_v3 = vadd.f32 %v7783_v2, %v7771_v62  ;;  %v7796_v4 = vpop.f32.mrf.mxu1 }
 0x341   :  { %v7797_v5 = vadd.f32 %v7796_v4, %v7784_v3 }
 0x346   :  { %v7809_v6 = vpop.f32.mrf.mxu2  ;;  %v7785_v8 = vpop.f32.mrf.mxu0 }
 0x347   :  { %v7822_v7 = vpop.f32.mrf.mxu3  ;;  %v7798_v9 = vpop.f32.mrf.mxu1  ;;  %v7810_v21 = vadd.f32 %v7809_v6, %v7797_v5 }
 0x349   :  { %v7823_v23 = vadd.f32 %v7822_v7, %v7810_v21 }
 0x34e   :  { %v7811_v10 = vpop.f32.mrf.mxu2 }
 0x34f   :  { %v7824_v11 = vpop.f32.mrf.mxu3 }
 0x35e   :  { %v7835_v12 = vpop.f32.mrf.mxu0 }
 0x35f   :  { %v7848_v13 = vpop.f32.mrf.mxu1  ;;  %v7836_v24 = vadd.f32 %v7835_v12, %v7823_v23 }
 0x361   :  { %v7849_v29 = vadd.f32 %v7848_v13, %v7836_v24 }
 0x366   :  { %v7861_v14 = vpop.f32.mrf.mxu2  ;;  %v7837_v16 = vpop.f32.mrf.mxu0 }
 0x367   :  { %v7874_v15 = vpop.f32.mrf.mxu3  ;;  %v7850_v17 = vpop.f32.mrf.mxu1  ;;  %v7862_v30 = vadd.f32 %v7861_v14, %v7849_v29 }
 0x369   :  { %v7875_v32 = vadd.f32 %v7874_v15, %v7862_v30 }
 0x36e   :  { %v7863_v18 = vpop.f32.mrf.mxu2 }
 0x36f   :  { %v7876_v19 = vpop.f32.mrf.mxu3 }
 0x37e   :  { %v7887_v20 = vpop.f32.mrf.mxu0 }
 0x37f   :  { %v7900_v22 = vpop.f32.mrf.mxu1  ;;  %v7888_v34 = vadd.f32 %v7887_v20, %v7875_v32 }
 0x381   :  { %v7901_v35 = vadd.f32 %v7900_v22, %v7888_v34 }
 0x386   :  { %v7913_v25 = vpop.f32.mrf.mxu2  ;;  %v7889_v26 = vpop.f32.mrf.mxu0 }
 0x387   :  { %v7926_v27 = vpop.f32.mrf.mxu3  ;;  %v7902_v28 = vpop.f32.mrf.mxu1  ;;  %v7914_v36 = vadd.f32 %v7913_v25, %v7901_v35 }
 0x389   :  { %v7927_v37 = vadd.f32 %v7926_v27, %v7914_v36 }
 0x38e   :  { %v7915_v31 = vpop.f32.mrf.mxu2 }
 0x38f   :  { %v7928_v33 = vpop.f32.mrf.mxu3 }
 0x39e   :  { %v7939_v38 = vpop.f32.mrf.mxu0 }
 0x39f   :  { %v7940_v39 = vadd.f32 %v7939_v38, %v7927_v37  ;;  %v7952_v40 = vpop.f32.mrf.mxu1 }
 0x3a1   :  { %v7953_v41 = vadd.f32 %v7952_v40, %v7940_v39 }
 0x3a3   :  { %7957 = vst.msk [vmem:[%s14462_s3] sm:$0xff] %vm7956_vm0, %v7953_v41 }
 0x3a6   :  { %v7941_v42 = vpop.f32.mrf.mxu0 }
 0x3a7   :  { %v7954_v43 = vpop.f32.mrf.mxu1 }

</bundles_post_ra>
